<compile_context>
chip_gen: v7x
topology: tpu7x:2x2x1
jax: 0.10.0
libtpu: 0.0.40
codegen_flags: <defaults>
</compile_context>

<pallas_src>
import functools

import jax
import jax.numpy as jnp
from jax import lax
from jax.experimental import pallas as pl
from jax.experimental.pallas import tpu as pltpu


def _round_up(x, m):
    return (x + m - 1) // m * m


# ----------------------------------------------------------------------------
# Pallas kernels
# ----------------------------------------------------------------------------
def _conv_bn_relu_pool_kernel(x_ref, w_ref, shift_ref, o_ref, slab_ref, *,
                              c_in, c_out, wrow, cols):
    """Fused 3x3 conv (pad=1) + folded BN/bias + ReLU + 2x2 max-pool, one batch tile.

    x_ref:     (4*c_in, in_cols) bf16 -- 4 space-to-depth phases of the padded
               input; per phase the tile's images sit in consecutive slots of
               length L = hpp*wrow, flattened row-major (row stride wrow).
               in_cols >= cols + wrow + 1, so shifted tap windows never run out.
    w_ref:     (c_out, 9*c_in)  bf16 -- BN-folded conv weights, tap-major K.
    shift_ref: (c_out, 1)       f32  -- folded conv-bias + BN shift.
    o_ref:     (c_out, cols)    bf16 -- pooled output tile (per-image slots of
               length L; only the first ho*wrow columns of each slot are valid,
               with 2 junk columns per row that the wrapper drops).
    slab_ref:  (4, 9*c_in, cols) bf16 VMEM scratch -- tap-stacked operand, one
               slab per pooled-output phase, so each phase is ONE K=9*c_in GEMM.
    """
    # Stage the 4 tap slabs: 36 contiguous VMEM->VMEM copies (no HBM traffic,
    # no per-image loop -- the batch is already folded into the lane dim).
    for ph, (dh, dw) in enumerate(((0, 0), (0, 1), (1, 0), (1, 1))):
        for kh in range(3):
            for kw in range(3):
                s, t = dh + kh, dw + kw
                pq = (s % 2) * 2 + (t % 2)          # source input phase
                off = (s // 2) * wrow + (t // 2)    # flat lane shift inside it
                tap = kh * 3 + kw
                slab_ref[ph, tap * c_in:(tap + 1) * c_in, :] = (
                    x_ref[pq * c_in:(pq + 1) * c_in, off:off + cols])

    w = w_ref[...]
    # One K = 9*c_in GEMM per pooled-output phase; the running max keeps the
    # live accumulator at a single (c_out, cols) f32 tile.
    res = None
    for ph in range(4):
        r = jnp.dot(w, slab_ref[ph], preferred_element_type=jnp.float32)
        res = r if res is None else jnp.maximum(res, r)
    # relu(max_phase(conv) + shift) == max_phase(relu(conv + shift))
    o_ref[...] = jnp.maximum(res + shift_ref[...], 0.0).astype(o_ref.dtype)


def _fc_head_kernel(*refs, num_hidden):
    """refs = (x, w1, b1, ..., w_h, b_h, w_out, b_out, out).  Dropout = identity."""
    x_ref, out_ref = refs[0], refs[-1]
    h = x_ref[...]                                         # bf16 (N, F)
    idx = 1
    for _ in range(num_hidden):
        w_ref, b_ref = refs[idx], refs[idx + 1]
        idx += 2
        h = jnp.dot(h, w_ref[...], preferred_element_type=jnp.float32) + b_ref[...]
        h = jnp.maximum(h, 0.0).astype(jnp.bfloat16)       # ReLU (f32) -> bf16 feed
        # TODO(synk): Dropout layers are identity here (eval-mode forward).
    w_ref, b_ref = refs[idx], refs[idx + 1]
    out_ref[...] = jnp.dot(h, w_ref[...],
                           preferred_element_type=jnp.float32) + b_ref[...]


# ----------------------------------------------------------------------------
# Layer wrappers
# ----------------------------------------------------------------------------
def conv_bn_relu_pool(x_nchw, w, b, gamma, beta, mean, var, *, eps=1e-5,
                      batch_tile=None):
    """x: (N, C_in, H, W) -> (N, C_out, H//2, W//2) bf16 (conv+BN+ReLU+pool)."""
    n, c_in, h, width = x_nchw.shape
    assert w.shape[:3] == (3, 3, c_in)
    c_out = w.shape[-1]
    ho, wo = h // 2, width // 2               # floor pooling (PyTorch MaxPool2d(2,2))
    hpp, wrow = ho + 2, wo + 2                # per-phase padded spatial dims
    L = hpp * wrow                            # per-image slot length (flat)

    # Batch tile: target ~1024 lane-dense GEMM columns, but keep >=2 grid steps
    # (when batch >= 2) so both TensorCores of a v7x chip get work.
    if batch_tile is None:
        batch_tile = min(n, max(1, pl.cdiv(1024, L)))
        if n >= 2:
            batch_tile = min(batch_tile, pl.cdiv(n, 2))
    nb = max(1, batch_tile)
    t = pl.cdiv(n, nb)                        # number of batch tiles (grid steps)
    npad = t * nb

    cols = _round_up(nb * L, 128)             # lane-dense GEMM/output width
    in_cols = _round_up(cols + wrow + 1, 128) # slack so shifted tap windows fit

    # --- Space-to-depth phase packing of the zero-padded input (wrapper/XLA).
    # The 4 even/odd phases of the (pad=1) padded image, per image flattened
    # row-major with row stride wrow; images of a tile occupy consecutive slots.
    pad_b = 2 * hpp - 1 - h
    pad_r = 2 * wrow - 1 - width
    xp = jnp.pad(x_nchw, ((0, npad - n), (0, 0), (1, pad_b), (1, pad_r)))
    xp = xp.reshape(npad, c_in, hpp, 2, wrow, 2)          # (img, ci, r, p, c, q)
    xp = jnp.transpose(xp, (3, 5, 1, 0, 2, 4))            # (p, q, ci, img, r, c)
    xp = xp.reshape(2, 2, c_in, t, nb, hpp, wrow)
    xp = jnp.transpose(xp, (3, 0, 1, 2, 4, 5, 6))         # (t, p, q, ci, nb, r, c)
    xp = xp.reshape(t, 4 * c_in, nb * L)
    xp = jnp.pad(xp, ((0, 0), (0, 0), (0, in_cols - nb * L))).astype(jnp.bfloat16)

    # Fold conv bias + eval-mode BatchNorm into the weights and a per-channel shift.
    scale = gamma / jnp.sqrt(var + eps)
    w2 = (jnp.transpose(w * scale, (3, 0, 1, 2))          # (c_out, 3, 3, c_in)
          .reshape(c_out, 9 * c_in).astype(jnp.bfloat16))
    shift = (beta + (b - mean) * scale).reshape(c_out, 1).astype(jnp.float32)

    kernel = functools.partial(_conv_bn_relu_pool_kernel,
                               c_in=c_in, c_out=c_out, wrow=wrow, cols=cols)
    out = pl.pallas_call(
        kernel,
        grid=(t,),
        in_specs=[
            pl.BlockSpec((None, 4 * c_in, in_cols), lambda i: (i, 0, 0)),
            pl.BlockSpec((c_out, 9 * c_in), lambda i: (0, 0)),  # resident weights
            pl.BlockSpec((c_out, 1), lambda i: (0, 0)),         # resident shift
        ],
        out_specs=pl.BlockSpec((None, c_out, cols), lambda i: (i, 0, 0)),
        out_shape=jax.ShapeDtypeStruct((t, c_out, cols), jnp.bfloat16),
        scratch_shapes=[pltpu.VMEM((4, 9 * c_in, cols), jnp.bfloat16)],
        compiler_params=pltpu.CompilerParams(
            dimension_semantics=("parallel",)),
    )(xp, w2, shift)

    # Unpack: drop padded columns / junk columns / padded batch -> NCHW bf16.
    # NOTE: the 2 junk columns per row are where flat-window row-wrap reads land;
    # they must be dropped here and never consumed downstream.
    out = out[:, :, :nb * L].reshape(t, c_out, nb, hpp, wrow)[:, :, :, :ho, :wo]
    out = jnp.transpose(out, (0, 2, 1, 3, 4)).reshape(npad, c_out, ho, wo)
    return out[:n]


def fc_head(x, fc_params, out_params):
    """Fused FC head: all hidden Linear+ReLU layers and the output Linear in one call."""
    n, f = x.shape
    args = [x.astype(jnp.bfloat16)]
    in_specs = [pl.BlockSpec((n, f), lambda i: (0, 0))]
    for (w, b) in fc_params:
        args += [w.astype(jnp.bfloat16), b.reshape(1, -1).astype(jnp.float32)]
        in_specs += [pl.BlockSpec(w.shape, lambda i: (0, 0)),
                     pl.BlockSpec((1, w.shape[1]), lambda i: (0, 0))]
    w_o, b_o = out_params
    args += [w_o.astype(jnp.bfloat16), b_o.reshape(1, -1).astype(jnp.float32)]
    in_specs += [pl.BlockSpec(w_o.shape, lambda i: (0, 0)),
                 pl.BlockSpec((1, w_o.shape[1]), lambda i: (0, 0))]
    num_classes = w_o.shape[1]

    kernel = functools.partial(_fc_head_kernel, num_hidden=len(fc_params))
    return pl.pallas_call(
        kernel,
        grid=(1,),        # batch rows only (pads to 8 sublanes); all weights in VMEM
        in_specs=in_specs,
        out_specs=pl.BlockSpec((n, num_classes), lambda i: (0, 0)),
        out_shape=jax.ShapeDtypeStruct((n, num_classes), jnp.float32),
    )(*args)


# ----------------------------------------------------------------------------
# Parameter init (deterministic, mirrors the PyTorch module's _initialize_weights)
# ----------------------------------------------------------------------------
def init_params(key, input_channels, conv_channels, fc_sizes, num_classes, spatial):
    conv_params = []
    cin = input_channels
    size = spatial
    for cout in conv_channels:
        key, kconv = jax.random.split(key)
        fan_out = cout * 3 * 3
        std = (2.0 / fan_out) ** 0.5                       # kaiming_normal, fan_out, relu
        w = jax.random.normal(kconv, (3, 3, cin, cout), jnp.float32) * std
        conv_params.append({
            "w": w,
            "b": jnp.zeros((cout,), jnp.float32),
            "gamma": jnp.ones((cout,), jnp.float32),
            "beta": jnp.zeros((cout,), jnp.float32),
            "mean": jnp.zeros((cout,), jnp.float32),       # BN running stats (eval mode)
            "var": jnp.ones((cout,), jnp.float32),
        })
        size = ((size + 2 * 1 - 3) // 1 + 1) // 2          # conv(pad=1,k=3,s=1) then pool/2
        cin = cout

    flattened = cin * size * size
    fc_params = []
    prev = flattened
    for hdim in fc_sizes:
        key, kfc = jax.random.split(key)
        w = jax.random.normal(kfc, (prev, hdim), jnp.float32) * 0.01
        fc_params.append((w, jnp.zeros((hdim,), jnp.float32)))
        prev = hdim

    key, kout = jax.random.split(key)
    w_out = jax.random.normal(kout, (prev, num_classes), jnp.float32) * 0.01
    out_params = (w_out, jnp.zeros((num_classes,), jnp.float32))
    return conv_params, fc_params, out_params


# ----------------------------------------------------------------------------
# Forward pass (Pallas) and f32 XLA reference
# ----------------------------------------------------------------------------
def cnn_forward(x_nchw, conv_params, fc_params, out_params, eps=1e-5):
    x = x_nchw.astype(jnp.float32)
    for p in conv_params:
        x = conv_bn_relu_pool(x, p["w"], p["b"], p["gamma"], p["beta"],
                              p["mean"], p["var"], eps=eps)
    n = x.shape[0]
    x = x.reshape(n, -1)                   # PyTorch NCHW x.view(N, -1) flatten order
    return fc_head(x, fc_params, out_params)


def reference_forward(x_nchw, conv_params, fc_params, out_params, eps=1e-5):
    x = x_nchw.astype(jnp.float32)
    for p in conv_params:
        y = lax.conv_general_dilated(x, p["w"], (1, 1), ((1, 1), (1, 1)),
                                     dimension_numbers=("NCHW", "HWIO", "NCHW"))
        y = y + p["b"][None, :, None, None]
        scale = p["gamma"] / jnp.sqrt(p["var"] + eps)
        y = (y - p["mean"][None, :, None, None]) * scale[None, :, None, None] \
            + p["beta"][None, :, None, None]
        y = jnp.maximum(y, 0.0)
        x = lax.reduce_window(y, -jnp.inf, lax.max, (1, 1, 2, 2), (1, 1, 2, 2), "VALID")
    h = x.reshape(x.shape[0], -1)
    for (w, b) in fc_params:
        h = jnp.maximum(h @ w + b, 0.0)
    w_o, b_o = out_params
    return h @ w_o + b_o


# ----------------------------------------------------------------------------
if __name__ == "__main__":
    # Small configuration consistent with the module: MNIST-like 28x28 input,
    # 3 conv blocks (channels 8/16/32), one hidden FC of 32, 10 classes.
    key = jax.random.PRNGKey(0)
    key, kx, kp = jax.random.split(key, 3)

    batch, in_ch, spatial = 8, 1, 28
    conv_channels = [8, 16, 32]
    fc_sizes = [32]
    num_classes = 10

    x = jax.random.normal(kx, (batch, in_ch, spatial, spatial), jnp.float32)
    conv_params, fc_params, out_params = init_params(
        kp, in_ch, conv_channels, fc_sizes, num_classes, spatial)

    forward = jax.jit(cnn_forward)
    logits = jax.block_until_ready(forward(x, conv_params, fc_params, out_params))
    assert logits.shape == (batch, num_classes)

    # Numerical sanity check vs. an f32 XLA reference (bf16 MXU path -> loose tol).
    ref = jax.block_until_ready(
        jax.jit(reference_forward)(x, conv_params, fc_params, out_params))
    err = float(jnp.max(jnp.abs(logits - ref)))
    scale = float(jnp.max(jnp.abs(ref))) + 1e-6
    assert err <= 0.1 * scale + 5e-4, (err, scale)

    print("KERNEL_OK")
</pallas_src>

<mosaic_0001>
module attributes {stable_mosaic.version = 11 : i64} {
  func.func @_conv_bn_relu_pool_kernel(%arg0: i32, %arg1: memref<1x4x1152xbf16, #tpu.memory_space<vmem>>, %arg2: memref<8x9xbf16, #tpu.memory_space<vmem>>, %arg3: memref<8x1xf32, #tpu.memory_space<vmem>>, %arg4: memref<1x8x1024xbf16, #tpu.memory_space<vmem>>, %arg5: memref<4x9x1024xbf16, #tpu.memory_space<vmem>>) attributes {dimension_semantics = [#tpu.dimension_semantics<parallel>], iteration_bounds = array<i64: 2>, scalar_prefetch = 0 : i64, scratch_operands = 1 : i64, tpu.core_type = #tpu.core_type<tc>, window_params = [{transform_indices = @transform_0, window_bounds = array<i64: 1, 4, 1152>}, {pipeline_mode = #tpu.pipeline_mode<synchronous>, transform_indices = @transform_1, window_bounds = array<i64: 8, 9>}, {pipeline_mode = #tpu.pipeline_mode<synchronous>, transform_indices = @transform_2, window_bounds = array<i64: 8, 1>}, {transform_indices = @transform_3, window_bounds = array<i64: 1, 8, 1024>}]} {
    %c0 = arith.constant 0 : index
    %c0_0 = arith.constant 0 : index
    %c0_1 = arith.constant 0 : index
    %0 = vector.load %arg1[%c0, %c0_0, %c0_1] : memref<1x4x1152xbf16, #tpu.memory_space<vmem>>, vector<1x1x1024xbf16>
    %1 = vector.shape_cast %0 : vector<1x1x1024xbf16> to vector<1x1024xbf16>
    %c0_2 = arith.constant 0 : index
    %c0_3 = arith.constant 0 : index
    %c0_4 = arith.constant 0 : index
    %2 = vector.load %arg5[%c0_2, %c0_3, %c0_4] : memref<4x9x1024xbf16, #tpu.memory_space<vmem>>, vector<1x1x1024xbf16>
    %3 = vector.shape_cast %2 : vector<1x1x1024xbf16> to vector<1x1024xbf16>
    %4 = vector.shape_cast %1 : vector<1x1024xbf16> to vector<1x1x1024xbf16>
    tpu.vector_store %arg5[%c0_2, %c0_3, %c0_4], %4 {strides = array<i32>} : memref<4x9x1024xbf16, #tpu.memory_space<vmem>>, vector<1x1x1024xbf16>,
    %c0_5 = arith.constant 0 : index
    %c1 = arith.constant 1 : index
    %c0_6 = arith.constant 0 : index
    %5 = vector.load %arg1[%c0_5, %c1, %c0_6] : memref<1x4x1152xbf16, #tpu.memory_space<vmem>>, vector<1x1x1024xbf16>
    %6 = vector.shape_cast %5 : vector<1x1x1024xbf16> to vector<1x1024xbf16>
    %c0_7 = arith.constant 0 : index
    %c1_8 = arith.constant 1 : index
    %c0_9 = arith.constant 0 : index
    %7 = vector.load %arg5[%c0_7, %c1_8, %c0_9] : memref<4x9x1024xbf16, #tpu.memory_space<vmem>>, vector<1x1x1024xbf16>
    %8 = vector.shape_cast %7 : vector<1x1x1024xbf16> to vector<1x1024xbf16>
    %9 = vector.shape_cast %6 : vector<1x1024xbf16> to vector<1x1x1024xbf16>
    tpu.vector_store %arg5[%c0_7, %c1_8, %c0_9], %9 {strides = array<i32>} : memref<4x9x1024xbf16, #tpu.memory_space<vmem>>, vector<1x1x1024xbf16>,
    %c0_10 = arith.constant 0 : index
    %c0_11 = arith.constant 0 : index
    %c1_12 = arith.constant 1 : index
    %10 = vector.load %arg1[%c0_10, %c0_11, %c1_12] : memref<1x4x1152xbf16, #tpu.memory_space<vmem>>, vector<1x1x1024xbf16>
    %11 = vector.shape_cast %10 : vector<1x1x1024xbf16> to vector<1x1024xbf16>
    %c0_13 = arith.constant 0 : index
    %c2 = arith.constant 2 : index
    %c0_14 = arith.constant 0 : index
    %12 = vector.load %arg5[%c0_13, %c2, %c0_14] : memref<4x9x1024xbf16, #tpu.memory_space<vmem>>, vector<1x1x1024xbf16>
    %13 = vector.shape_cast %12 : vector<1x1x1024xbf16> to vector<1x1024xbf16>
    %14 = vector.shape_cast %11 : vector<1x1024xbf16> to vector<1x1x1024xbf16>
    tpu.vector_store %arg5[%c0_13, %c2, %c0_14], %14 {strides = array<i32>} : memref<4x9x1024xbf16, #tpu.memory_space<vmem>>, vector<1x1x1024xbf16>,
    %c0_15 = arith.constant 0 : index
    %c2_16 = arith.constant 2 : index
    %c0_17 = arith.constant 0 : index
    %15 = vector.load %arg1[%c0_15, %c2_16, %c0_17] : memref<1x4x1152xbf16, #tpu.memory_space<vmem>>, vector<1x1x1024xbf16>
    %16 = vector.shape_cast %15 : vector<1x1x1024xbf16> to vector<1x1024xbf16>
    %c0_18 = arith.constant 0 : index
    %c3 = arith.constant 3 : index
    %c0_19 = arith.constant 0 : index
    %17 = vector.load %arg5[%c0_18, %c3, %c0_19] : memref<4x9x1024xbf16, #tpu.memory_space<vmem>>, vector<1x1x1024xbf16>
    %18 = vector.shape_cast %17 : vector<1x1x1024xbf16> to vector<1x1024xbf16>
    %19 = vector.shape_cast %16 : vector<1x1024xbf16> to vector<1x1x1024xbf16>
    tpu.vector_store %arg5[%c0_18, %c3, %c0_19], %19 {strides = array<i32>} : memref<4x9x1024xbf16, #tpu.memory_space<vmem>>, vector<1x1x1024xbf16>,
    %c0_20 = arith.constant 0 : index
    %c3_21 = arith.constant 3 : index
    %c0_22 = arith.constant 0 : index
    %20 = vector.load %arg1[%c0_20, %c3_21, %c0_22] : memref<1x4x1152xbf16, #tpu.memory_space<vmem>>, vector<1x1x1024xbf16>
    %21 = vector.shape_cast %20 : vector<1x1x1024xbf16> to vector<1x1024xbf16>
    %c0_23 = arith.constant 0 : index
    %c4 = arith.constant 4 : index
    %c0_24 = arith.constant 0 : index
    %22 = vector.load %arg5[%c0_23, %c4, %c0_24] : memref<4x9x1024xbf16, #tpu.memory_space<vmem>>, vector<1x1x1024xbf16>
    %23 = vector.shape_cast %22 : vector<1x1x1024xbf16> to vector<1x1024xbf16>
    %24 = vector.shape_cast %21 : vector<1x1024xbf16> to vector<1x1x1024xbf16>
    tpu.vector_store %arg5[%c0_23, %c4, %c0_24], %24 {strides = array<i32>} : memref<4x9x1024xbf16, #tpu.memory_space<vmem>>, vector<1x1x1024xbf16>,
    %c0_25 = arith.constant 0 : index
    %c2_26 = arith.constant 2 : index
    %c1_27 = arith.constant 1 : index
    %25 = vector.load %arg1[%c0_25, %c2_26, %c1_27] : memref<1x4x1152xbf16, #tpu.memory_space<vmem>>, vector<1x1x1024xbf16>
    %26 = vector.shape_cast %25 : vector<1x1x1024xbf16> to vector<1x1024xbf16>
    %c0_28 = arith.constant 0 : index
    %c5 = arith.constant 5 : index
    %c0_29 = arith.constant 0 : index
    %27 = vector.load %arg5[%c0_28, %c5, %c0_29] : memref<4x9x1024xbf16, #tpu.memory_space<vmem>>, vector<1x1x1024xbf16>
    %28 = vector.shape_cast %27 : vector<1x1x1024xbf16> to vector<1x1024xbf16>
    %29 = vector.shape_cast %26 : vector<1x1024xbf16> to vector<1x1x1024xbf16>
    tpu.vector_store %arg5[%c0_28, %c5, %c0_29], %29 {strides = array<i32>} : memref<4x9x1024xbf16, #tpu.memory_space<vmem>>, vector<1x1x1024xbf16>,
    %c0_30 = arith.constant 0 : index
    %c0_31 = arith.constant 0 : index
    %c16 = arith.constant 16 : index
    %30 = vector.load %arg1[%c0_30, %c0_31, %c16] : memref<1x4x1152xbf16, #tpu.memory_space<vmem>>, vector<1x1x1024xbf16>
    %31 = vector.shape_cast %30 : vector<1x1x1024xbf16> to vector<1x1024xbf16>
    %c0_32 = arith.constant 0 : index
    %c6 = arith.constant 6 : index
    %c0_33 = arith.constant 0 : index
    %32 = vector.load %arg5[%c0_32, %c6, %c0_33] : memref<4x9x1024xbf16, #tpu.memory_space<vmem>>, vector<1x1x1024xbf16>
    %33 = vector.shape_cast %32 : vector<1x1x1024xbf16> to vector<1x1024xbf16>
    %34 = vector.shape_cast %31 : vector<1x1024xbf16> to vector<1x1x1024xbf16>
    tpu.vector_store %arg5[%c0_32, %c6, %c0_33], %34 {strides = array<i32>} : memref<4x9x1024xbf16, #tpu.memory_space<vmem>>, vector<1x1x1024xbf16>,
    %c0_34 = arith.constant 0 : index
    %c1_35 = arith.constant 1 : index
    %c16_36 = arith.constant 16 : index
    %35 = vector.load %arg1[%c0_34, %c1_35, %c16_36] : memref<1x4x1152xbf16, #tpu.memory_space<vmem>>, vector<1x1x1024xbf16>
    %36 = vector.shape_cast %35 : vector<1x1x1024xbf16> to vector<1x1024xbf16>
    %c0_37 = arith.constant 0 : index
    %c7 = arith.constant 7 : index
    %c0_38 = arith.constant 0 : index
    %37 = vector.load %arg5[%c0_37, %c7, %c0_38] : memref<4x9x1024xbf16, #tpu.memory_space<vmem>>, vector<1x1x1024xbf16>
    %38 = vector.shape_cast %37 : vector<1x1x1024xbf16> to vector<1x1024xbf16>
    %39 = vector.shape_cast %36 : vector<1x1024xbf16> to vector<1x1x1024xbf16>
    tpu.vector_store %arg5[%c0_37, %c7, %c0_38], %39 {strides = array<i32>} : memref<4x9x1024xbf16, #tpu.memory_space<vmem>>, vector<1x1x1024xbf16>,
    %c0_39 = arith.constant 0 : index
    %c0_40 = arith.constant 0 : index
    %c17 = arith.constant 17 : index
    %40 = vector.load %arg1[%c0_39, %c0_40, %c17] : memref<1x4x1152xbf16, #tpu.memory_space<vmem>>, vector<1x1x1024xbf16>
    %41 = vector.shape_cast %40 : vector<1x1x1024xbf16> to vector<1x1024xbf16>
    %c0_41 = arith.constant 0 : index
    %c8 = arith.constant 8 : index
    %c0_42 = arith.constant 0 : index
    %42 = vector.load %arg5[%c0_41, %c8, %c0_42] : memref<4x9x1024xbf16, #tpu.memory_space<vmem>>, vector<1x1x1024xbf16>
    %43 = vector.shape_cast %42 : vector<1x1x1024xbf16> to vector<1x1024xbf16>
    %44 = vector.shape_cast %41 : vector<1x1024xbf16> to vector<1x1x1024xbf16>
    tpu.vector_store %arg5[%c0_41, %c8, %c0_42], %44 {strides = array<i32>} : memref<4x9x1024xbf16, #tpu.memory_space<vmem>>, vector<1x1x1024xbf16>,
    %c0_43 = arith.constant 0 : index
    %c1_44 = arith.constant 1 : index
    %c0_45 = arith.constant 0 : index
    %45 = vector.load %arg1[%c0_43, %c1_44, %c0_45] : memref<1x4x1152xbf16, #tpu.memory_space<vmem>>, vector<1x1x1024xbf16>
    %46 = vector.shape_cast %45 : vector<1x1x1024xbf16> to vector<1x1024xbf16>
    %c1_46 = arith.constant 1 : index
    %c0_47 = arith.constant 0 : index
    %c0_48 = arith.constant 0 : index
    %47 = vector.load %arg5[%c1_46, %c0_47, %c0_48] : memref<4x9x1024xbf16, #tpu.memory_space<vmem>>, vector<1x1x1024xbf16>
    %48 = vector.shape_cast %47 : vector<1x1x1024xbf16> to vector<1x1024xbf16>
    %49 = vector.shape_cast %46 : vector<1x1024xbf16> to vector<1x1x1024xbf16>
    tpu.vector_store %arg5[%c1_46, %c0_47, %c0_48], %49 {strides = array<i32>} : memref<4x9x1024xbf16, #tpu.memory_space<vmem>>, vector<1x1x1024xbf16>,
    %c0_49 = arith.constant 0 : index
    %c0_50 = arith.constant 0 : index
    %c1_51 = arith.constant 1 : index
    %50 = vector.load %arg1[%c0_49, %c0_50, %c1_51] : memref<1x4x1152xbf16, #tpu.memory_space<vmem>>, vector<1x1x1024xbf16>
    %51 = vector.shape_cast %50 : vector<1x1x1024xbf16> to vector<1x1024xbf16>
    %c1_52 = arith.constant 1 : index
    %c1_53 = arith.constant 1 : index
    %c0_54 = arith.constant 0 : index
    %52 = vector.load %arg5[%c1_52, %c1_53, %c0_54] : memref<4x9x1024xbf16, #tpu.memory_space<vmem>>, vector<1x1x1024xbf16>
    %53 = vector.shape_cast %52 : vector<1x1x1024xbf16> to vector<1x1024xbf16>
    %54 = vector.shape_cast %51 : vector<1x1024xbf16> to vector<1x1x1024xbf16>
    tpu.vector_store %arg5[%c1_52, %c1_53, %c0_54], %54 {strides = array<i32>} : memref<4x9x1024xbf16, #tpu.memory_space<vmem>>, vector<1x1x1024xbf16>,
    %c0_55 = arith.constant 0 : index
    %c1_56 = arith.constant 1 : index
    %c1_57 = arith.constant 1 : index
    %55 = vector.load %arg1[%c0_55, %c1_56, %c1_57] : memref<1x4x1152xbf16, #tpu.memory_space<vmem>>, vector<1x1x1024xbf16>
    %56 = vector.shape_cast %55 : vector<1x1x1024xbf16> to vector<1x1024xbf16>
    %c1_58 = arith.constant 1 : index
    %c2_59 = arith.constant 2 : index
    %c0_60 = arith.constant 0 : index
    %57 = vector.load %arg5[%c1_58, %c2_59, %c0_60] : memref<4x9x1024xbf16, #tpu.memory_space<vmem>>, vector<1x1x1024xbf16>
    %58 = vector.shape_cast %57 : vector<1x1x1024xbf16> to vector<1x1024xbf16>
    %59 = vector.shape_cast %56 : vector<1x1024xbf16> to vector<1x1x1024xbf16>
    tpu.vector_store %arg5[%c1_58, %c2_59, %c0_60], %59 {strides = array<i32>} : memref<4x9x1024xbf16, #tpu.memory_space<vmem>>, vector<1x1x1024xbf16>,
    %c0_61 = arith.constant 0 : index
    %c3_62 = arith.constant 3 : index
    %c0_63 = arith.constant 0 : index
    %60 = vector.load %arg1[%c0_61, %c3_62, %c0_63] : memref<1x4x1152xbf16, #tpu.memory_space<vmem>>, vector<1x1x1024xbf16>
    %61 = vector.shape_cast %60 : vector<1x1x1024xbf16> to vector<1x1024xbf16>
    %c1_64 = arith.constant 1 : index
    %c3_65 = arith.constant 3 : index
    %c0_66 = arith.constant 0 : index
    %62 = vector.load %arg5[%c1_64, %c3_65, %c0_66] : memref<4x9x1024xbf16, #tpu.memory_space<vmem>>, vector<1x1x1024xbf16>
    %63 = vector.shape_cast %62 : vector<1x1x1024xbf16> to vector<1x1024xbf16>
    %64 = vector.shape_cast %61 : vector<1x1024xbf16> to vector<1x1x1024xbf16>
    tpu.vector_store %arg5[%c1_64, %c3_65, %c0_66], %64 {strides = array<i32>} : memref<4x9x1024xbf16, #tpu.memory_space<vmem>>, vector<1x1x1024xbf16>,
    %c0_67 = arith.constant 0 : index
    %c2_68 = arith.constant 2 : index
    %c1_69 = arith.constant 1 : index
    %65 = vector.load %arg1[%c0_67, %c2_68, %c1_69] : memref<1x4x1152xbf16, #tpu.memory_space<vmem>>, vector<1x1x1024xbf16>
    %66 = vector.shape_cast %65 : vector<1x1x1024xbf16> to vector<1x1024xbf16>
    %c1_70 = arith.constant 1 : index
    %c4_71 = arith.constant 4 : index
    %c0_72 = arith.constant 0 : index
    %67 = vector.load %arg5[%c1_70, %c4_71, %c0_72] : memref<4x9x1024xbf16, #tpu.memory_space<vmem>>, vector<1x1x1024xbf16>
    %68 = vector.shape_cast %67 : vector<1x1x1024xbf16> to vector<1x1024xbf16>
    %69 = vector.shape_cast %66 : vector<1x1024xbf16> to vector<1x1x1024xbf16>
    tpu.vector_store %arg5[%c1_70, %c4_71, %c0_72], %69 {strides = array<i32>} : memref<4x9x1024xbf16, #tpu.memory_space<vmem>>, vector<1x1x1024xbf16>,
    %c0_73 = arith.constant 0 : index
    %c3_74 = arith.constant 3 : index
    %c1_75 = arith.constant 1 : index
    %70 = vector.load %arg1[%c0_73, %c3_74, %c1_75] : memref<1x4x1152xbf16, #tpu.memory_space<vmem>>, vector<1x1x1024xbf16>
    %71 = vector.shape_cast %70 : vector<1x1x1024xbf16> to vector<1x1024xbf16>
    %c1_76 = arith.constant 1 : index
    %c5_77 = arith.constant 5 : index
    %c0_78 = arith.constant 0 : index
    %72 = vector.load %arg5[%c1_76, %c5_77, %c0_78] : memref<4x9x1024xbf16, #tpu.memory_space<vmem>>, vector<1x1x1024xbf16>
    %73 = vector.shape_cast %72 : vector<1x1x1024xbf16> to vector<1x1024xbf16>
    %74 = vector.shape_cast %71 : vector<1x1024xbf16> to vector<1x1x1024xbf16>
    tpu.vector_store %arg5[%c1_76, %c5_77, %c0_78], %74 {strides = array<i32>} : memref<4x9x1024xbf16, #tpu.memory_space<vmem>>, vector<1x1x1024xbf16>,
    %c0_79 = arith.constant 0 : index
    %c1_80 = arith.constant 1 : index
    %c16_81 = arith.constant 16 : index
    %75 = vector.load %arg1[%c0_79, %c1_80, %c16_81] : memref<1x4x1152xbf16, #tpu.memory_space<vmem>>, vector<1x1x1024xbf16>
    %76 = vector.shape_cast %75 : vector<1x1x1024xbf16> to vector<1x1024xbf16>
    %c1_82 = arith.constant 1 : index
    %c6_83 = arith.constant 6 : index
    %c0_84 = arith.constant 0 : index
    %77 = vector.load %arg5[%c1_82, %c6_83, %c0_84] : memref<4x9x1024xbf16, #tpu.memory_space<vmem>>, vector<1x1x1024xbf16>
    %78 = vector.shape_cast %77 : vector<1x1x1024xbf16> to vector<1x1024xbf16>
    %79 = vector.shape_cast %76 : vector<1x1024xbf16> to vector<1x1x1024xbf16>
    tpu.vector_store %arg5[%c1_82, %c6_83, %c0_84], %79 {strides = array<i32>} : memref<4x9x1024xbf16, #tpu.memory_space<vmem>>, vector<1x1x1024xbf16>,
    %c0_85 = arith.constant 0 : index
    %c0_86 = arith.constant 0 : index
    %c17_87 = arith.constant 17 : index
    %80 = vector.load %arg1[%c0_85, %c0_86, %c17_87] : memref<1x4x1152xbf16, #tpu.memory_space<vmem>>, vector<1x1x1024xbf16>
    %81 = vector.shape_cast %80 : vector<1x1x1024xbf16> to vector<1x1024xbf16>
    %c1_88 = arith.constant 1 : index
    %c7_89 = arith.constant 7 : index
    %c0_90 = arith.constant 0 : index
    %82 = vector.load %arg5[%c1_88, %c7_89, %c0_90] : memref<4x9x1024xbf16, #tpu.memory_space<vmem>>, vector<1x1x1024xbf16>
    %83 = vector.shape_cast %82 : vector<1x1x1024xbf16> to vector<1x1024xbf16>
    %84 = vector.shape_cast %81 : vector<1x1024xbf16> to vector<1x1x1024xbf16>
    tpu.vector_store %arg5[%c1_88, %c7_89, %c0_90], %84 {strides = array<i32>} : memref<4x9x1024xbf16, #tpu.memory_space<vmem>>, vector<1x1x1024xbf16>,
    %c0_91 = arith.constant 0 : index
    %c1_92 = arith.constant 1 : index
    %c17_93 = arith.constant 17 : index
    %85 = vector.load %arg1[%c0_91, %c1_92, %c17_93] : memref<1x4x1152xbf16, #tpu.memory_space<vmem>>, vector<1x1x1024xbf16>
    %86 = vector.shape_cast %85 : vector<1x1x1024xbf16> to vector<1x1024xbf16>
    %c1_94 = arith.constant 1 : index
    %c8_95 = arith.constant 8 : index
    %c0_96 = arith.constant 0 : index
    %87 = vector.load %arg5[%c1_94, %c8_95, %c0_96] : memref<4x9x1024xbf16, #tpu.memory_space<vmem>>, vector<1x1x1024xbf16>
    %88 = vector.shape_cast %87 : vector<1x1x1024xbf16> to vector<1x1024xbf16>
    %89 = vector.shape_cast %86 : vector<1x1024xbf16> to vector<1x1x1024xbf16>
    tpu.vector_store %arg5[%c1_94, %c8_95, %c0_96], %89 {strides = array<i32>} : memref<4x9x1024xbf16, #tpu.memory_space<vmem>>, vector<1x1x1024xbf16>,
    %c0_97 = arith.constant 0 : index
    %c2_98 = arith.constant 2 : index
    %c0_99 = arith.constant 0 : index
    %90 = vector.load %arg1[%c0_97, %c2_98, %c0_99] : memref<1x4x1152xbf16, #tpu.memory_space<vmem>>, vector<1x1x1024xbf16>
    %91 = vector.shape_cast %90 : vector<1x1x1024xbf16> to vector<1x1024xbf16>
    %c2_100 = arith.constant 2 : index
    %c0_101 = arith.constant 0 : index
    %c0_102 = arith.constant 0 : index
    %92 = vector.load %arg5[%c2_100, %c0_101, %c0_102] : memref<4x9x1024xbf16, #tpu.memory_space<vmem>>, vector<1x1x1024xbf16>
    %93 = vector.shape_cast %92 : vector<1x1x1024xbf16> to vector<1x1024xbf16>
    %94 = vector.shape_cast %91 : vector<1x1024xbf16> to vector<1x1x1024xbf16>
    tpu.vector_store %arg5[%c2_100, %c0_101, %c0_102], %94 {strides = array<i32>} : memref<4x9x1024xbf16, #tpu.memory_space<vmem>>, vector<1x1x1024xbf16>,
    %c0_103 = arith.constant 0 : index
    %c3_104 = arith.constant 3 : index
    %c0_105 = arith.constant 0 : index
    %95 = vector.load %arg1[%c0_103, %c3_104, %c0_105] : memref<1x4x1152xbf16, #tpu.memory_space<vmem>>, vector<1x1x1024xbf16>
    %96 = vector.shape_cast %95 : vector<1x1x1024xbf16> to vector<1x1024xbf16>
    %c2_106 = arith.constant 2 : index
    %c1_107 = arith.constant 1 : index
    %c0_108 = arith.constant 0 : index
    %97 = vector.load %arg5[%c2_106, %c1_107, %c0_108] : memref<4x9x1024xbf16, #tpu.memory_space<vmem>>, vector<1x1x1024xbf16>
    %98 = vector.shape_cast %97 : vector<1x1x1024xbf16> to vector<1x1024xbf16>
    %99 = vector.shape_cast %96 : vector<1x1024xbf16> to vector<1x1x1024xbf16>
    tpu.vector_store %arg5[%c2_106, %c1_107, %c0_108], %99 {strides = array<i32>} : memref<4x9x1024xbf16, #tpu.memory_space<vmem>>, vector<1x1x1024xbf16>,
    %c0_109 = arith.constant 0 : index
    %c2_110 = arith.constant 2 : index
    %c1_111 = arith.constant 1 : index
    %100 = vector.load %arg1[%c0_109, %c2_110, %c1_111] : memref<1x4x1152xbf16, #tpu.memory_space<vmem>>, vector<1x1x1024xbf16>
    %101 = vector.shape_cast %100 : vector<1x1x1024xbf16> to vector<1x1024xbf16>
    %c2_112 = arith.constant 2 : index
    %c2_113 = arith.constant 2 : index
    %c0_114 = arith.constant 0 : index
    %102 = vector.load %arg5[%c2_112, %c2_113, %c0_114] : memref<4x9x1024xbf16, #tpu.memory_space<vmem>>, vector<1x1x1024xbf16>
    %103 = vector.shape_cast %102 : vector<1x1x1024xbf16> to vector<1x1024xbf16>
    %104 = vector.shape_cast %101 : vector<1x1024xbf16> to vector<1x1x1024xbf16>
    tpu.vector_store %arg5[%c2_112, %c2_113, %c0_114], %104 {strides = array<i32>} : memref<4x9x1024xbf16, #tpu.memory_space<vmem>>, vector<1x1x1024xbf16>,
    %c0_115 = arith.constant 0 : index
    %c0_116 = arith.constant 0 : index
    %c16_117 = arith.constant 16 : index
    %105 = vector.load %arg1[%c0_115, %c0_116, %c16_117] : memref<1x4x1152xbf16, #tpu.memory_space<vmem>>, vector<1x1x1024xbf16>
    %106 = vector.shape_cast %105 : vector<1x1x1024xbf16> to vector<1x1024xbf16>
    %c2_118 = arith.constant 2 : index
    %c3_119 = arith.constant 3 : index
    %c0_120 = arith.constant 0 : index
    %107 = vector.load %arg5[%c2_118, %c3_119, %c0_120] : memref<4x9x1024xbf16, #tpu.memory_space<vmem>>, vector<1x1x1024xbf16>
    %108 = vector.shape_cast %107 : vector<1x1x1024xbf16> to vector<1x1024xbf16>
    %109 = vector.shape_cast %106 : vector<1x1024xbf16> to vector<1x1x1024xbf16>
    tpu.vector_store %arg5[%c2_118, %c3_119, %c0_120], %109 {strides = array<i32>} : memref<4x9x1024xbf16, #tpu.memory_space<vmem>>, vector<1x1x1024xbf16>,
    %c0_121 = arith.constant 0 : index
    %c1_122 = arith.constant 1 : index
    %c16_123 = arith.constant 16 : index
    %110 = vector.load %arg1[%c0_121, %c1_122, %c16_123] : memref<1x4x1152xbf16, #tpu.memory_space<vmem>>, vector<1x1x1024xbf16>
    %111 = vector.shape_cast %110 : vector<1x1x1024xbf16> to vector<1x1024xbf16>
    %c2_124 = arith.constant 2 : index
    %c4_125 = arith.constant 4 : index
    %c0_126 = arith.constant 0 : index
    %112 = vector.load %arg5[%c2_124, %c4_125, %c0_126] : memref<4x9x1024xbf16, #tpu.memory_space<vmem>>, vector<1x1x1024xbf16>
    %113 = vector.shape_cast %112 : vector<1x1x1024xbf16> to vector<1x1024xbf16>
    %114 = vector.shape_cast %111 : vector<1x1024xbf16> to vector<1x1x1024xbf16>
    tpu.vector_store %arg5[%c2_124, %c4_125, %c0_126], %114 {strides = array<i32>} : memref<4x9x1024xbf16, #tpu.memory_space<vmem>>, vector<1x1x1024xbf16>,
    %c0_127 = arith.constant 0 : index
    %c0_128 = arith.constant 0 : index
    %c17_129 = arith.constant 17 : index
    %115 = vector.load %arg1[%c0_127, %c0_128, %c17_129] : memref<1x4x1152xbf16, #tpu.memory_space<vmem>>, vector<1x1x1024xbf16>
    %116 = vector.shape_cast %115 : vector<1x1x1024xbf16> to vector<1x1024xbf16>
    %c2_130 = arith.constant 2 : index
    %c5_131 = arith.constant 5 : index
    %c0_132 = arith.constant 0 : index
    %117 = vector.load %arg5[%c2_130, %c5_131, %c0_132] : memref<4x9x1024xbf16, #tpu.memory_space<vmem>>, vector<1x1x1024xbf16>
    %118 = vector.shape_cast %117 : vector<1x1x1024xbf16> to vector<1x1024xbf16>
    %119 = vector.shape_cast %116 : vector<1x1024xbf16> to vector<1x1x1024xbf16>
    tpu.vector_store %arg5[%c2_130, %c5_131, %c0_132], %119 {strides = array<i32>} : memref<4x9x1024xbf16, #tpu.memory_space<vmem>>, vector<1x1x1024xbf16>,
    %c0_133 = arith.constant 0 : index
    %c2_134 = arith.constant 2 : index
    %c16_135 = arith.constant 16 : index
    %120 = vector.load %arg1[%c0_133, %c2_134, %c16_135] : memref<1x4x1152xbf16, #tpu.memory_space<vmem>>, vector<1x1x1024xbf16>
    %121 = vector.shape_cast %120 : vector<1x1x1024xbf16> to vector<1x1024xbf16>
    %c2_136 = arith.constant 2 : index
    %c6_137 = arith.constant 6 : index
    %c0_138 = arith.constant 0 : index
    %122 = vector.load %arg5[%c2_136, %c6_137, %c0_138] : memref<4x9x1024xbf16, #tpu.memory_space<vmem>>, vector<1x1x1024xbf16>
    %123 = vector.shape_cast %122 : vector<1x1x1024xbf16> to vector<1x1024xbf16>
    %124 = vector.shape_cast %121 : vector<1x1024xbf16> to vector<1x1x1024xbf16>
    tpu.vector_store %arg5[%c2_136, %c6_137, %c0_138], %124 {strides = array<i32>} : memref<4x9x1024xbf16, #tpu.memory_space<vmem>>, vector<1x1x1024xbf16>,
    %c0_139 = arith.constant 0 : index
    %c3_140 = arith.constant 3 : index
    %c16_141 = arith.constant 16 : index
    %125 = vector.load %arg1[%c0_139, %c3_140, %c16_141] : memref<1x4x1152xbf16, #tpu.memory_space<vmem>>, vector<1x1x1024xbf16>
    %126 = vector.shape_cast %125 : vector<1x1x1024xbf16> to vector<1x1024xbf16>
    %c2_142 = arith.constant 2 : index
    %c7_143 = arith.constant 7 : index
    %c0_144 = arith.constant 0 : index
    %127 = vector.load %arg5[%c2_142, %c7_143, %c0_144] : memref<4x9x1024xbf16, #tpu.memory_space<vmem>>, vector<1x1x1024xbf16>
    %128 = vector.shape_cast %127 : vector<1x1x1024xbf16> to vector<1x1024xbf16>
    %129 = vector.shape_cast %126 : vector<1x1024xbf16> to vector<1x1x1024xbf16>
    tpu.vector_store %arg5[%c2_142, %c7_143, %c0_144], %129 {strides = array<i32>} : memref<4x9x1024xbf16, #tpu.memory_space<vmem>>, vector<1x1x1024xbf16>,
    %c0_145 = arith.constant 0 : index
    %c2_146 = arith.constant 2 : index
    %c17_147 = arith.constant 17 : index
    %130 = vector.load %arg1[%c0_145, %c2_146, %c17_147] : memref<1x4x1152xbf16, #tpu.memory_space<vmem>>, vector<1x1x1024xbf16>
    %131 = vector.shape_cast %130 : vector<1x1x1024xbf16> to vector<1x1024xbf16>
    %c2_148 = arith.constant 2 : index
    %c8_149 = arith.constant 8 : index
    %c0_150 = arith.constant 0 : index
    %132 = vector.load %arg5[%c2_148, %c8_149, %c0_150] : memref<4x9x1024xbf16, #tpu.memory_space<vmem>>, vector<1x1x1024xbf16>
    %133 = vector.shape_cast %132 : vector<1x1x1024xbf16> to vector<1x1024xbf16>
    %134 = vector.shape_cast %131 : vector<1x1024xbf16> to vector<1x1x1024xbf16>
    tpu.vector_store %arg5[%c2_148, %c8_149, %c0_150], %134 {strides = array<i32>} : memref<4x9x1024xbf16, #tpu.memory_space<vmem>>, vector<1x1x1024xbf16>,
    %c0_151 = arith.constant 0 : index
    %c3_152 = arith.constant 3 : index
    %c0_153 = arith.constant 0 : index
    %135 = vector.load %arg1[%c0_151, %c3_152, %c0_153] : memref<1x4x1152xbf16, #tpu.memory_space<vmem>>, vector<1x1x1024xbf16>
    %136 = vector.shape_cast %135 : vector<1x1x1024xbf16> to vector<1x1024xbf16>
    %c3_154 = arith.constant 3 : index
    %c0_155 = arith.constant 0 : index
    %c0_156 = arith.constant 0 : index
    %137 = vector.load %arg5[%c3_154, %c0_155, %c0_156] : memref<4x9x1024xbf16, #tpu.memory_space<vmem>>, vector<1x1x1024xbf16>
    %138 = vector.shape_cast %137 : vector<1x1x1024xbf16> to vector<1x1024xbf16>
    %139 = vector.shape_cast %136 : vector<1x1024xbf16> to vector<1x1x1024xbf16>
    tpu.vector_store %arg5[%c3_154, %c0_155, %c0_156], %139 {strides = array<i32>} : memref<4x9x1024xbf16, #tpu.memory_space<vmem>>, vector<1x1x1024xbf16>,
    %c0_157 = arith.constant 0 : index
    %c2_158 = arith.constant 2 : index
    %c1_159 = arith.constant 1 : index
    %140 = vector.load %arg1[%c0_157, %c2_158, %c1_159] : memref<1x4x1152xbf16, #tpu.memory_space<vmem>>, vector<1x1x1024xbf16>
    %141 = vector.shape_cast %140 : vector<1x1x1024xbf16> to vector<1x1024xbf16>
    %c3_160 = arith.constant 3 : index
    %c1_161 = arith.constant 1 : index
    %c0_162 = arith.constant 0 : index
    %142 = vector.load %arg5[%c3_160, %c1_161, %c0_162] : memref<4x9x1024xbf16, #tpu.memory_space<vmem>>, vector<1x1x1024xbf16>
    %143 = vector.shape_cast %142 : vector<1x1x1024xbf16> to vector<1x1024xbf16>
    %144 = vector.shape_cast %141 : vector<1x1024xbf16> to vector<1x1x1024xbf16>
    tpu.vector_store %arg5[%c3_160, %c1_161, %c0_162], %144 {strides = array<i32>} : memref<4x9x1024xbf16, #tpu.memory_space<vmem>>, vector<1x1x1024xbf16>,
    %c0_163 = arith.constant 0 : index
    %c3_164 = arith.constant 3 : index
    %c1_165 = arith.constant 1 : index
    %145 = vector.load %arg1[%c0_163, %c3_164, %c1_165] : memref<1x4x1152xbf16, #tpu.memory_space<vmem>>, vector<1x1x1024xbf16>
    %146 = vector.shape_cast %145 : vector<1x1x1024xbf16> to vector<1x1024xbf16>
    %c3_166 = arith.constant 3 : index
    %c2_167 = arith.constant 2 : index
    %c0_168 = arith.constant 0 : index
    %147 = vector.load %arg5[%c3_166, %c2_167, %c0_168] : memref<4x9x1024xbf16, #tpu.memory_space<vmem>>, vector<1x1x1024xbf16>
    %148 = vector.shape_cast %147 : vector<1x1x1024xbf16> to vector<1x1024xbf16>
    %149 = vector.shape_cast %146 : vector<1x1024xbf16> to vector<1x1x1024xbf16>
    tpu.vector_store %arg5[%c3_166, %c2_167, %c0_168], %149 {strides = array<i32>} : memref<4x9x1024xbf16, #tpu.memory_space<vmem>>, vector<1x1x1024xbf16>,
    %c0_169 = arith.constant 0 : index
    %c1_170 = arith.constant 1 : index
    %c16_171 = arith.constant 16 : index
    %150 = vector.load %arg1[%c0_169, %c1_170, %c16_171] : memref<1x4x1152xbf16, #tpu.memory_space<vmem>>, vector<1x1x1024xbf16>
    %151 = vector.shape_cast %150 : vector<1x1x1024xbf16> to vector<1x1024xbf16>
    %c3_172 = arith.constant 3 : index
    %c3_173 = arith.constant 3 : index
    %c0_174 = arith.constant 0 : index
    %152 = vector.load %arg5[%c3_172, %c3_173, %c0_174] : memref<4x9x1024xbf16, #tpu.memory_space<vmem>>, vector<1x1x1024xbf16>
    %153 = vector.shape_cast %152 : vector<1x1x1024xbf16> to vector<1x1024xbf16>
    %154 = vector.shape_cast %151 : vector<1x1024xbf16> to vector<1x1x1024xbf16>
    tpu.vector_store %arg5[%c3_172, %c3_173, %c0_174], %154 {strides = array<i32>} : memref<4x9x1024xbf16, #tpu.memory_space<vmem>>, vector<1x1x1024xbf16>,
    %c0_175 = arith.constant 0 : index
    %c0_176 = arith.constant 0 : index
    %c17_177 = arith.constant 17 : index
    %155 = vector.load %arg1[%c0_175, %c0_176, %c17_177] : memref<1x4x1152xbf16, #tpu.memory_space<vmem>>, vector<1x1x1024xbf16>
    %156 = vector.shape_cast %155 : vector<1x1x1024xbf16> to vector<1x1024xbf16>
    %c3_178 = arith.constant 3 : index
    %c4_179 = arith.constant 4 : index
    %c0_180 = arith.constant 0 : index
    %157 = vector.load %arg5[%c3_178, %c4_179, %c0_180] : memref<4x9x1024xbf16, #tpu.memory_space<vmem>>, vector<1x1x1024xbf16>
    %158 = vector.shape_cast %157 : vector<1x1x1024xbf16> to vector<1x1024xbf16>
    %159 = vector.shape_cast %156 : vector<1x1024xbf16> to vector<1x1x1024xbf16>
    tpu.vector_store %arg5[%c3_178, %c4_179, %c0_180], %159 {strides = array<i32>} : memref<4x9x1024xbf16, #tpu.memory_space<vmem>>, vector<1x1x1024xbf16>,
    %c0_181 = arith.constant 0 : index
    %c1_182 = arith.constant 1 : index
    %c17_183 = arith.constant 17 : index
    %160 = vector.load %arg1[%c0_181, %c1_182, %c17_183] : memref<1x4x1152xbf16, #tpu.memory_space<vmem>>, vector<1x1x1024xbf16>
    %161 = vector.shape_cast %160 : vector<1x1x1024xbf16> to vector<1x1024xbf16>
    %c3_184 = arith.constant 3 : index
    %c5_185 = arith.constant 5 : index
    %c0_186 = arith.constant 0 : index
    %162 = vector.load %arg5[%c3_184, %c5_185, %c0_186] : memref<4x9x1024xbf16, #tpu.memory_space<vmem>>, vector<1x1x1024xbf16>
    %163 = vector.shape_cast %162 : vector<1x1x1024xbf16> to vector<1x1024xbf16>
    %164 = vector.shape_cast %161 : vector<1x1024xbf16> to vector<1x1x1024xbf16>
    tpu.vector_store %arg5[%c3_184, %c5_185, %c0_186], %164 {strides = array<i32>} : memref<4x9x1024xbf16, #tpu.memory_space<vmem>>, vector<1x1x1024xbf16>,
    %c0_187 = arith.constant 0 : index
    %c3_188 = arith.constant 3 : index
    %c16_189 = arith.constant 16 : index
    %165 = vector.load %arg1[%c0_187, %c3_188, %c16_189] : memref<1x4x1152xbf16, #tpu.memory_space<vmem>>, vector<1x1x1024xbf16>
    %166 = vector.shape_cast %165 : vector<1x1x1024xbf16> to vector<1x1024xbf16>
    %c3_190 = arith.constant 3 : index
    %c6_191 = arith.constant 6 : index
    %c0_192 = arith.constant 0 : index
    %167 = vector.load %arg5[%c3_190, %c6_191, %c0_192] : memref<4x9x1024xbf16, #tpu.memory_space<vmem>>, vector<1x1x1024xbf16>
    %168 = vector.shape_cast %167 : vector<1x1x1024xbf16> to vector<1x1024xbf16>
    %169 = vector.shape_cast %166 : vector<1x1024xbf16> to vector<1x1x1024xbf16>
    tpu.vector_store %arg5[%c3_190, %c6_191, %c0_192], %169 {strides = array<i32>} : memref<4x9x1024xbf16, #tpu.memory_space<vmem>>, vector<1x1x1024xbf16>,
    %c0_193 = arith.constant 0 : index
    %c2_194 = arith.constant 2 : index
    %c17_195 = arith.constant 17 : index
    %170 = vector.load %arg1[%c0_193, %c2_194, %c17_195] : memref<1x4x1152xbf16, #tpu.memory_space<vmem>>, vector<1x1x1024xbf16>
    %171 = vector.shape_cast %170 : vector<1x1x1024xbf16> to vector<1x1024xbf16>
    %c3_196 = arith.constant 3 : index
    %c7_197 = arith.constant 7 : index
    %c0_198 = arith.constant 0 : index
    %172 = vector.load %arg5[%c3_196, %c7_197, %c0_198] : memref<4x9x1024xbf16, #tpu.memory_space<vmem>>, vector<1x1x1024xbf16>
    %173 = vector.shape_cast %172 : vector<1x1x1024xbf16> to vector<1x1024xbf16>
    %174 = vector.shape_cast %171 : vector<1x1024xbf16> to vector<1x1x1024xbf16>
    tpu.vector_store %arg5[%c3_196, %c7_197, %c0_198], %174 {strides = array<i32>} : memref<4x9x1024xbf16, #tpu.memory_space<vmem>>, vector<1x1x1024xbf16>,
    %c0_199 = arith.constant 0 : index
    %c3_200 = arith.constant 3 : index
    %c17_201 = arith.constant 17 : index
    %175 = vector.load %arg1[%c0_199, %c3_200, %c17_201] : memref<1x4x1152xbf16, #tpu.memory_space<vmem>>, vector<1x1x1024xbf16>
    %176 = vector.shape_cast %175 : vector<1x1x1024xbf16> to vector<1x1024xbf16>
    %c3_202 = arith.constant 3 : index
    %c8_203 = arith.constant 8 : index
    %c0_204 = arith.constant 0 : index
    %177 = vector.load %arg5[%c3_202, %c8_203, %c0_204] : memref<4x9x1024xbf16, #tpu.memory_space<vmem>>, vector<1x1x1024xbf16>
    %178 = vector.shape_cast %177 : vector<1x1x1024xbf16> to vector<1x1024xbf16>
    %179 = vector.shape_cast %176 : vector<1x1024xbf16> to vector<1x1x1024xbf16>
    tpu.vector_store %arg5[%c3_202, %c8_203, %c0_204], %179 {strides = array<i32>} : memref<4x9x1024xbf16, #tpu.memory_space<vmem>>, vector<1x1x1024xbf16>,
    %c0_205 = arith.constant 0 : index
    %c0_206 = arith.constant 0 : index
    %180 = vector.load %arg2[%c0_205, %c0_206] : memref<8x9xbf16, #tpu.memory_space<vmem>>, vector<8x9xbf16>
    %c0_207 = arith.constant 0 : index
    %c0_208 = arith.constant 0 : index
    %c0_209 = arith.constant 0 : index
    %181 = vector.load %arg5[%c0_207, %c0_208, %c0_209] : memref<4x9x1024xbf16, #tpu.memory_space<vmem>>, vector<1x9x1024xbf16>
    %182 = vector.shape_cast %181 : vector<1x9x1024xbf16> to vector<9x1024xbf16>
    %cst = arith.constant dense<0.000000e+00> : vector<8x1024xf32>
    %183 = tpu.matmul %180, %182, %cst {dimension_numbers = #tpu.dot_dimension_numbers<[1], [0], [0], [1], [0, 0, 1, 1], [], []>} : vector<8x9xbf16>, vector<9x1024xbf16>, vector<8x1024xf32> -> vector<8x1024xf32>
    %c1_210 = arith.constant 1 : index
    %c0_211 = arith.constant 0 : index
    %c0_212 = arith.constant 0 : index
    %184 = vector.load %arg5[%c1_210, %c0_211, %c0_212] : memref<4x9x1024xbf16, #tpu.memory_space<vmem>>, vector<1x9x1024xbf16>
    %185 = vector.shape_cast %184 : vector<1x9x1024xbf16> to vector<9x1024xbf16>
    %cst_213 = arith.constant dense<0.000000e+00> : vector<8x1024xf32>
    %186 = tpu.matmul %180, %185, %cst_213 {dimension_numbers = #tpu.dot_dimension_numbers<[1], [0], [0], [1], [0, 0, 1, 1], [], []>} : vector<8x9xbf16>, vector<9x1024xbf16>, vector<8x1024xf32> -> vector<8x1024xf32>
    %187 = arith.maximumf %183, %186 : vector<8x1024xf32>
    %c2_214 = arith.constant 2 : index
    %c0_215 = arith.constant 0 : index
    %c0_216 = arith.constant 0 : index
    %188 = vector.load %arg5[%c2_214, %c0_215, %c0_216] : memref<4x9x1024xbf16, #tpu.memory_space<vmem>>, vector<1x9x1024xbf16>
    %189 = vector.shape_cast %188 : vector<1x9x1024xbf16> to vector<9x1024xbf16>
    %cst_217 = arith.constant dense<0.000000e+00> : vector<8x1024xf32>
    %190 = tpu.matmul %180, %189, %cst_217 {dimension_numbers = #tpu.dot_dimension_numbers<[1], [0], [0], [1], [0, 0, 1, 1], [], []>} : vector<8x9xbf16>, vector<9x1024xbf16>, vector<8x1024xf32> -> vector<8x1024xf32>
    %191 = arith.maximumf %187, %190 : vector<8x1024xf32>
    %c3_218 = arith.constant 3 : index
    %c0_219 = arith.constant 0 : index
    %c0_220 = arith.constant 0 : index
    %192 = vector.load %arg5[%c3_218, %c0_219, %c0_220] : memref<4x9x1024xbf16, #tpu.memory_space<vmem>>, vector<1x9x1024xbf16>
    %193 = vector.shape_cast %192 : vector<1x9x1024xbf16> to vector<9x1024xbf16>
    %cst_221 = arith.constant dense<0.000000e+00> : vector<8x1024xf32>
    %194 = tpu.matmul %180, %193, %cst_221 {dimension_numbers = #tpu.dot_dimension_numbers<[1], [0], [0], [1], [0, 0, 1, 1], [], []>} : vector<8x9xbf16>, vector<9x1024xbf16>, vector<8x1024xf32> -> vector<8x1024xf32>
    %195 = arith.maximumf %191, %194 : vector<8x1024xf32>
    %c0_222 = arith.constant 0 : index
    %c0_223 = arith.constant 0 : index
    %196 = vector.load %arg3[%c0_222, %c0_223] : memref<8x1xf32, #tpu.memory_space<vmem>>, vector<8x1xf32>
    %197 = vector.broadcast %196 : vector<8x1xf32> to vector<8x1024xf32>
    %198 = arith.addf %195, %197 : vector<8x1024xf32>
    %cst_224 = arith.constant 0.000000e+00 : f32
    %199 = vector.broadcast %cst_224 : f32 to vector<8x1024xf32>
    %200 = arith.maximumf %198, %199 : vector<8x1024xf32>
    %201 = arith.truncf %200 : vector<8x1024xf32> to vector<8x1024xbf16>
    %c0_225 = arith.constant 0 : index
    %c0_226 = arith.constant 0 : index
    %c0_227 = arith.constant 0 : index
    %202 = vector.load %arg4[%c0_225, %c0_226, %c0_227] : memref<1x8x1024xbf16, #tpu.memory_space<vmem>>, vector<1x8x1024xbf16>
    %203 = vector.shape_cast %202 : vector<1x8x1024xbf16> to vector<8x1024xbf16>
    %204 = vector.shape_cast %201 : vector<8x1024xbf16> to vector<1x8x1024xbf16>
    tpu.vector_store %arg4[%c0_225, %c0_226, %c0_227], %204 {strides = array<i32>} : memref<1x8x1024xbf16, #tpu.memory_space<vmem>>, vector<1x8x1024xbf16>,
    return
  }
  func.func @transform_0(%arg0: i32) -> (i32, i32, i32) {
    %c0_i32 = arith.constant 0 : i32
    %c0_i32_0 = arith.constant 0 : i32
    %c0_i32_1 = arith.constant 0 : i32
    return %arg0, %c0_i32, %c0_i32_0 : i32, i32, i32
  }
  func.func @transform_1(%arg0: i32) -> (i32, i32) {
    %c0_i32 = arith.constant 0 : i32
    %c0_i32_0 = arith.constant 0 : i32
    %c0_i32_1 = arith.constant 0 : i32
    return %c0_i32, %c0_i32_0 : i32, i32
  }
  func.func @transform_2(%arg0: i32) -> (i32, i32) {
    %c0_i32 = arith.constant 0 : i32
    %c0_i32_0 = arith.constant 0 : i32
    %c0_i32_1 = arith.constant 0 : i32
    return %c0_i32, %c0_i32_0 : i32, i32
  }
  func.func @transform_3(%arg0: i32) -> (i32, i32, i32) {
    %c0_i32 = arith.constant 0 : i32
    %c0_i32_0 = arith.constant 0 : i32
    %c0_i32_1 = arith.constant 0 : i32
    return %arg0, %c0_i32, %c0_i32_0 : i32, i32, i32
  }
}

module attributes {stable_mosaic.version = 11 : i64} {
  func.func @_conv_bn_relu_pool_kernel(%arg0: i32, %arg1: memref<1x32x512xbf16, #tpu.memory_space<vmem>>, %arg2: memref<16x72xbf16, #tpu.memory_space<vmem>>, %arg3: memref<16x1xf32, #tpu.memory_space<vmem>>, %arg4: memref<1x16x384xbf16, #tpu.memory_space<vmem>>, %arg5: memref<4x72x384xbf16, #tpu.memory_space<vmem>>) attributes {dimension_semantics = [#tpu.dimension_semantics<parallel>], iteration_bounds = array<i64: 2>, scalar_prefetch = 0 : i64, scratch_operands = 1 : i64, tpu.core_type = #tpu.core_type<tc>, window_params = [{transform_indices = @transform_0, window_bounds = array<i64: 1, 32, 512>}, {pipeline_mode = #tpu.pipeline_mode<synchronous>, transform_indices = @transform_1, window_bounds = array<i64: 16, 72>}, {pipeline_mode = #tpu.pipeline_mode<synchronous>, transform_indices = @transform_2, window_bounds = array<i64: 16, 1>}, {transform_indices = @transform_3, window_bounds = array<i64: 1, 16, 384>}]} {
    %c0 = arith.constant 0 : index
    %c0_0 = arith.constant 0 : index
    %c0_1 = arith.constant 0 : index
    %0 = vector.load %arg1[%c0, %c0_0, %c0_1] : memref<1x32x512xbf16, #tpu.memory_space<vmem>>, vector<1x8x384xbf16>
    %1 = vector.shape_cast %0 : vector<1x8x384xbf16> to vector<8x384xbf16>
    %c0_2 = arith.constant 0 : index
    %c0_3 = arith.constant 0 : index
    %c0_4 = arith.constant 0 : index
    %2 = vector.load %arg5[%c0_2, %c0_3, %c0_4] : memref<4x72x384xbf16, #tpu.memory_space<vmem>>, vector<1x8x384xbf16>
    %3 = vector.shape_cast %2 : vector<1x8x384xbf16> to vector<8x384xbf16>
    %4 = vector.shape_cast %1 : vector<8x384xbf16> to vector<1x8x384xbf16>
    tpu.vector_store %arg5[%c0_2, %c0_3, %c0_4], %4 {strides = array<i32>} : memref<4x72x384xbf16, #tpu.memory_space<vmem>>, vector<1x8x384xbf16>,
    %c0_5 = arith.constant 0 : index
    %c8 = arith.constant 8 : index
    %c0_6 = arith.constant 0 : index
    %5 = vector.load %arg1[%c0_5, %c8, %c0_6] : memref<1x32x512xbf16, #tpu.memory_space<vmem>>, vector<1x8x384xbf16>
    %6 = vector.shape_cast %5 : vector<1x8x384xbf16> to vector<8x384xbf16>
    %c0_7 = arith.constant 0 : index
    %c8_8 = arith.constant 8 : index
    %c0_9 = arith.constant 0 : index
    %7 = vector.load %arg5[%c0_7, %c8_8, %c0_9] : memref<4x72x384xbf16, #tpu.memory_space<vmem>>, vector<1x8x384xbf16>
    %8 = vector.shape_cast %7 : vector<1x8x384xbf16> to vector<8x384xbf16>
    %9 = vector.shape_cast %6 : vector<8x384xbf16> to vector<1x8x384xbf16>
    tpu.vector_store %arg5[%c0_7, %c8_8, %c0_9], %9 {strides = array<i32>} : memref<4x72x384xbf16, #tpu.memory_space<vmem>>, vector<1x8x384xbf16>,
    %c0_10 = arith.constant 0 : index
    %c0_11 = arith.constant 0 : index
    %c1 = arith.constant 1 : index
    %10 = vector.load %arg1[%c0_10, %c0_11, %c1] : memref<1x32x512xbf16, #tpu.memory_space<vmem>>, vector<1x8x384xbf16>
    %11 = vector.shape_cast %10 : vector<1x8x384xbf16> to vector<8x384xbf16>
    %c0_12 = arith.constant 0 : index
    %c16 = arith.constant 16 : index
    %c0_13 = arith.constant 0 : index
    %12 = vector.load %arg5[%c0_12, %c16, %c0_13] : memref<4x72x384xbf16, #tpu.memory_space<vmem>>, vector<1x8x384xbf16>
    %13 = vector.shape_cast %12 : vector<1x8x384xbf16> to vector<8x384xbf16>
    %14 = vector.shape_cast %11 : vector<8x384xbf16> to vector<1x8x384xbf16>
    tpu.vector_store %arg5[%c0_12, %c16, %c0_13], %14 {strides = array<i32>} : memref<4x72x384xbf16, #tpu.memory_space<vmem>>, vector<1x8x384xbf16>,
    %c0_14 = arith.constant 0 : index
    %c16_15 = arith.constant 16 : index
    %c0_16 = arith.constant 0 : index
    %15 = vector.load %arg1[%c0_14, %c16_15, %c0_16] : memref<1x32x512xbf16, #tpu.memory_space<vmem>>, vector<1x8x384xbf16>
    %16 = vector.shape_cast %15 : vector<1x8x384xbf16> to vector<8x384xbf16>
    %c0_17 = arith.constant 0 : index
    %c24 = arith.constant 24 : index
    %c0_18 = arith.constant 0 : index
    %17 = vector.load %arg5[%c0_17, %c24, %c0_18] : memref<4x72x384xbf16, #tpu.memory_space<vmem>>, vector<1x8x384xbf16>
    %18 = vector.shape_cast %17 : vector<1x8x384xbf16> to vector<8x384xbf16>
    %19 = vector.shape_cast %16 : vector<8x384xbf16> to vector<1x8x384xbf16>
    tpu.vector_store %arg5[%c0_17, %c24, %c0_18], %19 {strides = array<i32>} : memref<4x72x384xbf16, #tpu.memory_space<vmem>>, vector<1x8x384xbf16>,
    %c0_19 = arith.constant 0 : index
    %c24_20 = arith.constant 24 : index
    %c0_21 = arith.constant 0 : index
    %20 = vector.load %arg1[%c0_19, %c24_20, %c0_21] : memref<1x32x512xbf16, #tpu.memory_space<vmem>>, vector<1x8x384xbf16>
    %21 = vector.shape_cast %20 : vector<1x8x384xbf16> to vector<8x384xbf16>
    %c0_22 = arith.constant 0 : index
    %c32 = arith.constant 32 : index
    %c0_23 = arith.constant 0 : index
    %22 = vector.load %arg5[%c0_22, %c32, %c0_23] : memref<4x72x384xbf16, #tpu.memory_space<vmem>>, vector<1x8x384xbf16>
    %23 = vector.shape_cast %22 : vector<1x8x384xbf16> to vector<8x384xbf16>
    %24 = vector.shape_cast %21 : vector<8x384xbf16> to vector<1x8x384xbf16>
    tpu.vector_store %arg5[%c0_22, %c32, %c0_23], %24 {strides = array<i32>} : memref<4x72x384xbf16, #tpu.memory_space<vmem>>, vector<1x8x384xbf16>,
    %c0_24 = arith.constant 0 : index
    %c16_25 = arith.constant 16 : index
    %c1_26 = arith.constant 1 : index
    %25 = vector.load %arg1[%c0_24, %c16_25, %c1_26] : memref<1x32x512xbf16, #tpu.memory_space<vmem>>, vector<1x8x384xbf16>
    %26 = vector.shape_cast %25 : vector<1x8x384xbf16> to vector<8x384xbf16>
    %c0_27 = arith.constant 0 : index
    %c40 = arith.constant 40 : index
    %c0_28 = arith.constant 0 : index
    %27 = vector.load %arg5[%c0_27, %c40, %c0_28] : memref<4x72x384xbf16, #tpu.memory_space<vmem>>, vector<1x8x384xbf16>
    %28 = vector.shape_cast %27 : vector<1x8x384xbf16> to vector<8x384xbf16>
    %29 = vector.shape_cast %26 : vector<8x384xbf16> to vector<1x8x384xbf16>
    tpu.vector_store %arg5[%c0_27, %c40, %c0_28], %29 {strides = array<i32>} : memref<4x72x384xbf16, #tpu.memory_space<vmem>>, vector<1x8x384xbf16>,
    %c0_29 = arith.constant 0 : index
    %c0_30 = arith.constant 0 : index
    %c9 = arith.constant 9 : index
    %30 = vector.load %arg1[%c0_29, %c0_30, %c9] : memref<1x32x512xbf16, #tpu.memory_space<vmem>>, vector<1x8x384xbf16>
    %31 = vector.shape_cast %30 : vector<1x8x384xbf16> to vector<8x384xbf16>
    %c0_31 = arith.constant 0 : index
    %c48 = arith.constant 48 : index
    %c0_32 = arith.constant 0 : index
    %32 = vector.load %arg5[%c0_31, %c48, %c0_32] : memref<4x72x384xbf16, #tpu.memory_space<vmem>>, vector<1x8x384xbf16>
    %33 = vector.shape_cast %32 : vector<1x8x384xbf16> to vector<8x384xbf16>
    %34 = vector.shape_cast %31 : vector<8x384xbf16> to vector<1x8x384xbf16>
    tpu.vector_store %arg5[%c0_31, %c48, %c0_32], %34 {strides = array<i32>} : memref<4x72x384xbf16, #tpu.memory_space<vmem>>, vector<1x8x384xbf16>,
    %c0_33 = arith.constant 0 : index
    %c8_34 = arith.constant 8 : index
    %c9_35 = arith.constant 9 : index
    %35 = vector.load %arg1[%c0_33, %c8_34, %c9_35] : memref<1x32x512xbf16, #tpu.memory_space<vmem>>, vector<1x8x384xbf16>
    %36 = vector.shape_cast %35 : vector<1x8x384xbf16> to vector<8x384xbf16>
    %c0_36 = arith.constant 0 : index
    %c56 = arith.constant 56 : index
    %c0_37 = arith.constant 0 : index
    %37 = vector.load %arg5[%c0_36, %c56, %c0_37] : memref<4x72x384xbf16, #tpu.memory_space<vmem>>, vector<1x8x384xbf16>
    %38 = vector.shape_cast %37 : vector<1x8x384xbf16> to vector<8x384xbf16>
    %39 = vector.shape_cast %36 : vector<8x384xbf16> to vector<1x8x384xbf16>
    tpu.vector_store %arg5[%c0_36, %c56, %c0_37], %39 {strides = array<i32>} : memref<4x72x384xbf16, #tpu.memory_space<vmem>>, vector<1x8x384xbf16>,
    %c0_38 = arith.constant 0 : index
    %c0_39 = arith.constant 0 : index
    %c10 = arith.constant 10 : index
    %40 = vector.load %arg1[%c0_38, %c0_39, %c10] : memref<1x32x512xbf16, #tpu.memory_space<vmem>>, vector<1x8x384xbf16>
    %41 = vector.shape_cast %40 : vector<1x8x384xbf16> to vector<8x384xbf16>
    %c0_40 = arith.constant 0 : index
    %c64 = arith.constant 64 : index
    %c0_41 = arith.constant 0 : index
    %42 = vector.load %arg5[%c0_40, %c64, %c0_41] : memref<4x72x384xbf16, #tpu.memory_space<vmem>>, vector<1x8x384xbf16>
    %43 = vector.shape_cast %42 : vector<1x8x384xbf16> to vector<8x384xbf16>
    %44 = vector.shape_cast %41 : vector<8x384xbf16> to vector<1x8x384xbf16>
    tpu.vector_store %arg5[%c0_40, %c64, %c0_41], %44 {strides = array<i32>} : memref<4x72x384xbf16, #tpu.memory_space<vmem>>, vector<1x8x384xbf16>,
    %c0_42 = arith.constant 0 : index
    %c8_43 = arith.constant 8 : index
    %c0_44 = arith.constant 0 : index
    %45 = vector.load %arg1[%c0_42, %c8_43, %c0_44] : memref<1x32x512xbf16, #tpu.memory_space<vmem>>, vector<1x8x384xbf16>
    %46 = vector.shape_cast %45 : vector<1x8x384xbf16> to vector<8x384xbf16>
    %c1_45 = arith.constant 1 : index
    %c0_46 = arith.constant 0 : index
    %c0_47 = arith.constant 0 : index
    %47 = vector.load %arg5[%c1_45, %c0_46, %c0_47] : memref<4x72x384xbf16, #tpu.memory_space<vmem>>, vector<1x8x384xbf16>
    %48 = vector.shape_cast %47 : vector<1x8x384xbf16> to vector<8x384xbf16>
    %49 = vector.shape_cast %46 : vector<8x384xbf16> to vector<1x8x384xbf16>
    tpu.vector_store %arg5[%c1_45, %c0_46, %c0_47], %49 {strides = array<i32>} : memref<4x72x384xbf16, #tpu.memory_space<vmem>>, vector<1x8x384xbf16>,
    %c0_48 = arith.constant 0 : index
    %c0_49 = arith.constant 0 : index
    %c1_50 = arith.constant 1 : index
    %50 = vector.load %arg1[%c0_48, %c0_49, %c1_50] : memref<1x32x512xbf16, #tpu.memory_space<vmem>>, vector<1x8x384xbf16>
    %51 = vector.shape_cast %50 : vector<1x8x384xbf16> to vector<8x384xbf16>
    %c1_51 = arith.constant 1 : index
    %c8_52 = arith.constant 8 : index
    %c0_53 = arith.constant 0 : index
    %52 = vector.load %arg5[%c1_51, %c8_52, %c0_53] : memref<4x72x384xbf16, #tpu.memory_space<vmem>>, vector<1x8x384xbf16>
    %53 = vector.shape_cast %52 : vector<1x8x384xbf16> to vector<8x384xbf16>
    %54 = vector.shape_cast %51 : vector<8x384xbf16> to vector<1x8x384xbf16>
    tpu.vector_store %arg5[%c1_51, %c8_52, %c0_53], %54 {strides = array<i32>} : memref<4x72x384xbf16, #tpu.memory_space<vmem>>, vector<1x8x384xbf16>,
    %c0_54 = arith.constant 0 : index
    %c8_55 = arith.constant 8 : index
    %c1_56 = arith.constant 1 : index
    %55 = vector.load %arg1[%c0_54, %c8_55, %c1_56] : memref<1x32x512xbf16, #tpu.memory_space<vmem>>, vector<1x8x384xbf16>
    %56 = vector.shape_cast %55 : vector<1x8x384xbf16> to vector<8x384xbf16>
    %c1_57 = arith.constant 1 : index
    %c16_58 = arith.constant 16 : index
    %c0_59 = arith.constant 0 : index
    %57 = vector.load %arg5[%c1_57, %c16_58, %c0_59] : memref<4x72x384xbf16, #tpu.memory_space<vmem>>, vector<1x8x384xbf16>
    %58 = vector.shape_cast %57 : vector<1x8x384xbf16> to vector<8x384xbf16>
    %59 = vector.shape_cast %56 : vector<8x384xbf16> to vector<1x8x384xbf16>
    tpu.vector_store %arg5[%c1_57, %c16_58, %c0_59], %59 {strides = array<i32>} : memref<4x72x384xbf16, #tpu.memory_space<vmem>>, vector<1x8x384xbf16>,
    %c0_60 = arith.constant 0 : index
    %c24_61 = arith.constant 24 : index
    %c0_62 = arith.constant 0 : index
    %60 = vector.load %arg1[%c0_60, %c24_61, %c0_62] : memref<1x32x512xbf16, #tpu.memory_space<vmem>>, vector<1x8x384xbf16>
    %61 = vector.shape_cast %60 : vector<1x8x384xbf16> to vector<8x384xbf16>
    %c1_63 = arith.constant 1 : index
    %c24_64 = arith.constant 24 : index
    %c0_65 = arith.constant 0 : index
    %62 = vector.load %arg5[%c1_63, %c24_64, %c0_65] : memref<4x72x384xbf16, #tpu.memory_space<vmem>>, vector<1x8x384xbf16>
    %63 = vector.shape_cast %62 : vector<1x8x384xbf16> to vector<8x384xbf16>
    %64 = vector.shape_cast %61 : vector<8x384xbf16> to vector<1x8x384xbf16>
    tpu.vector_store %arg5[%c1_63, %c24_64, %c0_65], %64 {strides = array<i32>} : memref<4x72x384xbf16, #tpu.memory_space<vmem>>, vector<1x8x384xbf16>,
    %c0_66 = arith.constant 0 : index
    %c16_67 = arith.constant 16 : index
    %c1_68 = arith.constant 1 : index
    %65 = vector.load %arg1[%c0_66, %c16_67, %c1_68] : memref<1x32x512xbf16, #tpu.memory_space<vmem>>, vector<1x8x384xbf16>
    %66 = vector.shape_cast %65 : vector<1x8x384xbf16> to vector<8x384xbf16>
    %c1_69 = arith.constant 1 : index
    %c32_70 = arith.constant 32 : index
    %c0_71 = arith.constant 0 : index
    %67 = vector.load %arg5[%c1_69, %c32_70, %c0_71] : memref<4x72x384xbf16, #tpu.memory_space<vmem>>, vector<1x8x384xbf16>
    %68 = vector.shape_cast %67 : vector<1x8x384xbf16> to vector<8x384xbf16>
    %69 = vector.shape_cast %66 : vector<8x384xbf16> to vector<1x8x384xbf16>
    tpu.vector_store %arg5[%c1_69, %c32_70, %c0_71], %69 {strides = array<i32>} : memref<4x72x384xbf16, #tpu.memory_space<vmem>>, vector<1x8x384xbf16>,
    %c0_72 = arith.constant 0 : index
    %c24_73 = arith.constant 24 : index
    %c1_74 = arith.constant 1 : index
    %70 = vector.load %arg1[%c0_72, %c24_73, %c1_74] : memref<1x32x512xbf16, #tpu.memory_space<vmem>>, vector<1x8x384xbf16>
    %71 = vector.shape_cast %70 : vector<1x8x384xbf16> to vector<8x384xbf16>
    %c1_75 = arith.constant 1 : index
    %c40_76 = arith.constant 40 : index
    %c0_77 = arith.constant 0 : index
    %72 = vector.load %arg5[%c1_75, %c40_76, %c0_77] : memref<4x72x384xbf16, #tpu.memory_space<vmem>>, vector<1x8x384xbf16>
    %73 = vector.shape_cast %72 : vector<1x8x384xbf16> to vector<8x384xbf16>
    %74 = vector.shape_cast %71 : vector<8x384xbf16> to vector<1x8x384xbf16>
    tpu.vector_store %arg5[%c1_75, %c40_76, %c0_77], %74 {strides = array<i32>} : memref<4x72x384xbf16, #tpu.memory_space<vmem>>, vector<1x8x384xbf16>,
    %c0_78 = arith.constant 0 : index
    %c8_79 = arith.constant 8 : index
    %c9_80 = arith.constant 9 : index
    %75 = vector.load %arg1[%c0_78, %c8_79, %c9_80] : memref<1x32x512xbf16, #tpu.memory_space<vmem>>, vector<1x8x384xbf16>
    %76 = vector.shape_cast %75 : vector<1x8x384xbf16> to vector<8x384xbf16>
    %c1_81 = arith.constant 1 : index
    %c48_82 = arith.constant 48 : index
    %c0_83 = arith.constant 0 : index
    %77 = vector.load %arg5[%c1_81, %c48_82, %c0_83] : memref<4x72x384xbf16, #tpu.memory_space<vmem>>, vector<1x8x384xbf16>
    %78 = vector.shape_cast %77 : vector<1x8x384xbf16> to vector<8x384xbf16>
    %79 = vector.shape_cast %76 : vector<8x384xbf16> to vector<1x8x384xbf16>
    tpu.vector_store %arg5[%c1_81, %c48_82, %c0_83], %79 {strides = array<i32>} : memref<4x72x384xbf16, #tpu.memory_space<vmem>>, vector<1x8x384xbf16>,
    %c0_84 = arith.constant 0 : index
    %c0_85 = arith.constant 0 : index
    %c10_86 = arith.constant 10 : index
    %80 = vector.load %arg1[%c0_84, %c0_85, %c10_86] : memref<1x32x512xbf16, #tpu.memory_space<vmem>>, vector<1x8x384xbf16>
    %81 = vector.shape_cast %80 : vector<1x8x384xbf16> to vector<8x384xbf16>
    %c1_87 = arith.constant 1 : index
    %c56_88 = arith.constant 56 : index
    %c0_89 = arith.constant 0 : index
    %82 = vector.load %arg5[%c1_87, %c56_88, %c0_89] : memref<4x72x384xbf16, #tpu.memory_space<vmem>>, vector<1x8x384xbf16>
    %83 = vector.shape_cast %82 : vector<1x8x384xbf16> to vector<8x384xbf16>
    %84 = vector.shape_cast %81 : vector<8x384xbf16> to vector<1x8x384xbf16>
    tpu.vector_store %arg5[%c1_87, %c56_88, %c0_89], %84 {strides = array<i32>} : memref<4x72x384xbf16, #tpu.memory_space<vmem>>, vector<1x8x384xbf16>,
    %c0_90 = arith.constant 0 : index
    %c8_91 = arith.constant 8 : index
    %c10_92 = arith.constant 10 : index
    %85 = vector.load %arg1[%c0_90, %c8_91, %c10_92] : memref<1x32x512xbf16, #tpu.memory_space<vmem>>, vector<1x8x384xbf16>
    %86 = vector.shape_cast %85 : vector<1x8x384xbf16> to vector<8x384xbf16>
    %c1_93 = arith.constant 1 : index
    %c64_94 = arith.constant 64 : index
    %c0_95 = arith.constant 0 : index
    %87 = vector.load %arg5[%c1_93, %c64_94, %c0_95] : memref<4x72x384xbf16, #tpu.memory_space<vmem>>, vector<1x8x384xbf16>
    %88 = vector.shape_cast %87 : vector<1x8x384xbf16> to vector<8x384xbf16>
    %89 = vector.shape_cast %86 : vector<8x384xbf16> to vector<1x8x384xbf16>
    tpu.vector_store %arg5[%c1_93, %c64_94, %c0_95], %89 {strides = array<i32>} : memref<4x72x384xbf16, #tpu.memory_space<vmem>>, vector<1x8x384xbf16>,
    %c0_96 = arith.constant 0 : index
    %c16_97 = arith.constant 16 : index
    %c0_98 = arith.constant 0 : index
    %90 = vector.load %arg1[%c0_96, %c16_97, %c0_98] : memref<1x32x512xbf16, #tpu.memory_space<vmem>>, vector<1x8x384xbf16>
    %91 = vector.shape_cast %90 : vector<1x8x384xbf16> to vector<8x384xbf16>
    %c2 = arith.constant 2 : index
    %c0_99 = arith.constant 0 : index
    %c0_100 = arith.constant 0 : index
    %92 = vector.load %arg5[%c2, %c0_99, %c0_100] : memref<4x72x384xbf16, #tpu.memory_space<vmem>>, vector<1x8x384xbf16>
    %93 = vector.shape_cast %92 : vector<1x8x384xbf16> to vector<8x384xbf16>
    %94 = vector.shape_cast %91 : vector<8x384xbf16> to vector<1x8x384xbf16>
    tpu.vector_store %arg5[%c2, %c0_99, %c0_100], %94 {strides = array<i32>} : memref<4x72x384xbf16, #tpu.memory_space<vmem>>, vector<1x8x384xbf16>,
    %c0_101 = arith.constant 0 : index
    %c24_102 = arith.constant 24 : index
    %c0_103 = arith.constant 0 : index
    %95 = vector.load %arg1[%c0_101, %c24_102, %c0_103] : memref<1x32x512xbf16, #tpu.memory_space<vmem>>, vector<1x8x384xbf16>
    %96 = vector.shape_cast %95 : vector<1x8x384xbf16> to vector<8x384xbf16>
    %c2_104 = arith.constant 2 : index
    %c8_105 = arith.constant 8 : index
    %c0_106 = arith.constant 0 : index
    %97 = vector.load %arg5[%c2_104, %c8_105, %c0_106] : memref<4x72x384xbf16, #tpu.memory_space<vmem>>, vector<1x8x384xbf16>
    %98 = vector.shape_cast %97 : vector<1x8x384xbf16> to vector<8x384xbf16>
    %99 = vector.shape_cast %96 : vector<8x384xbf16> to vector<1x8x384xbf16>
    tpu.vector_store %arg5[%c2_104, %c8_105, %c0_106], %99 {strides = array<i32>} : memref<4x72x384xbf16, #tpu.memory_space<vmem>>, vector<1x8x384xbf16>,
    %c0_107 = arith.constant 0 : index
    %c16_108 = arith.constant 16 : index
    %c1_109 = arith.constant 1 : index
    %100 = vector.load %arg1[%c0_107, %c16_108, %c1_109] : memref<1x32x512xbf16, #tpu.memory_space<vmem>>, vector<1x8x384xbf16>
    %101 = vector.shape_cast %100 : vector<1x8x384xbf16> to vector<8x384xbf16>
    %c2_110 = arith.constant 2 : index
    %c16_111 = arith.constant 16 : index
    %c0_112 = arith.constant 0 : index
    %102 = vector.load %arg5[%c2_110, %c16_111, %c0_112] : memref<4x72x384xbf16, #tpu.memory_space<vmem>>, vector<1x8x384xbf16>
    %103 = vector.shape_cast %102 : vector<1x8x384xbf16> to vector<8x384xbf16>
    %104 = vector.shape_cast %101 : vector<8x384xbf16> to vector<1x8x384xbf16>
    tpu.vector_store %arg5[%c2_110, %c16_111, %c0_112], %104 {strides = array<i32>} : memref<4x72x384xbf16, #tpu.memory_space<vmem>>, vector<1x8x384xbf16>,
    %c0_113 = arith.constant 0 : index
    %c0_114 = arith.constant 0 : index
    %c9_115 = arith.constant 9 : index
    %105 = vector.load %arg1[%c0_113, %c0_114, %c9_115] : memref<1x32x512xbf16, #tpu.memory_space<vmem>>, vector<1x8x384xbf16>
    %106 = vector.shape_cast %105 : vector<1x8x384xbf16> to vector<8x384xbf16>
    %c2_116 = arith.constant 2 : index
    %c24_117 = arith.constant 24 : index
    %c0_118 = arith.constant 0 : index
    %107 = vector.load %arg5[%c2_116, %c24_117, %c0_118] : memref<4x72x384xbf16, #tpu.memory_space<vmem>>, vector<1x8x384xbf16>
    %108 = vector.shape_cast %107 : vector<1x8x384xbf16> to vector<8x384xbf16>
    %109 = vector.shape_cast %106 : vector<8x384xbf16> to vector<1x8x384xbf16>
    tpu.vector_store %arg5[%c2_116, %c24_117, %c0_118], %109 {strides = array<i32>} : memref<4x72x384xbf16, #tpu.memory_space<vmem>>, vector<1x8x384xbf16>,
    %c0_119 = arith.constant 0 : index
    %c8_120 = arith.constant 8 : index
    %c9_121 = arith.constant 9 : index
    %110 = vector.load %arg1[%c0_119, %c8_120, %c9_121] : memref<1x32x512xbf16, #tpu.memory_space<vmem>>, vector<1x8x384xbf16>
    %111 = vector.shape_cast %110 : vector<1x8x384xbf16> to vector<8x384xbf16>
    %c2_122 = arith.constant 2 : index
    %c32_123 = arith.constant 32 : index
    %c0_124 = arith.constant 0 : index
    %112 = vector.load %arg5[%c2_122, %c32_123, %c0_124] : memref<4x72x384xbf16, #tpu.memory_space<vmem>>, vector<1x8x384xbf16>
    %113 = vector.shape_cast %112 : vector<1x8x384xbf16> to vector<8x384xbf16>
    %114 = vector.shape_cast %111 : vector<8x384xbf16> to vector<1x8x384xbf16>
    tpu.vector_store %arg5[%c2_122, %c32_123, %c0_124], %114 {strides = array<i32>} : memref<4x72x384xbf16, #tpu.memory_space<vmem>>, vector<1x8x384xbf16>,
    %c0_125 = arith.constant 0 : index
    %c0_126 = arith.constant 0 : index
    %c10_127 = arith.constant 10 : index
    %115 = vector.load %arg1[%c0_125, %c0_126, %c10_127] : memref<1x32x512xbf16, #tpu.memory_space<vmem>>, vector<1x8x384xbf16>
    %116 = vector.shape_cast %115 : vector<1x8x384xbf16> to vector<8x384xbf16>
    %c2_128 = arith.constant 2 : index
    %c40_129 = arith.constant 40 : index
    %c0_130 = arith.constant 0 : index
    %117 = vector.load %arg5[%c2_128, %c40_129, %c0_130] : memref<4x72x384xbf16, #tpu.memory_space<vmem>>, vector<1x8x384xbf16>
    %118 = vector.shape_cast %117 : vector<1x8x384xbf16> to vector<8x384xbf16>
    %119 = vector.shape_cast %116 : vector<8x384xbf16> to vector<1x8x384xbf16>
    tpu.vector_store %arg5[%c2_128, %c40_129, %c0_130], %119 {strides = array<i32>} : memref<4x72x384xbf16, #tpu.memory_space<vmem>>, vector<1x8x384xbf16>,
    %c0_131 = arith.constant 0 : index
    %c16_132 = arith.constant 16 : index
    %c9_133 = arith.constant 9 : index
    %120 = vector.load %arg1[%c0_131, %c16_132, %c9_133] : memref<1x32x512xbf16, #tpu.memory_space<vmem>>, vector<1x8x384xbf16>
    %121 = vector.shape_cast %120 : vector<1x8x384xbf16> to vector<8x384xbf16>
    %c2_134 = arith.constant 2 : index
    %c48_135 = arith.constant 48 : index
    %c0_136 = arith.constant 0 : index
    %122 = vector.load %arg5[%c2_134, %c48_135, %c0_136] : memref<4x72x384xbf16, #tpu.memory_space<vmem>>, vector<1x8x384xbf16>
    %123 = vector.shape_cast %122 : vector<1x8x384xbf16> to vector<8x384xbf16>
    %124 = vector.shape_cast %121 : vector<8x384xbf16> to vector<1x8x384xbf16>
    tpu.vector_store %arg5[%c2_134, %c48_135, %c0_136], %124 {strides = array<i32>} : memref<4x72x384xbf16, #tpu.memory_space<vmem>>, vector<1x8x384xbf16>,
    %c0_137 = arith.constant 0 : index
    %c24_138 = arith.constant 24 : index
    %c9_139 = arith.constant 9 : index
    %125 = vector.load %arg1[%c0_137, %c24_138, %c9_139] : memref<1x32x512xbf16, #tpu.memory_space<vmem>>, vector<1x8x384xbf16>
    %126 = vector.shape_cast %125 : vector<1x8x384xbf16> to vector<8x384xbf16>
    %c2_140 = arith.constant 2 : index
    %c56_141 = arith.constant 56 : index
    %c0_142 = arith.constant 0 : index
    %127 = vector.load %arg5[%c2_140, %c56_141, %c0_142] : memref<4x72x384xbf16, #tpu.memory_space<vmem>>, vector<1x8x384xbf16>
    %128 = vector.shape_cast %127 : vector<1x8x384xbf16> to vector<8x384xbf16>
    %129 = vector.shape_cast %126 : vector<8x384xbf16> to vector<1x8x384xbf16>
    tpu.vector_store %arg5[%c2_140, %c56_141, %c0_142], %129 {strides = array<i32>} : memref<4x72x384xbf16, #tpu.memory_space<vmem>>, vector<1x8x384xbf16>,
    %c0_143 = arith.constant 0 : index
    %c16_144 = arith.constant 16 : index
    %c10_145 = arith.constant 10 : index
    %130 = vector.load %arg1[%c0_143, %c16_144, %c10_145] : memref<1x32x512xbf16, #tpu.memory_space<vmem>>, vector<1x8x384xbf16>
    %131 = vector.shape_cast %130 : vector<1x8x384xbf16> to vector<8x384xbf16>
    %c2_146 = arith.constant 2 : index
    %c64_147 = arith.constant 64 : index
    %c0_148 = arith.constant 0 : index
    %132 = vector.load %arg5[%c2_146, %c64_147, %c0_148] : memref<4x72x384xbf16, #tpu.memory_space<vmem>>, vector<1x8x384xbf16>
    %133 = vector.shape_cast %132 : vector<1x8x384xbf16> to vector<8x384xbf16>
    %134 = vector.shape_cast %131 : vector<8x384xbf16> to vector<1x8x384xbf16>
    tpu.vector_store %arg5[%c2_146, %c64_147, %c0_148], %134 {strides = array<i32>} : memref<4x72x384xbf16, #tpu.memory_space<vmem>>, vector<1x8x384xbf16>,
    %c0_149 = arith.constant 0 : index
    %c24_150 = arith.constant 24 : index
    %c0_151 = arith.constant 0 : index
    %135 = vector.load %arg1[%c0_149, %c24_150, %c0_151] : memref<1x32x512xbf16, #tpu.memory_space<vmem>>, vector<1x8x384xbf16>
    %136 = vector.shape_cast %135 : vector<1x8x384xbf16> to vector<8x384xbf16>
    %c3 = arith.constant 3 : index
    %c0_152 = arith.constant 0 : index
    %c0_153 = arith.constant 0 : index
    %137 = vector.load %arg5[%c3, %c0_152, %c0_153] : memref<4x72x384xbf16, #tpu.memory_space<vmem>>, vector<1x8x384xbf16>
    %138 = vector.shape_cast %137 : vector<1x8x384xbf16> to vector<8x384xbf16>
    %139 = vector.shape_cast %136 : vector<8x384xbf16> to vector<1x8x384xbf16>
    tpu.vector_store %arg5[%c3, %c0_152, %c0_153], %139 {strides = array<i32>} : memref<4x72x384xbf16, #tpu.memory_space<vmem>>, vector<1x8x384xbf16>,
    %c0_154 = arith.constant 0 : index
    %c16_155 = arith.constant 16 : index
    %c1_156 = arith.constant 1 : index
    %140 = vector.load %arg1[%c0_154, %c16_155, %c1_156] : memref<1x32x512xbf16, #tpu.memory_space<vmem>>, vector<1x8x384xbf16>
    %141 = vector.shape_cast %140 : vector<1x8x384xbf16> to vector<8x384xbf16>
    %c3_157 = arith.constant 3 : index
    %c8_158 = arith.constant 8 : index
    %c0_159 = arith.constant 0 : index
    %142 = vector.load %arg5[%c3_157, %c8_158, %c0_159] : memref<4x72x384xbf16, #tpu.memory_space<vmem>>, vector<1x8x384xbf16>
    %143 = vector.shape_cast %142 : vector<1x8x384xbf16> to vector<8x384xbf16>
    %144 = vector.shape_cast %141 : vector<8x384xbf16> to vector<1x8x384xbf16>
    tpu.vector_store %arg5[%c3_157, %c8_158, %c0_159], %144 {strides = array<i32>} : memref<4x72x384xbf16, #tpu.memory_space<vmem>>, vector<1x8x384xbf16>,
    %c0_160 = arith.constant 0 : index
    %c24_161 = arith.constant 24 : index
    %c1_162 = arith.constant 1 : index
    %145 = vector.load %arg1[%c0_160, %c24_161, %c1_162] : memref<1x32x512xbf16, #tpu.memory_space<vmem>>, vector<1x8x384xbf16>
    %146 = vector.shape_cast %145 : vector<1x8x384xbf16> to vector<8x384xbf16>
    %c3_163 = arith.constant 3 : index
    %c16_164 = arith.constant 16 : index
    %c0_165 = arith.constant 0 : index
    %147 = vector.load %arg5[%c3_163, %c16_164, %c0_165] : memref<4x72x384xbf16, #tpu.memory_space<vmem>>, vector<1x8x384xbf16>
    %148 = vector.shape_cast %147 : vector<1x8x384xbf16> to vector<8x384xbf16>
    %149 = vector.shape_cast %146 : vector<8x384xbf16> to vector<1x8x384xbf16>
    tpu.vector_store %arg5[%c3_163, %c16_164, %c0_165], %149 {strides = array<i32>} : memref<4x72x384xbf16, #tpu.memory_space<vmem>>, vector<1x8x384xbf16>,
    %c0_166 = arith.constant 0 : index
    %c8_167 = arith.constant 8 : index
    %c9_168 = arith.constant 9 : index
    %150 = vector.load %arg1[%c0_166, %c8_167, %c9_168] : memref<1x32x512xbf16, #tpu.memory_space<vmem>>, vector<1x8x384xbf16>
    %151 = vector.shape_cast %150 : vector<1x8x384xbf16> to vector<8x384xbf16>
    %c3_169 = arith.constant 3 : index
    %c24_170 = arith.constant 24 : index
    %c0_171 = arith.constant 0 : index
    %152 = vector.load %arg5[%c3_169, %c24_170, %c0_171] : memref<4x72x384xbf16, #tpu.memory_space<vmem>>, vector<1x8x384xbf16>
    %153 = vector.shape_cast %152 : vector<1x8x384xbf16> to vector<8x384xbf16>
    %154 = vector.shape_cast %151 : vector<8x384xbf16> to vector<1x8x384xbf16>
    tpu.vector_store %arg5[%c3_169, %c24_170, %c0_171], %154 {strides = array<i32>} : memref<4x72x384xbf16, #tpu.memory_space<vmem>>, vector<1x8x384xbf16>,
    %c0_172 = arith.constant 0 : index
    %c0_173 = arith.constant 0 : index
    %c10_174 = arith.constant 10 : index
    %155 = vector.load %arg1[%c0_172, %c0_173, %c10_174] : memref<1x32x512xbf16, #tpu.memory_space<vmem>>, vector<1x8x384xbf16>
    %156 = vector.shape_cast %155 : vector<1x8x384xbf16> to vector<8x384xbf16>
    %c3_175 = arith.constant 3 : index
    %c32_176 = arith.constant 32 : index
    %c0_177 = arith.constant 0 : index
    %157 = vector.load %arg5[%c3_175, %c32_176, %c0_177] : memref<4x72x384xbf16, #tpu.memory_space<vmem>>, vector<1x8x384xbf16>
    %158 = vector.shape_cast %157 : vector<1x8x384xbf16> to vector<8x384xbf16>
    %159 = vector.shape_cast %156 : vector<8x384xbf16> to vector<1x8x384xbf16>
    tpu.vector_store %arg5[%c3_175, %c32_176, %c0_177], %159 {strides = array<i32>} : memref<4x72x384xbf16, #tpu.memory_space<vmem>>, vector<1x8x384xbf16>,
    %c0_178 = arith.constant 0 : index
    %c8_179 = arith.constant 8 : index
    %c10_180 = arith.constant 10 : index
    %160 = vector.load %arg1[%c0_178, %c8_179, %c10_180] : memref<1x32x512xbf16, #tpu.memory_space<vmem>>, vector<1x8x384xbf16>
    %161 = vector.shape_cast %160 : vector<1x8x384xbf16> to vector<8x384xbf16>
    %c3_181 = arith.constant 3 : index
    %c40_182 = arith.constant 40 : index
    %c0_183 = arith.constant 0 : index
    %162 = vector.load %arg5[%c3_181, %c40_182, %c0_183] : memref<4x72x384xbf16, #tpu.memory_space<vmem>>, vector<1x8x384xbf16>
    %163 = vector.shape_cast %162 : vector<1x8x384xbf16> to vector<8x384xbf16>
    %164 = vector.shape_cast %161 : vector<8x384xbf16> to vector<1x8x384xbf16>
    tpu.vector_store %arg5[%c3_181, %c40_182, %c0_183], %164 {strides = array<i32>} : memref<4x72x384xbf16, #tpu.memory_space<vmem>>, vector<1x8x384xbf16>,
    %c0_184 = arith.constant 0 : index
    %c24_185 = arith.constant 24 : index
    %c9_186 = arith.constant 9 : index
    %165 = vector.load %arg1[%c0_184, %c24_185, %c9_186] : memref<1x32x512xbf16, #tpu.memory_space<vmem>>, vector<1x8x384xbf16>
    %166 = vector.shape_cast %165 : vector<1x8x384xbf16> to vector<8x384xbf16>
    %c3_187 = arith.constant 3 : index
    %c48_188 = arith.constant 48 : index
    %c0_189 = arith.constant 0 : index
    %167 = vector.load %arg5[%c3_187, %c48_188, %c0_189] : memref<4x72x384xbf16, #tpu.memory_space<vmem>>, vector<1x8x384xbf16>
    %168 = vector.shape_cast %167 : vector<1x8x384xbf16> to vector<8x384xbf16>
    %169 = vector.shape_cast %166 : vector<8x384xbf16> to vector<1x8x384xbf16>
    tpu.vector_store %arg5[%c3_187, %c48_188, %c0_189], %169 {strides = array<i32>} : memref<4x72x384xbf16, #tpu.memory_space<vmem>>, vector<1x8x384xbf16>,
    %c0_190 = arith.constant 0 : index
    %c16_191 = arith.constant 16 : index
    %c10_192 = arith.constant 10 : index
    %170 = vector.load %arg1[%c0_190, %c16_191, %c10_192] : memref<1x32x512xbf16, #tpu.memory_space<vmem>>, vector<1x8x384xbf16>
    %171 = vector.shape_cast %170 : vector<1x8x384xbf16> to vector<8x384xbf16>
    %c3_193 = arith.constant 3 : index
    %c56_194 = arith.constant 56 : index
    %c0_195 = arith.constant 0 : index
    %172 = vector.load %arg5[%c3_193, %c56_194, %c0_195] : memref<4x72x384xbf16, #tpu.memory_space<vmem>>, vector<1x8x384xbf16>
    %173 = vector.shape_cast %172 : vector<1x8x384xbf16> to vector<8x384xbf16>
    %174 = vector.shape_cast %171 : vector<8x384xbf16> to vector<1x8x384xbf16>
    tpu.vector_store %arg5[%c3_193, %c56_194, %c0_195], %174 {strides = array<i32>} : memref<4x72x384xbf16, #tpu.memory_space<vmem>>, vector<1x8x384xbf16>,
    %c0_196 = arith.constant 0 : index
    %c24_197 = arith.constant 24 : index
    %c10_198 = arith.constant 10 : index
    %175 = vector.load %arg1[%c0_196, %c24_197, %c10_198] : memref<1x32x512xbf16, #tpu.memory_space<vmem>>, vector<1x8x384xbf16>
    %176 = vector.shape_cast %175 : vector<1x8x384xbf16> to vector<8x384xbf16>
    %c3_199 = arith.constant 3 : index
    %c64_200 = arith.constant 64 : index
    %c0_201 = arith.constant 0 : index
    %177 = vector.load %arg5[%c3_199, %c64_200, %c0_201] : memref<4x72x384xbf16, #tpu.memory_space<vmem>>, vector<1x8x384xbf16>
    %178 = vector.shape_cast %177 : vector<1x8x384xbf16> to vector<8x384xbf16>
    %179 = vector.shape_cast %176 : vector<8x384xbf16> to vector<1x8x384xbf16>
    tpu.vector_store %arg5[%c3_199, %c64_200, %c0_201], %179 {strides = array<i32>} : memref<4x72x384xbf16, #tpu.memory_space<vmem>>, vector<1x8x384xbf16>,
    %c0_202 = arith.constant 0 : index
    %c0_203 = arith.constant 0 : index
    %180 = vector.load %arg2[%c0_202, %c0_203] : memref<16x72xbf16, #tpu.memory_space<vmem>>, vector<16x72xbf16>
    %c0_204 = arith.constant 0 : index
    %c0_205 = arith.constant 0 : index
    %c0_206 = arith.constant 0 : index
    %181 = vector.load %arg5[%c0_204, %c0_205, %c0_206] : memref<4x72x384xbf16, #tpu.memory_space<vmem>>, vector<1x72x384xbf16>
    %182 = vector.shape_cast %181 : vector<1x72x384xbf16> to vector<72x384xbf16>
    %cst = arith.constant dense<0.000000e+00> : vector<16x384xf32>
    %183 = tpu.matmul %180, %182, %cst {dimension_numbers = #tpu.dot_dimension_numbers<[1], [0], [0], [1], [0, 0, 1, 1], [], []>} : vector<16x72xbf16>, vector<72x384xbf16>, vector<16x384xf32> -> vector<16x384xf32>
    %c1_207 = arith.constant 1 : index
    %c0_208 = arith.constant 0 : index
    %c0_209 = arith.constant 0 : index
    %184 = vector.load %arg5[%c1_207, %c0_208, %c0_209] : memref<4x72x384xbf16, #tpu.memory_space<vmem>>, vector<1x72x384xbf16>
    %185 = vector.shape_cast %184 : vector<1x72x384xbf16> to vector<72x384xbf16>
    %cst_210 = arith.constant dense<0.000000e+00> : vector<16x384xf32>
    %186 = tpu.matmul %180, %185, %cst_210 {dimension_numbers = #tpu.dot_dimension_numbers<[1], [0], [0], [1], [0, 0, 1, 1], [], []>} : vector<16x72xbf16>, vector<72x384xbf16>, vector<16x384xf32> -> vector<16x384xf32>
    %187 = arith.maximumf %183, %186 : vector<16x384xf32>
    %c2_211 = arith.constant 2 : index
    %c0_212 = arith.constant 0 : index
    %c0_213 = arith.constant 0 : index
    %188 = vector.load %arg5[%c2_211, %c0_212, %c0_213] : memref<4x72x384xbf16, #tpu.memory_space<vmem>>, vector<1x72x384xbf16>
    %189 = vector.shape_cast %188 : vector<1x72x384xbf16> to vector<72x384xbf16>
    %cst_214 = arith.constant dense<0.000000e+00> : vector<16x384xf32>
    %190 = tpu.matmul %180, %189, %cst_214 {dimension_numbers = #tpu.dot_dimension_numbers<[1], [0], [0], [1], [0, 0, 1, 1], [], []>} : vector<16x72xbf16>, vector<72x384xbf16>, vector<16x384xf32> -> vector<16x384xf32>
    %191 = arith.maximumf %187, %190 : vector<16x384xf32>
    %c3_215 = arith.constant 3 : index
    %c0_216 = arith.constant 0 : index
    %c0_217 = arith.constant 0 : index
    %192 = vector.load %arg5[%c3_215, %c0_216, %c0_217] : memref<4x72x384xbf16, #tpu.memory_space<vmem>>, vector<1x72x384xbf16>
    %193 = vector.shape_cast %192 : vector<1x72x384xbf16> to vector<72x384xbf16>
    %cst_218 = arith.constant dense<0.000000e+00> : vector<16x384xf32>
    %194 = tpu.matmul %180, %193, %cst_218 {dimension_numbers = #tpu.dot_dimension_numbers<[1], [0], [0], [1], [0, 0, 1, 1], [], []>} : vector<16x72xbf16>, vector<72x384xbf16>, vector<16x384xf32> -> vector<16x384xf32>
    %195 = arith.maximumf %191, %194 : vector<16x384xf32>
    %c0_219 = arith.constant 0 : index
    %c0_220 = arith.constant 0 : index
    %196 = vector.load %arg3[%c0_219, %c0_220] : memref<16x1xf32, #tpu.memory_space<vmem>>, vector<16x1xf32>
    %197 = vector.broadcast %196 : vector<16x1xf32> to vector<16x384xf32>
    %198 = arith.addf %195, %197 : vector<16x384xf32>
    %cst_221 = arith.constant 0.000000e+00 : f32
    %199 = vector.broadcast %cst_221 : f32 to vector<16x384xf32>
    %200 = arith.maximumf %198, %199 : vector<16x384xf32>
    %201 = arith.truncf %200 : vector<16x384xf32> to vector<16x384xbf16>
    %c0_222 = arith.constant 0 : index
    %c0_223 = arith.constant 0 : index
    %c0_224 = arith.constant 0 : index
    %202 = vector.load %arg4[%c0_222, %c0_223, %c0_224] : memref<1x16x384xbf16, #tpu.memory_space<vmem>>, vector<1x16x384xbf16>
    %203 = vector.shape_cast %202 : vector<1x16x384xbf16> to vector<16x384xbf16>
    %204 = vector.shape_cast %201 : vector<16x384xbf16> to vector<1x16x384xbf16>
    tpu.vector_store %arg4[%c0_222, %c0_223, %c0_224], %204 {strides = array<i32>} : memref<1x16x384xbf16, #tpu.memory_space<vmem>>, vector<1x16x384xbf16>,
    return
  }
  func.func @transform_0(%arg0: i32) -> (i32, i32, i32) {
    %c0_i32 = arith.constant 0 : i32
    %c0_i32_0 = arith.constant 0 : i32
    %c0_i32_1 = arith.constant 0 : i32
    return %arg0, %c0_i32, %c0_i32_0 : i32, i32, i32
  }
  func.func @transform_1(%arg0: i32) -> (i32, i32) {
    %c0_i32 = arith.constant 0 : i32
    %c0_i32_0 = arith.constant 0 : i32
    %c0_i32_1 = arith.constant 0 : i32
    return %c0_i32, %c0_i32_0 : i32, i32
  }
  func.func @transform_2(%arg0: i32) -> (i32, i32) {
    %c0_i32 = arith.constant 0 : i32
    %c0_i32_0 = arith.constant 0 : i32
    %c0_i32_1 = arith.constant 0 : i32
    return %c0_i32, %c0_i32_0 : i32, i32
  }
  func.func @transform_3(%arg0: i32) -> (i32, i32, i32) {
    %c0_i32 = arith.constant 0 : i32
    %c0_i32_0 = arith.constant 0 : i32
    %c0_i32_1 = arith.constant 0 : i32
    return %arg0, %c0_i32, %c0_i32_0 : i32, i32, i32
  }
}

module attributes {stable_mosaic.version = 11 : i64} {
  func.func @_conv_bn_relu_pool_kernel(%arg0: i32, %arg1: memref<1x64x256xbf16, #tpu.memory_space<vmem>>, %arg2: memref<32x144xbf16, #tpu.memory_space<vmem>>, %arg3: memref<32x1xf32, #tpu.memory_space<vmem>>, %arg4: memref<1x32x128xbf16, #tpu.memory_space<vmem>>, %arg5: memref<4x144x128xbf16, #tpu.memory_space<vmem>>) attributes {dimension_semantics = [#tpu.dimension_semantics<parallel>], iteration_bounds = array<i64: 2>, scalar_prefetch = 0 : i64, scratch_operands = 1 : i64, tpu.core_type = #tpu.core_type<tc>, window_params = [{transform_indices = @transform_0, window_bounds = array<i64: 1, 64, 256>}, {pipeline_mode = #tpu.pipeline_mode<synchronous>, transform_indices = @transform_1, window_bounds = array<i64: 32, 144>}, {pipeline_mode = #tpu.pipeline_mode<synchronous>, transform_indices = @transform_2, window_bounds = array<i64: 32, 1>}, {transform_indices = @transform_3, window_bounds = array<i64: 1, 32, 128>}]} {
    %c0 = arith.constant 0 : index
    %c0_0 = arith.constant 0 : index
    %c0_1 = arith.constant 0 : index
    %0 = vector.load %arg1[%c0, %c0_0, %c0_1] : memref<1x64x256xbf16, #tpu.memory_space<vmem>>, vector<1x16x128xbf16>
    %1 = vector.shape_cast %0 : vector<1x16x128xbf16> to vector<16x128xbf16>
    %c0_2 = arith.constant 0 : index
    %c0_3 = arith.constant 0 : index
    %c0_4 = arith.constant 0 : index
    %2 = vector.load %arg5[%c0_2, %c0_3, %c0_4] : memref<4x144x128xbf16, #tpu.memory_space<vmem>>, vector<1x16x128xbf16>
    %3 = vector.shape_cast %2 : vector<1x16x128xbf16> to vector<16x128xbf16>
    %4 = vector.shape_cast %1 : vector<16x128xbf16> to vector<1x16x128xbf16>
    tpu.vector_store %arg5[%c0_2, %c0_3, %c0_4], %4 {strides = array<i32>} : memref<4x144x128xbf16, #tpu.memory_space<vmem>>, vector<1x16x128xbf16>,
    %c0_5 = arith.constant 0 : index
    %c16 = arith.constant 16 : index
    %c0_6 = arith.constant 0 : index
    %5 = vector.load %arg1[%c0_5, %c16, %c0_6] : memref<1x64x256xbf16, #tpu.memory_space<vmem>>, vector<1x16x128xbf16>
    %6 = vector.shape_cast %5 : vector<1x16x128xbf16> to vector<16x128xbf16>
    %c0_7 = arith.constant 0 : index
    %c16_8 = arith.constant 16 : index
    %c0_9 = arith.constant 0 : index
    %7 = vector.load %arg5[%c0_7, %c16_8, %c0_9] : memref<4x144x128xbf16, #tpu.memory_space<vmem>>, vector<1x16x128xbf16>
    %8 = vector.shape_cast %7 : vector<1x16x128xbf16> to vector<16x128xbf16>
    %9 = vector.shape_cast %6 : vector<16x128xbf16> to vector<1x16x128xbf16>
    tpu.vector_store %arg5[%c0_7, %c16_8, %c0_9], %9 {strides = array<i32>} : memref<4x144x128xbf16, #tpu.memory_space<vmem>>, vector<1x16x128xbf16>,
    %c0_10 = arith.constant 0 : index
    %c0_11 = arith.constant 0 : index
    %c1 = arith.constant 1 : index
    %10 = vector.load %arg1[%c0_10, %c0_11, %c1] : memref<1x64x256xbf16, #tpu.memory_space<vmem>>, vector<1x16x128xbf16>
    %11 = vector.shape_cast %10 : vector<1x16x128xbf16> to vector<16x128xbf16>
    %c0_12 = arith.constant 0 : index
    %c32 = arith.constant 32 : index
    %c0_13 = arith.constant 0 : index
    %12 = vector.load %arg5[%c0_12, %c32, %c0_13] : memref<4x144x128xbf16, #tpu.memory_space<vmem>>, vector<1x16x128xbf16>
    %13 = vector.shape_cast %12 : vector<1x16x128xbf16> to vector<16x128xbf16>
    %14 = vector.shape_cast %11 : vector<16x128xbf16> to vector<1x16x128xbf16>
    tpu.vector_store %arg5[%c0_12, %c32, %c0_13], %14 {strides = array<i32>} : memref<4x144x128xbf16, #tpu.memory_space<vmem>>, vector<1x16x128xbf16>,
    %c0_14 = arith.constant 0 : index
    %c32_15 = arith.constant 32 : index
    %c0_16 = arith.constant 0 : index
    %15 = vector.load %arg1[%c0_14, %c32_15, %c0_16] : memref<1x64x256xbf16, #tpu.memory_space<vmem>>, vector<1x16x128xbf16>
    %16 = vector.shape_cast %15 : vector<1x16x128xbf16> to vector<16x128xbf16>
    %c0_17 = arith.constant 0 : index
    %c48 = arith.constant 48 : index
    %c0_18 = arith.constant 0 : index
    %17 = vector.load %arg5[%c0_17, %c48, %c0_18] : memref<4x144x128xbf16, #tpu.memory_space<vmem>>, vector<1x16x128xbf16>
    %18 = vector.shape_cast %17 : vector<1x16x128xbf16> to vector<16x128xbf16>
    %19 = vector.shape_cast %16 : vector<16x128xbf16> to vector<1x16x128xbf16>
    tpu.vector_store %arg5[%c0_17, %c48, %c0_18], %19 {strides = array<i32>} : memref<4x144x128xbf16, #tpu.memory_space<vmem>>, vector<1x16x128xbf16>,
    %c0_19 = arith.constant 0 : index
    %c48_20 = arith.constant 48 : index
    %c0_21 = arith.constant 0 : index
    %20 = vector.load %arg1[%c0_19, %c48_20, %c0_21] : memref<1x64x256xbf16, #tpu.memory_space<vmem>>, vector<1x16x128xbf16>
    %21 = vector.shape_cast %20 : vector<1x16x128xbf16> to vector<16x128xbf16>
    %c0_22 = arith.constant 0 : index
    %c64 = arith.constant 64 : index
    %c0_23 = arith.constant 0 : index
    %22 = vector.load %arg5[%c0_22, %c64, %c0_23] : memref<4x144x128xbf16, #tpu.memory_space<vmem>>, vector<1x16x128xbf16>
    %23 = vector.shape_cast %22 : vector<1x16x128xbf16> to vector<16x128xbf16>
    %24 = vector.shape_cast %21 : vector<16x128xbf16> to vector<1x16x128xbf16>
    tpu.vector_store %arg5[%c0_22, %c64, %c0_23], %24 {strides = array<i32>} : memref<4x144x128xbf16, #tpu.memory_space<vmem>>, vector<1x16x128xbf16>,
    %c0_24 = arith.constant 0 : index
    %c32_25 = arith.constant 32 : index
    %c1_26 = arith.constant 1 : index
    %25 = vector.load %arg1[%c0_24, %c32_25, %c1_26] : memref<1x64x256xbf16, #tpu.memory_space<vmem>>, vector<1x16x128xbf16>
    %26 = vector.shape_cast %25 : vector<1x16x128xbf16> to vector<16x128xbf16>
    %c0_27 = arith.constant 0 : index
    %c80 = arith.constant 80 : index
    %c0_28 = arith.constant 0 : index
    %27 = vector.load %arg5[%c0_27, %c80, %c0_28] : memref<4x144x128xbf16, #tpu.memory_space<vmem>>, vector<1x16x128xbf16>
    %28 = vector.shape_cast %27 : vector<1x16x128xbf16> to vector<16x128xbf16>
    %29 = vector.shape_cast %26 : vector<16x128xbf16> to vector<1x16x128xbf16>
    tpu.vector_store %arg5[%c0_27, %c80, %c0_28], %29 {strides = array<i32>} : memref<4x144x128xbf16, #tpu.memory_space<vmem>>, vector<1x16x128xbf16>,
    %c0_29 = arith.constant 0 : index
    %c0_30 = arith.constant 0 : index
    %c5 = arith.constant 5 : index
    %30 = vector.load %arg1[%c0_29, %c0_30, %c5] : memref<1x64x256xbf16, #tpu.memory_space<vmem>>, vector<1x16x128xbf16>
    %31 = vector.shape_cast %30 : vector<1x16x128xbf16> to vector<16x128xbf16>
    %c0_31 = arith.constant 0 : index
    %c96 = arith.constant 96 : index
    %c0_32 = arith.constant 0 : index
    %32 = vector.load %arg5[%c0_31, %c96, %c0_32] : memref<4x144x128xbf16, #tpu.memory_space<vmem>>, vector<1x16x128xbf16>
    %33 = vector.shape_cast %32 : vector<1x16x128xbf16> to vector<16x128xbf16>
    %34 = vector.shape_cast %31 : vector<16x128xbf16> to vector<1x16x128xbf16>
    tpu.vector_store %arg5[%c0_31, %c96, %c0_32], %34 {strides = array<i32>} : memref<4x144x128xbf16, #tpu.memory_space<vmem>>, vector<1x16x128xbf16>,
    %c0_33 = arith.constant 0 : index
    %c16_34 = arith.constant 16 : index
    %c5_35 = arith.constant 5 : index
    %35 = vector.load %arg1[%c0_33, %c16_34, %c5_35] : memref<1x64x256xbf16, #tpu.memory_space<vmem>>, vector<1x16x128xbf16>
    %36 = vector.shape_cast %35 : vector<1x16x128xbf16> to vector<16x128xbf16>
    %c0_36 = arith.constant 0 : index
    %c112 = arith.constant 112 : index
    %c0_37 = arith.constant 0 : index
    %37 = vector.load %arg5[%c0_36, %c112, %c0_37] : memref<4x144x128xbf16, #tpu.memory_space<vmem>>, vector<1x16x128xbf16>
    %38 = vector.shape_cast %37 : vector<1x16x128xbf16> to vector<16x128xbf16>
    %39 = vector.shape_cast %36 : vector<16x128xbf16> to vector<1x16x128xbf16>
    tpu.vector_store %arg5[%c0_36, %c112, %c0_37], %39 {strides = array<i32>} : memref<4x144x128xbf16, #tpu.memory_space<vmem>>, vector<1x16x128xbf16>,
    %c0_38 = arith.constant 0 : index
    %c0_39 = arith.constant 0 : index
    %c6 = arith.constant 6 : index
    %40 = vector.load %arg1[%c0_38, %c0_39, %c6] : memref<1x64x256xbf16, #tpu.memory_space<vmem>>, vector<1x16x128xbf16>
    %41 = vector.shape_cast %40 : vector<1x16x128xbf16> to vector<16x128xbf16>
    %c0_40 = arith.constant 0 : index
    %c128 = arith.constant 128 : index
    %c0_41 = arith.constant 0 : index
    %42 = vector.load %arg5[%c0_40, %c128, %c0_41] : memref<4x144x128xbf16, #tpu.memory_space<vmem>>, vector<1x16x128xbf16>
    %43 = vector.shape_cast %42 : vector<1x16x128xbf16> to vector<16x128xbf16>
    %44 = vector.shape_cast %41 : vector<16x128xbf16> to vector<1x16x128xbf16>
    tpu.vector_store %arg5[%c0_40, %c128, %c0_41], %44 {strides = array<i32>} : memref<4x144x128xbf16, #tpu.memory_space<vmem>>, vector<1x16x128xbf16>,
    %c0_42 = arith.constant 0 : index
    %c16_43 = arith.constant 16 : index
    %c0_44 = arith.constant 0 : index
    %45 = vector.load %arg1[%c0_42, %c16_43, %c0_44] : memref<1x64x256xbf16, #tpu.memory_space<vmem>>, vector<1x16x128xbf16>
    %46 = vector.shape_cast %45 : vector<1x16x128xbf16> to vector<16x128xbf16>
    %c1_45 = arith.constant 1 : index
    %c0_46 = arith.constant 0 : index
    %c0_47 = arith.constant 0 : index
    %47 = vector.load %arg5[%c1_45, %c0_46, %c0_47] : memref<4x144x128xbf16, #tpu.memory_space<vmem>>, vector<1x16x128xbf16>
    %48 = vector.shape_cast %47 : vector<1x16x128xbf16> to vector<16x128xbf16>
    %49 = vector.shape_cast %46 : vector<16x128xbf16> to vector<1x16x128xbf16>
    tpu.vector_store %arg5[%c1_45, %c0_46, %c0_47], %49 {strides = array<i32>} : memref<4x144x128xbf16, #tpu.memory_space<vmem>>, vector<1x16x128xbf16>,
    %c0_48 = arith.constant 0 : index
    %c0_49 = arith.constant 0 : index
    %c1_50 = arith.constant 1 : index
    %50 = vector.load %arg1[%c0_48, %c0_49, %c1_50] : memref<1x64x256xbf16, #tpu.memory_space<vmem>>, vector<1x16x128xbf16>
    %51 = vector.shape_cast %50 : vector<1x16x128xbf16> to vector<16x128xbf16>
    %c1_51 = arith.constant 1 : index
    %c16_52 = arith.constant 16 : index
    %c0_53 = arith.constant 0 : index
    %52 = vector.load %arg5[%c1_51, %c16_52, %c0_53] : memref<4x144x128xbf16, #tpu.memory_space<vmem>>, vector<1x16x128xbf16>
    %53 = vector.shape_cast %52 : vector<1x16x128xbf16> to vector<16x128xbf16>
    %54 = vector.shape_cast %51 : vector<16x128xbf16> to vector<1x16x128xbf16>
    tpu.vector_store %arg5[%c1_51, %c16_52, %c0_53], %54 {strides = array<i32>} : memref<4x144x128xbf16, #tpu.memory_space<vmem>>, vector<1x16x128xbf16>,
    %c0_54 = arith.constant 0 : index
    %c16_55 = arith.constant 16 : index
    %c1_56 = arith.constant 1 : index
    %55 = vector.load %arg1[%c0_54, %c16_55, %c1_56] : memref<1x64x256xbf16, #tpu.memory_space<vmem>>, vector<1x16x128xbf16>
    %56 = vector.shape_cast %55 : vector<1x16x128xbf16> to vector<16x128xbf16>
    %c1_57 = arith.constant 1 : index
    %c32_58 = arith.constant 32 : index
    %c0_59 = arith.constant 0 : index
    %57 = vector.load %arg5[%c1_57, %c32_58, %c0_59] : memref<4x144x128xbf16, #tpu.memory_space<vmem>>, vector<1x16x128xbf16>
    %58 = vector.shape_cast %57 : vector<1x16x128xbf16> to vector<16x128xbf16>
    %59 = vector.shape_cast %56 : vector<16x128xbf16> to vector<1x16x128xbf16>
    tpu.vector_store %arg5[%c1_57, %c32_58, %c0_59], %59 {strides = array<i32>} : memref<4x144x128xbf16, #tpu.memory_space<vmem>>, vector<1x16x128xbf16>,
    %c0_60 = arith.constant 0 : index
    %c48_61 = arith.constant 48 : index
    %c0_62 = arith.constant 0 : index
    %60 = vector.load %arg1[%c0_60, %c48_61, %c0_62] : memref<1x64x256xbf16, #tpu.memory_space<vmem>>, vector<1x16x128xbf16>
    %61 = vector.shape_cast %60 : vector<1x16x128xbf16> to vector<16x128xbf16>
    %c1_63 = arith.constant 1 : index
    %c48_64 = arith.constant 48 : index
    %c0_65 = arith.constant 0 : index
    %62 = vector.load %arg5[%c1_63, %c48_64, %c0_65] : memref<4x144x128xbf16, #tpu.memory_space<vmem>>, vector<1x16x128xbf16>
    %63 = vector.shape_cast %62 : vector<1x16x128xbf16> to vector<16x128xbf16>
    %64 = vector.shape_cast %61 : vector<16x128xbf16> to vector<1x16x128xbf16>
    tpu.vector_store %arg5[%c1_63, %c48_64, %c0_65], %64 {strides = array<i32>} : memref<4x144x128xbf16, #tpu.memory_space<vmem>>, vector<1x16x128xbf16>,
    %c0_66 = arith.constant 0 : index
    %c32_67 = arith.constant 32 : index
    %c1_68 = arith.constant 1 : index
    %65 = vector.load %arg1[%c0_66, %c32_67, %c1_68] : memref<1x64x256xbf16, #tpu.memory_space<vmem>>, vector<1x16x128xbf16>
    %66 = vector.shape_cast %65 : vector<1x16x128xbf16> to vector<16x128xbf16>
    %c1_69 = arith.constant 1 : index
    %c64_70 = arith.constant 64 : index
    %c0_71 = arith.constant 0 : index
    %67 = vector.load %arg5[%c1_69, %c64_70, %c0_71] : memref<4x144x128xbf16, #tpu.memory_space<vmem>>, vector<1x16x128xbf16>
    %68 = vector.shape_cast %67 : vector<1x16x128xbf16> to vector<16x128xbf16>
    %69 = vector.shape_cast %66 : vector<16x128xbf16> to vector<1x16x128xbf16>
    tpu.vector_store %arg5[%c1_69, %c64_70, %c0_71], %69 {strides = array<i32>} : memref<4x144x128xbf16, #tpu.memory_space<vmem>>, vector<1x16x128xbf16>,
    %c0_72 = arith.constant 0 : index
    %c48_73 = arith.constant 48 : index
    %c1_74 = arith.constant 1 : index
    %70 = vector.load %arg1[%c0_72, %c48_73, %c1_74] : memref<1x64x256xbf16, #tpu.memory_space<vmem>>, vector<1x16x128xbf16>
    %71 = vector.shape_cast %70 : vector<1x16x128xbf16> to vector<16x128xbf16>
    %c1_75 = arith.constant 1 : index
    %c80_76 = arith.constant 80 : index
    %c0_77 = arith.constant 0 : index
    %72 = vector.load %arg5[%c1_75, %c80_76, %c0_77] : memref<4x144x128xbf16, #tpu.memory_space<vmem>>, vector<1x16x128xbf16>
    %73 = vector.shape_cast %72 : vector<1x16x128xbf16> to vector<16x128xbf16>
    %74 = vector.shape_cast %71 : vector<16x128xbf16> to vector<1x16x128xbf16>
    tpu.vector_store %arg5[%c1_75, %c80_76, %c0_77], %74 {strides = array<i32>} : memref<4x144x128xbf16, #tpu.memory_space<vmem>>, vector<1x16x128xbf16>,
    %c0_78 = arith.constant 0 : index
    %c16_79 = arith.constant 16 : index
    %c5_80 = arith.constant 5 : index
    %75 = vector.load %arg1[%c0_78, %c16_79, %c5_80] : memref<1x64x256xbf16, #tpu.memory_space<vmem>>, vector<1x16x128xbf16>
    %76 = vector.shape_cast %75 : vector<1x16x128xbf16> to vector<16x128xbf16>
    %c1_81 = arith.constant 1 : index
    %c96_82 = arith.constant 96 : index
    %c0_83 = arith.constant 0 : index
    %77 = vector.load %arg5[%c1_81, %c96_82, %c0_83] : memref<4x144x128xbf16, #tpu.memory_space<vmem>>, vector<1x16x128xbf16>
    %78 = vector.shape_cast %77 : vector<1x16x128xbf16> to vector<16x128xbf16>
    %79 = vector.shape_cast %76 : vector<16x128xbf16> to vector<1x16x128xbf16>
    tpu.vector_store %arg5[%c1_81, %c96_82, %c0_83], %79 {strides = array<i32>} : memref<4x144x128xbf16, #tpu.memory_space<vmem>>, vector<1x16x128xbf16>,
    %c0_84 = arith.constant 0 : index
    %c0_85 = arith.constant 0 : index
    %c6_86 = arith.constant 6 : index
    %80 = vector.load %arg1[%c0_84, %c0_85, %c6_86] : memref<1x64x256xbf16, #tpu.memory_space<vmem>>, vector<1x16x128xbf16>
    %81 = vector.shape_cast %80 : vector<1x16x128xbf16> to vector<16x128xbf16>
    %c1_87 = arith.constant 1 : index
    %c112_88 = arith.constant 112 : index
    %c0_89 = arith.constant 0 : index
    %82 = vector.load %arg5[%c1_87, %c112_88, %c0_89] : memref<4x144x128xbf16, #tpu.memory_space<vmem>>, vector<1x16x128xbf16>
    %83 = vector.shape_cast %82 : vector<1x16x128xbf16> to vector<16x128xbf16>
    %84 = vector.shape_cast %81 : vector<16x128xbf16> to vector<1x16x128xbf16>
    tpu.vector_store %arg5[%c1_87, %c112_88, %c0_89], %84 {strides = array<i32>} : memref<4x144x128xbf16, #tpu.memory_space<vmem>>, vector<1x16x128xbf16>,
    %c0_90 = arith.constant 0 : index
    %c16_91 = arith.constant 16 : index
    %c6_92 = arith.constant 6 : index
    %85 = vector.load %arg1[%c0_90, %c16_91, %c6_92] : memref<1x64x256xbf16, #tpu.memory_space<vmem>>, vector<1x16x128xbf16>
    %86 = vector.shape_cast %85 : vector<1x16x128xbf16> to vector<16x128xbf16>
    %c1_93 = arith.constant 1 : index
    %c128_94 = arith.constant 128 : index
    %c0_95 = arith.constant 0 : index
    %87 = vector.load %arg5[%c1_93, %c128_94, %c0_95] : memref<4x144x128xbf16, #tpu.memory_space<vmem>>, vector<1x16x128xbf16>
    %88 = vector.shape_cast %87 : vector<1x16x128xbf16> to vector<16x128xbf16>
    %89 = vector.shape_cast %86 : vector<16x128xbf16> to vector<1x16x128xbf16>
    tpu.vector_store %arg5[%c1_93, %c128_94, %c0_95], %89 {strides = array<i32>} : memref<4x144x128xbf16, #tpu.memory_space<vmem>>, vector<1x16x128xbf16>,
    %c0_96 = arith.constant 0 : index
    %c32_97 = arith.constant 32 : index
    %c0_98 = arith.constant 0 : index
    %90 = vector.load %arg1[%c0_96, %c32_97, %c0_98] : memref<1x64x256xbf16, #tpu.memory_space<vmem>>, vector<1x16x128xbf16>
    %91 = vector.shape_cast %90 : vector<1x16x128xbf16> to vector<16x128xbf16>
    %c2 = arith.constant 2 : index
    %c0_99 = arith.constant 0 : index
    %c0_100 = arith.constant 0 : index
    %92 = vector.load %arg5[%c2, %c0_99, %c0_100] : memref<4x144x128xbf16, #tpu.memory_space<vmem>>, vector<1x16x128xbf16>
    %93 = vector.shape_cast %92 : vector<1x16x128xbf16> to vector<16x128xbf16>
    %94 = vector.shape_cast %91 : vector<16x128xbf16> to vector<1x16x128xbf16>
    tpu.vector_store %arg5[%c2, %c0_99, %c0_100], %94 {strides = array<i32>} : memref<4x144x128xbf16, #tpu.memory_space<vmem>>, vector<1x16x128xbf16>,
    %c0_101 = arith.constant 0 : index
    %c48_102 = arith.constant 48 : index
    %c0_103 = arith.constant 0 : index
    %95 = vector.load %arg1[%c0_101, %c48_102, %c0_103] : memref<1x64x256xbf16, #tpu.memory_space<vmem>>, vector<1x16x128xbf16>
    %96 = vector.shape_cast %95 : vector<1x16x128xbf16> to vector<16x128xbf16>
    %c2_104 = arith.constant 2 : index
    %c16_105 = arith.constant 16 : index
    %c0_106 = arith.constant 0 : index
    %97 = vector.load %arg5[%c2_104, %c16_105, %c0_106] : memref<4x144x128xbf16, #tpu.memory_space<vmem>>, vector<1x16x128xbf16>
    %98 = vector.shape_cast %97 : vector<1x16x128xbf16> to vector<16x128xbf16>
    %99 = vector.shape_cast %96 : vector<16x128xbf16> to vector<1x16x128xbf16>
    tpu.vector_store %arg5[%c2_104, %c16_105, %c0_106], %99 {strides = array<i32>} : memref<4x144x128xbf16, #tpu.memory_space<vmem>>, vector<1x16x128xbf16>,
    %c0_107 = arith.constant 0 : index
    %c32_108 = arith.constant 32 : index
    %c1_109 = arith.constant 1 : index
    %100 = vector.load %arg1[%c0_107, %c32_108, %c1_109] : memref<1x64x256xbf16, #tpu.memory_space<vmem>>, vector<1x16x128xbf16>
    %101 = vector.shape_cast %100 : vector<1x16x128xbf16> to vector<16x128xbf16>
    %c2_110 = arith.constant 2 : index
    %c32_111 = arith.constant 32 : index
    %c0_112 = arith.constant 0 : index
    %102 = vector.load %arg5[%c2_110, %c32_111, %c0_112] : memref<4x144x128xbf16, #tpu.memory_space<vmem>>, vector<1x16x128xbf16>
    %103 = vector.shape_cast %102 : vector<1x16x128xbf16> to vector<16x128xbf16>
    %104 = vector.shape_cast %101 : vector<16x128xbf16> to vector<1x16x128xbf16>
    tpu.vector_store %arg5[%c2_110, %c32_111, %c0_112], %104 {strides = array<i32>} : memref<4x144x128xbf16, #tpu.memory_space<vmem>>, vector<1x16x128xbf16>,
    %c0_113 = arith.constant 0 : index
    %c0_114 = arith.constant 0 : index
    %c5_115 = arith.constant 5 : index
    %105 = vector.load %arg1[%c0_113, %c0_114, %c5_115] : memref<1x64x256xbf16, #tpu.memory_space<vmem>>, vector<1x16x128xbf16>
    %106 = vector.shape_cast %105 : vector<1x16x128xbf16> to vector<16x128xbf16>
    %c2_116 = arith.constant 2 : index
    %c48_117 = arith.constant 48 : index
    %c0_118 = arith.constant 0 : index
    %107 = vector.load %arg5[%c2_116, %c48_117, %c0_118] : memref<4x144x128xbf16, #tpu.memory_space<vmem>>, vector<1x16x128xbf16>
    %108 = vector.shape_cast %107 : vector<1x16x128xbf16> to vector<16x128xbf16>
    %109 = vector.shape_cast %106 : vector<16x128xbf16> to vector<1x16x128xbf16>
    tpu.vector_store %arg5[%c2_116, %c48_117, %c0_118], %109 {strides = array<i32>} : memref<4x144x128xbf16, #tpu.memory_space<vmem>>, vector<1x16x128xbf16>,
    %c0_119 = arith.constant 0 : index
    %c16_120 = arith.constant 16 : index
    %c5_121 = arith.constant 5 : index
    %110 = vector.load %arg1[%c0_119, %c16_120, %c5_121] : memref<1x64x256xbf16, #tpu.memory_space<vmem>>, vector<1x16x128xbf16>
    %111 = vector.shape_cast %110 : vector<1x16x128xbf16> to vector<16x128xbf16>
    %c2_122 = arith.constant 2 : index
    %c64_123 = arith.constant 64 : index
    %c0_124 = arith.constant 0 : index
    %112 = vector.load %arg5[%c2_122, %c64_123, %c0_124] : memref<4x144x128xbf16, #tpu.memory_space<vmem>>, vector<1x16x128xbf16>
    %113 = vector.shape_cast %112 : vector<1x16x128xbf16> to vector<16x128xbf16>
    %114 = vector.shape_cast %111 : vector<16x128xbf16> to vector<1x16x128xbf16>
    tpu.vector_store %arg5[%c2_122, %c64_123, %c0_124], %114 {strides = array<i32>} : memref<4x144x128xbf16, #tpu.memory_space<vmem>>, vector<1x16x128xbf16>,
    %c0_125 = arith.constant 0 : index
    %c0_126 = arith.constant 0 : index
    %c6_127 = arith.constant 6 : index
    %115 = vector.load %arg1[%c0_125, %c0_126, %c6_127] : memref<1x64x256xbf16, #tpu.memory_space<vmem>>, vector<1x16x128xbf16>
    %116 = vector.shape_cast %115 : vector<1x16x128xbf16> to vector<16x128xbf16>
    %c2_128 = arith.constant 2 : index
    %c80_129 = arith.constant 80 : index
    %c0_130 = arith.constant 0 : index
    %117 = vector.load %arg5[%c2_128, %c80_129, %c0_130] : memref<4x144x128xbf16, #tpu.memory_space<vmem>>, vector<1x16x128xbf16>
    %118 = vector.shape_cast %117 : vector<1x16x128xbf16> to vector<16x128xbf16>
    %119 = vector.shape_cast %116 : vector<16x128xbf16> to vector<1x16x128xbf16>
    tpu.vector_store %arg5[%c2_128, %c80_129, %c0_130], %119 {strides = array<i32>} : memref<4x144x128xbf16, #tpu.memory_space<vmem>>, vector<1x16x128xbf16>,
    %c0_131 = arith.constant 0 : index
    %c32_132 = arith.constant 32 : index
    %c5_133 = arith.constant 5 : index
    %120 = vector.load %arg1[%c0_131, %c32_132, %c5_133] : memref<1x64x256xbf16, #tpu.memory_space<vmem>>, vector<1x16x128xbf16>
    %121 = vector.shape_cast %120 : vector<1x16x128xbf16> to vector<16x128xbf16>
    %c2_134 = arith.constant 2 : index
    %c96_135 = arith.constant 96 : index
    %c0_136 = arith.constant 0 : index
    %122 = vector.load %arg5[%c2_134, %c96_135, %c0_136] : memref<4x144x128xbf16, #tpu.memory_space<vmem>>, vector<1x16x128xbf16>
    %123 = vector.shape_cast %122 : vector<1x16x128xbf16> to vector<16x128xbf16>
    %124 = vector.shape_cast %121 : vector<16x128xbf16> to vector<1x16x128xbf16>
    tpu.vector_store %arg5[%c2_134, %c96_135, %c0_136], %124 {strides = array<i32>} : memref<4x144x128xbf16, #tpu.memory_space<vmem>>, vector<1x16x128xbf16>,
    %c0_137 = arith.constant 0 : index
    %c48_138 = arith.constant 48 : index
    %c5_139 = arith.constant 5 : index
    %125 = vector.load %arg1[%c0_137, %c48_138, %c5_139] : memref<1x64x256xbf16, #tpu.memory_space<vmem>>, vector<1x16x128xbf16>
    %126 = vector.shape_cast %125 : vector<1x16x128xbf16> to vector<16x128xbf16>
    %c2_140 = arith.constant 2 : index
    %c112_141 = arith.constant 112 : index
    %c0_142 = arith.constant 0 : index
    %127 = vector.load %arg5[%c2_140, %c112_141, %c0_142] : memref<4x144x128xbf16, #tpu.memory_space<vmem>>, vector<1x16x128xbf16>
    %128 = vector.shape_cast %127 : vector<1x16x128xbf16> to vector<16x128xbf16>
    %129 = vector.shape_cast %126 : vector<16x128xbf16> to vector<1x16x128xbf16>
    tpu.vector_store %arg5[%c2_140, %c112_141, %c0_142], %129 {strides = array<i32>} : memref<4x144x128xbf16, #tpu.memory_space<vmem>>, vector<1x16x128xbf16>,
    %c0_143 = arith.constant 0 : index
    %c32_144 = arith.constant 32 : index
    %c6_145 = arith.constant 6 : index
    %130 = vector.load %arg1[%c0_143, %c32_144, %c6_145] : memref<1x64x256xbf16, #tpu.memory_space<vmem>>, vector<1x16x128xbf16>
    %131 = vector.shape_cast %130 : vector<1x16x128xbf16> to vector<16x128xbf16>
    %c2_146 = arith.constant 2 : index
    %c128_147 = arith.constant 128 : index
    %c0_148 = arith.constant 0 : index
    %132 = vector.load %arg5[%c2_146, %c128_147, %c0_148] : memref<4x144x128xbf16, #tpu.memory_space<vmem>>, vector<1x16x128xbf16>
    %133 = vector.shape_cast %132 : vector<1x16x128xbf16> to vector<16x128xbf16>
    %134 = vector.shape_cast %131 : vector<16x128xbf16> to vector<1x16x128xbf16>
    tpu.vector_store %arg5[%c2_146, %c128_147, %c0_148], %134 {strides = array<i32>} : memref<4x144x128xbf16, #tpu.memory_space<vmem>>, vector<1x16x128xbf16>,
    %c0_149 = arith.constant 0 : index
    %c48_150 = arith.constant 48 : index
    %c0_151 = arith.constant 0 : index
    %135 = vector.load %arg1[%c0_149, %c48_150, %c0_151] : memref<1x64x256xbf16, #tpu.memory_space<vmem>>, vector<1x16x128xbf16>
    %136 = vector.shape_cast %135 : vector<1x16x128xbf16> to vector<16x128xbf16>
    %c3 = arith.constant 3 : index
    %c0_152 = arith.constant 0 : index
    %c0_153 = arith.constant 0 : index
    %137 = vector.load %arg5[%c3, %c0_152, %c0_153] : memref<4x144x128xbf16, #tpu.memory_space<vmem>>, vector<1x16x128xbf16>
    %138 = vector.shape_cast %137 : vector<1x16x128xbf16> to vector<16x128xbf16>
    %139 = vector.shape_cast %136 : vector<16x128xbf16> to vector<1x16x128xbf16>
    tpu.vector_store %arg5[%c3, %c0_152, %c0_153], %139 {strides = array<i32>} : memref<4x144x128xbf16, #tpu.memory_space<vmem>>, vector<1x16x128xbf16>,
    %c0_154 = arith.constant 0 : index
    %c32_155 = arith.constant 32 : index
    %c1_156 = arith.constant 1 : index
    %140 = vector.load %arg1[%c0_154, %c32_155, %c1_156] : memref<1x64x256xbf16, #tpu.memory_space<vmem>>, vector<1x16x128xbf16>
    %141 = vector.shape_cast %140 : vector<1x16x128xbf16> to vector<16x128xbf16>
    %c3_157 = arith.constant 3 : index
    %c16_158 = arith.constant 16 : index
    %c0_159 = arith.constant 0 : index
    %142 = vector.load %arg5[%c3_157, %c16_158, %c0_159] : memref<4x144x128xbf16, #tpu.memory_space<vmem>>, vector<1x16x128xbf16>
    %143 = vector.shape_cast %142 : vector<1x16x128xbf16> to vector<16x128xbf16>
    %144 = vector.shape_cast %141 : vector<16x128xbf16> to vector<1x16x128xbf16>
    tpu.vector_store %arg5[%c3_157, %c16_158, %c0_159], %144 {strides = array<i32>} : memref<4x144x128xbf16, #tpu.memory_space<vmem>>, vector<1x16x128xbf16>,
    %c0_160 = arith.constant 0 : index
    %c48_161 = arith.constant 48 : index
    %c1_162 = arith.constant 1 : index
    %145 = vector.load %arg1[%c0_160, %c48_161, %c1_162] : memref<1x64x256xbf16, #tpu.memory_space<vmem>>, vector<1x16x128xbf16>
    %146 = vector.shape_cast %145 : vector<1x16x128xbf16> to vector<16x128xbf16>
    %c3_163 = arith.constant 3 : index
    %c32_164 = arith.constant 32 : index
    %c0_165 = arith.constant 0 : index
    %147 = vector.load %arg5[%c3_163, %c32_164, %c0_165] : memref<4x144x128xbf16, #tpu.memory_space<vmem>>, vector<1x16x128xbf16>
    %148 = vector.shape_cast %147 : vector<1x16x128xbf16> to vector<16x128xbf16>
    %149 = vector.shape_cast %146 : vector<16x128xbf16> to vector<1x16x128xbf16>
    tpu.vector_store %arg5[%c3_163, %c32_164, %c0_165], %149 {strides = array<i32>} : memref<4x144x128xbf16, #tpu.memory_space<vmem>>, vector<1x16x128xbf16>,
    %c0_166 = arith.constant 0 : index
    %c16_167 = arith.constant 16 : index
    %c5_168 = arith.constant 5 : index
    %150 = vector.load %arg1[%c0_166, %c16_167, %c5_168] : memref<1x64x256xbf16, #tpu.memory_space<vmem>>, vector<1x16x128xbf16>
    %151 = vector.shape_cast %150 : vector<1x16x128xbf16> to vector<16x128xbf16>
    %c3_169 = arith.constant 3 : index
    %c48_170 = arith.constant 48 : index
    %c0_171 = arith.constant 0 : index
    %152 = vector.load %arg5[%c3_169, %c48_170, %c0_171] : memref<4x144x128xbf16, #tpu.memory_space<vmem>>, vector<1x16x128xbf16>
    %153 = vector.shape_cast %152 : vector<1x16x128xbf16> to vector<16x128xbf16>
    %154 = vector.shape_cast %151 : vector<16x128xbf16> to vector<1x16x128xbf16>
    tpu.vector_store %arg5[%c3_169, %c48_170, %c0_171], %154 {strides = array<i32>} : memref<4x144x128xbf16, #tpu.memory_space<vmem>>, vector<1x16x128xbf16>,
    %c0_172 = arith.constant 0 : index
    %c0_173 = arith.constant 0 : index
    %c6_174 = arith.constant 6 : index
    %155 = vector.load %arg1[%c0_172, %c0_173, %c6_174] : memref<1x64x256xbf16, #tpu.memory_space<vmem>>, vector<1x16x128xbf16>
    %156 = vector.shape_cast %155 : vector<1x16x128xbf16> to vector<16x128xbf16>
    %c3_175 = arith.constant 3 : index
    %c64_176 = arith.constant 64 : index
    %c0_177 = arith.constant 0 : index
    %157 = vector.load %arg5[%c3_175, %c64_176, %c0_177] : memref<4x144x128xbf16, #tpu.memory_space<vmem>>, vector<1x16x128xbf16>
    %158 = vector.shape_cast %157 : vector<1x16x128xbf16> to vector<16x128xbf16>
    %159 = vector.shape_cast %156 : vector<16x128xbf16> to vector<1x16x128xbf16>
    tpu.vector_store %arg5[%c3_175, %c64_176, %c0_177], %159 {strides = array<i32>} : memref<4x144x128xbf16, #tpu.memory_space<vmem>>, vector<1x16x128xbf16>,
    %c0_178 = arith.constant 0 : index
    %c16_179 = arith.constant 16 : index
    %c6_180 = arith.constant 6 : index
    %160 = vector.load %arg1[%c0_178, %c16_179, %c6_180] : memref<1x64x256xbf16, #tpu.memory_space<vmem>>, vector<1x16x128xbf16>
    %161 = vector.shape_cast %160 : vector<1x16x128xbf16> to vector<16x128xbf16>
    %c3_181 = arith.constant 3 : index
    %c80_182 = arith.constant 80 : index
    %c0_183 = arith.constant 0 : index
    %162 = vector.load %arg5[%c3_181, %c80_182, %c0_183] : memref<4x144x128xbf16, #tpu.memory_space<vmem>>, vector<1x16x128xbf16>
    %163 = vector.shape_cast %162 : vector<1x16x128xbf16> to vector<16x128xbf16>
    %164 = vector.shape_cast %161 : vector<16x128xbf16> to vector<1x16x128xbf16>
    tpu.vector_store %arg5[%c3_181, %c80_182, %c0_183], %164 {strides = array<i32>} : memref<4x144x128xbf16, #tpu.memory_space<vmem>>, vector<1x16x128xbf16>,
    %c0_184 = arith.constant 0 : index
    %c48_185 = arith.constant 48 : index
    %c5_186 = arith.constant 5 : index
    %165 = vector.load %arg1[%c0_184, %c48_185, %c5_186] : memref<1x64x256xbf16, #tpu.memory_space<vmem>>, vector<1x16x128xbf16>
    %166 = vector.shape_cast %165 : vector<1x16x128xbf16> to vector<16x128xbf16>
    %c3_187 = arith.constant 3 : index
    %c96_188 = arith.constant 96 : index
    %c0_189 = arith.constant 0 : index
    %167 = vector.load %arg5[%c3_187, %c96_188, %c0_189] : memref<4x144x128xbf16, #tpu.memory_space<vmem>>, vector<1x16x128xbf16>
    %168 = vector.shape_cast %167 : vector<1x16x128xbf16> to vector<16x128xbf16>
    %169 = vector.shape_cast %166 : vector<16x128xbf16> to vector<1x16x128xbf16>
    tpu.vector_store %arg5[%c3_187, %c96_188, %c0_189], %169 {strides = array<i32>} : memref<4x144x128xbf16, #tpu.memory_space<vmem>>, vector<1x16x128xbf16>,
    %c0_190 = arith.constant 0 : index
    %c32_191 = arith.constant 32 : index
    %c6_192 = arith.constant 6 : index
    %170 = vector.load %arg1[%c0_190, %c32_191, %c6_192] : memref<1x64x256xbf16, #tpu.memory_space<vmem>>, vector<1x16x128xbf16>
    %171 = vector.shape_cast %170 : vector<1x16x128xbf16> to vector<16x128xbf16>
    %c3_193 = arith.constant 3 : index
    %c112_194 = arith.constant 112 : index
    %c0_195 = arith.constant 0 : index
    %172 = vector.load %arg5[%c3_193, %c112_194, %c0_195] : memref<4x144x128xbf16, #tpu.memory_space<vmem>>, vector<1x16x128xbf16>
    %173 = vector.shape_cast %172 : vector<1x16x128xbf16> to vector<16x128xbf16>
    %174 = vector.shape_cast %171 : vector<16x128xbf16> to vector<1x16x128xbf16>
    tpu.vector_store %arg5[%c3_193, %c112_194, %c0_195], %174 {strides = array<i32>} : memref<4x144x128xbf16, #tpu.memory_space<vmem>>, vector<1x16x128xbf16>,
    %c0_196 = arith.constant 0 : index
    %c48_197 = arith.constant 48 : index
    %c6_198 = arith.constant 6 : index
    %175 = vector.load %arg1[%c0_196, %c48_197, %c6_198] : memref<1x64x256xbf16, #tpu.memory_space<vmem>>, vector<1x16x128xbf16>
    %176 = vector.shape_cast %175 : vector<1x16x128xbf16> to vector<16x128xbf16>
    %c3_199 = arith.constant 3 : index
    %c128_200 = arith.constant 128 : index
    %c0_201 = arith.constant 0 : index
    %177 = vector.load %arg5[%c3_199, %c128_200, %c0_201] : memref<4x144x128xbf16, #tpu.memory_space<vmem>>, vector<1x16x128xbf16>
    %178 = vector.shape_cast %177 : vector<1x16x128xbf16> to vector<16x128xbf16>
    %179 = vector.shape_cast %176 : vector<16x128xbf16> to vector<1x16x128xbf16>
    tpu.vector_store %arg5[%c3_199, %c128_200, %c0_201], %179 {strides = array<i32>} : memref<4x144x128xbf16, #tpu.memory_space<vmem>>, vector<1x16x128xbf16>,
    %c0_202 = arith.constant 0 : index
    %c0_203 = arith.constant 0 : index
    %180 = vector.load %arg2[%c0_202, %c0_203] : memref<32x144xbf16, #tpu.memory_space<vmem>>, vector<32x144xbf16>
    %c0_204 = arith.constant 0 : index
    %c0_205 = arith.constant 0 : index
    %c0_206 = arith.constant 0 : index
    %181 = vector.load %arg5[%c0_204, %c0_205, %c0_206] : memref<4x144x128xbf16, #tpu.memory_space<vmem>>, vector<1x144x128xbf16>
    %182 = vector.shape_cast %181 : vector<1x144x128xbf16> to vector<144x128xbf16>
    %cst = arith.constant dense<0.000000e+00> : vector<32x128xf32>
    %183 = tpu.matmul %180, %182, %cst {dimension_numbers = #tpu.dot_dimension_numbers<[1], [0], [0], [1], [0, 0, 1, 1], [], []>} : vector<32x144xbf16>, vector<144x128xbf16>, vector<32x128xf32> -> vector<32x128xf32>
    %c1_207 = arith.constant 1 : index
    %c0_208 = arith.constant 0 : index
    %c0_209 = arith.constant 0 : index
    %184 = vector.load %arg5[%c1_207, %c0_208, %c0_209] : memref<4x144x128xbf16, #tpu.memory_space<vmem>>, vector<1x144x128xbf16>
    %185 = vector.shape_cast %184 : vector<1x144x128xbf16> to vector<144x128xbf16>
    %cst_210 = arith.constant dense<0.000000e+00> : vector<32x128xf32>
    %186 = tpu.matmul %180, %185, %cst_210 {dimension_numbers = #tpu.dot_dimension_numbers<[1], [0], [0], [1], [0, 0, 1, 1], [], []>} : vector<32x144xbf16>, vector<144x128xbf16>, vector<32x128xf32> -> vector<32x128xf32>
    %187 = arith.maximumf %183, %186 : vector<32x128xf32>
    %c2_211 = arith.constant 2 : index
    %c0_212 = arith.constant 0 : index
    %c0_213 = arith.constant 0 : index
    %188 = vector.load %arg5[%c2_211, %c0_212, %c0_213] : memref<4x144x128xbf16, #tpu.memory_space<vmem>>, vector<1x144x128xbf16>
    %189 = vector.shape_cast %188 : vector<1x144x128xbf16> to vector<144x128xbf16>
    %cst_214 = arith.constant dense<0.000000e+00> : vector<32x128xf32>
    %190 = tpu.matmul %180, %189, %cst_214 {dimension_numbers = #tpu.dot_dimension_numbers<[1], [0], [0], [1], [0, 0, 1, 1], [], []>} : vector<32x144xbf16>, vector<144x128xbf16>, vector<32x128xf32> -> vector<32x128xf32>
    %191 = arith.maximumf %187, %190 : vector<32x128xf32>
    %c3_215 = arith.constant 3 : index
    %c0_216 = arith.constant 0 : index
    %c0_217 = arith.constant 0 : index
    %192 = vector.load %arg5[%c3_215, %c0_216, %c0_217] : memref<4x144x128xbf16, #tpu.memory_space<vmem>>, vector<1x144x128xbf16>
    %193 = vector.shape_cast %192 : vector<1x144x128xbf16> to vector<144x128xbf16>
    %cst_218 = arith.constant dense<0.000000e+00> : vector<32x128xf32>
    %194 = tpu.matmul %180, %193, %cst_218 {dimension_numbers = #tpu.dot_dimension_numbers<[1], [0], [0], [1], [0, 0, 1, 1], [], []>} : vector<32x144xbf16>, vector<144x128xbf16>, vector<32x128xf32> -> vector<32x128xf32>
    %195 = arith.maximumf %191, %194 : vector<32x128xf32>
    %c0_219 = arith.constant 0 : index
    %c0_220 = arith.constant 0 : index
    %196 = vector.load %arg3[%c0_219, %c0_220] : memref<32x1xf32, #tpu.memory_space<vmem>>, vector<32x1xf32>
    %197 = vector.broadcast %196 : vector<32x1xf32> to vector<32x128xf32>
    %198 = arith.addf %195, %197 : vector<32x128xf32>
    %cst_221 = arith.constant 0.000000e+00 : f32
    %199 = vector.broadcast %cst_221 : f32 to vector<32x128xf32>
    %200 = arith.maximumf %198, %199 : vector<32x128xf32>
    %201 = arith.truncf %200 : vector<32x128xf32> to vector<32x128xbf16>
    %c0_222 = arith.constant 0 : index
    %c0_223 = arith.constant 0 : index
    %c0_224 = arith.constant 0 : index
    %202 = vector.load %arg4[%c0_222, %c0_223, %c0_224] : memref<1x32x128xbf16, #tpu.memory_space<vmem>>, vector<1x32x128xbf16>
    %203 = vector.shape_cast %202 : vector<1x32x128xbf16> to vector<32x128xbf16>
    %204 = vector.shape_cast %201 : vector<32x128xbf16> to vector<1x32x128xbf16>
    tpu.vector_store %arg4[%c0_222, %c0_223, %c0_224], %204 {strides = array<i32>} : memref<1x32x128xbf16, #tpu.memory_space<vmem>>, vector<1x32x128xbf16>,
    return
  }
  func.func @transform_0(%arg0: i32) -> (i32, i32, i32) {
    %c0_i32 = arith.constant 0 : i32
    %c0_i32_0 = arith.constant 0 : i32
    %c0_i32_1 = arith.constant 0 : i32
    return %arg0, %c0_i32, %c0_i32_0 : i32, i32, i32
  }
  func.func @transform_1(%arg0: i32) -> (i32, i32) {
    %c0_i32 = arith.constant 0 : i32
    %c0_i32_0 = arith.constant 0 : i32
    %c0_i32_1 = arith.constant 0 : i32
    return %c0_i32, %c0_i32_0 : i32, i32
  }
  func.func @transform_2(%arg0: i32) -> (i32, i32) {
    %c0_i32 = arith.constant 0 : i32
    %c0_i32_0 = arith.constant 0 : i32
    %c0_i32_1 = arith.constant 0 : i32
    return %c0_i32, %c0_i32_0 : i32, i32
  }
  func.func @transform_3(%arg0: i32) -> (i32, i32, i32) {
    %c0_i32 = arith.constant 0 : i32
    %c0_i32_0 = arith.constant 0 : i32
    %c0_i32_1 = arith.constant 0 : i32
    return %arg0, %c0_i32, %c0_i32_0 : i32, i32, i32
  }
}

module attributes {stable_mosaic.version = 11 : i64} {
  func.func @_fc_head_kernel(%arg0: i32, %arg1: memref<8x288xbf16, #tpu.memory_space<vmem>>, %arg2: memref<288x32xbf16, #tpu.memory_space<vmem>>, %arg3: memref<1x32xf32, #tpu.memory_space<vmem>>, %arg4: memref<32x10xbf16, #tpu.memory_space<vmem>>, %arg5: memref<1x10xf32, #tpu.memory_space<vmem>>, %arg6: memref<8x10xf32, #tpu.memory_space<vmem>>) attributes {dimension_semantics = [#tpu.dimension_semantics<arbitrary>], iteration_bounds = array<i64: 1>, scalar_prefetch = 0 : i64, scratch_operands = 0 : i64, tpu.core_type = #tpu.core_type<tc>, window_params = [{pipeline_mode = #tpu.pipeline_mode<synchronous>, transform_indices = @transform_0, window_bounds = array<i64: 8, 288>}, {pipeline_mode = #tpu.pipeline_mode<synchronous>, transform_indices = @transform_1, window_bounds = array<i64: 288, 32>}, {pipeline_mode = #tpu.pipeline_mode<synchronous>, transform_indices = @transform_2, window_bounds = array<i64: 1, 32>}, {pipeline_mode = #tpu.pipeline_mode<synchronous>, transform_indices = @transform_3, window_bounds = array<i64: 32, 10>}, {pipeline_mode = #tpu.pipeline_mode<synchronous>, transform_indices = @transform_4, window_bounds = array<i64: 1, 10>}, {pipeline_mode = #tpu.pipeline_mode<synchronous>, transform_indices = @transform_5, window_bounds = array<i64: 8, 10>}]} {
    %c0 = arith.constant 0 : index
    %c0_0 = arith.constant 0 : index
    %0 = vector.load %arg1[%c0, %c0_0] : memref<8x288xbf16, #tpu.memory_space<vmem>>, vector<8x288xbf16>
    %c0_1 = arith.constant 0 : index
    %c0_2 = arith.constant 0 : index
    %1 = vector.load %arg2[%c0_1, %c0_2] : memref<288x32xbf16, #tpu.memory_space<vmem>>, vector<288x32xbf16>
    %cst = arith.constant dense<0.000000e+00> : vector<8x32xf32>
    %2 = tpu.matmul %0, %1, %cst {dimension_numbers = #tpu.dot_dimension_numbers<[1], [0], [0], [1], [0, 0, 1, 1], [], []>} : vector<8x288xbf16>, vector<288x32xbf16>, vector<8x32xf32> -> vector<8x32xf32>
    %c0_3 = arith.constant 0 : index
    %c0_4 = arith.constant 0 : index
    %3 = vector.load %arg3[%c0_3, %c0_4] : memref<1x32xf32, #tpu.memory_space<vmem>>, vector<1x32xf32>
    %4 = vector.broadcast %3 : vector<1x32xf32> to vector<8x32xf32>
    %5 = arith.addf %2, %4 : vector<8x32xf32>
    %cst_5 = arith.constant 0.000000e+00 : f32
    %6 = vector.broadcast %cst_5 : f32 to vector<8x32xf32>
    %7 = arith.maximumf %5, %6 : vector<8x32xf32>
    %8 = arith.truncf %7 : vector<8x32xf32> to vector<8x32xbf16>
    %c0_6 = arith.constant 0 : index
    %c0_7 = arith.constant 0 : index
    %9 = vector.load %arg4[%c0_6, %c0_7] : memref<32x10xbf16, #tpu.memory_space<vmem>>, vector<32x10xbf16>
    %cst_8 = arith.constant dense<0.000000e+00> : vector<8x10xf32>
    %10 = tpu.matmul %8, %9, %cst_8 {dimension_numbers = #tpu.dot_dimension_numbers<[1], [0], [0], [1], [0, 0, 1, 1], [], []>} : vector<8x32xbf16>, vector<32x10xbf16>, vector<8x10xf32> -> vector<8x10xf32>
    %c0_9 = arith.constant 0 : index
    %c0_10 = arith.constant 0 : index
    %11 = vector.load %arg5[%c0_9, %c0_10] : memref<1x10xf32, #tpu.memory_space<vmem>>, vector<1x10xf32>
    %12 = vector.broadcast %11 : vector<1x10xf32> to vector<8x10xf32>
    %13 = arith.addf %10, %12 : vector<8x10xf32>
    %c0_11 = arith.constant 0 : index
    %c0_12 = arith.constant 0 : index
    %14 = vector.load %arg6[%c0_11, %c0_12] : memref<8x10xf32, #tpu.memory_space<vmem>>, vector<8x10xf32>
    tpu.vector_store %arg6[%c0_11, %c0_12], %13 {strides = array<i32>} : memref<8x10xf32, #tpu.memory_space<vmem>>, vector<8x10xf32>,
    return
  }
  func.func @transform_0(%arg0: i32) -> (i32, i32) {
    %c0_i32 = arith.constant 0 : i32
    %c0_i32_0 = arith.constant 0 : i32
    %c0_i32_1 = arith.constant 0 : i32
    return %c0_i32, %c0_i32_0 : i32, i32
  }
  func.func @transform_1(%arg0: i32) -> (i32, i32) {
    %c0_i32 = arith.constant 0 : i32
    %c0_i32_0 = arith.constant 0 : i32
    %c0_i32_1 = arith.constant 0 : i32
    return %c0_i32, %c0_i32_0 : i32, i32
  }
  func.func @transform_2(%arg0: i32) -> (i32, i32) {
    %c0_i32 = arith.constant 0 : i32
    %c0_i32_0 = arith.constant 0 : i32
    %c0_i32_1 = arith.constant 0 : i32
    return %c0_i32, %c0_i32_0 : i32, i32
  }
  func.func @transform_3(%arg0: i32) -> (i32, i32) {
    %c0_i32 = arith.constant 0 : i32
    %c0_i32_0 = arith.constant 0 : i32
    %c0_i32_1 = arith.constant 0 : i32
    return %c0_i32, %c0_i32_0 : i32, i32
  }
  func.func @transform_4(%arg0: i32) -> (i32, i32) {
    %c0_i32 = arith.constant 0 : i32
    %c0_i32_0 = arith.constant 0 : i32
    %c0_i32_1 = arith.constant 0 : i32
    return %c0_i32, %c0_i32_0 : i32, i32
  }
  func.func @transform_5(%arg0: i32) -> (i32, i32) {
    %c0_i32 = arith.constant 0 : i32
    %c0_i32_0 = arith.constant 0 : i32
    %c0_i32_1 = arith.constant 0 : i32
    return %c0_i32, %c0_i32_0 : i32, i32
  }
}

</mosaic_0001>

<bundles_post_ra>
// kernel: cnn_forward.4
= control target key start
LH: loop header
LB: loop body
LE: loop exit
PB: predicated region body
PF: predicated region fallthrough
CT: control target
= control target key end

     0   :  { %s4712_s12 = smov 0   ;;  %s6566_s0 = inlined_call_operand.vmem [shape: bf16[2,4,1152], index: 0, kind: input, shape index: {}]   ;;  %s6567_s1 = inlined_call_operand.vmem [shape: bf16[8,9], index: 1, kind: input, shape index: {}]   ;;  %s6568_s2 = inlined_call_operand.vmem [shape: f32[8,1], index: 2, kind: input, shape index: {}]   ;;  %s6569_s3 = inlined_call_operand.vmem [shape: bf16[2,8,1024], index: 3, kind: output, shape index: {}]  }
   0x1 LB: > { %s4372_s13 = sadd.s32 4294967295, %s4684_s12   ;;  %p4376_p0 = scmp.ge.s32.totalorder %s4684_s12, 1  ;;  %s4684_s12 = sphi %s4712_s12, %s13_s12  }
   0x2   : > { %p137_p1 = scmp.lt.s32.totalorder %s4684_s12, 3 }
   0x4   : > { %p138_p2 = pnand %p4376_p0, %p137_p1 }
   0x5   : > { %p161_p3 = scmp.lt.s32.totalorder (!%p138_p2), %s4372_s13, 1  ;;  %v180_v0 = vlaneseq (!%p138_p2)  ;;  %v4686_v1 = vmov (!%p138_p2), 1983009808   ;;  %s4687_s18 = smov (!%p138_p2), 127   ;;  %vm501_vm0 = vcmask (!%p138_p2), 1042434   ;;  %vm504_vm3 = vcmask (!%p138_p2), 1046534  }
   0x6   : > { %141 = sbr.rel (%p138_p2) target bundleno = 623 (0x26f), region = 32  ;;  %v178_v2 = vunpack.c.l.s4 (!%p138_p2), %v4686_v1  ;;  %s4688_s19 = smov (!%p138_p2), 112   ;;  %vm502_vm1 = vsmask.f32 (!%p138_p2), 2304  ;;  %vm505_vm4 = vsmask.f32 (!%p138_p2), 6400 }
   0x7   : > { %v181_v3 = vshrl.u32 (!%p138_p2), %v180_v0, 7  ;;  %s4689_s20 = smov (!%p138_p2), 111   ;;  %vm503_vm2 = vmand (!%p138_p2), %vm501_vm0, %vm502_vm1  ;;  %vm610_vm5 = vsmask.f32 (!%p138_p2), 7946  ;;  %vm612_vm7 = vsmask.f32 (!%p138_p2), 7962 }
   0x8   : > { %v179_v4 = vunpack.c.0.s8 (!%p138_p2), %v178_v2  ;;  %vm506_vm6 = vmand (!%p138_p2), %vm504_vm3, %vm505_vm4  ;;  %vm210_vm12 = vcmask (!%p138_p2), 1040384   ;;  %vm211_vm13 = vsmask.f32 (!%p138_p2), 256  ;;  %vm213_vm14 = vcmask (!%p138_p2), 1044484  }
   0x9   : > { %vm4839_vm8 = vmor (!%p138_p2), %vm506_vm6, %vm503_vm2  ;;  %vm214_vm15 = vsmask.f32 (!%p138_p2), 4352  ;;  %vm269_vm4 = vsmask.f32 (!%p138_p2), 7954 }
   0xa   : > { %v4723_v5 = vsub.s32 (!%p138_p2), %v179_v4, %v181_v3  ;;  %vm611_vm9 = vmand (!%p138_p2), %vm501_vm0, %vm610_vm5 }
   0xb   : > { %vm613_vm10 = vmand (!%p138_p2), %vm504_vm3, %vm612_vm7  ;;  %vm267_vm3 = vsmask.f32 (!%p138_p2), 7938 }
   0xc   : > { %vm4854_vm11 = vmor (!%p138_p2), %vm613_vm10, %vm611_vm9  ;;  %vm361_vm9 = vcmask (!%p138_p2), 1041409   ;;  %vm362_vm10 = vsmask.f32 (!%p138_p2), 1280 }
   0xd   : > { %s6713_s13 = smov (!%p161_p3, %s4372_s13), 1  ;;  %vm4887_vm0 = vmand %vm210_vm12, %vm211_vm13  ;;  %vm365_vm13 = vsmask.f32 5376 }
   0xe   : > { %s4503_s14 = smul.u32 18, %s6713_s13  ;;  %vm215_vm1 = vmand %vm213_vm14, %vm214_vm15  ;;  %vm704_vm15 = vsmask.f32 3328  ;;  %s4498_s27 = sshll.u32 %s6713_s13, 5 }
   0xf   : > { %vm4908_vm2 = vmor %vm215_vm1, %vm4887_vm0  ;;  %vm347_vm0 = vcmask 1043456   ;;  %s6557_s30 = scalar_lea.vmem %s6569_s3, %s4498_s27 }
  0x10   : > { %s4728_s17 = scalar_lea.vmem %s6566_s0, %s4503_s14  ;;  %vm4933_vm5 = vmand %vm210_vm12, %vm267_vm3  ;;  %vm364_vm12 = vcmask 1045509   ;;  %vm707_vm3 = vsmask.f32 7424 }
  0x11   : > { %v4731_v6 = vld.sshfl [vmem:[%s4728_s17 + $0x10] sm:$0x1 pattern:$0x76325410]  ;;  %v284_v7 = vld [vmem:[%s4728_s17] sm:$0x55]  ;;  %vm4943_vm6 = vmand %vm213_vm14, %vm269_vm4 }
  0x12   : > { %v331_v8 = vrot.slane %v4731_v6, 7  ;;  %v297_v9 = vrot.slane %v284_v7, %v4723_v5  ;;  %v290_v10 = vcombine.high %v284_v7, %v284_v7  ;;  %v285_v11 = vld [vmem:[%s4728_s17 + $0x8] sm:$0x55]  ;;  %v627_v12 = vld [vmem:[%s4728_s17] sm:$0x55]  ;;  %v674_v44 = vrot.slane %v4731_v6, 5  ;;  %vm4961_vm7 = vmor %vm4943_vm6, %vm4933_vm5 }
  0x13   : > { %v312_v13 = vrot.slane %v285_v11, %v4723_v5  ;;  %v633_v14 = vcombine.high %v627_v12, %v627_v12  ;;  %v521_v15 = vld [vmem:[%s4728_s17 + $0x8] sm:$0xaa]  ;;  %v640_v18 = vrot.slane %v627_v12, %v4723_v5  ;;  %v520_v19 = vld [vmem:[%s4728_s17] sm:$0xaa]  ;;  %v628_v21 = vld [vmem:[%s4728_s17 + $0x8] sm:$0x55]  ;;  %v305_v24 = vcombine.high %v285_v11, %v285_v11 }
  0x14   : > { %340 = vrot.lane.b32.xlu1 %v331_v8, %s4687_s18  ;;  %v327_v16 = vrot.slane %v297_v9, 7  ;;  %v304_v17 = vrot.slane %v290_v10, %v4723_v5  ;;  %v541_v25 = vcombine.high %v521_v15, %v521_v15  ;;  %v526_v26 = vcombine.high %v520_v19, %v520_v19  ;;  %v722_v39 = vld [vmem:[%s4728_s17] sm:$0x55]  ;;  %v4770_v56 = vld [vmem:[%s4728_s17 + $0x8] sm:$0x55]  ;;  %vm5151_vm6 = vmand %vm361_vm9, %vm362_vm10 }
  0x15   : > { %v329_v20 = vrot.slane %v312_v13, 7  ;;  %v647_v23 = vrot.slane %v633_v14, %v4723_v5  ;;  %v670_v27 = vrot.slane %v640_v18, 5  ;;  %v655_v28 = vrot.slane %v628_v21, %v4723_v5  ;;  %v1065_v53 = vld [vmem:[%s4728_s17] sm:$0x55]  ;;  %v4781_v0 = vld [vmem:[%s4728_s17 + $0x8] sm:$0x55]  ;;  %vm5170_vm10 = vmand %vm364_vm12, %vm365_vm13 }
  0x16   : > { %332 = vrot.lane.b32.xlu0 %v327_v16, %s4687_s18  ;;  %v328_v22 = vrot.slane %v304_v17, 7  ;;  %v548_v29 = vrot.slane %v521_v15, %v4723_v5  ;;  %v555_v30 = vrot.slane %v541_v25, %v4723_v5  ;;  %v648_v31 = vcombine.high %v628_v21, %v628_v21  ;;  %v814_v59 = vld [vmem:[%s4728_s17] sm:$0x55]  ;;  %v4786_v4 = vld [vmem:[%s4728_s17 + $0x8] sm:$0x55]  ;;  %vm5207_vm13 = vmor %vm5170_vm10, %vm5151_vm6 }
  0x17   : > { %v671_v32 = vrot.slane %v647_v23, 5  ;;  %v319_v33 = vrot.slane %v305_v24, %v4723_v5  ;;  %v533_v34 = vrot.slane %v520_v19, %v4723_v5  ;;  %v540_v35 = vrot.slane %v526_v26, %v4723_v5  ;;  %v1217_v9 = vld [vmem:[%s4728_s17] sm:$0xaa]  ;;  %v1391_v10 = vld [vmem:[%s4728_s17] sm:$0x55] }
  0x18   : > { %336 = vrot.lane.b32.xlu1 %v329_v20, %s4687_s18  ;;  %v672_v36 = vrot.slane %v655_v28, 5  ;;  %v572_v37 = vshll.u32 %v548_v29, 16  ;;  %v576_v38 = vshll.u32 %v555_v30, 16  ;;  %v662_v41 = vrot.slane %v648_v31, %v4723_v5  ;;  %v4800_v17 = vld [vmem:[%s4728_s17 + $0x8] sm:$0xaa] }
  0x19   : > { %v330_v40 = vrot.slane %v319_v33, 7  ;;  %v564_v42 = vshll.u32 %v533_v34, 16  ;;  %v568_v43 = vshll.u32 %v540_v35, 16  ;;  %v728_v47 = vcombine.high %v722_v39, %v722_v39  ;;  %v4811_v25 = vld [vmem:[%s4728_s17] sm:$0x55] }
  0x1a   : > { %334 = vrot.lane.b32.xlu0 %v328_v22, %s4687_s18  ;;  %v574_v45 = vrot.slane %v572_v37, 7  ;;  %v578_v46 = vrot.slane %v576_v38, 7  ;;  %v673_v48 = vrot.slane %v662_v41, 5  ;;  %v735_v55 = vrot.slane %v722_v39, %v4723_v5  ;;  %v4817_v29 = vld [vmem:[%s4728_s17 + $0x8] sm:$0x55] }
  0x1b   : > { %v566_v49 = vrot.slane %v564_v42, 7  ;;  %v570_v50 = vrot.slane %v568_v43, 7  ;;  %v742_v52 = vrot.slane %v728_v47, %v4723_v5  ;;  %v1071_v58 = vcombine.high %v1065_v53, %v1065_v53  ;;  %v4808_v24 = vld.sshfl [vmem:[%s4728_s17 + $0x10] sm:$0x2 pattern:$0x76325410] }
  0x1c   : > { %675 = vrot.lane.b32.xlu1 %v670_v27, %s4688_s19  ;;  %v4523_v51 = vpack.i.bf16 %v578_v46, %v574_v45  ;;  %v765_v60 = vrot.slane %v735_v55, 5  ;;  %v750_v61 = vrot.slane %v4770_v56, %v4723_v5  ;;  %v827_v62 = vrot.slane %v814_v59, %v4723_v5  ;;  %v4827_v37 = vld [vmem:[%s4728_s17 + $0x8] sm:$0xaa]  ;;  %v447_v46 = vld [vmem:[%s4728_s17] sm:$0xaa] }
  0x1d   : > { %v4518_v54 = vpack.i.bf16 %v570_v50, %v566_v49  ;;  %v766_v57 = vrot.slane %v742_v52, 5  ;;  %v1085_v63 = vrot.slane %v1071_v58, %v4723_v5  ;;  %v820_v2 = vcombine.high %v814_v59, %v814_v59  ;;  %v514_v49 = vld [vmem:[#allocation2 + $0x10] sm:$0x44] }
  0x1e   : > { %677 = vrot.lane.b32.xlu0 %v671_v32, %s4688_s19  ;;  %v767_v1 = vrot.slane %v750_v61, 5  ;;  %v1078_v3 = vrot.slane %v1065_v53, %v4723_v5  ;;  %v842_v7 = vrot.slane %v4781_v0, %v4723_v5  ;;  %v1093_v13 = vrot.slane %v4786_v4, %v4723_v5 }
  0x1f   : > { %v1113_v8 = vshrl.u32 %v1085_v63, 16  ;;  %v834_v11 = vrot.slane %v820_v2, %v4723_v5  ;;  %v1230_v15 = vrot.slane %v1217_v9, %v4723_v5  ;;  %v1397_v16 = vcombine.high %v1391_v10, %v1391_v10 }
  0x20   : > { %679 = vrot.lane.b32.xlu1 %v672_v36, %s4688_s19  ;;  %v1109_v12 = vshrl.u32 %v1078_v3, 16  ;;  %v1117_v19 = vshrl.u32 %v1093_v13, 16  ;;  %v1223_v20 = vcombine.high %v1217_v9, %v1217_v9  ;;  %v1245_v22 = vrot.slane %v4800_v17, %v4723_v5 }
  0x21   : > { %v1115_v14 = vrot.slane %v1113_v8, 7  ;;  %v1260_v21 = vrot.slane %v1230_v15, 7  ;;  %v1411_v23 = vrot.slane %v1397_v16, %v4723_v5  ;;  %v1404_v28 = vrot.slane %v1391_v10, %v4723_v5  ;;  %v1494_v15 = vld [vmem:[%s4728_s17 + $0x8] sm:$0x55] }
  0x22   : > { %338 = vrot.lane.b32.xlu0 %v330_v40, %s4687_s18  ;;  %v1111_v18 = vrot.slane %v1109_v12, 7  ;;  %v1119_v26 = vrot.slane %v1117_v19, 7  ;;  %v1237_v27 = vrot.slane %v1223_v20, %v4723_v5  ;;  %v1262_v30 = vrot.slane %v1245_v22, 7  ;;  %v1493_v22 = vld [vmem:[%s4728_s17] sm:$0x55] }
  0x23   : > { %v1439_v31 = vshrl.u32 %v1411_v23, 16  ;;  %v580_v32 = vshll.u32 %v4808_v24, 16  ;;  %v981_v33 = vrot.slane %v4811_v25, %v4723_v5  ;;  %v1435_v35 = vshrl.u32 %v1404_v28, 16  ;;  %v172_v23 = vld [vmem:[%s4728_s17] sm:$0x55] }
  0x24   : > { %683 = vrot.lane.b32.xlu1 %v674_v44, %s4688_s19  ;;  %v1261_v34 = vrot.slane %v1237_v27, 7  ;;  %v1419_v36 = vrot.slane %v4817_v29, %v4723_v5  ;;  %v473_v41 = vrot.slane %v4827_v37, %v4723_v5  ;;  %v743_v45 = vcombine.high %v4770_v56, %v4770_v56 }
  0x25   : > { %v1441_v38 = vrot.slane %v1439_v31, 5  ;;  %v582_v39 = vrot.slane %v580_v32, 7  ;;  %v1012_v40 = vshll.u32 %v981_v33, 16  ;;  %v1437_v42 = vrot.slane %v1435_v35, 5  ;;  %v217_v32 = vld [vmem:[#allocation2] sm:$0x11] }
  0x26   : > { %681 = vrot.lane.b32.xlu0 %v673_v48, %s4688_s19  ;;  %v1443_v43 = vshrl.u32 %v1419_v36, 16  ;;  %v490_v47 = vshrl.u32 %v473_v41, 16  ;;  %v451_v52 = vcombine.high %v447_v46, %v447_v46  ;;  %v1086_v55 = vcombine.high %v4786_v4, %v4786_v4  ;;  %v511_v4 = vld [vmem:[#allocation2 + $0x8] sm:$0x44] }
  0x27   : > { %v4528_v48 = vpack.i.bf16 %v1012_v40, %v582_v39  ;;  %v458_v56 = vrot.slane %v447_v46, %v4723_v5  ;;  %v4866_v8 = vshrl.u32 %v4731_v6, 16  ;;  %v1238_v12 = vcombine.high %v4800_v17, %v4800_v17  ;;  %v4921_v40 = vld [vmem:[%s4728_s17 + $0x8] sm:$0xaa] }
  0x28   : > { %4524 = vrot.lane.b32.xlu1 %v4523_v51, %s4687_s18  ;;  %v492_v50 = vrot.slane %v490_v47, 7  ;;  %v1445_v53 = vrot.slane %v1443_v43, 5  ;;  %v465_v58 = vrot.slane %v451_v52, %v4723_v5  ;;  %v1100_v2 = vrot.slane %v1086_v55, %v4723_v5  ;;  %v517_v43 = vld [vmem:[#allocation2 + $0x18] sm:$0x44]  ;;  %v229_v55 = vld [vmem:[%s4728_s17] sm:$0x55] }
  0x29   : > { %v1127_v13 = vrot.slane %v4866_v8, 7  ;;  %v466_v16 = vcombine.high %v4827_v37, %v4827_v37  ;;  %v1252_v19 = vrot.slane %v1238_v12, %v4723_v5  ;;  %v1514_v27 = vcombine.high %v1494_v15, %v1494_v15 }
  0x2a   : > { %4519 = vrot.lane.b32.xlu0 %v4518_v54, %s4687_s18  ;;  %v757_v54 = vrot.slane %v743_v45, %v4723_v5  ;;  %v486_v61 = vshrl.u32 %v465_v58, 16  ;;  %v1499_v35 = vcombine.high %v1493_v22, %v1493_v22  ;;  %v183_v36 = vrot.slane %v172_v23, %v4723_v5 }
  0x2b   : > { %v480_v31 = vrot.slane %v466_v16, %v4723_v5  ;;  %v1263_v33 = vrot.slane %v1252_v19, 7  ;;  %v1453_v37 = vrot.slane %v4866_v8, 5  ;;  %v1521_v41 = vrot.slane %v1494_v15, %v4723_v5 }
  0x2c   : > { %772 = vrot.lane.b32.xlu1 %v766_v57, %s4688_s19  ;;  %v515_v57 = vsel %vm4839_vm8, %v492_v50, %v514_v49  ;;  %v768_v63 = vrot.slane %v757_v54, 5  ;;  %v218_v45 = vsel %vm4908_vm2, %v183_v36, %v217_v32  ;;  %v176_v49 = vcombine.high %v172_v23, %v172_v23 }
  0x2d   : > { %516 = vst [vmem:[#allocation2 + $0x10] sm:$0x44] %v515_v57  ;;  %v494_v39 = vshrl.u32 %v480_v31, 16  ;;  %219 = vst [vmem:[#allocation2] sm:$0x11] %v218_v45  ;;  %v1513_v54 = vrot.slane %v1499_v35, %v4723_v5  ;;  %v1332_v58 = vrot.slane %v4921_v40, %v4723_v5  ;;  %v6571_v35 = vmov 0  }
  0x2e   : > { %770 = vrot.lane.b32.xlu0 %v765_v60, %s4688_s19  ;;  %v482_v60 = vshrl.u32 %v458_v56, 16  ;;  %v220_v57 = vld [vmem:[#allocation2 + $0x8] sm:$0x11]  ;;  %v223_v31 = vld [vmem:[#allocation2 + $0x10] sm:$0x11]  ;;  %3419 = vmatprep.mubr.bf16.mxu0 %v6571_v35  ;;  %vm6570_vm14 = vcmask 1043459  }
  0x2f   : > { %3460 = vmatprep.mubr.bf16.mxu1 %v6571_v35  ;;  %4598 = vset.pattern.permute.xlu1 %v6571_v35  ;;  %vm430_vm5 = vsmask.f32 7942  ;;  %vm432_vm4 = vsmask.f32 7958  ;;  %vm5222_vm6 = vmand %vm6570_vm14, %vm704_vm15  ;;  %vm6600_vm15 = vcmask 1047559   ;;  %vm6603_vm14 = vcmask 1039360  }
  0x30   : > { %857 = vrot.lane.b32.xlu1 %v827_v62, %s4689_s20  ;;  %v508_v62 = vld [vmem:[#allocation2] sm:$0x44]  ;;  %v484_v3 = vrot.slane %v482_v60, 7  ;;  %4599 = vset.pattern.permute.xlu0 %v6571_v35  ;;  %vm5240_vm10 = vmand %vm6600_vm15, %vm707_vm3  ;;  %v1702_v35 = vld [vmem:[%s4728_s17] sm:$0xaa]  ;;  %vm6615_vm15 = vcmask 1039360  }
  0x31   : > { %vm6604_vm1 = vmmov %vm6603_vm14  ;;  %vm797_vm3 = vsmask.f32 7950 }
  0x32   : > { %774 = vrot.lane.b32.xlu0 %v767_v1, %s4688_s19  ;;  %v835_v1 = vcombine.high %v4781_v0, %v4781_v0  ;;  %v509_v9 = vsel %vm4839_vm8, %v484_v3, %v508_v62  ;;  %v190_v62 = vrot.slane %v176_v49, %v4723_v5  ;;  %v226_v49 = vld [vmem:[#allocation2 + $0x18] sm:$0x11] }
  0x33   : > { %510 = vst [vmem:[#allocation2] sm:$0x44] %v509_v9 }
  0x34   : > { %861 = vrot.lane.b32.xlu1 %v842_v7, %s4689_s20  ;;  %v488_v7 = vrot.slane %v486_v61, 7  ;;  %v849_v10 = vrot.slane %v835_v1, %v4723_v5  ;;  %v1545_v1 = vshll.u32 %v1521_v41, 16  ;;  %v221_v9 = vsel %vm4908_vm2, %v190_v62, %v220_v57  ;;  %v272_v17 = vld [vmem:[#allocation2] sm:$0x11] }
  0x35   : > { %222 = vst [vmem:[#allocation2 + $0x8] sm:$0x11] %v221_v9 }
  0x36   : > { %859 = vrot.lane.b32.xlu0 %v834_v11, %s4689_s20  ;;  %v512_v0 = vsel %vm4839_vm8, %v488_v7, %v511_v4  ;;  %v1121_v11 = vshrl.u32 %v1100_v2, 16  ;;  %v4951_v4 = vld [vmem:[%s4728_s17] sm:$0x55]  ;;  %v240_v7 = vrot.slane %v229_v55, %v4723_v5 }
  0x37   : > { %513 = vst [vmem:[#allocation2 + $0x8] sm:$0x44] %v512_v0  ;;  %v1601_v16 = vcombine.high %v4951_v4, %v4951_v4  ;;  %v1608_v45 = vrot.slane %v4951_v4, %v4723_v5 }
  0x38   : > { %1130 = vrot.lane.b32.xlu1 %v1115_v14, %s4687_s18  ;;  %v974_v14 = vcombine.high %v4811_v25, %v4811_v25  ;;  %v1264_v25 = vrot.slane %v4808_v24, 7  ;;  %v273_v19 = vsel %vm4961_vm7, %v240_v7, %v272_v17  ;;  %v5012_v7 = vld [vmem:[%s4728_s17 + $0x8] sm:$0xaa]  ;;  %v5026_v17 = vld [vmem:[%s4728_s17] sm:$0xaa] }
  0x39   : > { %274 = vst [vmem:[#allocation2] sm:$0x11] %v273_v19  ;;  %v1639_v62 = vshrl.u32 %v1608_v45, 16  ;;  %v1902_v45 = vld [vmem:[%s4728_s17 + $0x8] sm:$0x55] }
  0x3a   : > { %1128 = vrot.lane.b32.xlu0 %v1111_v18, %s4687_s18  ;;  %v1123_v18 = vrot.slane %v1121_v11, 7  ;;  %v988_v28 = vrot.slane %v974_v14, %v4723_v5  ;;  %v1541_v11 = vshll.u32 %v1513_v54, 16  ;;  %v1547_v14 = vrot.slane %v1545_v1, 5  ;;  %v230_v54 = vld [vmem:[%s4728_s17 + $0x8] sm:$0x55] }
  0x3b   : > { %v248_v1 = vcombine.high %v230_v54, %v230_v54 }
  0x3c   : > { %1265 = vrot.lane.b32.xlu1 %v1260_v21, %s4687_s18  ;;  %v4895_v21 = vld [vmem:[%s4728_s17 + $0x8] sm:$0x55]  ;;  %v1015_v52 = vshll.u32 %v988_v28, 16  ;;  %v1543_v23 = vrot.slane %v1541_v11, 5 }
  0x3e   : > { %1132 = vrot.lane.b32.xlu0 %v1119_v26, %s4687_s18  ;;  %v1304_v26 = vld [vmem:[%s4728_s17] sm:$0xaa] }
  0x3f   : > { %v1310_v47 = vcombine.high %v1304_v26, %v1304_v26 }
  0x40   : > { %1269 = vrot.lane.b32.xlu1 %v1262_v30, %s4687_s18 }
  0x41   : > { %v1324_v3 = vrot.slane %v1310_v47, %v4723_v5  ;;  %v959_v47 = vld [vmem:[#allocation2 + $0x48] sm:$0x11] }
  0x42   : > { %1267 = vrot.lane.b32.xlu0 %v1261_v34, %s4687_s18 }
  0x44   : > { %1456 = vrot.lane.b32.xlu1 %v1441_v38, %s4688_s19  ;;  %v1317_v38 = vrot.slane %v1304_v26, %v4723_v5 }
  0x46   : > { %1454 = vrot.lane.b32.xlu0 %v1437_v42, %s4688_s19  ;;  %v1528_v42 = vrot.slane %v1514_v27, %v4723_v5  ;;  %v173_v27 = vld [vmem:[%s4728_s17 + $0x8] sm:$0x55] }
  0x47   : > { %v198_v36 = vrot.slane %v173_v27, %v4723_v5 }
  0x48   : > { %4529 = vrot.lane.b32.xlu1 %v4528_v48, %s4687_s18  ;;  %v496_v48 = vrot.slane %v494_v39, 7  ;;  %v1549_v2 = vshll.u32 %v1528_v42, 16  ;;  %v191_v42 = vcombine.high %v173_v27, %v173_v27  ;;  %v898_v27 = vld [vmem:[%s4728_s17 + $0x8] sm:$0x55] }
  0x4a   : > { %1458 = vrot.lane.b32.xlu0 %v1445_v53, %s4688_s19  ;;  %v1506_v53 = vrot.slane %v1493_v22, %v4723_v5  ;;  %v518_v60 = vsel %vm4839_vm8, %v496_v48, %v517_v43  ;;  %v1551_v15 = vrot.slane %v1549_v2, 5  ;;  %v224_v48 = vsel %vm4908_vm2, %v198_v36, %v223_v31 }
  0x4b   : > { %519 = vst [vmem:[#allocation2 + $0x18] sm:$0x44] %v518_v60  ;;  %225 = vst [vmem:[#allocation2 + $0x10] sm:$0x11] %v224_v48  ;;  %v255_v2 = vrot.slane %v230_v54, %v4723_v5  ;;  %v989_v36 = vcombine.high %v4895_v21, %v4895_v21  ;;  %v5061_v48 = vld [vmem:[%s4728_s17] sm:$0x55] }
  0x4c   : > { %778 = vrot.lane.b32.xlu1 %v674_v44, %s4688_s19  ;;  %v1412_v44 = vcombine.high %v4817_v29, %v4817_v29  ;;  %v996_v29 = vrot.slane %v4895_v21, %v4723_v5  ;;  %v4543_v32 = vpack.i.bf16 %v1551_v15, %v1547_v14  ;;  %v1847_v15 = vrot.slane %v5012_v7, %v4723_v5 }
  0x4e   : > { %776 = vrot.lane.b32.xlu0 %v768_v63, %s4688_s19  ;;  %v1426_v20 = vrot.slane %v1412_v44, %v4723_v5  ;;  %v1018_v46 = vshll.u32 %v996_v29, 16  ;;  %v1347_v63 = vrot.slane %v1317_v38, 7  ;;  %v233_v44 = vcombine.high %v229_v55, %v229_v55  ;;  %v275_v38 = vld [vmem:[#allocation2 + $0x8] sm:$0x11] }
  0x4f   : > { %v205_v55 = vrot.slane %v191_v42, %v4723_v5 }
  0x50   : > { %865 = vrot.lane.b32.xlu1 %v4731_v6, %s4689_s20  ;;  %v1447_v34 = vshrl.u32 %v1426_v20, 16  ;;  %v4533_v0 = vpack.i.bf16 %v1018_v46, %v1015_v52  ;;  %v1348_v20 = vrot.slane %v1324_v3, 7  ;;  %v247_v26 = vrot.slane %v233_v44, %v4723_v5 }
  0x51   : > { %v227_v61 = vsel %vm4908_vm2, %v205_v55, %v226_v49  ;;  %v262_v44 = vrot.slane %v248_v1, %v4723_v5 }
  0x52   : > { %863 = vrot.lane.b32.xlu0 %v849_v10, %s4689_s20  ;;  %v1449_v50 = vrot.slane %v1447_v34, 5  ;;  %v1537_v10 = vshll.u32 %v1506_v53, 16  ;;  %v956_v34 = vld [vmem:[#allocation2 + $0x40] sm:$0x11]  ;;  %v276_v46 = vsel %vm4961_vm7, %v247_v26, %v275_v38  ;;  %228 = vst [vmem:[#allocation2 + $0x18] sm:$0x11] %v227_v61  ;;  %v1325_v38 = vcombine.high %v4921_v40, %v4921_v40 }
  0x53   : > { %277 = vst [vmem:[#allocation2 + $0x8] sm:$0x11] %v276_v46  ;;  %v278_v11 = vld [vmem:[#allocation2 + $0x10] sm:$0x11]  ;;  %v965_v40 = vld [vmem:[#allocation2 + $0x58] sm:$0x11] }
  0x54   : > { %1136 = vrot.lane.b32.xlu1 %v1127_v13, %s4687_s18  ;;  %v1349_v13 = vrot.slane %v1332_v58, 7  ;;  %v1539_v22 = vrot.slane %v1537_v10, 5  ;;  %v1819_v58 = vld [vmem:[%s4728_s17] sm:$0xaa]  ;;  %v279_v14 = vsel %vm4961_vm7, %v255_v2, %v278_v11 }
  0x55   : > { %v1832_v3 = vrot.slane %v1819_v58, %v4723_v5  ;;  %280 = vst [vmem:[#allocation2 + $0x10] sm:$0x11] %v279_v14  ;;  %v5091_v14 = vld [vmem:[%s4728_s17 + $0x8] sm:$0x55] }
  0x56   : > { %1134 = vrot.lane.b32.xlu0 %v1123_v18, %s4687_s18  ;;  %v897_v18 = vld [vmem:[%s4728_s17] sm:$0x55]  ;;  %v4538_v43 = vpack.i.bf16 %v1543_v23, %v1539_v22  ;;  %v5033_v23 = vld [vmem:[%s4728_s17 + $0x8] sm:$0xaa] }
  0x57   : > { %v901_v28 = vcombine.high %v897_v18, %v897_v18  ;;  %v908_v29 = vrot.slane %v897_v18, %v4723_v5  ;;  %v2228_v31 = vcombine.low %v5033_v23, %v5033_v23 }
  0x58   : > { %1273 = vrot.lane.b32.xlu1 %v1264_v25, %s4687_s18 }
  0x59   : > { %v915_v39 = vrot.slane %v901_v28, %v4723_v5  ;;  %v932_v41 = vshrl.u32 %v908_v29, 16  ;;  %v281_v18 = vld [vmem:[#allocation2 + $0x18] sm:$0x11]  ;;  %v2213_v29 = vcombine.low %v5026_v17, %v5026_v17  ;;  %v2235_v21 = vrot.slane %v2228_v31, %v4723_v5 }
  0x5a   : > { %1271 = vrot.lane.b32.xlu0 %v1263_v33, %s4687_s18  ;;  %v1615_v33 = vrot.slane %v1601_v16, %v4723_v5  ;;  %v282_v26 = vsel %vm4961_vm7, %v262_v44, %v281_v18  ;;  %v1929_v44 = vrot.slane %v1902_v45, %v4723_v5  ;;  %v2133_v31 = vrot.slane %v5091_v14, %v4723_v5 }
  0x5b   : > { %v937_v52 = vshrl.u32 %v915_v39, 16  ;;  %v957_v53 = vsel %vm4908_vm2, %v932_v41, %v956_v34  ;;  %283 = vst [vmem:[#allocation2 + $0x18] sm:$0x11] %v282_v26  ;;  %v380_v39 = vld [vmem:[%s4728_s17] sm:$0xaa]  ;;  %v923_v41 = vrot.slane %v898_v27, %v4723_v5  ;;  %v2220_v42 = vrot.slane %v2213_v29, %v4723_v5 }
  0x5c   : > { %1462 = vrot.lane.b32.xlu1 %v1453_v37, %s4688_s19  ;;  %v2003_v37 = vld [vmem:[%s4728_s17] sm:$0x55]  ;;  %v1644_v56 = vshrl.u32 %v1615_v33, 16  ;;  %958 = vst [vmem:[#allocation2 + $0x40] sm:$0x11] %v957_v53  ;;  %v1003_v53 = vrot.slane %v989_v36, %v4723_v5  ;;  %v384_v54 = vcombine.high %v380_v39, %v380_v39  ;;  %v1953_v36 = vshll.u32 %v1929_v44, 16 }
  0x5d   : > { %v2009_v57 = vcombine.high %v2003_v37, %v2003_v37  ;;  %v960_v60 = vsel %vm4908_vm2, %v937_v52, %v959_v47  ;;  %v2016_v10 = vrot.slane %v2003_v37, %v4723_v5  ;;  %v916_v37 = vcombine.high %v898_v27, %v898_v27  ;;  %v962_v47 = vld [vmem:[#allocation2 + $0x50] sm:$0x11] }
  0x5e   : > { %1460 = vrot.lane.b32.xlu0 %v1449_v50, %s4688_s19  ;;  %v4991_v50 = vld [vmem:[%s4728_s17 + $0x8] sm:$0x55]  ;;  %961 = vst [vmem:[#allocation2 + $0x48] sm:$0x11] %v960_v60  ;;  %v942_v49 = vshrl.u32 %v923_v41, 16 }
  0x5f   : > { %v2023_v4 = vrot.slane %v2009_v57, %v4723_v5  ;;  %v930_v46 = vrot.slane %v916_v37, %v4723_v5  ;;  %v1024_v57 = vshll.u32 %v4731_v6, 16  ;;  %v391_v6 = vrot.slane %v380_v39, %v4723_v5 }
  0x60   : > { %1352 = vrot.lane.b32.xlu1 %v1347_v63, %s4687_s18  ;;  %v1623_v63 = vrot.slane %v4991_v50, %v4723_v5  ;;  %v963_v60 = vsel %vm4908_vm2, %v942_v49, %v962_v47  ;;  %v5127_v47 = vld [vmem:[%s4728_s17 + $0x8] sm:$0xaa] }
  0x61   : > { %v2051_v16 = vshrl.u32 %v2023_v4, 16  ;;  %v947_v55 = vshrl.u32 %v930_v46, 16  ;;  %964 = vst [vmem:[#allocation2 + $0x50] sm:$0x11] %v963_v60  ;;  %v5083_v4 = vrot.slane %v384_v54, %v4723_v5  ;;  %v1555_v11 = vrot.slane %v1024_v57, 5 }
  0x62   : > { %4534 = vrot.lane.b32.xlu0 %v4533_v0, %s4687_s18  ;;  %v1649_v9 = vshrl.u32 %v1623_v63, 16  ;;  %v1825_v0 = vcombine.high %v1819_v58, %v1819_v58  ;;  %v1922_v58 = vcombine.high %v1902_v45, %v1902_v45  ;;  %v1907_v63 = vcombine.high %v5061_v48, %v5061_v48 }
  0x63   : > { %v2053_v28 = vrot.slane %v2051_v16, 6  ;;  %v966_v1 = vsel %vm4908_vm2, %v947_v55, %v965_v40  ;;  %v418_v27 = vshll.u32 %v5083_v4, 16 }
  0x64   : > { %1356 = vrot.lane.b32.xlu1 %v1349_v13, %s4687_s18  ;;  %v5018_v13 = vld [vmem:[%s4728_s17 + $0x8] sm:$0x55]  ;;  %v1839_v19 = vrot.slane %v1825_v0, %v4723_v5  ;;  %967 = vst [vmem:[#allocation2 + $0x58] sm:$0x11] %v966_v1  ;;  %v1921_v18 = vrot.slane %v1907_v63, %v4723_v5  ;;  %v2311_v63 = vcombine.low %v5127_v47, %v5127_v47 }
  0x65   : > { %v2031_v22 = vrot.slane %v5018_v13, %v4723_v5  ;;  %v2024_v2 = vcombine.high %v5018_v13, %v5018_v13  ;;  %v1936_v13 = vrot.slane %v1922_v58, %v4723_v5  ;;  %v2643_v58 = vld [vmem:[%s4728_s17] sm:$0xaa] }
  0x66   : > { %1354 = vrot.lane.b32.xlu0 %v1348_v20, %s4687_s18  ;;  %v2047_v20 = vshrl.u32 %v2016_v10, 16 }
  0x67   : > { %v2055_v34 = vshrl.u32 %v2031_v22, 16  ;;  %v2038_v22 = vrot.slane %v2024_v2, %v4723_v5  ;;  %v1957_v37 = vshll.u32 %v1936_v13, 16 }
  0x68   : > { %4544 = vrot.lane.b32.xlu1 %v4543_v32, %s4689_s20  ;;  %v5044_v32 = vld [vmem:[%s4728_s17] sm:$0x55]  ;;  %v2049_v33 = vrot.slane %v2047_v20, 6 }
  0x69   : > { %v2057_v52 = vrot.slane %v2055_v34, 6  ;;  %v2111_v0 = vcombine.high %v5044_v32, %v5044_v32  ;;  %v2059_v46 = vshrl.u32 %v2038_v22, 16 }
  0x6a   : > { %4539 = vrot.lane.b32.xlu0 %v4538_v43, %s4689_s20  ;;  %v2118_v43 = vrot.slane %v5044_v32, %v4723_v5  ;;  %v5112_v32 = vld [vmem:[%s4728_s17] sm:$0xaa] }
  0x6b   : > { %v2125_v29 = vrot.slane %v2111_v0, %v4723_v5  ;;  %v2386_v1 = vrot.slane %v5112_v32, %v4723_v5 }
  0x6c   : > { %1665 = vrot.lane.b32.xlu1 %v1644_v56, %s4689_s20  ;;  %v1339_v56 = vrot.slane %v1325_v38, %v4723_v5  ;;  %v2149_v61 = vshll.u32 %v2118_v43, 16  ;;  %v5118_v38 = vld [vmem:[%s4728_s17] sm:$0xaa]  ;;  %v1949_v43 = vshll.u32 %v1921_v18, 16 }
  0x6d   : > { %v2296_v40 = vcombine.low %v5118_v38, %v5118_v38 }
  0x6e   : > { %1663 = vrot.lane.b32.xlu0 %v1639_v62, %s4689_s20  ;;  %v1616_v62 = vcombine.high %v4991_v50, %v4991_v50  ;;  %v1021_v50 = vshll.u32 %v1003_v53, 16  ;;  %v1350_v10 = vrot.slane %v1339_v56, 7  ;;  %v2157_v53 = vshll.u32 %v2133_v31, 16 }
  0x6f   : > { %v1955_v56 = vrot.slane %v1953_v36, 7  ;;  %v2649_v36 = vcombine.high %v2643_v58, %v2643_v58 }
  0x70   : > { %1862 = vrot.lane.b32.xlu1 %v1832_v3, %s4687_s18  ;;  %v2227_v3 = vrot.slane %v5026_v17, %v4723_v5  ;;  %v5095_v16 = vrot.slane %v1616_v62, %v4723_v5  ;;  %v1914_v17 = vrot.slane %v5061_v48, %v4723_v5  ;;  %v4548_v26 = vpack.i.bf16 %v1024_v57, %v1021_v50 }
  0x71   : > { %v1959_v57 = vrot.slane %v1957_v37, 7  ;;  %v1951_v62 = vrot.slane %v1949_v43, 7  ;;  %v2159_v13 = vrot.slane %v2157_v53, 6 }
  0x72   : > { %1667 = vrot.lane.b32.xlu0 %v1649_v9, %s4689_s20  ;;  %v381_v9 = vld [vmem:[%s4728_s17 + $0x8] sm:$0xaa]  ;;  %v1654_v41 = vshrl.u32 %v5095_v16, 16 }
  0x73   : > { %v399_v20 = vcombine.high %v381_v9, %v381_v9  ;;  %v406_v34 = vrot.slane %v381_v9, %v4723_v5 }
  0x74   : > { %1866 = vrot.lane.b32.xlu1 %v1847_v15, %s4687_s18  ;;  %v2151_v15 = vrot.slane %v2149_v61, 6 }
  0x75   : > { %v5124_v45 = vrot.slane %v399_v20, %v4723_v5  ;;  %v5141_v55 = vshll.u32 %v406_v34, 16  ;;  %v5182_v20 = vpack.i.bf16 %v1959_v57, %v1955_v56  ;;  %v5201_v34 = vrot.slane %v2386_v1, 9 }
  0x76   : > { %1864 = vrot.lane.b32.xlu0 %v1839_v19, %s4687_s18  ;;  %v5100_v19 = vshll.u32 %v391_v6, 16  ;;  %v4553_v39 = vpack.i.bf16 %v2151_v15, %v1555_v11  ;;  %v5175_v11 = vrot.slane %v2296_v40, %v4723_v5  ;;  %v2656_v15 = vrot.slane %v2643_v58, %v4723_v5  ;;  %v368_v40 = vld [vmem:[#allocation2] sm:$0x22] }
  0x78   : > { %2068 = vrot.lane.b32.xlu1 %v2053_v28, %s4688_s19  ;;  %v5106_v28 = vld [vmem:[%s4728_s17 + $0x10] ss:$0 sps:$4 sm:$0x22]   ;;  %v5228_v58 = vshrl.u32 %v2656_v15, 16 }
  0x79   : > { %v2250_v49 = vrot.slane %v5106_v28, %v4723_v5 }
  0x7a   : > { %2066 = vrot.lane.b32.xlu0 %v2049_v33, %s4688_s19  ;;  %v1840_v33 = vcombine.high %v5012_v7, %v5012_v7  ;;  %v2065_v7 = vrot.slane %v4866_v8, 6 }
  0x7c   : > { %2251 = vrot.lane.b32.xlu1 %v2220_v42, %s4688_s19  ;;  %v1945_v42 = vshll.u32 %v1914_v17, 16  ;;  %v5139_v54 = vrot.slane %v1840_v33, %v4723_v5  ;;  %v5179_v17 = vld [vmem:[%s4728_s17] sm:$0xaa]  ;;  %v5199_v33 = vrot.slane %v2311_v63, %v4723_v5 }
  0x7d   : > { %v1171_v22 = vcombine.high %v5179_v17, %v5179_v17 }
  0x7e   : > { %2070 = vrot.lane.b32.xlu0 %v2057_v52, %s4688_s19  ;;  %v2153_v52 = vshll.u32 %v2125_v29, 16  ;;  %v1947_v61 = vrot.slane %v1945_v42, 7  ;;  %v5192_v29 = vld [vmem:[%s4728_s17 + $0x8] sm:$0xaa] }
  0x7f   : > { %v5245_v6 = vrot.slane %v1171_v22, %v4723_v5 }
  0x80   : > { %2255 = vrot.lane.b32.xlu1 %v2235_v21, %s4688_s19  ;;  %v2379_v21 = vcombine.high %v5112_v32, %v5112_v32  ;;  %v2155_v44 = vrot.slane %v2153_v52, 6  ;;  %v5196_v32 = vpack.i.bf16 %v1951_v62, %v1947_v61  ;;  %v371_v52 = vld [vmem:[#allocation2 + $0x8] sm:$0x22]  ;;  %v2671_v62 = vrot.slane %v5192_v29, %v4723_v5 }
  0x82   : > { %2253 = vrot.lane.b32.xlu0 %v2227_v3, %s4688_s19  ;;  %v5156_v3 = vrot.slane %v2059_v46, 6  ;;  %v5161_v9 = vrot.slane %v2379_v21, %v4723_v5  ;;  %v5215_v21 = vld [vmem:[%s4728_s17] sm:$0x55]  ;;  %v5226_v57 = vpack.i.bf16 %v2159_v13, %v2155_v44 }
  0x84   : > { %1358 = vrot.lane.b32.xlu1 %v1350_v10, %s4687_s18  ;;  %v5248_v10 = vld [vmem:[%s4728_s17] sm:$0xaa] }
  0x85   : > { %v3016_v56 = vrot.slane %v5248_v10, %v4723_v5 }
  0x86   : > { %v5131_v48 = vpop.permute.xlu1 %340  ;;  %4549 = vrot.lane.b32.xlu0 %v4548_v26, %s4687_s18  ;;  %v5189_v26 = vld [vmem:[%s4728_s17 + $0x8] sm:$0xaa] }
  0x87   : > { %v2401_v61 = vrot.slane %v5189_v26, %v4723_v5  ;;  %v5354_v28 = vshrl.u32 %v3016_v56, 16  ;;  %v6617_v56 = vrot.slane %v5033_v23, %v4723_v5 }
  0x88   : > { %4554 = vrot.lane.b32.xlu1 %v4553_v39, %s4689_s20  ;;  %v333_v60 = vpop.permute.xlu0 %332 }
  0x89   : > { %v342_v37 = vrot.slane %v333_v60, 4 }
  0x8a   : > { %v5163_v0 = vpop.permute.xlu1 %336  ;;  %1360 = vrot.lane.b32.xlu0 %v1264_v25, %s4687_s18 }
  0x8b   : > { %v344_v18 = vrot.slane %v5163_v0, 4 }
  0x8c   : > { %1671 = vrot.lane.b32.xlu1 %v4866_v8, %s4689_s20  ;;  %v335_v31 = vpop.permute.xlu0 %334 }
  0x8d   : > { %v343_v42 = vrot.slane %v335_v31, 4 }
  0x8e   : > { %v676_v53 = vpop.permute.xlu1 %675  ;;  %1669 = vrot.lane.b32.xlu0 %v1654_v41, %s4689_s20 }
  0x8f   : > { %v348_v16 = vsel %vm347_vm0, %v342_v37, %v343_v42  ;;  %v351_v41 = vsel %vm347_vm0, %v343_v42, %v344_v18  ;;  %v685_v63 = vrot.slane %v676_v53, 4  ;;  %v5255_v37 = vrot.slane %v2649_v36, %v4723_v5  ;;  %v710_v36 = vld [vmem:[#allocation2] sm:$0x88] }
  0x90   : > { %v350_v44 = vsel %vm6603_vm14, %v333_v60, %v348_v16  ;;  %v352_v13 = vsel %vm6604_vm1, %v335_v31, %v351_v41  ;;  %1870 = vrot.lane.b32.xlu1 %v4808_v24, %s4687_s18  ;;  %v678_v15 = vpop.permute.xlu0 %677  ;;  %v2843_v42 = vcombine.low %v5215_v21, %v5215_v21  ;;  %v1706_v31 = vcombine.high %v1702_v35, %v1702_v35  ;;  %vm5268_vm14 = vmor %vm5240_vm10, %vm5222_vm6 }
  0x91   : > { %v369_v22 = vsel %vm5207_vm13, %v350_v44, %v368_v40  ;;  %v372_v46 = vsel %vm5207_vm13, %v352_v13, %v371_v52  ;;  %v686_v60 = vrot.slane %v678_v15, 4  ;;  %v5276_v40 = vrot.slane %v2401_v61, 9  ;;  %vm5286_vm1 = vmand %vm361_vm9, %vm430_vm5  ;;  %v5293_v61 = vld [vmem:[%s4728_s17 + $0x8] sm:$0x55] }
  0x92   : > { %370 = vst [vmem:[#allocation2] sm:$0x22] %v369_v22  ;;  %373 = vst [vmem:[#allocation2 + $0x8] sm:$0x22] %v372_v46  ;;  %v5272_v16 = vpop.permute.xlu1 %679  ;;  %1868 = vrot.lane.b32.xlu0 %v5139_v54, %s4687_s18  ;;  %v5278_v52 = vshrl.u32 %v2671_v62, 16  ;;  %v1713_v62 = vrot.slane %v1702_v35, %v4723_v5  ;;  %v1720_v44 = vrot.slane %v1706_v31, %v4723_v5  ;;  %v346_v13 = vrot.slane %v5131_v48, 4 }
  0x93   : > { %v690_v1 = vsel %vm347_vm0, %v685_v63, %v686_v60  ;;  %v687_v54 = vrot.slane %v5272_v16, 4  ;;  %vm5300_vm6 = vmand %vm364_vm12, %vm432_vm4  ;;  %vm6611_vm9 = vcmask 916480   ;;  %v713_v63 = vld [vmem:[#allocation2 + $0x8] sm:$0x88]  ;;  %vm799_vm5 = vsmask.f32 7966 }
  0x94   : > { %v692_v46 = vsel %vm6611_vm9, %v676_v53, %v690_v1  ;;  %2074 = vrot.lane.b32.xlu1 %v2065_v7, %s4688_s19  ;;  %v339_v43 = vpop.permute.xlu0 %338  ;;  %v5310_v31 = vrot.slane %v2843_v42, %v4723_v5  ;;  %v374_v53 = vld [vmem:[#allocation2 + $0x10] sm:$0x22]  ;;  %v377_v1 = vld [vmem:[#allocation2 + $0x18] sm:$0x22]  ;;  %v4401_v8 = vrot.slane %v1713_v62, 9  ;;  %vm6612_vm12 = vmmov %vm6611_vm9  ;;  %v2858_v42 = vcombine.low %v5293_v61, %v5293_v61 }
  0x95   : > { %v711_v48 = vsel %vm5268_vm14, %v692_v46, %v710_v36  ;;  %v693_v25 = vsel %vm347_vm0, %v686_v60, %v687_v54  ;;  %v345_v2 = vrot.slane %v339_v43, 4  ;;  %v1749_v36 = vld [vmem:[#allocation2 + $0x80] sm:$0x11]  ;;  %v4402_v46 = vrot.slane %v1720_v44, 9  ;;  %v1752_v35 = vld [vmem:[#allocation2 + $0x88] sm:$0x11]  ;;  %vm5326_vm4 = vmor %vm5300_vm6, %vm5286_vm1 }
  0x96   : > { %712 = vst [vmem:[#allocation2] sm:$0x88] %v711_v48  ;;  %v694_v7 = vsel %vm6612_vm12, %v678_v15, %v693_v25  ;;  %v684_v50 = vpop.permute.xlu1 %683  ;;  %2072 = vrot.lane.b32.xlu0 %v5156_v3, %s4688_s19  ;;  %v5337_v44 = vld [vmem:[%s4728_s17 + $0x8] sm:$0xaa]  ;;  %vm6616_vm10 = vmmov %vm6615_vm15  ;;  %vm3360_vm1 = vcmask 1044480   ;;  %vm6620_vm12 = vcmask 1043459  }
  0x97   : > { %v714_v25 = vsel %vm5268_vm14, %v694_v7, %v713_v63  ;;  %v353_v3 = vsel %vm347_vm0, %v344_v18, %v345_v2  ;;  %v355_v15 = vsel %vm347_vm0, %v345_v2, %v346_v13  ;;  %v689_v62 = vrot.slane %v684_v50, 4  ;;  %v716_v63 = vld [vmem:[#allocation2 + $0x10] sm:$0x88]  ;;  %vm6618_vm6 = vmmov %vm6611_vm9 }
  0x98   : > { %715 = vst [vmem:[#allocation2 + $0x8] sm:$0x88] %v714_v25  ;;  %v354_v41 = vsel %vm6615_vm15, %v5163_v0, %v353_v3  ;;  %v356_v22 = vsel %vm6616_vm10, %v339_v43, %v355_v15  ;;  %2259 = vrot.lane.b32.xlu1 %v2250_v49, %s4688_s19  ;;  %v682_v48 = vpop.permute.xlu0 %681  ;;  %v1750_v18 = vsel %vm4908_vm2, %v4401_v8, %v1749_v36  ;;  %vm6619_vm9 = vmmov %vm6618_vm6  ;;  %vm6623_vm10 = vcmask 1047559  }
  0x99   : > { %v1753_v2 = vsel %vm4908_vm2, %v4402_v46, %v1752_v35  ;;  %v435_v50 = vld [vmem:[#allocation2] sm:$0x22]  ;;  %v438_v13 = vld [vmem:[#allocation2 + $0x8] sm:$0x22]  ;;  %v375_v0 = vsel %vm5207_vm13, %v354_v41, %v374_v53  ;;  %v378_v43 = vsel %vm5207_vm13, %v356_v22, %v377_v1  ;;  %v688_v7 = vrot.slane %v682_v48, 4  ;;  %vm5401_vm15 = vmand %vm6620_vm12, %vm797_vm3 }
  0x9a   : > { %1751 = vst [vmem:[#allocation2 + $0x80] sm:$0x11] %v1750_v18  ;;  %1754 = vst [vmem:[#allocation2 + $0x88] sm:$0x11] %v1753_v2  ;;  %v436_v49 = vsel %vm5326_vm4, %v5100_v19, %v435_v50  ;;  %v439_v35 = vsel %vm5326_vm4, %v418_v27, %v438_v13  ;;  %v719_v53 = vld [vmem:[#allocation2 + $0x18] sm:$0x88]  ;;  %v5363_v8 = vpop.permute.xlu1 %4524  ;;  %2257 = vrot.lane.b32.xlu0 %v6617_v56, %s4688_s19  ;;  %v3031_v4 = vrot.slane %v5337_v44, %v4723_v5 }
  0x9b   : > { %376 = vst [vmem:[#allocation2 + $0x10] sm:$0x22] %v375_v0  ;;  %379 = vst [vmem:[#allocation2 + $0x18] sm:$0x22] %v378_v43  ;;  %v4691_v1 = vmov 65535   ;;  %v695_v27 = vsel %vm347_vm0, %v687_v54, %v688_v7  ;;  %v697_v46 = vsel %vm347_vm0, %v688_v7, %v689_v62  ;;  %v6573_v25 = vunpack.i.h.bf16 %v5363_v8 }
  0x9c   : > { %v5370_v36 = vsel %vm347_vm0, 4294967295, %v4691_v1  ;;  %v1761_v19 = vld [vmem:[%s4728_s17] sm:$0xaa]  ;;  %437 = vst [vmem:[#allocation2] sm:$0x22] %v436_v49  ;;  %v4526_v23 = vunpack.i.l.bf16 %v5363_v8  ;;  %v696_v3 = vsel %vm6618_vm6, %v5272_v16, %v695_v27  ;;  %v698_v15 = vsel %vm6619_vm9, %v682_v48, %v697_v46  ;;  %4564 = vrot.lane.b32.xlu1 %v5182_v20, %s4688_s19  ;;  %v4520_v41 = vpop.permute.xlu0 %4519  ;;  %vm5411_vm6 = vmand %vm6623_vm10, %vm799_vm5 }
  0x9d   : > { %440 = vst [vmem:[#allocation2 + $0x8] sm:$0x22] %v439_v35  ;;  %v1772_v22 = vrot.slane %v1761_v19, %v4723_v5  ;;  %v1765_v18 = vcombine.high %v1761_v19, %v1761_v19  ;;  %v717_v54 = vsel %vm5268_vm14, %v696_v3, %v716_v63  ;;  %v720_v62 = vsel %vm5268_vm14, %v698_v15, %v719_v53  ;;  %v621_v48 = vld [vmem:[#allocation2 + $0x10] sm:$0x44]  ;;  %v615_v49 = vld [vmem:[#allocation2] sm:$0x44]  ;;  %vm5444_vm9 = vmor %vm5411_vm6, %vm5401_vm15 }
  0x9e   : > { %v5393_v2 = vrot.slane %v6573_v25, 4  ;;  %v595_v16 = vrot.slane %v4526_v23, 4  ;;  %718 = vst [vmem:[#allocation2 + $0x10] sm:$0x88] %v717_v54  ;;  %721 = vst [vmem:[#allocation2 + $0x18] sm:$0x88] %v720_v62  ;;  %v4522_v50 = vunpack.i.h.bf16 %v4520_v41  ;;  %v4521_v20 = vunpack.i.l.bf16 %v4520_v41  ;;  %v5395_v13 = vpop.permute.xlu1 %772  ;;  %4559 = vrot.lane.b32.xlu0 %v5196_v32, %s4688_s19 }
  0x9f   : > { %v4405_v0 = vrot.slane %v1772_v22, 9  ;;  %v1779_v43 = vrot.slane %v1765_v18, %v4723_v5  ;;  %v618_v35 = vld [vmem:[#allocation2 + $0x8] sm:$0x44]  ;;  %v781_v53 = vrot.slane %v5395_v13, 4  ;;  %v3009_v56 = vcombine.high %v5248_v10, %v5248_v10 }
  0xa0   : > { %v602_v7 = vsel %vm347_vm0, %v595_v16, %v5393_v2  ;;  %v2126_v1 = vcombine.high %v5091_v14, %v5091_v14  ;;  %vm6626_vm3 = vcmask 1039360   ;;  %v594_v27 = vrot.slane %v4522_v50, 4  ;;  %2334 = vrot.lane.b32.xlu1 %v5175_v11, %s4688_s19  ;;  %v771_v3 = vpop.permute.xlu0 %770  ;;  %v5423_v15 = vld.sshfl [vmem:[%s4728_s17 + $0x10] sm:$0x1 pattern:$0x76325410] }
  0xa1   : > { %v603_v19 = vsel %vm6626_vm3, %v4526_v23, %v602_v7  ;;  %v593_v46 = vrot.slane %v4521_v20, 4  ;;  %v1807_v41 = vld [vmem:[#allocation2 + $0x80] sm:$0x11]  ;;  %v4406_v22 = vrot.slane %v1779_v43, 9  ;;  %v780_v62 = vrot.slane %v771_v3, 4  ;;  %vm6630_vm12 = vmmov %vm6626_vm3 }
  0xa2   : > { %v441_v18 = vld [vmem:[#allocation2 + $0x10] sm:$0x22]  ;;  %v444_v54 = vld [vmem:[#allocation2 + $0x18] sm:$0x22]  ;;  %v622_v10 = vsel %vm4854_vm11, %v603_v19, %v621_v48  ;;  %vm873_vm5 = vcmask 908288   ;;  %v5427_v14 = vshrl.u32 %v3031_v4, 16  ;;  %v1808_v23 = vsel %vm4961_vm7, %v4405_v0, %v1807_v41  ;;  %v5448_v0 = vpop.permute.xlu1 %857  ;;  %4569 = vrot.lane.b32.xlu0 %v5226_v57, %s4689_s20  ;;  %vm6631_vm10 = vmmov %vm6626_vm3 }
  0xa3   : > { %v442_v11 = vsel %vm5326_vm4, %v5141_v55, %v441_v18  ;;  %v6627_v7 = vshll.u32 %v5124_v45, 16  ;;  %623 = vst [vmem:[#allocation2 + $0x10] sm:$0x44] %v622_v10  ;;  %v600_v25 = vsel %vm347_vm0, %v594_v27, %v595_v16  ;;  %v598_v48 = vsel %vm347_vm0, %v593_v46, %v594_v27  ;;  %v5453_v45 = vld [vmem:[%s4728_s17 + $0x10] ss:$0 sps:$4 sm:$0x22]   ;;  %vm6636_vm6 = vmmov %vm6626_vm3 }
  0xa4   : > { %1809 = vst [vmem:[#allocation2 + $0x80] sm:$0x11] %v1808_v23  ;;  %v1810_v55 = vld [vmem:[#allocation2 + $0x88] sm:$0x11]  ;;  %443 = vst [vmem:[#allocation2 + $0x10] sm:$0x22] %v442_v11  ;;  %v601_v16 = vsel %vm6630_vm12, %v4522_v50, %v600_v25  ;;  %v599_v63 = vsel %vm6631_vm10, %v4521_v20, %v598_v48  ;;  %v785_v32 = vsel %vm347_vm0, %v780_v62, %v781_v53  ;;  %2338 = vrot.lane.b32.xlu1 %v5199_v33, %s4688_s19  ;;  %v5468_v25 = vpop.permute.xlu0 %774 }
  0xa5   : > { %v445_v43 = vsel %vm5326_vm4, %v6627_v7, %v444_v54  ;;  %v5459_v19 = vrot.slane %v3009_v56, %v4723_v5  ;;  %v619_v27 = vsel %vm4854_vm11, %v601_v16, %v618_v35  ;;  %v616_v57 = vsel %vm4854_vm11, %v599_v63, %v615_v49  ;;  %v802_v46 = vld [vmem:[#allocation2] sm:$0x88]  ;;  %v805_v23 = vld [vmem:[#allocation2 + $0x8] sm:$0x88]  ;;  %vm6638_vm12 = vmmov %vm6636_vm6 }
  0xa6   : > { %446 = vst [vmem:[#allocation2 + $0x18] sm:$0x22] %v445_v43  ;;  %vm6632_vm15 = vcmask 916480   ;;  %v1811_v50 = vsel %vm4961_vm7, %v4406_v22, %v1810_v55  ;;  %620 = vst [vmem:[#allocation2 + $0x8] sm:$0x44] %v619_v27  ;;  %v6575_v35 = vrot.slane %v5468_v25, 4  ;;  %v2140_v49 = vrot.slane %v2126_v1, %v4723_v5  ;;  %v5477_v33 = vpop.permute.xlu1 %861 }
  0xa7   : > { %v786_v41 = vsel %vm6632_vm15, %v771_v3, %v785_v32  ;;  %617 = vst [vmem:[#allocation2] sm:$0x44] %v616_v57  ;;  %v2165_v56 = vshll.u32 %v5423_v15, 16  ;;  %1812 = vst [vmem:[#allocation2 + $0x88] sm:$0x11] %v1811_v50  ;;  %v6633_v3 = vrot.slane %v5118_v38, %v4723_v5  ;;  %v5488_v18 = vrot.slane %v2858_v42, %v4723_v5 }
  0xa8   : > { %v803_v20 = vsel %vm5444_vm9, %v786_v41, %v802_v46  ;;  %v5492_v1 = vsel %vm3360_vm1, %v5370_v36, 0  ;;  %v867_v54 = vrot.slane %v5448_v0, 4  ;;  %v787_v38 = vsel %vm347_vm0, %v781_v53, %v6575_v35  ;;  %v5504_v42 = vld.sshfl [vmem:[%s4728_s17 + $0x10] sm:$0x2 pattern:$0x76325410]  ;;  %vm6634_vm1 = vmmov %vm6632_vm15  ;;  %v860_v7 = vpop.permute.xlu0 %859 }
  0xa9   : > { %804 = vst [vmem:[#allocation2] sm:$0x88] %v803_v20  ;;  %2336 = vrot.lane.b32.xlu0 %v6633_v3, %s4688_s19  ;;  %v6574_v10 = vrot.slane %v5477_v33, 4  ;;  %v788_v36 = vsel %vm6634_vm1, %v5395_v13, %v787_v38  ;;  %v6635_v11 = vrot.slane %v5161_v9, 9  ;;  %v3051_v53 = vshrl.u32 %v5459_v19, 16  ;;  %vm6640_vm10 = vmmov %vm6636_vm6 }
  0xaa   : > { %v5514_v48 = vld [vmem:[%s4728_s17 + $0x8] sm:$0xaa]  ;;  %v3024_v55 = vcombine.high %v5337_v44, %v5337_v44  ;;  %v806_v16 = vsel %vm5444_vm9, %v788_v36, %v805_v23  ;;  %v868_v63 = vrot.slane %v860_v7, 4  ;;  %v2161_v13 = vshll.u32 %v2140_v49, 16  ;;  %v885_v9 = vld [vmem:[#allocation2 + $0x20] sm:$0x11]  ;;  %v1131_v57 = vpop.permute.xlu1 %1130  ;;  %vm6641_vm15 = vmmov %vm6636_vm6 }
  0xab   : > { %2428 = vrot.lane.b32.xlu1 %v6635_v11, %s4689_s20  ;;  %v5520_v32 = vrot.slane %v2165_v56, 6  ;;  %807 = vst [vmem:[#allocation2 + $0x8] sm:$0x88] %v806_v16  ;;  %v888_v27 = vld [vmem:[#allocation2 + $0x28] sm:$0x11]  ;;  %v5524_v19 = vrot.slane %v2165_v56, 7  ;;  %v2394_v44 = vcombine.high %v5189_v26, %v5189_v26  ;;  %v2664_v41 = vcombine.high %v5192_v29, %v5192_v29 }
  0xac   : > { %v872_v50 = vsel %vm347_vm0, %v867_v54, %v868_v63  ;;  %v875_v20 = vsel %vm347_vm0, %v868_v63, %v6574_v10  ;;  %v1139_v49 = vrot.slane %v1131_v57, 4  ;;  %v5538_v56 = vld [vmem:[%s4728_s17 + $0x10] ss:$0 sps:$4 sm:$0x11]   ;;  %v1129_v29 = vpop.permute.xlu0 %1128  ;;  %v3038_v38 = vrot.slane %v3024_v55, %v4723_v5 }
  0xad   : > { %2426 = vrot.lane.b32.xlu0 %v5201_v34, %s4689_s20  ;;  %v1186_v34 = vcombine.high %v5514_v48, %v5514_v48  ;;  %v874_v3 = vsel %vm873_vm5, %v5448_v0, %v872_v50  ;;  %v876_v26 = vsel %vm873_vm5, %v860_v7, %v875_v20  ;;  %v1138_v11 = vrot.slane %v1129_v29, 4  ;;  %v5555_v7 = vld [vmem:[%s4728_s17 + $0x8] sm:$0xaa]  ;;  %v5581_v20 = vld [vmem:[%s4728_s17] sm:$0xaa] }
  0xae   : > { %v886_v23 = vsel %vm4908_vm2, %v874_v3, %v885_v9  ;;  %v889_v36 = vsel %vm4908_vm2, %v876_v26, %v888_v27  ;;  %v5552_v0 = vrot.slane %v2161_v13, 6  ;;  %v5557_v16 = vpop.permute.xlu1 %1265  ;;  %v5561_v55 = vrot.slane %v3051_v53, 6 }
  0xaf   : > { %2711 = vrot.lane.b32.xlu1 %v5228_v58, %s4687_s18  ;;  %887 = vst [vmem:[#allocation2 + $0x20] sm:$0x11] %v886_v23  ;;  %890 = vst [vmem:[#allocation2 + $0x28] sm:$0x11] %v889_v36  ;;  %v1155_v58 = vld [vmem:[#allocation2 + $0x40] sm:$0x22]  ;;  %v5564_v63 = vrot.slane %v2394_v44, %v4723_v5  ;;  %v5570_v13 = vrot.slane %v2664_v41, %v4723_v5  ;;  %v1143_v27 = vsel %vm347_vm0, %v1138_v11, %v1139_v49 }
  0xb0   : > { %v5567_v9 = vshrl.u32 %v5504_v42, 16  ;;  %v5574_v50 = vrot.slane %v1186_v34, %v4723_v5  ;;  %v1144_v44 = vsel %vm6636_vm6, %v1129_v29, %v1143_v27  ;;  %v5586_v41 = vpop.permute.xlu0 %1132  ;;  %v3059_v26 = vshrl.u32 %v3038_v38, 16  ;;  %v1703_v23 = vld [vmem:[%s4728_s17 + $0x8] sm:$0xaa]  ;;  %v3315_v10 = vld [vmem:[#allocation2] sm:$0xff] }
  0xb1   : > { %2430 = vrot.lane.b32.xlu0 %v5276_v40, %s4689_s20  ;;  %v2557_v34 = vcombine.high %v5555_v7, %v5555_v7  ;;  %v1156_v36 = vsel %vm5207_vm13, %v1144_v44, %v1155_v58  ;;  %v6576_v11 = vrot.slane %v5586_v41, 4  ;;  %v1721_v27 = vcombine.high %v1703_v23, %v1703_v23  ;;  %v1295_v58 = vld [vmem:[#allocation2 + $0x48] sm:$0x44] }
  0xb2   : > { %1157 = vst [vmem:[#allocation2 + $0x40] sm:$0x22] %v1156_v36  ;;  %v5597_v54 = vpop.permute.xlu1 %1269  ;;  %v6637_v38 = vshrl.u32 %v5255_v37, 16  ;;  %v1275_v40 = vrot.slane %v5557_v16, 4  ;;  %vm3355_vm3 = vcmask 72704   ;;  %v1728_v37 = vrot.slane %v1703_v23, %v4723_v5  ;;  %v3316_v62 = vld [vmem:[#allocation2 + $0x8] sm:$0xff] }
  0xb3   : > { %2715 = vrot.lane.b32.xlu1 %v5278_v52, %s4687_s18  ;;  %v1158_v52 = vld [vmem:[#allocation2 + $0x48] sm:$0x22]  ;;  %v1145_v36 = vsel %vm347_vm0, %v1139_v49, %v6576_v11  ;;  %v6577_v46 = vrot.slane %v5597_v54, 4  ;;  %v6639_v53 = vrot.slane %v5215_v21, %v4723_v5  ;;  %v5619_v15 = vrot.slane %v3059_v26, 6 }
  0xb4   : > { %v1268_v3 = vpop.permute.xlu0 %1267  ;;  %v5622_v35 = vrot.slane %v2557_v34, %v4723_v5  ;;  %v4403_v29 = vrot.slane %v1728_v37, 9  ;;  %v1735_v21 = vrot.slane %v1721_v27, %v4723_v5 }
  0xb5   : > { %2713 = vrot.lane.b32.xlu0 %v6637_v38, %s4687_s18  ;;  %v1146_v38 = vsel %vm6638_vm12, %v1131_v57, %v1145_v36  ;;  %v1276_v57 = vrot.slane %v1268_v3, 4  ;;  %vm6650_vm12 = vmmov %vm6634_vm1 }
  0xb6   : > { %v1159_v23 = vsel %vm5207_vm13, %v1146_v38, %v1158_v52  ;;  %v3319_v36 = vld [vmem:[#allocation2 + $0x20] sm:$0x11]  ;;  %v3320_v11 = vld [vmem:[#allocation2 + $0x28] sm:$0x11]  ;;  %v5629_v26 = vpop.permute.xlu1 %1456  ;;  %v1755_v52 = vld [vmem:[#allocation2 + $0x90] sm:$0x11] }
  0xb7   : > { %2883 = vrot.lane.b32.xlu1 %v6639_v53, %s4689_s20  ;;  %1160 = vst [vmem:[#allocation2 + $0x48] sm:$0x22] %v1159_v23  ;;  %v1292_v53 = vld [vmem:[#allocation2 + $0x40] sm:$0x44]  ;;  %v4445_v34 = vcombine.high %v3315_v10, %v3319_v36  ;;  %v4447_v49 = vcombine.high %v3316_v62, %v3320_v11  ;;  %v4444_v43 = vcombine.low %v3315_v10, %v3319_v36  ;;  %v1465_v37 = vrot.slane %v5629_v26, 4 }
  0xb8   : > { %v4446_v44 = vcombine.low %v3316_v62, %v3320_v11  ;;  %v1280_v38 = vsel %vm347_vm0, %v1275_v40, %v1276_v57  ;;  %v1282_v27 = vsel %vm347_vm0, %v1276_v57, %v6577_v46  ;;  %v1756_v23 = vsel %vm4908_vm2, %v4403_v29, %v1755_v52  ;;  %v1455_v62 = vpop.permute.xlu0 %1454  ;;  %v5649_v57 = vld [vmem:[%s4728_s17] sm:$0x55]  ;;  %v1758_v36 = vld [vmem:[#allocation2 + $0x98] sm:$0x11]  ;;  %v1762_v52 = vld [vmem:[%s4728_s17 + $0x8] sm:$0xaa] }
  0xb9   : > { %2881 = vrot.lane.b32.xlu0 %v5310_v31, %s4689_s20  ;;  %v1281_v31 = vsel %vm6640_vm10, %v5557_v16, %v1280_v38  ;;  %v1283_v22 = vsel %vm6641_vm15, %v1268_v3, %v1282_v27  ;;  %v6642_v10 = vrot.slane %v5354_v28, 6  ;;  %v3367_v40 = vand.u32 %v4445_v34, %v5492_v1  ;;  %1757 = vst [vmem:[#allocation2 + $0x90] sm:$0x11] %v1756_v23  ;;  %v1205_v46 = vld [vmem:[#allocation2 + $0x40] sm:$0x22]  ;;  %vm6653_vm10 = vmmov %vm6634_vm1 }
  0xba   : > { %v3373_v11 = vand.u32 %v4447_v49, %v5492_v1  ;;  %v1293_v29 = vsel %vm4839_vm8, %v1281_v31, %v1292_v53  ;;  %v1296_v16 = vsel %vm4839_vm8, %v1283_v22, %v1295_v58  ;;  %v1464_v3 = vrot.slane %v1455_v62, 4  ;;  %v1481_v38 = vld [vmem:[#allocation2 + $0x40] sm:$0x88]  ;;  %v5662_v27 = vpop.permute.xlu1 %4529  ;;  %vm6654_vm15 = vmmov %vm6634_vm1 }
  0xbb   : > { %3066 = vrot.lane.b32.xlu1 %v6642_v10, %s4688_s19  ;;  %v3364_v28 = vand.u32 %v4444_v43, %v5492_v1  ;;  %v6643_v34 = vrot.slane %v5179_v17, %v4723_v5  ;;  %1294 = vst [vmem:[#allocation2 + $0x40] sm:$0x44] %v1293_v29  ;;  %1297 = vst [vmem:[#allocation2 + $0x48] sm:$0x44] %v1296_v16  ;;  %3387 = vmatprep.subr.bf16.mxu0 %v3367_v40  ;;  %v4404_v43 = vrot.slane %v1735_v21, 9 }
  0xbc   : > { %v3370_v22 = vand.u32 %v4446_v44, %v5492_v1  ;;  %v1780_v58 = vcombine.high %v1762_v52, %v1762_v52  ;;  %v1469_v17 = vsel %vm347_vm0, %v1464_v3, %v1465_v37  ;;  %v4531_v53 = vunpack.i.l.bf16 %v5662_v27  ;;  %3428 = vmatprep.subr.bf16.mxu1 %v3373_v11  ;;  %v5686_v10 = vpop.permute.xlu0 %1458  ;;  %v5694_v29 = vld [vmem:[%s4728_s17] sm:$0x55] }
  0xbd   : > { %v1206_v49 = vsel %vm5326_vm4, %v6643_v34, %v1205_v46  ;;  %2885 = vrot.lane.b32.xlu0 %v5488_v18, %s4689_s20  ;;  %3388 = vmatpush1.bf16.msra.mxu0 %v3364_v28  ;;  %v5672_v46 = vld [vmem:[%s6567_s1] sm:$0xf]  ;;  %v6644_v18 = vcombine.high %v5581_v20, %v5581_v20  ;;  %v2756_v21 = vcombine.high %v5649_v57, %v5649_v57  ;;  %v6645_v31 = vrot.slane %v5427_v14, 6 }
  0xbe   : > { %1207 = vst [vmem:[#allocation2 + $0x40] sm:$0x22] %v1206_v49  ;;  %v1470_v23 = vsel %vm6634_vm1, %v1455_v62, %v1469_v17  ;;  %3429 = vmatpush1.bf16.msra.mxu1 %v3370_v22  ;;  %v6646_v40 = vrot.slane %v5555_v7, %v4723_v5  ;;  %v1787_v16 = vrot.slane %v1762_v52, %v4723_v5  ;;  %v1208_v62 = vld [vmem:[#allocation2 + $0x48] sm:$0x22]  ;;  %v597_v14 = vrot.slane %v4531_v53, 4  ;;  %vm6661_vm1 = vmmov %vm6636_vm6 }
  0xbf   : > { %v5678_v44 = vrot.slane %v6644_v18, %v4723_v5  ;;  %3070 = vrot.lane.b32.xlu1 %v6645_v31, %s4688_s19  ;;  %v1759_v3 = vsel %vm4908_vm2, %v4404_v43, %v1758_v36  ;;  %v1482_v28 = vsel %vm5268_vm14, %v1470_v23, %v1481_v38  ;;  %v1466_v34 = vrot.slane %v5686_v10, 4  ;;  %v624_v22 = vld [vmem:[#allocation2 + $0x18] sm:$0x44]  ;;  %v1484_v36 = vld [vmem:[#allocation2 + $0x48] sm:$0x88]  ;;  %v779_v43 = vpop.permute.xlu1 %778 }
  0xc0   : > { %v5691_v11 = vshll.u32 %v6646_v40, 16  ;;  %v6647_v49 = vrot.slane %v5581_v20, %v4723_v5  ;;  %1760 = vst [vmem:[#allocation2 + $0x98] sm:$0x11] %v1759_v3  ;;  %v1209_v52 = vsel %vm5326_vm4, %v5245_v6, %v1208_v62  ;;  %1483 = vst [vmem:[#allocation2 + $0x40] sm:$0x88] %v1482_v28  ;;  %4452 = vmatmul.mubr.msk.bf16.vlgmr.msra.gmra.mrb[0].mxu0 %vm3355_vm3, %v5672_v46  ;;  %v4407_v38 = vrot.slane %v1787_v16, 9  ;;  %v777_v40 = vpop.permute.xlu0 %776 }
  0xc1   : > { %3068 = vrot.lane.b32.xlu0 %v5561_v55, %s4688_s19  ;;  %v2763_v20 = vrot.slane %v5649_v57, %v4723_v5  ;;  %v1794_v17 = vrot.slane %v1780_v58, %v4723_v5  ;;  %1210 = vst [vmem:[#allocation2 + $0x48] sm:$0x22] %v1209_v52  ;;  %v604_v6 = vsel %vm347_vm0, %v5393_v2, %v597_v14  ;;  %v784_v18 = vrot.slane %v779_v43, 4  ;;  %v1813_v23 = vld [vmem:[#allocation2 + $0x90] sm:$0x11] }
  0xc2   : > { %v5705_v7 = vshll.u32 %v6647_v49, 16  ;;  %v1471_v53 = vsel %vm347_vm0, %v1465_v37, %v1466_v34  ;;  %4453 = vmatmul.mubr.msk.bf16.vlgmr.msra.gmra.mrb[0].mxu1 %vm3355_vm3, %v5672_v46  ;;  %v2926_v55 = vcombine.low %v5694_v29, %v5694_v29  ;;  %v6648_v57 = vmov 0  }
  0xc3   : > { %3501 = vmatprep.mubr.bf16.mxu0 %v6648_v57  ;;  %v6649_v58 = vunpack.i.h.bf16 %v5363_v8  ;;  %v1472_v2 = vsel %vm6650_vm12, %v5629_v26, %v1471_v53  ;;  %v6651_v37 = vpack.i.bf16 %v5520_v32, %v5552_v0  ;;  %v4426_v16 = vrot.slane %v5691_v11, 9  ;;  %3542 = vmatprep.mubr.bf16.mxu1 %v6648_v57  ;;  %v5746_v32 = vld [vmem:[%s4728_s17 + $0x8] sm:$0x55]  ;;  %v866_v0 = vpop.permute.xlu1 %865  ;;  %vm6665_vm12 = vmmov %vm6661_vm1 }
  0xc4   : > { %v1814_v3 = vsel %vm4961_vm7, %v4407_v38, %v1813_v23  ;;  %v1485_v62 = vsel %vm5268_vm14, %v1472_v2, %v1484_v36  ;;  %v783_v26 = vrot.slane %v777_v40, 4  ;;  %v2595_v28 = vshll.u32 %v5622_v35, 16  ;;  %v808_v35 = vld [vmem:[#allocation2 + $0x10] sm:$0x88]  ;;  %v811_v23 = vld [vmem:[#allocation2 + $0x18] sm:$0x88] }
  0xc5   : > { %v605_v31 = vsel %vm6636_vm6, %v6649_v58, %v604_v6  ;;  %4574 = vrot.lane.b32.xlu1 %v6651_v37, %s4689_s20  ;;  %1815 = vst [vmem:[#allocation2 + $0x90] sm:$0x11] %v1814_v3  ;;  %1486 = vst [vmem:[#allocation2 + $0x48] sm:$0x88] %v1485_v62  ;;  %1972 = vrot.lane.b32.xlu0 %v5524_v19, %s4688_s19  ;;  %v4424_v14 = vrot.slane %v5705_v7, 9  ;;  %v2585_v49 = vshll.u32 %v5678_v44, 16  ;;  %v864_v58 = vpop.permute.xlu0 %863 }
  0xc6   : > { %v625_v8 = vsel %vm4854_vm11, %v605_v31, %v624_v22  ;;  %v5753_v52 = vrot.slane %v2756_v21, %v4723_v5  ;;  %v4408_v22 = vrot.slane %v1794_v17, 9  ;;  %v6652_v36 = vrot.slane %v5468_v25, 4  ;;  %v5762_v19 = vld [vmem:[%s4728_s17 + $0x8] sm:$0x55]  ;;  %vm6662_vm6 = vmmov %vm6661_vm1 }
  0xc7   : > { %626 = vst [vmem:[#allocation2 + $0x18] sm:$0x44] %v625_v8  ;;  %v791_v38 = vsel %vm347_vm0, %v783_v26, %v784_v18  ;;  %v871_v6 = vrot.slane %v866_v0, 4  ;;  %v5759_v53 = vrot.slane %v2763_v20, 7  ;;  %v6655_v17 = vrot.slane %v5453_v45, %v4723_v5  ;;  %v2465_v18 = vld [vmem:[%s4728_s17] sm:$0xaa] }
  0xc8   : > { %v789_v43 = vsel %vm347_vm0, %v6652_v36, %v783_v26  ;;  %v792_v21 = vsel %vm6654_vm15, %v777_v40, %v791_v38  ;;  %v5772_v31 = vrot.slane %v2926_v55, %v4723_v5  ;;  %v2778_v20 = vrot.slane %v5746_v32, %v4723_v5  ;;  %v1816_v2 = vld [vmem:[#allocation2 + $0x98] sm:$0x11]  ;;  %v891_v45 = vld [vmem:[#allocation2 + $0x30] sm:$0x11]  ;;  %v1137_v55 = vpop.permute.xlu1 %1136 }
  0xc9   : > { %v790_v44 = vsel %vm6653_vm10, %v5468_v25, %v789_v43  ;;  %2342 = vrot.lane.b32.xlu1 %v6655_v17, %s4688_s19  ;;  %v812_v25 = vsel %vm5444_vm9, %v792_v21, %v811_v23  ;;  %v870_v40 = vrot.slane %v864_v58, 4  ;;  %v2469_v3 = vcombine.high %v2465_v18, %v2465_v18  ;;  %v894_v8 = vld [vmem:[#allocation2 + $0x38] sm:$0x11]  ;;  %v5795_v21 = vld [vmem:[%s4728_s17 + $0x8] sm:$0xaa]  ;;  %vm6666_vm10 = vmmov %vm6661_vm1 }
  0xca   : > { %v809_v37 = vsel %vm5444_vm9, %v790_v44, %v808_v35  ;;  %813 = vst [vmem:[#allocation2 + $0x18] sm:$0x88] %v812_v25  ;;  %v6656_v62 = vrot.slane %v5127_v47, %v4723_v5  ;;  %v4427_v26 = vrot.slane %v2595_v28, 9  ;;  %v2794_v0 = vrot.slane %v5753_v52, 7 }
  0xcb   : > { %810 = vst [vmem:[#allocation2 + $0x10] sm:$0x88] %v809_v37  ;;  %v2941_v35 = vcombine.low %v5762_v19, %v5762_v19  ;;  %v1817_v36 = vsel %vm4961_vm7, %v4408_v22, %v1816_v2  ;;  %v6657_v43 = vrot.slane %v5477_v33, 4  ;;  %v879_v23 = vsel %vm347_vm0, %v870_v40, %v871_v6  ;;  %v1135_v2 = vpop.permute.xlu0 %1134 }
  0xcc   : > { %2340 = vrot.lane.b32.xlu0 %v6656_v62, %s4688_s19  ;;  %v1142_v44 = vrot.slane %v1137_v55, 4  ;;  %v2476_v47 = vrot.slane %v2465_v18, %v4723_v5  ;;  %1818 = vst [vmem:[#allocation2 + $0x98] sm:$0x11] %v1817_v36  ;;  %v880_v17 = vsel %vm873_vm5, %v864_v58, %v879_v23  ;;  %v6658_v22 = vrot.slane %v5504_v42, 9  ;;  %v1164_v55 = vld [vmem:[#allocation2 + $0x58] sm:$0x22]  ;;  %v1274_v62 = vpop.permute.xlu1 %1273 }
  0xcd   : > { %v877_v38 = vsel %vm347_vm0, %v6657_v43, %v870_v40  ;;  %v2491_v37 = vrot.slane %v5795_v21, %v4723_v5  ;;  %v2483_v6 = vrot.slane %v2469_v3, %v4723_v5  ;;  %v895_v18 = vsel %vm4908_vm2, %v880_v17, %v894_v8  ;;  %v5821_v17 = vld [vmem:[%s4728_s17] sm:$0xaa] }
  0xce   : > { %v878_v28 = vsel %vm873_vm5, %v5477_v33, %v877_v38  ;;  %2434 = vrot.lane.b32.xlu1 %v6658_v22, %s4689_s20  ;;  %v1161_v33 = vld [vmem:[#allocation2 + $0x50] sm:$0x22]  ;;  %v1141_v40 = vrot.slane %v1135_v2, 4  ;;  %v2500_v58 = vshrl.u32 %v2476_v47, 16  ;;  %896 = vst [vmem:[#allocation2 + $0x38] sm:$0x11] %v895_v18  ;;  %v2940_v3 = vrot.slane %v5694_v29, %v4723_v5 }
  0xcf   : > { %v892_v25 = vsel %vm4908_vm2, %v878_v28, %v891_v45  ;;  %v6659_v36 = vrot.slane %v5564_v63, 9  ;;  %v4425_v43 = vrot.slane %v2585_v49, 9  ;;  %v2510_v45 = vshrl.u32 %v2491_v37, 16  ;;  %v1272_v37 = vpop.permute.xlu0 %1271  ;;  %v2524_v18 = vld [vmem:[#allocation2 + $0xc0] sm:$0x11] }
  0xd0   : > { %893 = vst [vmem:[#allocation2 + $0x30] sm:$0x11] %v892_v25  ;;  %v2505_v38 = vshrl.u32 %v2483_v6, 16  ;;  %v6660_v8 = vrot.slane %v5586_v41, 4  ;;  %v1149_v47 = vsel %vm347_vm0, %v1141_v40, %v1142_v44  ;;  %v1279_v28 = vrot.slane %v1274_v62, 4 }
  0xd1   : > { %2432 = vrot.lane.b32.xlu0 %v6659_v36, %s4689_s20  ;;  %v4419_v22 = vrot.slane %v2500_v58, 9  ;;  %v1150_v49 = vsel %vm6662_vm6, %v1135_v2, %v1149_v47  ;;  %v4421_v6 = vrot.slane %v2510_v45, 9  ;;  %v2527_v36 = vld [vmem:[#allocation2 + $0xc8] sm:$0x11]  ;;  %v1278_v58 = vrot.slane %v1272_v37, 4 }
  0xd2   : > { %v1147_v23 = vsel %vm347_vm0, %v6660_v8, %v1141_v40  ;;  %2719 = vrot.lane.b32.xlu1 %v5567_v9, %s4687_s18  ;;  %v4420_v25 = vrot.slane %v2505_v38, 9  ;;  %v1165_v40 = vsel %vm5207_vm13, %v1150_v49, %v1164_v55  ;;  %v2530_v62 = vld [vmem:[#allocation2 + $0xd0] sm:$0x11]  ;;  %v1298_v2 = vld [vmem:[#allocation2 + $0x50] sm:$0x44]  ;;  %v6663_v45 = vshrl.u32 %v5570_v13, 16 }
  0xd3   : > { %v1148_v63 = vsel %vm6661_vm1, %v5586_v41, %v1147_v23  ;;  %v2525_v41 = vsel %vm4908_vm2, %v4419_v22, %v2524_v18  ;;  %1166 = vst [vmem:[#allocation2 + $0x58] sm:$0x22] %v1165_v40  ;;  %v1301_v8 = vld [vmem:[#allocation2 + $0x58] sm:$0x44]  ;;  %v1463_v23 = vpop.permute.xlu1 %1462  ;;  %v3111_v55 = vcombine.high %v5821_v17, %v5821_v17  ;;  %v2531_v38 = vsel %vm4908_vm2, %v4421_v6, %v2530_v62  ;;  %v3317_v18 = vld [vmem:[#allocation2 + $0x10] sm:$0xff]  ;;  %vm6669_vm1 = vmmov %vm6654_vm15 }
  0xd4   : > { %v1162_v44 = vsel %vm5207_vm13, %v1148_v63, %v1161_v33  ;;  %v5839_v33 = vpack.i.bf16 %v4427_v26, %v4426_v16  ;;  %2526 = vst [vmem:[#allocation2 + $0xc0] sm:$0x11] %v2525_v41  ;;  %v2528_v47 = vsel %vm4908_vm2, %v4420_v25, %v2527_v36  ;;  %v4532_v22 = vunpack.i.h.bf16 %v5662_v27  ;;  %2532 = vst [vmem:[#allocation2 + $0xd0] sm:$0x11] %v2531_v38  ;;  %v1461_v25 = vpop.permute.xlu0 %1460  ;;  %v3318_v40 = vld [vmem:[#allocation2 + $0x18] sm:$0xff] }
  0xd5   : > { %1163 = vst [vmem:[#allocation2 + $0x50] sm:$0x22] %v1162_v44  ;;  %2717 = vrot.lane.b32.xlu0 %v6663_v45, %s4687_s18  ;;  %v6664_v63 = vrot.slane %v5597_v54, 4  ;;  %v1286_v11 = vsel %vm347_vm0, %v1278_v58, %v1279_v28  ;;  %v1468_v16 = vrot.slane %v1463_v23, 4  ;;  %2529 = vst [vmem:[#allocation2 + $0xc8] sm:$0x11] %v2528_v47  ;;  %v6667_v6 = vrot.slane %v5538_v56, %v4723_v5 }
  0xd6   : > { %v1287_v49 = vsel %vm6666_vm10, %v1272_v37, %v1286_v11  ;;  %v5861_v36 = vpack.i.bf16 %v4425_v43, %v4424_v14  ;;  %v5867_v28 = vrot.slane %v2941_v35, %v4723_v5  ;;  %v1467_v56 = vrot.slane %v1461_v25, 4  ;;  %v1487_v14 = vld [vmem:[#allocation2 + $0x50] sm:$0x88]  ;;  %v1490_v43 = vld [vmem:[#allocation2 + $0x58] sm:$0x88]  ;;  %vm6673_vm10 = vmmov %vm6662_vm6 }
  0xd7   : > { %v1284_v13 = vsel %vm347_vm0, %v6664_v63, %v1278_v58  ;;  %2889 = vrot.lane.b32.xlu1 %v6667_v6, %s4689_s20  ;;  %v1302_v37 = vsel %vm4839_vm8, %v1287_v49, %v1301_v8  ;;  %v3321_v44 = vld [vmem:[#allocation2 + $0x30] sm:$0x11]  ;;  %v3322_v58 = vld [vmem:[#allocation2 + $0x38] sm:$0x11]  ;;  %v3118_v7 = vrot.slane %v5821_v17, %v4723_v5  ;;  %v5875_v62 = vpop.permute.xlu1 %1352  ;;  %v6668_v35 = vrot.slane %v5293_v61, %v4723_v5 }
  0xd8   : > { %v1285_v26 = vsel %vm6665_vm12, %v5597_v54, %v1284_v13  ;;  %1303 = vst [vmem:[#allocation2 + $0x58] sm:$0x44] %v1302_v37  ;;  %v4448_v41 = vcombine.low %v3317_v18, %v3321_v44  ;;  %v4451_v8 = vcombine.high %v3318_v40, %v3322_v58  ;;  %v5882_v23 = vrot.slane %v3111_v55, %v4723_v5  ;;  %v5896_v13 = vpop.permute.xlu0 %4534  ;;  %vm6672_vm12 = vmmov %vm6662_vm6 }
  0xd9   : > { %v1299_v54 = vsel %vm4839_vm8, %v1285_v26, %v1298_v2  ;;  %2887 = vrot.lane.b32.xlu0 %v6668_v35, %s4689_s20  ;;  %v4449_v2 = vcombine.high %v3317_v18, %v3321_v44  ;;  %v1036_v17 = vrot.slane %v4532_v22, 4  ;;  %v1473_v45 = vsel %vm347_vm0, %v1466_v34, %v1467_v56  ;;  %v5901_v34 = vld [vmem:[%s4728_s17 + $0x8] sm:$0xaa] }
  0xda   : > { %1300 = vst [vmem:[#allocation2 + $0x50] sm:$0x44] %v1299_v54  ;;  %v1475_v38 = vsel %vm347_vm0, %v1467_v56, %v1468_v16  ;;  %v4450_v47 = vcombine.low %v3318_v40, %v3322_v58  ;;  %v1474_v61 = vsel %vm6654_vm15, %v5686_v10, %v1473_v45  ;;  %v6670_v55 = vrot.slane %v5567_v9, 6  ;;  %v1214_v16 = vld [vmem:[#allocation2 + $0x58] sm:$0x22]  ;;  %vm6674_vm15 = vmmov %vm6662_vm6 }
  0xdb   : > { %v1476_v63 = vsel %vm6669_vm1, %v1461_v25, %v1475_v38  ;;  %v3379_v11 = vand.u32 %v4449_v2, %v5492_v1  ;;  %v3385_v26 = vand.u32 %v4451_v8, %v5492_v1  ;;  %v1488_v6 = vsel %vm5268_vm14, %v1474_v61, %v1487_v14  ;;  %v5910_v54 = vld [vmem:[%s4728_s17] sm:$0xaa]  ;;  %v5921_v58 = vpop.permute.xlu1 %1356  ;;  %v1053_v2 = vld [vmem:[#allocation2 + $0x40] sm:$0x11]  ;;  %v1056_v8 = vld [vmem:[#allocation2 + $0x48] sm:$0x11] }
  0xdc   : > { %3074 = vrot.lane.b32.xlu1 %v6670_v55, %s4688_s19  ;;  %v1211_v49 = vld [vmem:[#allocation2 + $0x50] sm:$0x22]  ;;  %v1491_v10 = vsel %vm5268_vm14, %v1476_v63, %v1490_v43  ;;  %v4537_v25 = vunpack.i.h.bf16 %v5896_v13  ;;  %v4536_v18 = vunpack.i.l.bf16 %v5896_v13  ;;  %v6671_v37 = vrot.slane %v5514_v48, %v4723_v5  ;;  %1489 = vst [vmem:[#allocation2 + $0x50] sm:$0x88] %v1488_v6  ;;  %vm6675_vm1 = vmmov %vm6662_vm6 }
  0xdd   : > { %v1215_v44 = vsel %vm5326_vm4, %v5574_v50, %v1214_v16  ;;  %1492 = vst [vmem:[#allocation2 + $0x58] sm:$0x88] %v1491_v10  ;;  %v1362_v40 = vrot.slane %v5875_v62, 4  ;;  %3072 = vrot.lane.b32.xlu0 %v5619_v15, %s4688_s19  ;;  %3469 = vmatprep.subr.bf16.mxu0 %v3379_v11  ;;  %v3376_v14 = vand.u32 %v4448_v41, %v5492_v1  ;;  %v1364_v50 = vrot.slane %v5921_v58, 4  ;;  %v1355_v15 = vpop.permute.xlu0 %1354 }
  0xde   : > { %v1212_v56 = vsel %vm5326_vm4, %v6671_v37, %v1211_v49  ;;  %1216 = vst [vmem:[#allocation2 + $0x58] sm:$0x22] %v1215_v44  ;;  %v5928_v48 = vrot.slane %v4537_v25, 4  ;;  %v1037_v43 = vrot.slane %v4536_v18, 4  ;;  %3510 = vmatprep.subr.bf16.mxu1 %v3385_v26  ;;  %v3382_v35 = vand.u32 %v4450_v47, %v5492_v1 }
  0xdf   : > { %1213 = vst [vmem:[#allocation2 + $0x50] sm:$0x22] %v1212_v56  ;;  %3470 = vmatpush1.bf16.msra.mxu0 %v3376_v14  ;;  %v5937_v41 = vrot.slane %v2778_v20, 7  ;;  %v3133_v45 = vrot.slane %v5901_v34, %v4723_v5  ;;  %v3213_v38 = vcombine.high %v5910_v54, %v5910_v54  ;;  %v3220_v47 = vrot.slane %v5910_v54, %v4723_v5  ;;  %v5954_v26 = vpop.permute.xlu1 %4544 }
  0xe0   : > { %4584 = vrot.lane.b32.xlu1 %v5839_v33, %s4687_s18  ;;  %v1041_v61 = vsel %vm347_vm0, %v1036_v17, %v1037_v43  ;;  %v1043_v33 = vsel %vm347_vm0, %v1037_v43, %v5928_v48  ;;  %3511 = vmatpush1.bf16.msra.mxu1 %v3382_v35  ;;  %v1363_v63 = vrot.slane %v1355_v15, 4  ;;  %v5948_v55 = vshll.u32 %v3118_v7, 16 }
  0xe1   : > { %v1042_v20 = vsel %vm6662_vm6, %v4532_v22, %v1041_v61  ;;  %v1044_v11 = vsel %vm6672_vm12, %v4536_v18, %v1043_v33  ;;  %4579 = vrot.lane.b32.xlu0 %v5861_v36, %s4687_s18  ;;  %v3153_v17 = vshll.u32 %v5882_v23, 16  ;;  %v2484_v49 = vcombine.high %v5795_v21, %v5795_v21  ;;  %v1379_v36 = vld [vmem:[#allocation2 + $0x40] sm:$0x44]  ;;  %v1382_v23 = vld [vmem:[#allocation2 + $0x48] sm:$0x44]  ;;  %v4540_v37 = vpop.permute.xlu0 %4539  ;;  %vm6676_vm6 = vmmov %vm6675_vm1 }
  0xe2   : > { %v1054_v7 = vsel %vm4961_vm7, %v1042_v20, %v1053_v2  ;;  %v1057_v27 = vsel %vm4961_vm7, %v1044_v11, %v1056_v8  ;;  %v1367_v22 = vsel %vm347_vm0, %v1362_v40, %v1363_v63  ;;  %v1369_v16 = vsel %vm347_vm0, %v1363_v63, %v1364_v50  ;;  %4454 = vmatmul.mubr.msk.bf16.vlgmr.msra.gmra.mrb[4].mxu0 %vm3355_vm3, %v5672_v46  ;;  %v1690_v63 = vld [vmem:[#allocation2 + $0x60] sm:$0x11] }
  0xe3   : > { %1055 = vst [vmem:[#allocation2 + $0x40] sm:$0x11] %v1054_v7  ;;  %1058 = vst [vmem:[#allocation2 + $0x48] sm:$0x11] %v1057_v27  ;;  %v1368_v21 = vsel %vm6673_vm10, %v5875_v62, %v1367_v22  ;;  %v1370_v6 = vsel %vm6674_vm15, %v1355_v15, %v1369_v16  ;;  %v4547_v10 = vunpack.i.h.bf16 %v5954_v26  ;;  %v4546_v18 = vunpack.i.l.bf16 %v5954_v26  ;;  %4455 = vmatmul.mubr.msk.bf16.vlgmr.msra.gmra.mrb[4].mxu1 %vm3355_vm3, %v5672_v46  ;;  %v1666_v14 = vpop.permute.xlu1 %1665  ;;  %v2533_v16 = vld [vmem:[#allocation2 + $0xd8] sm:$0x11] }
  0xe4   : > { %2800 = vrot.lane.b32.xlu1 %v2794_v0, %s4688_s19  ;;  %v1380_v56 = vsel %vm4854_vm11, %v1368_v21, %v1379_v36  ;;  %v1383_v62 = vsel %vm4854_vm11, %v1370_v6, %v1382_v23  ;;  %v4542_v44 = vunpack.i.h.bf16 %v4540_v37  ;;  %v4541_v40 = vunpack.i.l.bf16 %v4540_v37  ;;  %3647 = vmatprep.mubr.bf16.mxu0 %v6648_v57  ;;  %v1586_v23 = vld [vmem:[#allocation2 + $0x48] sm:$0x88]  ;;  %v1592_v13 = vld [vmem:[#allocation2 + $0x58] sm:$0x88]  ;;  %v1696_v26 = vld [vmem:[#allocation2 + $0x70] sm:$0x11] }
  0xe5   : > { %3688 = vmatprep.mubr.bf16.mxu1 %v6648_v57  ;;  %1381 = vst [vmem:[#allocation2 + $0x40] sm:$0x44] %v1380_v56  ;;  %1384 = vst [vmem:[#allocation2 + $0x48] sm:$0x44] %v1383_v62  ;;  %v5989_v52 = vrot.slane %v4547_v10, 4  ;;  %v1568_v0 = vrot.slane %v4546_v18, 4  ;;  %2798 = vrot.lane.b32.xlu0 %v5759_v53, %s4688_s19  ;;  %v2498_v35 = vrot.slane %v2484_v49, %v4723_v5  ;;  %v1664_v20 = vpop.permute.xlu0 %1663 }
  0xe6   : > { %v3157_v43 = vshll.u32 %v3133_v45, 16  ;;  %v1567_v2 = vrot.slane %v4542_v44, 4  ;;  %v1566_v8 = vrot.slane %v4541_v40, 4  ;;  %v1674_v15 = vrot.slane %v1666_v14, 4  ;;  %v1589_v49 = vld [vmem:[#allocation2 + $0x50] sm:$0x88] }
  0xe7   : > { %v3227_v61 = vrot.slane %v3213_v38, %v4723_v5  ;;  %v1575_v33 = vsel %vm347_vm0, %v1568_v0, %v5989_v52  ;;  %v3151_v11 = vrot.slane %v5948_v55, 6  ;;  %v3155_v7 = vrot.slane %v3153_v17, 6  ;;  %v1863_v17 = vpop.permute.xlu1 %1862  ;;  %v6015_v62 = vld [vmem:[%s4728_s17 + $0x8] sm:$0xaa] }
  0xe8   : > { %2964 = vrot.lane.b32.xlu1 %v5772_v31, %s4689_s20  ;;  %v2515_v53 = vshrl.u32 %v2498_v35, 16  ;;  %v1576_v45 = vsel %vm873_vm5, %v4546_v18, %v1575_v33  ;;  %v1573_v27 = vsel %vm347_vm0, %v1567_v2, %v1568_v0  ;;  %v1571_v38 = vsel %vm347_vm0, %v1566_v8, %v1567_v2  ;;  %v1583_v31 = vld [vmem:[#allocation2 + $0x40] sm:$0x88]  ;;  %v1693_v33 = vld [vmem:[#allocation2 + $0x68] sm:$0x11] }
  0xe9   : > { %v1673_v22 = vrot.slane %v1664_v20, 4  ;;  %v1590_v36 = vsel %vm5444_vm9, %v1576_v45, %v1589_v49  ;;  %v1574_v21 = vsel %vm873_vm5, %v4542_v44, %v1573_v27  ;;  %v1572_v55 = vsel %vm873_vm5, %v4541_v40, %v1571_v38  ;;  %2802 = vrot.lane.b32.xlu0 %v5937_v41, %s4688_s19  ;;  %v6020_v41 = vpop.permute.xlu0 %1667  ;;  %v1889_v27 = vld [vmem:[#allocation2 + $0x80] sm:$0x22]  ;;  %v1892_v38 = vld [vmem:[#allocation2 + $0x88] sm:$0x22] }
  0xea   : > { %v4422_v6 = vrot.slane %v2515_v53, 9  ;;  %1591 = vst [vmem:[#allocation2 + $0x50] sm:$0x88] %v1590_v36  ;;  %v1587_v18 = vsel %vm5444_vm9, %v1574_v21, %v1586_v23  ;;  %v1584_v37 = vsel %vm5444_vm9, %v1572_v55, %v1583_v31  ;;  %v3159_v40 = vrot.slane %v3157_v43, 6 }
  0xeb   : > { %v1678_v56 = vsel %vm347_vm0, %v1673_v22, %v1674_v15  ;;  %1588 = vst [vmem:[#allocation2 + $0x48] sm:$0x88] %v1587_v18  ;;  %1585 = vst [vmem:[#allocation2 + $0x40] sm:$0x88] %v1584_v37  ;;  %v3256_v0 = vshrl.u32 %v3227_v61, 16  ;;  %v1675_v8 = vrot.slane %v6020_v41, 4  ;;  %v6027_v53 = vpop.permute.xlu1 %1866  ;;  %v3235_v61 = vrot.slane %v6015_v62, %v4723_v5 }
  0xec   : > { %v1679_v44 = vsel %vm873_vm5, %v1664_v20, %v1678_v56  ;;  %2968 = vrot.lane.b32.xlu1 %v5867_v28, %s4689_s20  ;;  %v2534_v35 = vsel %vm4908_vm2, %v4422_v6, %v2533_v16  ;;  %v4588_v28 = vpack.i.bf16 %v3155_v7, %v3151_v11  ;;  %v3251_v43 = vshrl.u32 %v3220_v47, 16 }
  0xed   : > { %v1691_v2 = vsel %vm4908_vm2, %v1679_v44, %v1690_v63  ;;  %2535 = vst [vmem:[#allocation2 + $0xd8] sm:$0x11] %v2534_v35  ;;  %2966 = vrot.lane.b32.xlu0 %v2940_v3, %s4689_s20  ;;  %v1872_v63 = vrot.slane %v1863_v17, 4  ;;  %v1680_v20 = vsel %vm347_vm0, %v1674_v15, %v1675_v8  ;;  %v1874_v45 = vrot.slane %v6027_v53, 4  ;;  %v1865_v29 = vpop.permute.xlu0 %1864 }
  0xee   : > { %1692 = vst [vmem:[#allocation2 + $0x60] sm:$0x11] %v1691_v2  ;;  %v1681_v49 = vsel %vm873_vm5, %v1666_v14, %v1680_v20  ;;  %v4440_v3 = vrot.slane %v3256_v0, 9  ;;  %v2600_v11 = vshll.u32 %v5504_v42, 16  ;;  %v1873_v47 = vrot.slane %v1865_v29, 4 }
  0xef   : > { %v1694_v54 = vsel %vm4908_vm2, %v1681_v49, %v1693_v33  ;;  %v2771_v7 = vcombine.high %v5746_v32, %v5746_v32  ;;  %v3126_v15 = vcombine.high %v5901_v34, %v5901_v34  ;;  %v2069_v14 = vpop.permute.xlu1 %2068  ;;  %v4439_v22 = vrot.slane %v3251_v43, 9  ;;  %v2093_v0 = vld [vmem:[#allocation2 + $0x80] sm:$0x44]  ;;  %v4667_v20 = vld [vmem:[%s4728_s17 + $0x10] ss:$0 sps:$4 sm:$0x11]  }
  0xf0   : > { %3172 = vrot.lane.b32.xlu1 %v3159_v40, %s4689_s20  ;;  %1695 = vst [vmem:[#allocation2 + $0x68] sm:$0x11] %v1694_v54  ;;  %v3261_v16 = vshrl.u32 %v3235_v61, 16  ;;  %v1877_v36 = vsel %vm347_vm0, %v1872_v63, %v1873_v47  ;;  %v1879_v31 = vsel %vm347_vm0, %v1873_v47, %v1874_v45  ;;  %v2077_v23 = vrot.slane %v2069_v14, 4 }
  0xf1   : > { %4589 = vrot.lane.b32.xlu0 %v4588_v28, %s4689_s20  ;;  %v1878_v32 = vsel %vm6675_vm1, %v1863_v17, %v1877_v36  ;;  %v1880_v21 = vsel %vm6676_vm6, %v1865_v29, %v1879_v31  ;;  %v2067_v34 = vpop.permute.xlu0 %2066  ;;  %v4428_v55 = vrot.slane %v2600_v11, 9  ;;  %v3228_v6 = vcombine.high %v6015_v62, %v6015_v62  ;;  %v4676_v61 = vld.sshfl [vmem:[%s4728_s17 + $0x10] sm:$0x1 pattern:$0x76325410] }
  0xf2   : > { %v1890_v18 = vsel %vm5207_vm13, %v1878_v32, %v1889_v27  ;;  %v1893_v37 = vsel %vm5207_vm13, %v1880_v21, %v1892_v38  ;;  %v2076_v56 = vrot.slane %v2067_v34, 4  ;;  %v3551_v17 = vld [vmem:[#allocation2 + $0x40] sm:$0xff]  ;;  %v2785_v40 = vrot.slane %v2771_v7, %v4723_v5  ;;  %v3552_v27 = vld [vmem:[#allocation2 + $0x48] sm:$0xff] }
  0xf3   : > { %1891 = vst [vmem:[#allocation2 + $0x80] sm:$0x22] %v1890_v18  ;;  %1894 = vst [vmem:[#allocation2 + $0x88] sm:$0x22] %v1893_v37  ;;  %v2252_v35 = vpop.permute.xlu1 %2251  ;;  %v4441_v62 = vrot.slane %v3261_v16, 9  ;;  %v3140_v28 = vrot.slane %v3126_v15, %v4723_v5  ;;  %v2797_v63 = vrot.slane %v4676_v61, 7  ;;  %v3242_v47 = vrot.slane %v3228_v6, %v4723_v5 }
  0xf4   : > { %3277 = vrot.lane.b32.xlu1 %v4440_v3, %s4689_s20  ;;  %v2081_v43 = vsel %vm347_vm0, %v2076_v56, %v2077_v23  ;;  %vm6677_vm12 = vcmask 916480   ;;  %v2796_v36 = vrot.slane %v2785_v40, 7  ;;  %v2963_v18 = vrot.slane %v4667_v20, %v4723_v5 }
  0xf5   : > { %v3555_v44 = vld [vmem:[#allocation2 + $0x60] sm:$0x11]  ;;  %3275 = vrot.lane.b32.xlu0 %v4439_v22, %s4689_s20  ;;  %v2082_v49 = vsel %vm6677_vm12, %v2067_v34, %v2081_v43  ;;  %v6075_v29 = vpop.permute.xlu0 %2070  ;;  %v2096_v22 = vld [vmem:[#allocation2 + $0x88] sm:$0x44]  ;;  %v3161_v21 = vshll.u32 %v3140_v28, 16  ;;  %v2261_v34 = vrot.slane %v2252_v35, 4  ;;  %vm6678_vm10 = vmmov %vm6677_vm12 }
  0xf6   : > { %v4456_v2 = vcombine.low %v3551_v17, %v3555_v44  ;;  %v4457_v33 = vcombine.high %v3551_v17, %v3555_v44  ;;  %v2094_v7 = vsel %vm4839_vm8, %v2082_v49, %v2093_v0  ;;  %v2078_v15 = vrot.slane %v6075_v29, 4  ;;  %vm6679_vm15 = vmmov %vm6678_vm10 }
  0xf7   : > { %v3556_v38 = vld [vmem:[#allocation2 + $0x68] sm:$0x11]  ;;  %2095 = vst [vmem:[#allocation2 + $0x80] sm:$0x44] %v2094_v7  ;;  %v6083_v16 = vpop.permute.xlu1 %2255  ;;  %v3266_v40 = vshrl.u32 %v3242_v47, 16  ;;  %v3163_v28 = vrot.slane %v3161_v21, 6  ;;  %vm6680_vm1 = vmmov %vm6678_vm10 }
  0xf8   : > { %2612 = vrot.lane.b32.xlu1 %v4428_v55, %s4687_s18  ;;  %v3595_v3 = vand.u32 %v4457_v33, %v5492_v1  ;;  %v3592_v54 = vand.u32 %v4456_v2, %v5492_v1  ;;  %v4458_v31 = vcombine.low %v3552_v27, %v3556_v38  ;;  %v4459_v32 = vcombine.high %v3552_v27, %v3556_v38  ;;  %v2281_v2 = vld [vmem:[#allocation2 + $0x88] sm:$0x88]  ;;  %v1385_v7 = vld [vmem:[#allocation2 + $0x50] sm:$0x44]  ;;  %v1059_v21 = vld [vmem:[#allocation2 + $0x50] sm:$0x11] }
  0xf9   : > { %3279 = vrot.lane.b32.xlu0 %v4441_v62, %s4689_s20  ;;  %v2083_v55 = vsel %vm347_vm0, %v2077_v23, %v2078_v15  ;;  %v2263_v6 = vrot.slane %v6083_v16, 4  ;;  %v2254_v56 = vpop.permute.xlu0 %2253  ;;  %v2278_v23 = vld [vmem:[#allocation2 + $0x80] sm:$0x88]  ;;  %v3167_v43 = vrot.slane %v2600_v11, 6  ;;  %v4442_v42 = vrot.slane %v3266_v40, 9  ;;  %vm6681_vm12 = vmmov %vm6676_vm6 }
  0xfa   : > { %3615 = vmatprep.subr.bf16.mxu0 %v3595_v3  ;;  %v2084_v37 = vsel %vm6678_vm10, %v2069_v14, %v2083_v55  ;;  %v3601_v17 = vand.u32 %v4459_v32, %v5492_v1  ;;  %v3598_v44 = vand.u32 %v4458_v31, %v5492_v1  ;;  %v2262_v62 = vrot.slane %v2254_v56, 4  ;;  %vm6682_vm10 = vmmov %vm6676_vm6 }
  0xfb   : > { %3616 = vmatpush1.bf16.msra.mxu0 %v3592_v54  ;;  %v2097_v0 = vsel %vm4839_vm8, %v2084_v37, %v2096_v22  ;;  %v1359_v33 = vpop.permute.xlu1 %1358  ;;  %v2955_v14 = vrot.slane %v5762_v19, %v4723_v5  ;;  %v4593_v22 = vpack.i.bf16 %v3167_v43, %v3163_v28 }
  0xfc   : > { %2806 = vrot.lane.b32.xlu1 %v2797_v63, %s4688_s19  ;;  %2098 = vst [vmem:[#allocation2 + $0x88] sm:$0x44] %v2097_v0  ;;  %3656 = vmatprep.subr.bf16.mxu1 %v3601_v17  ;;  %v2266_v61 = vsel %vm347_vm0, %v2261_v34, %v2262_v62  ;;  %v2268_v63 = vsel %vm347_vm0, %v2262_v62, %v2263_v6  ;;  %v1365_v20 = vrot.slane %v1359_v33, 4  ;;  %v1062_v34 = vld [vmem:[#allocation2 + $0x58] sm:$0x11]  ;;  %v4443_v17 = vrot.slane %v5567_v9, 9 }
  0xfd   : > { %2804 = vrot.lane.b32.xlu0 %v2796_v36, %s4688_s19  ;;  %3657 = vmatpush1.bf16.msra.mxu1 %v3598_v44  ;;  %v2267_v49 = vsel %vm6679_vm15, %v2252_v35, %v2266_v61  ;;  %v2269_v3 = vsel %vm6680_vm1, %v2254_v56, %v2268_v63  ;;  %v4550_v5 = vpop.permute.xlu0 %4549  ;;  %vm6683_vm15 = vmmov %vm6676_vm6  ;;  %v1699_v63 = vld [vmem:[#allocation2 + $0x78] sm:$0x11] }
  0xfe   : > { %4464 = vmatmul.mubr.msk.bf16.vlgmr.msra.gmra.mrb[8].mxu0 %vm3355_vm3, %v5672_v46  ;;  %v2279_v19 = vsel %vm5268_vm14, %v2267_v49, %v2278_v23  ;;  %v2282_v11 = vsel %vm5268_vm14, %v2269_v3, %v2281_v2  ;;  %v1371_v54 = vsel %vm347_vm0, %v1364_v50, %v1365_v20  ;;  %v4552_v47 = vunpack.i.h.bf16 %v4550_v5  ;;  %v1388_v2 = vld [vmem:[#allocation2 + $0x58] sm:$0x44]  ;;  %vm6684_vm1 = vmmov %vm6676_vm6 }
  0xff   : > { %3729 = vmatprep.mubr.bf16.mxu0 %v6648_v57  ;;  %2280 = vst [vmem:[#allocation2 + $0x80] sm:$0x88] %v2279_v19  ;;  %2283 = vst [vmem:[#allocation2 + $0x88] sm:$0x88] %v2282_v11  ;;  %v1372_v35 = vsel %vm6676_vm6, %v5921_v58, %v1371_v54  ;;  %v4551_v27 = vunpack.i.l.bf16 %v4550_v5  ;;  %v6121_v38 = vpop.permute.xlu1 %4554 }
 0x100   : > { %2972 = vrot.lane.b32.xlu1 %v2963_v18, %s4689_s20  ;;  %4465 = vmatmul.mubr.msk.bf16.vlgmr.msra.gmra.mrb[8].mxu1 %vm3355_vm3, %v5672_v46  ;;  %v1386_v36 = vsel %vm4854_vm11, %v1372_v35, %v1385_v7  ;;  %v1040_v50 = vrot.slane %v4552_v47, 4  ;;  %v4556_v31 = vunpack.i.l.bf16 %v6121_v38  ;;  %v1895_v47 = vld [vmem:[#allocation2 + $0x90] sm:$0x22]  ;;  %vm6685_vm6 = vmmov %vm6684_vm1 }
 0x101   : > { %2970 = vrot.lane.b32.xlu0 %v2955_v14, %s4689_s20  ;;  %3770 = vmatprep.mubr.bf16.mxu1 %v6648_v57  ;;  %1387 = vst [vmem:[#allocation2 + $0x50] sm:$0x44] %v1386_v36  ;;  %v1039_v58 = vrot.slane %v4551_v27, 4  ;;  %v1361_v32 = vpop.permute.xlu0 %1360 }
 0x102   : > { %v1570_v55 = vrot.slane %v4556_v31, 4  ;;  %v1366_v18 = vrot.slane %v1361_v32, 4 }
 0x103   : > { %v1045_v46 = vsel %vm347_vm0, %v5928_v48, %v1039_v58  ;;  %v1047_v37 = vsel %vm347_vm0, %v1039_v58, %v1040_v50  ;;  %v1672_v56 = vpop.permute.xlu1 %1671 }
 0x104   : > { %3281 = vrot.lane.b32.xlu1 %v4442_v42, %s4689_s20  ;;  %v1046_v44 = vsel %vm6681_vm12, %v4537_v25, %v1045_v46  ;;  %v1048_v40 = vsel %vm6682_vm10, %v4551_v27, %v1047_v37  ;;  %v1577_v0 = vsel %vm347_vm0, %v5989_v52, %v1570_v55  ;;  %v1373_v62 = vsel %vm347_vm0, %v1365_v20, %v1366_v18  ;;  %v4259_v55 = vld [vmem:[%s6568_s2] sm:$0xff] }
 0x105   : > { %4594 = vrot.lane.b32.xlu0 %v4593_v22, %s4689_s20  ;;  %v1060_v48 = vsel %vm4961_vm7, %v1046_v44, %v1059_v21  ;;  %v1063_v23 = vsel %vm4961_vm7, %v1048_v40, %v1062_v34  ;;  %v1578_v9 = vsel %vm873_vm5, %v4547_v10, %v1577_v0  ;;  %v1374_v25 = vsel %vm6683_vm15, %v1359_v33, %v1373_v62  ;;  %v1670_v14 = vpop.permute.xlu0 %1669  ;;  %v2099_v21 = vld [vmem:[#allocation2 + $0x90] sm:$0x44] }
 0x106   : > { %1061 = vst [vmem:[#allocation2 + $0x50] sm:$0x11] %v1060_v48  ;;  %1064 = vst [vmem:[#allocation2 + $0x58] sm:$0x11] %v1063_v23  ;;  %v1593_v52 = vsel %vm5444_vm9, %v1578_v9, %v1592_v13  ;;  %v1389_v28 = vsel %vm4854_vm11, %v1374_v25, %v1388_v2  ;;  %v1677_v43 = vrot.slane %v1672_v56, 4  ;;  %v1676_v61 = vrot.slane %v1670_v14, 4 }
 0x107   : > { %1594 = vst [vmem:[#allocation2 + $0x58] sm:$0x88] %v1593_v52  ;;  %1390 = vst [vmem:[#allocation2 + $0x58] sm:$0x44] %v1389_v28  ;;  %v1871_v10 = vpop.permute.xlu1 %1870  ;;  %vm6686_vm12 = vcmask 916480   ;;  %v4557_v40 = vunpack.i.h.bf16 %v6121_v38 }
 0x108   : > { %v1682_v33 = vsel %vm347_vm0, %v1675_v8, %v1676_v61  ;;  %v1684_v20 = vsel %vm347_vm0, %v1676_v61, %v1677_v43  ;;  %v1876_v49 = vrot.slane %v1871_v10, 4  ;;  %v1898_v8 = vld [vmem:[#allocation2 + $0x98] sm:$0x22]  ;;  %4262 = vperm.xlu1 %4598, %v4259_v55   ;;  %vm6687_vm10 = vmmov %vm6686_vm12  ;;  %v2284_v13 = vld [vmem:[#allocation2 + $0x90] sm:$0x88] }
 0x109   : > { %3283 = vrot.lane.b32.xlu0 %v4443_v17, %s4689_s20  ;;  %v1683_v3 = vsel %vm873_vm5, %v6020_v41, %v1682_v33  ;;  %v1685_v5 = vsel %vm873_vm5, %v1670_v14, %v1684_v20  ;;  %v1869_v42 = vpop.permute.xlu0 %1868  ;;  %vm6688_vm15 = vmmov %vm6687_vm10  ;;  %v2361_v38 = vld [vmem:[#allocation2 + $0x80] sm:$0x88] }
 0x10a   : > { %v1697_v19 = vsel %vm4908_vm2, %v1683_v3, %v1696_v26  ;;  %v1700_v11 = vsel %vm4908_vm2, %v1685_v5, %v1699_v63  ;;  %v1875_v54 = vrot.slane %v1869_v42, 4 }
 0x10b   : > { %1698 = vst [vmem:[#allocation2 + $0x70] sm:$0x11] %v1697_v19  ;;  %1701 = vst [vmem:[#allocation2 + $0x78] sm:$0x11] %v1700_v11  ;;  %v2075_v35 = vpop.permute.xlu1 %2074 }
 0x10c   : > { %v1881_v7 = vsel %vm347_vm0, %v1874_v45, %v1875_v54  ;;  %v1883_v41 = vsel %vm347_vm0, %v1875_v54, %v1876_v49  ;;  %v2080_v27 = vrot.slane %v2075_v35, 4  ;;  %v2102_v45 = vld [vmem:[#allocation2 + $0x98] sm:$0x44] }
 0x10d   : > { %v1882_v22 = vsel %vm6684_vm1, %v6027_v53, %v1881_v7  ;;  %v1884_v36 = vsel %vm6685_vm6, %v1869_v42, %v1883_v41  ;;  %v2073_v50 = vpop.permute.xlu0 %2072  ;;  %v3553_v44 = vld [vmem:[#allocation2 + $0x50] sm:$0xff]  ;;  %vm6689_vm1 = vmmov %vm6687_vm10 }
 0x10e   : > { %v1896_v31 = vsel %vm5207_vm13, %v1882_v22, %v1895_v47  ;;  %v1899_v58 = vsel %vm5207_vm13, %v1884_v36, %v1898_v8  ;;  %v2079_v32 = vrot.slane %v2073_v50, 4  ;;  %v3554_v23 = vld [vmem:[#allocation2 + $0x58] sm:$0xff]  ;;  %vm6690_vm6 = vmmov %vm6689_vm1 }
 0x10f   : > { %1897 = vst [vmem:[#allocation2 + $0x90] sm:$0x22] %v1896_v31  ;;  %1900 = vst [vmem:[#allocation2 + $0x98] sm:$0x22] %v1899_v58  ;;  %v2260_v34 = vpop.permute.xlu1 %2259 }
 0x110   : > { %v2085_v53 = vsel %vm347_vm0, %v2078_v15, %v2079_v32  ;;  %v2087_v18 = vsel %vm347_vm0, %v2079_v32, %v2080_v27  ;;  %v2265_v46 = vrot.slane %v2260_v34, 4  ;;  %v2178_v32 = vrot.slane %v4557_v40, 4 }
 0x111   : > { %v2086_v37 = vsel %vm6686_vm12, %v6075_v29, %v2085_v53  ;;  %v2088_v56 = vsel %vm6687_vm10, %v2073_v50, %v2087_v18  ;;  %v2258_v17 = vpop.permute.xlu0 %2257  ;;  %v2287_v29 = vld [vmem:[#allocation2 + $0x98] sm:$0x88]  ;;  %v1991_v53 = vld [vmem:[#allocation2 + $0x80] sm:$0x22]  ;;  %v1994_v18 = vld [vmem:[#allocation2 + $0x88] sm:$0x22] }
 0x112   : > { %v2100_v0 = vsel %vm4839_vm8, %v2086_v37, %v2099_v21  ;;  %v2103_v62 = vsel %vm4839_vm8, %v2088_v56, %v2102_v45  ;;  %v2264_v15 = vrot.slane %v2258_v17, 4  ;;  %v3557_v48 = vld [vmem:[#allocation2 + $0x70] sm:$0x11]  ;;  %v3558_v9 = vld [vmem:[#allocation2 + $0x78] sm:$0x11]  ;;  %vm6691_vm12 = vmmov %vm6689_vm1 }
 0x113   : > { %2101 = vst [vmem:[#allocation2 + $0x90] sm:$0x44] %v2100_v0  ;;  %2104 = vst [vmem:[#allocation2 + $0x98] sm:$0x44] %v2103_v62  ;;  %v6193_v2 = vpop.permute.xlu1 %4564  ;;  %v4460_v25 = vcombine.low %v3553_v44, %v3557_v48  ;;  %v4461_v14 = vcombine.high %v3553_v44, %v3557_v48  ;;  %v4462_v52 = vcombine.low %v3554_v23, %v3558_v9  ;;  %v6240_v44 = vld [vmem:[%s6567_s1] sm:$0xf] }
 0x114   : > { %v4463_v28 = vcombine.high %v3554_v23, %v3558_v9  ;;  %v2270_v43 = vsel %vm347_vm0, %v2263_v6, %v2264_v15  ;;  %v2272_v61 = vsel %vm347_vm0, %v2264_v15, %v2265_v46  ;;  %v4567_v26 = vunpack.i.h.bf16 %v6193_v2  ;;  %vm6692_vm10 = vmmov %vm6689_vm1 }
 0x115   : > { %v4566_v63 = vunpack.i.l.bf16 %v6193_v2  ;;  %v2271_v10 = vsel %vm6688_vm15, %v6083_v16, %v2270_v43  ;;  %v2273_v33 = vsel %vm6689_vm1, %v2258_v17, %v2272_v61  ;;  %v4560_v20 = vpop.permute.xlu0 %4559  ;;  %v3607_v49 = vand.u32 %v4461_v14, %v5492_v1  ;;  %vm6693_vm15 = vmmov %vm6689_vm1 }
 0x116   : > { %v3613_v3 = vand.u32 %v4463_v28, %v5492_v1  ;;  %v2285_v5 = vsel %vm5268_vm14, %v2271_v10, %v2284_v13  ;;  %v2288_v6 = vsel %vm5268_vm14, %v2273_v33, %v2287_v29  ;;  %v6212_v42 = vrot.slane %v4567_v26, 4  ;;  %v1997_v41 = vld [vmem:[#allocation2 + $0x90] sm:$0x22]  ;;  %v2195_v29 = vld [vmem:[#allocation2 + $0x80] sm:$0x44] }
 0x117   : > { %v1976_v19 = vrot.slane %v4566_v63, 4  ;;  %2286 = vst [vmem:[#allocation2 + $0x90] sm:$0x88] %v2285_v5  ;;  %2289 = vst [vmem:[#allocation2 + $0x98] sm:$0x88] %v2288_v6  ;;  %v4562_v16 = vunpack.i.h.bf16 %v4560_v20  ;;  %v4561_v11 = vunpack.i.l.bf16 %v4560_v20  ;;  %v2335_v54 = vpop.permute.xlu1 %2334  ;;  %3697 = vmatprep.subr.bf16.mxu0 %v3607_v49  ;;  %v3604_v47 = vand.u32 %v4460_v25, %v5492_v1 }
 0x118   : > { %3738 = vmatprep.subr.bf16.mxu1 %v3613_v3  ;;  %v3610_v8 = vand.u32 %v4462_v52, %v5492_v1  ;;  %v2344_v34 = vrot.slane %v2335_v54, 4  ;;  %v2198_v25 = vld [vmem:[#allocation2 + $0x88] sm:$0x44]  ;;  %v2364_v33 = vld [vmem:[#allocation2 + $0x88] sm:$0x88] }
 0x119   : > { %v1983_v35 = vsel %vm347_vm0, %v1976_v19, %v6212_v42  ;;  %v1975_v27 = vrot.slane %v4562_v16, 4  ;;  %v1974_v22 = vrot.slane %v4561_v11, 4  ;;  %3698 = vmatpush1.bf16.msra.mxu0 %v3604_v47  ;;  %v6219_v36 = vpop.permute.xlu0 %4569 }
 0x11a   : > { %v1984_v7 = vsel %vm6690_vm6, %v4566_v63, %v1983_v35  ;;  %3739 = vmatpush1.bf16.msra.mxu1 %v3610_v8  ;;  %v4572_v31 = vunpack.i.h.bf16 %v6219_v36  ;;  %v4571_v58 = vunpack.i.l.bf16 %v6219_v36  ;;  %vm6694_vm6 = vcmask 1039360  }
 0x11b   : > { %v1998_v50 = vsel %vm5326_vm4, %v1984_v7, %v1997_v41  ;;  %v1981_v21 = vsel %vm347_vm0, %v1975_v27, %v1976_v19  ;;  %v1979_v45 = vsel %vm347_vm0, %v1974_v22, %v1975_v27  ;;  %v6229_v55 = vpop.permute.xlu1 %2338  ;;  %v2456_v41 = vld [vmem:[#allocation2 + $0xa8] sm:$0x11] }
 0x11c   : > { %1999 = vst [vmem:[#allocation2 + $0x90] sm:$0x22] %v1998_v50  ;;  %v1982_v46 = vsel %vm6691_vm12, %v4562_v16, %v1981_v21  ;;  %v1980_v37 = vsel %vm6692_vm10, %v4561_v11, %v1979_v45  ;;  %v6235_v56 = vrot.slane %v4572_v31, 4  ;;  %v2179_v17 = vrot.slane %v4571_v58, 4  ;;  %4466 = vmatmul.mubr.msk.bf16.vlgmr.msra.gmra.mrb[12].mxu0 %vm3355_vm3, %v6240_v44  ;;  %v2453_v16 = vld [vmem:[#allocation2 + $0xa0] sm:$0x11]  ;;  %vm6695_vm12 = vmmov %vm6694_vm6 }
 0x11d   : > { %4467 = vmatmul.mubr.msk.bf16.vlgmr.msra.gmra.mrb[12].mxu1 %vm3355_vm3, %v6240_v44  ;;  %v1995_v0 = vsel %vm5326_vm4, %v1982_v46, %v1994_v18  ;;  %v1992_v62 = vsel %vm5326_vm4, %v1980_v37, %v1991_v53  ;;  %v2346_v15 = vrot.slane %v6229_v55, 4  ;;  %v2337_v48 = vpop.permute.xlu0 %2336  ;;  %3883 = vmatprep.mubr.bf16.mxu0 %v6648_v57  ;;  %v2738_v53 = vld [vmem:[#allocation2 + $0xc0] sm:$0x22]  ;;  %v2741_v18 = vld [vmem:[#allocation2 + $0xc8] sm:$0x22]  ;;  %vm6696_vm10 = vmmov %vm6689_vm1 }
 0x11e   : > { %3924 = vmatprep.mubr.bf16.mxu1 %v6648_v57  ;;  %1996 = vst [vmem:[#allocation2 + $0x88] sm:$0x22] %v1995_v0  ;;  %1993 = vst [vmem:[#allocation2 + $0x80] sm:$0x22] %v1992_v62  ;;  %v2183_v23 = vsel %vm347_vm0, %v2178_v32, %v2179_v17  ;;  %v2185_v9 = vsel %vm347_vm0, %v2179_v17, %v6235_v56  ;;  %v2345_v13 = vrot.slane %v2337_v48, 4 }
 0x11f   : > { %v2184_v14 = vsel %vm873_vm5, %v4557_v40, %v2183_v23  ;;  %v2186_v52 = vsel %vm873_vm5, %v4571_v58, %v2185_v9  ;;  %v2429_v28 = vpop.permute.xlu1 %2428 }
 0x120   : > { %v2196_v43 = vsel %vm4854_vm11, %v2184_v14, %v2195_v29  ;;  %v2199_v61 = vsel %vm4854_vm11, %v2186_v52, %v2198_v25  ;;  %v2349_v63 = vsel %vm347_vm0, %v2344_v34, %v2345_v13  ;;  %v2351_v10 = vsel %vm347_vm0, %v2345_v13, %v2346_v15  ;;  %v2908_v52 = vld [vmem:[#allocation2 + $0xc0] sm:$0x44] }
 0x121   : > { %2197 = vst [vmem:[#allocation2 + $0x80] sm:$0x44] %v2196_v43  ;;  %2200 = vst [vmem:[#allocation2 + $0x88] sm:$0x44] %v2199_v61  ;;  %v2350_v40 = vsel %vm6693_vm15, %v2335_v54, %v2349_v63  ;;  %v2352_v20 = vsel %vm6689_vm1, %v2337_v48, %v2351_v10  ;;  %v2437_v49 = vrot.slane %v2429_v28, 4  ;;  %v2427_v3 = vpop.permute.xlu0 %2426 }
 0x122   : > { %v2362_v5 = vsel %vm5444_vm9, %v2350_v40, %v2361_v38  ;;  %v2365_v6 = vsel %vm5444_vm9, %v2352_v20, %v2364_v33  ;;  %v2436_v19 = vrot.slane %v2427_v3, 4  ;;  %vm6697_vm15 = vmmov %vm6689_vm1 }
 0x123   : > { %2363 = vst [vmem:[#allocation2 + $0x80] sm:$0x88] %v2362_v5  ;;  %2366 = vst [vmem:[#allocation2 + $0x88] sm:$0x88] %v2365_v6  ;;  %v2712_v11 = vpop.permute.xlu1 %2711  ;;  %v2911_v6 = vld [vmem:[#allocation2 + $0xc8] sm:$0x44] }
 0x124   : > { %v2441_v47 = vsel %vm347_vm0, %v2436_v19, %v2437_v49  ;;  %v2721_v22 = vrot.slane %v2712_v11, 4 }
 0x125   : > { %v2442_v8 = vsel %vm873_vm5, %v2427_v3, %v2441_v47  ;;  %v6276_v54 = vpop.permute.xlu0 %2430 }
 0x126   : > { %v2454_v35 = vsel %vm4908_vm2, %v2442_v8, %v2453_v16  ;;  %v2438_v7 = vrot.slane %v6276_v54, 4 }
 0x127   : > { %2455 = vst [vmem:[#allocation2 + $0xa0] sm:$0x11] %v2454_v35  ;;  %v6281_v27 = vpop.permute.xlu1 %2715 }
 0x128   : > { %v2443_v50 = vsel %vm347_vm0, %v2437_v49, %v2438_v7  ;;  %v2723_v58 = vrot.slane %v6281_v27, 4 }
 0x129   : > { %v2444_v32 = vsel %vm873_vm5, %v2429_v28, %v2443_v50  ;;  %v2714_v21 = vpop.permute.xlu0 %2713 }
 0x12a   : > { %v2457_v45 = vsel %vm4908_vm2, %v2444_v32, %v2456_v41  ;;  %v2722_v34 = vrot.slane %v2714_v21, 4  ;;  %v3787_v25 = vld [vmem:[#allocation2 + $0x80] sm:$0xff]  ;;  %v3788_v3 = vld [vmem:[#allocation2 + $0x88] sm:$0xff] }
 0x12b   : > { %2458 = vst [vmem:[#allocation2 + $0xa8] sm:$0x11] %v2457_v45  ;;  %v2884_v46 = vpop.permute.xlu1 %2883 }
 0x12c   : > { %v2726_v37 = vsel %vm347_vm0, %v2721_v22, %v2722_v34  ;;  %v2728_v17 = vsel %vm347_vm0, %v2722_v34, %v2723_v58  ;;  %v2892_v0 = vrot.slane %v2884_v46, 4  ;;  %v3093_v34 = vld [vmem:[#allocation2 + $0xc0] sm:$0x88] }
 0x12d   : > { %v2727_v62 = vsel %vm6694_vm6, %v2712_v11, %v2726_v37  ;;  %v2729_v48 = vsel %vm6695_vm12, %v2714_v21, %v2728_v17  ;;  %v2882_v23 = vpop.permute.xlu0 %2881  ;;  %vm6698_vm6 = vmmov %vm6689_vm1 }
 0x12e   : > { %v2739_v9 = vsel %vm5207_vm13, %v2727_v62, %v2738_v53  ;;  %v2742_v13 = vsel %vm5207_vm13, %v2729_v48, %v2741_v18  ;;  %v2891_v29 = vrot.slane %v2882_v23, 4  ;;  %v3791_v14 = vld [vmem:[#allocation2 + $0xa0] sm:$0x11]  ;;  %v3096_v53 = vld [vmem:[#allocation2 + $0xc8] sm:$0x88]  ;;  %vm6699_vm12 = vmmov %vm6689_vm1 }
 0x12f   : > { %2740 = vst [vmem:[#allocation2 + $0xc0] sm:$0x22] %v2739_v9  ;;  %2743 = vst [vmem:[#allocation2 + $0xc8] sm:$0x22] %v2742_v13  ;;  %v3067_v28 = vpop.permute.xlu1 %3066  ;;  %v4468_v43 = vcombine.low %v3787_v25, %v3791_v14  ;;  %v4469_v61 = vcombine.high %v3787_v25, %v3791_v14 }
 0x130   : > { %v2896_v63 = vsel %vm347_vm0, %v2891_v29, %v2892_v0  ;;  %v3076_v47 = vrot.slane %v3067_v28, 4 }
 0x131   : > { %v2897_v10 = vsel %vm873_vm5, %v2882_v23, %v2896_v63  ;;  %v6302_v38 = vpop.permute.xlu0 %2885  ;;  %v3831_v33 = vand.u32 %v4469_v61, %v5492_v1  ;;  %v3828_v40 = vand.u32 %v4468_v43, %v5492_v1 }
 0x132   : > { %v2909_v20 = vsel %vm4839_vm8, %v2897_v10, %v2908_v52  ;;  %v2893_v49 = vrot.slane %v6302_v38, 4  ;;  %v3792_v5 = vld [vmem:[#allocation2 + $0xa8] sm:$0x11] }
 0x133   : > { %2910 = vst [vmem:[#allocation2 + $0xc0] sm:$0x44] %v2909_v20  ;;  %v6309_v19 = vpop.permute.xlu1 %3070  ;;  %3851 = vmatprep.subr.bf16.mxu0 %v3831_v33  ;;  %v4470_v16 = vcombine.low %v3788_v3, %v3792_v5  ;;  %v4471_v11 = vcombine.high %v3788_v3, %v3792_v5  ;;  %v2201_v33 = vld [vmem:[#allocation2 + $0x90] sm:$0x44] }
 0x134   : > { %v2898_v8 = vsel %vm347_vm0, %v2892_v0, %v2893_v49  ;;  %v3078_v35 = vrot.slane %v6309_v19, 4  ;;  %3852 = vmatpush1.bf16.msra.mxu0 %v3828_v40  ;;  %v2204_v40 = vld [vmem:[#allocation2 + $0x98] sm:$0x44] }
 0x135   : > { %v2899_v41 = vsel %vm873_vm5, %v2884_v46, %v2898_v8  ;;  %v3069_v22 = vpop.permute.xlu0 %3068  ;;  %v3837_v50 = vand.u32 %v4471_v11, %v5492_v1  ;;  %v3834_v32 = vand.u32 %v4470_v16, %v5492_v1 }
 0x136   : > { %v2912_v21 = vsel %vm4839_vm8, %v2899_v41, %v2911_v6  ;;  %v3077_v45 = vrot.slane %v3069_v22, 4  ;;  %v2000_v6 = vld [vmem:[#allocation2 + $0x98] sm:$0x22]  ;;  %v2367_v41 = vld [vmem:[#allocation2 + $0x90] sm:$0x88] }
 0x137   : > { %2913 = vst [vmem:[#allocation2 + $0xc8] sm:$0x44] %v2912_v21  ;;  %v4575_v18 = vpop.permute.xlu1 %4574  ;;  %3892 = vmatprep.subr.bf16.mxu1 %v3837_v50  ;;  %4476 = vmatmul.mubr.msk.bf16.vlgmr.msra.gmra.mrb[16].mxu0 %vm3355_vm3, %v6240_v44 }
 0x138   : > { %v3081_v37 = vsel %vm347_vm0, %v3076_v47, %v3077_v45  ;;  %v3083_v46 = vsel %vm347_vm0, %v3077_v45, %v3078_v35  ;;  %v4577_v17 = vunpack.i.h.bf16 %v4575_v18  ;;  %v4576_v0 = vunpack.i.l.bf16 %v4575_v18  ;;  %3893 = vmatpush1.bf16.msra.mxu1 %v3834_v32  ;;  %3965 = vmatprep.mubr.bf16.mxu0 %v6648_v57 }
 0x139   : > { %v3082_v62 = vsel %vm6696_vm10, %v3067_v28, %v3081_v37  ;;  %v3084_v48 = vsel %vm6697_vm15, %v3069_v22, %v3083_v46  ;;  %v1973_v23 = vpop.permute.xlu0 %1972  ;;  %v2370_v22 = vld [vmem:[#allocation2 + $0x98] sm:$0x88]  ;;  %vm6700_vm10 = vcmask 1039360  }
 0x13a   : > { %v3094_v9 = vsel %vm5268_vm14, %v3082_v62, %v3093_v34  ;;  %v3097_v13 = vsel %vm5268_vm14, %v3084_v48, %v3096_v53  ;;  %v2182_v29 = vrot.slane %v4577_v17, 4  ;;  %v2181_v25 = vrot.slane %v4576_v0, 4  ;;  %v2462_v34 = vld [vmem:[#allocation2 + $0xb8] sm:$0x11]  ;;  %vm6701_vm15 = vmmov %vm6700_vm10 }
 0x13b   : > { %3095 = vst [vmem:[#allocation2 + $0xc0] sm:$0x88] %v3094_v9  ;;  %3098 = vst [vmem:[#allocation2 + $0xc8] sm:$0x88] %v3097_v13  ;;  %v1978_v14 = vrot.slane %v1973_v23, 4  ;;  %v2343_v52 = vpop.permute.xlu1 %2342  ;;  %4477 = vmatmul.mubr.msk.bf16.vlgmr.msra.gmra.mrb[16].mxu1 %vm3355_vm3, %v6240_v44 }
 0x13c   : > { %v2187_v28 = vsel %vm347_vm0, %v6235_v56, %v2181_v25  ;;  %v2189_v43 = vsel %vm347_vm0, %v2181_v25, %v2182_v29  ;;  %v2348_v61 = vrot.slane %v2343_v52, 4  ;;  %4006 = vmatprep.mubr.bf16.mxu1 %v6648_v57  ;;  %v2744_v9 = vld [vmem:[#allocation2 + $0xd0] sm:$0x22] }
 0x13d   : > { %v2188_v63 = vsel %vm873_vm5, %v4572_v31, %v2187_v28  ;;  %v2190_v10 = vsel %vm873_vm5, %v4576_v0, %v2189_v43  ;;  %v1985_v20 = vsel %vm347_vm0, %v6212_v42, %v1978_v14 }
 0x13e   : > { %v2341_v3 = vpop.permute.xlu0 %2340  ;;  %v2202_v56 = vsel %vm4854_vm11, %v2188_v63, %v2201_v33  ;;  %v2205_v5 = vsel %vm4854_vm11, %v2190_v10, %v2204_v40  ;;  %v1986_v36 = vsel %vm6689_vm1, %v4567_v26, %v1985_v20  ;;  %v2914_v10 = vld [vmem:[#allocation2 + $0xd0] sm:$0x44] }
 0x13f   : > { %v2347_v31 = vrot.slane %v2341_v3, 4  ;;  %2203 = vst [vmem:[#allocation2 + $0x90] sm:$0x44] %v2202_v56  ;;  %2206 = vst [vmem:[#allocation2 + $0x98] sm:$0x44] %v2205_v5  ;;  %v2001_v16 = vsel %vm5326_vm4, %v1986_v36, %v2000_v6 }
 0x140   : > { %v2435_v11 = vpop.permute.xlu1 %2434  ;;  %2002 = vst [vmem:[#allocation2 + $0x98] sm:$0x22] %v2001_v16 }
 0x141   : > { %v2353_v42 = vsel %vm347_vm0, %v2346_v15, %v2347_v31  ;;  %v2355_v47 = vsel %vm347_vm0, %v2347_v31, %v2348_v61  ;;  %v2440_v8 = vrot.slane %v2435_v11, 4  ;;  %v2459_v15 = vld [vmem:[#allocation2 + $0xb0] sm:$0x11] }
 0x142   : > { %v2354_v2 = vsel %vm6698_vm6, %v6229_v55, %v2353_v42  ;;  %v2356_v26 = vsel %vm6699_vm12, %v2341_v3, %v2355_v47  ;;  %v3099_v42 = vld [vmem:[#allocation2 + $0xd0] sm:$0x88]  ;;  %v3102_v47 = vld [vmem:[#allocation2 + $0xd8] sm:$0x88] }
 0x143   : > { %v2433_v50 = vpop.permute.xlu0 %2432  ;;  %v2368_v32 = vsel %vm5444_vm9, %v2354_v2, %v2367_v41  ;;  %v2371_v21 = vsel %vm5444_vm9, %v2356_v26, %v2370_v22 }
 0x144   : > { %v2439_v45 = vrot.slane %v2433_v50, 4  ;;  %2369 = vst [vmem:[#allocation2 + $0x90] sm:$0x88] %v2368_v32  ;;  %2372 = vst [vmem:[#allocation2 + $0x98] sm:$0x88] %v2371_v21  ;;  %v2720_v53 = vpop.permute.xlu1 %2719 }
 0x145   : > { %v2725_v37 = vrot.slane %v2720_v53, 4 }
 0x146   : > { %v2445_v18 = vsel %vm347_vm0, %v2438_v7, %v2439_v45  ;;  %v2447_v55 = vsel %vm347_vm0, %v2439_v45, %v2440_v8  ;;  %v2747_v7 = vld [vmem:[#allocation2 + $0xd8] sm:$0x22] }
 0x147   : > { %v2446_v46 = vsel %vm873_vm5, %v6276_v54, %v2445_v18  ;;  %v2448_v17 = vsel %vm873_vm5, %v2433_v50, %v2447_v55  ;;  %v2718_v0 = vpop.permute.xlu0 %2717 }
 0x148   : > { %v2460_v62 = vsel %vm4908_vm2, %v2446_v46, %v2459_v15  ;;  %v2463_v48 = vsel %vm4908_vm2, %v2448_v17, %v2462_v34  ;;  %v2724_v23 = vrot.slane %v2718_v0, 4 }
 0x149   : > { %2461 = vst [vmem:[#allocation2 + $0xb0] sm:$0x11] %v2460_v62  ;;  %2464 = vst [vmem:[#allocation2 + $0xb8] sm:$0x11] %v2463_v48  ;;  %v2890_v13 = vpop.permute.xlu1 %2889 }
 0x14a   : > { %v2730_v29 = vsel %vm347_vm0, %v2723_v58, %v2724_v23  ;;  %v2732_v54 = vsel %vm347_vm0, %v2724_v23, %v2725_v37  ;;  %v2895_v25 = vrot.slane %v2890_v13, 4  ;;  %v2917_v58 = vld [vmem:[#allocation2 + $0xd8] sm:$0x44] }
 0x14b   : > { %v2731_v14 = vsel %vm6700_vm10, %v6281_v27, %v2730_v29  ;;  %v2733_v52 = vsel %vm6701_vm15, %v2718_v0, %v2732_v54  ;;  %v2888_v28 = vpop.permute.xlu0 %2887  ;;  %v3789_v5 = vld [vmem:[#allocation2 + $0x90] sm:$0xff]  ;;  %v3790_v11 = vld [vmem:[#allocation2 + $0x98] sm:$0xff] }
 0x14c   : > { %v2745_v43 = vsel %vm5207_vm13, %v2731_v14, %v2744_v9  ;;  %v2748_v61 = vsel %vm5207_vm13, %v2733_v52, %v2747_v7  ;;  %v2894_v63 = vrot.slane %v2888_v28, 4  ;;  %vm6703_vm13 = vmmov %vm6689_vm1  ;;  %v2634_v14 = vld [vmem:[#allocation2 + $0xc8] sm:$0x11] }
 0x14d   : > { %2746 = vst [vmem:[#allocation2 + $0xd0] sm:$0x22] %v2745_v43  ;;  %2749 = vst [vmem:[#allocation2 + $0xd8] sm:$0x22] %v2748_v61 }
 0x14e   : > { %v3075_v33 = vpop.permute.xlu1 %3074  ;;  %v2900_v40 = vsel %vm347_vm0, %v2893_v49, %v2894_v63  ;;  %v2902_v27 = vsel %vm347_vm0, %v2894_v63, %v2895_v25  ;;  %v2631_v25 = vld [vmem:[#allocation2 + $0xc0] sm:$0x11] }
 0x14f   : > { %v3080_v20 = vrot.slane %v3075_v33, 4  ;;  %v2901_v3 = vsel %vm873_vm5, %v6302_v38, %v2900_v40  ;;  %v2903_v56 = vsel %vm873_vm5, %v2888_v28, %v2902_v27  ;;  %v3073_v39 = vpop.permute.xlu0 %3072  ;;  %v2825_v27 = vld [vmem:[#allocation2 + $0xc0] sm:$0x22] }
 0x150   : > { %v2915_v6 = vsel %vm4839_vm8, %v2901_v3, %v2914_v10  ;;  %v2918_v36 = vsel %vm4839_vm8, %v2903_v56, %v2917_v58  ;;  %v3079_v31 = vrot.slane %v3073_v39, 4  ;;  %v3793_v16 = vld [vmem:[#allocation2 + $0xb0] sm:$0x11]  ;;  %v3794_v49 = vld [vmem:[#allocation2 + $0xb8] sm:$0x11]  ;;  %vm6702_vm8 = vmmov %vm6689_vm1 }
 0x151   : > { %2916 = vst [vmem:[#allocation2 + $0xd0] sm:$0x44] %v2915_v6  ;;  %2919 = vst [vmem:[#allocation2 + $0xd8] sm:$0x44] %v2918_v36  ;;  %v4472_v38 = vcombine.low %v3789_v5, %v3793_v16  ;;  %v4473_v41 = vcombine.high %v3789_v5, %v3793_v16  ;;  %v4474_v22 = vcombine.low %v3790_v11, %v3794_v49  ;;  %v2828_v16 = vld [vmem:[#allocation2 + $0xc8] sm:$0x22] }
 0x152   : > { %v6398_v8 = vpop.permute.xlu1 %4584  ;;  %v4475_v2 = vcombine.high %v3790_v11, %v3794_v49  ;;  %v3085_v26 = vsel %vm347_vm0, %v3078_v35, %v3079_v31  ;;  %v3087_v51 = vsel %vm347_vm0, %v3079_v31, %v3080_v20  ;;  %vm6705_vm1 = vmmov %vm6700_vm10 }
 0x153   : > { %v4587_v50 = vunpack.i.h.bf16 %v6398_v8  ;;  %v4586_v32 = vunpack.i.l.bf16 %v6398_v8  ;;  %v3086_v21 = vsel %vm6702_vm8, %v6309_v19, %v3085_v26  ;;  %v3088_v45 = vsel %vm6703_vm13, %v3073_v39, %v3087_v51  ;;  %v4580_v15 = vpop.permute.xlu0 %4579  ;;  %v2637_v19 = vld [vmem:[#allocation2 + $0xd0] sm:$0x11]  ;;  %vm6706_vm6 = vmmov %vm6705_vm1  ;;  %v2994_v26 = vld [vmem:[#allocation2 + $0xc8] sm:$0x44] }
 0x154   : > { %v3843_v34 = vand.u32 %v4473_v41, %v5492_v1  ;;  %v3849_v53 = vand.u32 %v4475_v2, %v5492_v1  ;;  %v3100_v18 = vsel %vm5268_vm14, %v3086_v21, %v3099_v42  ;;  %v3103_v35 = vsel %vm5268_vm14, %v3088_v45, %v3102_v47  ;;  %vm6704_vm14 = vmmov %vm6700_vm10  ;;  %v2991_v2 = vld [vmem:[#allocation2 + $0xc0] sm:$0x44] }
 0x155   : > { %v6417_v55 = vrot.slane %v4587_v50, 4  ;;  %v2616_v37 = vrot.slane %v4586_v32, 4  ;;  %3101 = vst [vmem:[#allocation2 + $0xd0] sm:$0x88] %v3100_v18  ;;  %3104 = vst [vmem:[#allocation2 + $0xd8] sm:$0x88] %v3103_v35  ;;  %v4582_v46 = vunpack.i.h.bf16 %v4580_v15  ;;  %v4581_v17 = vunpack.i.l.bf16 %v4580_v15 }
 0x156   : > { %v2801_v0 = vpop.permute.xlu1 %2800  ;;  %3933 = vmatprep.subr.bf16.mxu0 %v3843_v34  ;;  %3974 = vmatprep.subr.bf16.mxu1 %v3849_v53  ;;  %v3840_v62 = vand.u32 %v4472_v38, %v5492_v1  ;;  %v3846_v48 = vand.u32 %v4474_v22, %v5492_v1  ;;  %vm6707_vm12 = vmmov %vm6702_vm8 }
 0x157   : > { %v2623_v24 = vsel %vm347_vm0, %v2616_v37, %v6417_v55  ;;  %v2809_v23 = vrot.slane %v2801_v0, 4  ;;  %v2615_v7 = vrot.slane %v4582_v46, 4  ;;  %v2614_v13 = vrot.slane %v4581_v17, 4  ;;  %v2799_v29 = vpop.permute.xlu0 %2798  ;;  %vm6708_vm10 = vmmov %vm6702_vm8 }
 0x158   : > { %v2624_v9 = vsel %vm6704_vm14, %v4586_v32, %v2623_v24  ;;  %3934 = vmatpush1.bf16.msra.mxu0 %v3840_v62  ;;  %3975 = vmatpush1.bf16.msra.mxu1 %v3846_v48  ;;  %v2808_v52 = vrot.slane %v2799_v29, 4  ;;  %v3195_v24 = vld [vmem:[#allocation2 + $0xc0] sm:$0x88]  ;;  %vm6709_vm15 = vmmov %vm6705_vm1 }
 0x159   : > { %v2638_v54 = vsel %vm4961_vm7, %v2624_v9, %v2637_v19  ;;  %v2621_v28 = vsel %vm347_vm0, %v2615_v7, %v2616_v37  ;;  %v2619_v43 = vsel %vm347_vm0, %v2614_v13, %v2615_v7  ;;  %v3302_v13 = vld [vmem:[#allocation2 + $0xe0] sm:$0x11] }
 0x15a   : > { %2639 = vst [vmem:[#allocation2 + $0xd0] sm:$0x11] %v2638_v54  ;;  %v2965_v61 = vpop.permute.xlu1 %2964  ;;  %v2622_v63 = vsel %vm6705_vm1, %v4582_v46, %v2621_v28  ;;  %v2620_v10 = vsel %vm6706_vm6, %v4581_v17, %v2619_v43  ;;  %v2813_v58 = vsel %vm347_vm0, %v2808_v52, %v2809_v23  ;;  %v2640_v43 = vld [vmem:[#allocation2 + $0xd8] sm:$0x11] }
 0x15b   : > { %4478 = vmatmul.mubr.msk.bf16.vlgmr.msra.gmra.mrb[20].mxu0 %vm3355_vm3, %v6240_v44  ;;  %4479 = vmatmul.mubr.msk.bf16.vlgmr.msra.gmra.mrb[20].mxu1 %vm3355_vm3, %v6240_v44  ;;  %v2635_v33 = vsel %vm4961_vm7, %v2622_v63, %v2634_v14  ;;  %v2632_v40 = vsel %vm4961_vm7, %v2620_v10, %v2631_v25  ;;  %v2814_v20 = vsel %vm6707_vm12, %v2799_v29, %v2813_v58  ;;  %v6440_v3 = vpop.permute.xlu0 %2802  ;;  %v2974_v6 = vrot.slane %v2965_v61, 4 }
 0x15c   : > { %4119 = vmatprep.mubr.bf16.mxu0 %v6648_v57  ;;  %4160 = vmatprep.mubr.bf16.mxu1 %v6648_v57  ;;  %2636 = vst [vmem:[#allocation2 + $0xc8] sm:$0x11] %v2635_v33  ;;  %2633 = vst [vmem:[#allocation2 + $0xc0] sm:$0x11] %v2632_v40  ;;  %v2826_v56 = vsel %vm5326_vm4, %v2814_v20, %v2825_v27  ;;  %v2810_v39 = vrot.slane %v6440_v3, 4 }
 0x15d   : > { %2827 = vst [vmem:[#allocation2 + $0xc0] sm:$0x22] %v2826_v56  ;;  %v3305_v40 = vld [vmem:[#allocation2 + $0xe8] sm:$0x11] }
 0x15e   : > { %v6447_v5 = vpop.permute.xlu1 %2968  ;;  %v2815_v36 = vsel %vm347_vm0, %v2809_v23, %v2810_v39  ;;  %v3198_v23 = vld [vmem:[#allocation2 + $0xc8] sm:$0x88] }
 0x15f   : > { %v2976_v31 = vrot.slane %v6447_v5, 4  ;;  %v2816_v11 = vsel %vm6708_vm10, %v2801_v0, %v2815_v36  ;;  %v2967_v49 = vpop.permute.xlu0 %2966 }
 0x160   : > { %v2829_v42 = vsel %vm5326_vm4, %v2816_v11, %v2828_v16  ;;  %v2975_v47 = vrot.slane %v2967_v49, 4 }
 0x161   : > { %2830 = vst [vmem:[#allocation2 + $0xc8] sm:$0x22] %v2829_v42  ;;  %v2831_v42 = vld [vmem:[#allocation2 + $0xd0] sm:$0x22] }
 0x162   : > { %v6456_v38 = vpop.permute.xlu1 %3172  ;;  %v2979_v41 = vsel %vm347_vm0, %v2974_v6, %v2975_v47  ;;  %v2981_v22 = vsel %vm347_vm0, %v2975_v47, %v2976_v31  ;;  %v2834_v47 = vld [vmem:[#allocation2 + $0xd8] sm:$0x22] }
 0x163   : > { %v2980_v51 = vsel %vm873_vm5, %v2965_v61, %v2979_v41  ;;  %v2982_v32 = vsel %vm873_vm5, %v2967_v49, %v2981_v22  ;;  %v3180_v21 = vrot.slane %v6456_v38, 4  ;;  %v4590_v45 = vpop.permute.xlu0 %4589 }
 0x164   : > { %v2992_v15 = vsel %vm4854_vm11, %v2980_v51, %v2991_v2  ;;  %v2995_v34 = vsel %vm4854_vm11, %v2982_v32, %v2994_v26  ;;  %v4592_v53 = vunpack.i.h.bf16 %v4590_v45  ;;  %v4591_v18 = vunpack.i.l.bf16 %v4590_v45 }
 0x165   : > { %2993 = vst [vmem:[#allocation2 + $0xc0] sm:$0x44] %v2992_v15  ;;  %2996 = vst [vmem:[#allocation2 + $0xc8] sm:$0x44] %v2995_v34 }
 0x166   : > { %v3278_v35 = vpop.permute.xlu1 %3277  ;;  %v3179_v37 = vrot.slane %v4592_v53, 4  ;;  %v3178_v19 = vrot.slane %v4591_v18, 4 }
 0x167   : > { %v3286_v46 = vrot.slane %v3278_v35, 4  ;;  %v3276_v17 = vpop.permute.xlu0 %3275 }
 0x168   : > { %v3185_v0 = vsel %vm347_vm0, %v3179_v37, %v3180_v21  ;;  %v3183_v62 = vsel %vm347_vm0, %v3178_v19, %v3179_v37  ;;  %v3285_v48 = vrot.slane %v3276_v17, 4  ;;  %v2997_v37 = vld [vmem:[#allocation2 + $0xd0] sm:$0x44]  ;;  %v3000_v19 = vld [vmem:[#allocation2 + $0xd8] sm:$0x44] }
 0x169   : > { %v3186_v9 = vsel %vm873_vm5, %v4592_v53, %v3185_v0  ;;  %v3184_v7 = vsel %vm873_vm5, %v4591_v18, %v3183_v62 }
 0x16a   : > { %v2613_v29 = vpop.permute.xlu1 %2612  ;;  %v3199_v54 = vsel %vm5444_vm9, %v3186_v9, %v3198_v23  ;;  %v3196_v25 = vsel %vm5444_vm9, %v3184_v7, %v3195_v24  ;;  %v3290_v14 = vsel %vm347_vm0, %v3285_v48, %v3286_v46 }
 0x16b   : > { %v2618_v52 = vrot.slane %v2613_v29, 4  ;;  %3200 = vst [vmem:[#allocation2 + $0xc8] sm:$0x88] %v3199_v54  ;;  %3197 = vst [vmem:[#allocation2 + $0xc0] sm:$0x88] %v3196_v25  ;;  %v3291_v28 = vsel %vm873_vm5, %v3276_v17, %v3290_v14  ;;  %v3280_v61 = vpop.permute.xlu0 %3279 }
 0x16c   : > { %v3303_v63 = vsel %vm4908_vm2, %v3291_v28, %v3302_v13  ;;  %v3287_v58 = vrot.slane %v3280_v61, 4  ;;  %v3308_v17 = vld [vmem:[#allocation2 + $0xf0] sm:$0x11] }
 0x16d   : > { %v2625_v10 = vsel %vm347_vm0, %v6417_v55, %v2618_v52  ;;  %3304 = vst [vmem:[#allocation2 + $0xe0] sm:$0x11] %v3303_v63 }
 0x16e   : > { %v2626_v33 = vsel %vm6709_vm15, %v4587_v50, %v2625_v10  ;;  %v2807_v27 = vpop.permute.xlu1 %2806  ;;  %v3292_v56 = vsel %vm347_vm0, %v3286_v46, %v3287_v58 }
 0x16f   : > { %v2641_v20 = vsel %vm4961_vm7, %v2626_v33, %v2640_v43  ;;  %v2812_v6 = vrot.slane %v2807_v27, 4  ;;  %v3293_v36 = vsel %vm873_vm5, %v3278_v35, %v3292_v56  ;;  %v2805_v16 = vpop.permute.xlu0 %2804  ;;  %vm6710_vm7 = vmmov %vm6702_vm8  ;;  %v3311_v33 = vld [vmem:[#allocation2 + $0xf8] sm:$0x11]  ;;  %v3204_v27 = vld [vmem:[#allocation2 + $0xd8] sm:$0x88] }
 0x170   : > { %2642 = vst [vmem:[#allocation2 + $0xd8] sm:$0x11] %v2641_v20  ;;  %v3306_v55 = vsel %vm4908_vm2, %v3293_v36, %v3305_v40  ;;  %v2811_v11 = vrot.slane %v2805_v16, 4  ;;  %vm6711_vm8 = vmmov %vm6710_vm7  ;;  %v3201_v40 = vld [vmem:[#allocation2 + $0xd0] sm:$0x88] }
 0x171   : > { %3307 = vst [vmem:[#allocation2 + $0xe8] sm:$0x11] %v3306_v55 }
 0x172   : > { %v2973_v8 = vpop.permute.xlu1 %2972  ;;  %v2817_v50 = vsel %vm347_vm0, %v2810_v39, %v2811_v11  ;;  %v2819_v12 = vsel %vm347_vm0, %v2811_v11, %v2812_v6  ;;  %v4023_v45 = vld [vmem:[#allocation2 + $0xc0] sm:$0xff]  ;;  %v4024_v7 = vld [vmem:[#allocation2 + $0xc8] sm:$0xff] }
 0x173   : > { %v2978_v49 = vrot.slane %v2973_v8, 4  ;;  %v2818_v41 = vsel %vm6710_vm7, %v6440_v3, %v2817_v50  ;;  %v2820_v22 = vsel %vm6711_vm8, %v2805_v16, %v2819_v12  ;;  %v2971_v2 = vpop.permute.xlu0 %2970 }
 0x174   : > { %v2832_v26 = vsel %vm5326_vm4, %v2818_v41, %v2831_v42  ;;  %v2835_v51 = vsel %vm5326_vm4, %v2820_v22, %v2834_v47  ;;  %v2977_v32 = vrot.slane %v2971_v2, 4  ;;  %v4027_v39 = vld [vmem:[#allocation2 + $0xe0] sm:$0x11] }
 0x175   : > { %2833 = vst [vmem:[#allocation2 + $0xd0] sm:$0x22] %v2832_v26  ;;  %2836 = vst [vmem:[#allocation2 + $0xd8] sm:$0x22] %v2835_v51  ;;  %v4480_v34 = vcombine.low %v4023_v45, %v4027_v39  ;;  %v4481_v53 = vcombine.high %v4023_v45, %v4027_v39 }
 0x176   : > { %v3282_v15 = vpop.permute.xlu1 %3281  ;;  %v2983_v3 = vsel %vm347_vm0, %v2976_v31, %v2977_v32  ;;  %v2985_v18 = vsel %vm347_vm0, %v2977_v32, %v2978_v49 }
 0x177   : > { %v3288_v35 = vrot.slane %v3282_v15, 4  ;;  %v2984_v60 = vsel %vm873_vm5, %v6447_v5, %v2983_v3  ;;  %v2986_v46 = vsel %vm873_vm5, %v2971_v2, %v2985_v18  ;;  %v4595_v0 = vpop.permute.xlu0 %4594  ;;  %v4067_v62 = vand.u32 %v4481_v53, %v5492_v1 }
 0x178   : > { %v4064_v48 = vand.u32 %v4480_v34, %v5492_v1  ;;  %v2998_v24 = vsel %vm4854_vm11, %v2984_v60, %v2997_v37  ;;  %v3001_v31 = vsel %vm4854_vm11, %v2986_v46, %v3000_v19  ;;  %v4597_v9 = vunpack.i.h.bf16 %v4595_v0  ;;  %v4028_v13 = vld [vmem:[#allocation2 + $0xe8] sm:$0x11] }
 0x179   : > { %v3294_v23 = vsel %vm347_vm0, %v3287_v58, %v3288_v35  ;;  %2999 = vst [vmem:[#allocation2 + $0xd0] sm:$0x44] %v2998_v24  ;;  %3002 = vst [vmem:[#allocation2 + $0xd8] sm:$0x44] %v3001_v31  ;;  %v4596_v29 = vunpack.i.l.bf16 %v4595_v0  ;;  %4087 = vmatprep.subr.bf16.mxu0 %v4067_v62  ;;  %v4482_v54 = vcombine.low %v4024_v7, %v4028_v13 }
 0x17a   : > { %v3295_v5 = vsel %vm873_vm5, %v3280_v61, %v3294_v23  ;;  %v4483_v25 = vcombine.high %v4024_v7, %v4028_v13  ;;  %v3182_v52 = vrot.slane %v4597_v9, 4  ;;  %4088 = vmatpush1.bf16.msra.mxu0 %v4064_v48 }
 0x17b   : > { %v3309_v14 = vsel %vm4908_vm2, %v3295_v5, %v3308_v17  ;;  %v3181_v59 = vrot.slane %v4596_v29, 4  ;;  %v3284_v28 = vpop.permute.xlu0 %3283  ;;  %v4070_v63 = vand.u32 %v4482_v54, %v5492_v1 }
 0x17c   : > { %3310 = vst [vmem:[#allocation2 + $0xf0] sm:$0x11] %v3309_v14  ;;  %v4073_v43 = vand.u32 %v4483_v25, %v5492_v1  ;;  %v3289_v10 = vrot.slane %v3284_v28, 4 }
 0x17d   : > { %v3187_v61 = vsel %vm347_vm0, %v3180_v21, %v3181_v59  ;;  %v3189_v58 = vsel %vm347_vm0, %v3181_v59, %v3182_v52  ;;  %4488 = vmatmul.mubr.msk.bf16.vlgmr.msra.gmra.mrb[24].mxu0 %vm3355_vm3, %v6240_v44 }
 0x17e   : > { %4128 = vmatprep.subr.bf16.mxu1 %v4073_v43  ;;  %v3188_v20 = vsel %vm873_vm5, %v6456_v38, %v3187_v61  ;;  %v3190_v56 = vsel %vm873_vm5, %v4596_v29, %v3189_v58  ;;  %v3296_v6 = vsel %vm347_vm0, %v3288_v35, %v3289_v10  ;;  %4201 = vmatprep.mubr.bf16.mxu0 %v6648_v57 }
 0x17f   : > { %4129 = vmatpush1.bf16.msra.mxu1 %v4070_v63  ;;  %v3202_v21 = vsel %vm5444_vm9, %v3188_v20, %v3201_v40  ;;  %v3205_v36 = vsel %vm5444_vm9, %v3190_v56, %v3204_v27  ;;  %v3297_v16 = vsel %vm873_vm5, %v3282_v15, %v3296_v6 }
 0x180   : > { %3203 = vst [vmem:[#allocation2 + $0xd0] sm:$0x88] %v3202_v21  ;;  %3206 = vst [vmem:[#allocation2 + $0xd8] sm:$0x88] %v3205_v36  ;;  %v3312_v38 = vsel %vm4908_vm2, %v3297_v16, %v3311_v33 }
 0x181   : > { %3313 = vst [vmem:[#allocation2 + $0xf8] sm:$0x11] %v3312_v38 }
 0x182   : > { %4489 = vmatmul.mubr.msk.bf16.vlgmr.msra.gmra.mrb[24].mxu1 %vm3355_vm3, %v6240_v44 }
 0x183   : > { %4242 = vmatprep.mubr.bf16.mxu1 %v6648_v57  ;;  %v4029_v11 = vld [vmem:[#allocation2 + $0xf0] sm:$0x11] }
 0x187   : > { %v4025_v55 = vld [vmem:[#allocation2 + $0xd0] sm:$0xff]  ;;  %v4026_v12 = vld [vmem:[#allocation2 + $0xd8] sm:$0xff] }
 0x188   : > { %v4484_v8 = vcombine.low %v4025_v55, %v4029_v11  ;;  %v4485_v50 = vcombine.high %v4025_v55, %v4029_v11  ;;  %v4030_v4 = vld [vmem:[#allocation2 + $0xf8] sm:$0x11] }
 0x189   : > { %v4486_v49 = vcombine.low %v4026_v12, %v4030_v4  ;;  %v4487_v42 = vcombine.high %v4026_v12, %v4030_v4 }
 0x18a   : > { %v4079_v47 = vand.u32 %v4485_v50, %v5492_v1  ;;  %v4076_v41 = vand.u32 %v4484_v8, %v5492_v1 }
 0x18b   : > { %v4085_v30 = vand.u32 %v4487_v42, %v5492_v1  ;;  %v4082_v22 = vand.u32 %v4486_v49, %v5492_v1 }
 0x18c   : > { %4169 = vmatprep.subr.bf16.mxu0 %v4079_v47 }
 0x18d   : > { %4170 = vmatpush1.bf16.msra.mxu0 %v4076_v41  ;;  %4210 = vmatprep.subr.bf16.mxu1 %v4085_v30 }
 0x18e   : > { %4211 = vmatpush1.bf16.msra.mxu1 %v4082_v22 }
 0x190   : > { %4490 = vmatmul.mubr.msk.bf16.vlgmr.msra.gmra.mrb[28].mxu0 %vm3355_vm3, %v6240_v44 }
 0x191   : > { %4491 = vmatmul.mubr.msk.bf16.vlgmr.msra.gmra.mrb[28].mxu1 %vm3355_vm3, %v6240_v44 }
 0x193   : > { %v3421_v57 = vpop.f32.mrb[0].mxu0 }
 0x194   : > { %v3423_v26 = vpop.f32.mrb[1].mxu0 }
 0x195   : > { %v3462_v2 = vpop.f32.mrb[0].mxu1  ;;  %v3425_v32 = vpop.f32.mrb[2].mxu0 }
 0x196   : > { %v3464_v51 = vpop.f32.mrb[1].mxu1  ;;  %v3426_v39 = vpop.f32.mrb[3].mxu0 }
 0x197   : > { %v3466_v45 = vpop.f32.mrb[2].mxu1 }
 0x198   : > { %v3467_v15 = vpop.f32.mrb[3].mxu1 }
 0x1b5   : > { %v3503_v34 = vpop.f32.mrb[4].mxu0 }
 0x1b6   : > { %v3544_v1 = vpop.f32.mrb[4].mxu1  ;;  %v3505_v53 = vpop.f32.mrb[5].mxu0 }
 0x1b7   : > { %v3546_v3 = vpop.f32.mrb[5].mxu1  ;;  %v3507_v18 = vpop.f32.mrb[6].mxu0 }
 0x1b8   : > { %v3548_v35 = vpop.f32.mrb[6].mxu1  ;;  %v3508_v37 = vpop.f32.mrb[7].mxu0 }
 0x1b9   : > { %v3549_v19 = vpop.f32.mrb[7].mxu1 }
 0x1d1   : > { %v3649_v60 = vpop.f32.mrb[8].mxu0 }
 0x1d2   : > { %v3779_v46 = vmax.f32 %v3421_v57, %v3649_v60  ;;  %v3651_v17 = vpop.f32.mrb[9].mxu0 }
 0x1d3   : > { %v3780_v44 = vmax.f32 %v3423_v26, %v3651_v17  ;;  %v3653_v0 = vpop.f32.mrb[10].mxu0  ;;  %v3690_v62 = vpop.f32.mrb[8].mxu1 }
 0x1d4   : > { %v3654_v48 = vpop.f32.mrb[11].mxu0  ;;  %v3781_v24 = vmax.f32 %v3462_v2, %v3690_v62  ;;  %v3692_v31 = vpop.f32.mrb[9].mxu1 }
 0x1d5   : > { %v3782_v23 = vmax.f32 %v3464_v51, %v3692_v31  ;;  %v3694_v9 = vpop.f32.mrb[10].mxu1  ;;  %v4263_v2 = vpop.permute.xlu1 %4262 }
 0x1d6   : > { %v3695_v7 = vpop.f32.mrb[11].mxu1 }
 0x1ef   : > { %v3731_v13 = vpop.f32.mrb[12].mxu0 }
 0x1f0   : > { %v3772_v5 = vpop.f32.mrb[12].mxu1  ;;  %v3783_v29 = vmax.f32 %v3503_v34, %v3731_v13  ;;  %v3733_v25 = vpop.f32.mrb[13].mxu0 }
 0x1f1   : > { %v3785_v54 = vmax.f32 %v3544_v1, %v3772_v5  ;;  %v3774_v14 = vpop.f32.mrb[13].mxu1  ;;  %v3784_v52 = vmax.f32 %v3505_v53, %v3733_v25  ;;  %v3735_v28 = vpop.f32.mrb[14].mxu0 }
 0x1f2   : > { %v3786_v59 = vmax.f32 %v3546_v3, %v3774_v14  ;;  %v3776_v43 = vpop.f32.mrb[14].mxu1  ;;  %v3736_v63 = vpop.f32.mrb[15].mxu0 }
 0x1f3   : > { %v3777_v10 = vpop.f32.mrb[15].mxu1 }
 0x20a   : > { %v3885_v61 = vpop.f32.mrb[16].mxu0 }
 0x20b   : > { %v4015_v58 = vmax.f32 %v3779_v46, %v3885_v61  ;;  %v3887_v33 = vpop.f32.mrb[17].mxu0 }
 0x20c   : > { %v4016_v40 = vmax.f32 %v3780_v44, %v3887_v33  ;;  %v3889_v27 = vpop.f32.mrb[18].mxu0 }
 0x20d   : > { %v3890_v20 = vpop.f32.mrb[19].mxu0 }
 0x20e   : > { %v3926_v56 = vpop.f32.mrb[16].mxu1 }
 0x20f   : > { %v4017_v6 = vmax.f32 %v3781_v24, %v3926_v56  ;;  %v3928_v21 = vpop.f32.mrb[17].mxu1 }
 0x210   : > { %v4018_v36 = vmax.f32 %v3782_v23, %v3928_v21  ;;  %v3930_v16 = vpop.f32.mrb[18].mxu1 }
 0x211   : > { %v3931_v38 = vpop.f32.mrb[19].mxu1 }
 0x22e   : > { %v3967_v55 = vpop.f32.mrb[20].mxu0  ;;  %v4008_v11 = vpop.f32.mrb[20].mxu1 }
 0x22f   : > { %v4019_v8 = vmax.f32 %v3783_v29, %v3967_v55  ;;  %v4021_v50 = vmax.f32 %v3785_v54, %v4008_v11  ;;  %v3969_v12 = vpop.f32.mrb[21].mxu0  ;;  %v4010_v4 = vpop.f32.mrb[21].mxu1 }
 0x230   : > { %v4020_v49 = vmax.f32 %v3784_v52, %v3969_v12  ;;  %v4022_v42 = vmax.f32 %v3786_v59, %v4010_v4  ;;  %v3971_v47 = vpop.f32.mrb[22].mxu0  ;;  %v4012_v41 = vpop.f32.mrb[22].mxu1 }
 0x231   : > { %v3972_v30 = vpop.f32.mrb[23].mxu0  ;;  %v4013_v22 = vpop.f32.mrb[23].mxu1 }
 0x250   : > { %v4121_v57 = vpop.f32.mrb[24].mxu0 }
 0x251   : > { %v4251_v26 = vmax.f32 %v4015_v58, %v4121_v57  ;;  %v4123_v51 = vpop.f32.mrb[25].mxu0 }
 0x252   : > { %v4252_v32 = vmax.f32 %v4016_v40, %v4123_v51  ;;  %v4125_v45 = vpop.f32.mrb[26].mxu0 }
 0x253   : > { %v4265_v39 = vadd.f32 %v4263_v2, %v4251_v26  ;;  %v4126_v15 = vpop.f32.mrb[27].mxu0 }
 0x254   : > { %v4266_v34 = vadd.f32 %v4263_v2, %v4252_v32 }
 0x255   : > { %v4162_v1 = vpop.f32.mrb[24].mxu1  ;;  %v4273_v53 = vmax.f32 %v4265_v39, 0.0 }
 0x256   : > { %v4253_v3 = vmax.f32 %v4017_v6, %v4162_v1  ;;  %v4164_v18 = vpop.f32.mrb[25].mxu1  ;;  %v4274_v35 = vmax.f32 %v4266_v34, 0.0 }
 0x257   : > { %v4254_v37 = vmax.f32 %v4018_v36, %v4164_v18  ;;  %v4166_v19 = vpop.f32.mrb[26].mxu1 }
 0x258   : > { %v4267_v60 = vadd.f32 %v4263_v2, %v4253_v3  ;;  %v4167_v46 = vpop.f32.mrb[27].mxu1  ;;  %v4499_v44 = vpack.c.bf16 %v4274_v35, %v4273_v53 }
 0x259   : > { %v4268_v17 = vadd.f32 %v4263_v2, %v4254_v37 }
 0x25a   : > { %v4275_v0 = vmax.f32 %v4267_v60, 0.0  ;;  %4313 = vst [vmem:[%s6557_s30] sm:$0xff] %v4499_v44 }
 0x25b   : > { %v4276_v62 = vmax.f32 %v4268_v17, 0.0 }
 0x25d   : > { %v4500_v48 = vpack.c.bf16 %v4276_v62, %v4275_v0 }
 0x25f   : > { %4314 = vst [vmem:[%s6557_s30 + $0x8] sm:$0xff] %v4500_v48 }
 0x263   : > { %v4203_v24 = vpop.f32.mrb[28].mxu0 }
 0x264   : > { %v4255_v31 = vmax.f32 %v4019_v8, %v4203_v24  ;;  %v4205_v23 = vpop.f32.mrb[29].mxu0  ;;  %v4244_v9 = vpop.f32.mrb[28].mxu1 }
 0x265   : > { %v4256_v7 = vmax.f32 %v4020_v49, %v4205_v23  ;;  %v4257_v13 = vmax.f32 %v4021_v50, %v4244_v9  ;;  %v4246_v5 = vpop.f32.mrb[29].mxu1  ;;  %v4207_v29 = vpop.f32.mrb[30].mxu0 }
 0x266   : > { %v4269_v54 = vadd.f32 %v4263_v2, %v4255_v31  ;;  %v4258_v25 = vmax.f32 %v4022_v42, %v4246_v5  ;;  %v4248_v14 = vpop.f32.mrb[30].mxu1  ;;  %v4208_v52 = vpop.f32.mrb[31].mxu0 }
 0x267   : > { %v4270_v59 = vadd.f32 %v4263_v2, %v4256_v7  ;;  %v4271_v28 = vadd.f32 %v4263_v2, %v4257_v13  ;;  %v4249_v43 = vpop.f32.mrb[31].mxu1 }
 0x268   : > { %v4277_v63 = vmax.f32 %v4269_v54, 0.0  ;;  %v4272_v10 = vadd.f32 %v4263_v2, %v4258_v25 }
 0x269   : > { %v4278_v61 = vmax.f32 %v4270_v59, 0.0  ;;  %v4279_v58 = vmax.f32 %v4271_v28, 0.0 }
 0x26a   : > { %v4280_v33 = vmax.f32 %v4272_v10, 0.0 }
 0x26b   : > { %v4501_v40 = vpack.c.bf16 %v4278_v61, %v4277_v63 }
 0x26c   : > { %v4502_v27 = vpack.c.bf16 %v4280_v33, %v4279_v58 }
 0x26d   : > { %4315 = vst [vmem:[%s6557_s30 + $0x10] sm:$0xff] %v4501_v40 }
 0x26e   : > { %4316 = vst [vmem:[%s6557_s30 + $0x18] sm:$0xff] %v4502_v27 }
 0x26f PF: > { %s13_s12 = sadd.s32 1, %s4684_s12  }
 0x270   : > { %p10_p4 = scmp.ge.s32.totalorder %s13_s12, 4  }
 0x272   :  { %12 = sbr.rel (!%p10_p4) target bundleno = 1 (0x1), region = 65 }

// kernel: cnn_forward.5
= control target key start
LH: loop header
LB: loop body
LE: loop exit
PB: predicated region body
PF: predicated region fallthrough
CT: control target
= control target key end

     0   :  { %s1787_s12 = smov 0   ;;  %s2107_s0 = inlined_call_operand.vmem [shape: bf16[2,32,512], index: 0, kind: input, shape index: {}]   ;;  %s2108_s1 = inlined_call_operand.vmem [shape: bf16[16,72], index: 1, kind: input, shape index: {}]   ;;  %s2109_s2 = inlined_call_operand.vmem [shape: f32[16,1], index: 2, kind: input, shape index: {}]   ;;  %s2110_s3 = inlined_call_operand.vmem [shape: bf16[2,16,384], index: 3, kind: output, shape index: {}]  }
   0x1 LB: > { %s1539_s13 = sadd.s32 4294967295, %s1759_s12   ;;  %p1543_p0 = scmp.ge.s32.totalorder %s1759_s12, 1  ;;  %s1759_s12 = sphi %s1787_s12, %s13_s12  }
   0x2   : > { %p137_p1 = scmp.lt.s32.totalorder %s1759_s12, 3 }
   0x4   : > { %p138_p2 = pnand %p1543_p0, %p137_p1 }
   0x5   : > { %p161_p3 = scmp.lt.s32.totalorder (!%p138_p2), %s1539_s13, 1  ;;  %v1761_v0 = vmov (!%p138_p2), 0.0   ;;  %s1762_s18 = smov (!%p138_p2), 127   ;;  %v1764_v16 = vmov (!%p138_p2), 0   ;;  %vm1766_vm0 = vmmov (!%p138_p2), 0   ;;  %v1436_v22 = vld [vmem:[%s2109_s2] sm:$0xff] (!%p138_p2) }
   0x6   : > { %141 = sbr.rel (%p138_p2) target bundleno = 474 (0x1da), region = 32  ;;  %1655 = vmatprep.subr.bf16.mxu1 (!%p138_p2), %v1761_v0  ;;  %s1763_s19 = smov (!%p138_p2), 119   ;;  %817 = vmatprep.mubr.bf16.mxu0 (!%p138_p2), %v1764_v16  ;;  %v1437_v23 = vld [vmem:[%s2109_s2 + $0x8] sm:$0xff] (!%p138_p2)  ;;  %vm190_vm1 = vcmask (!%p138_p2), 1043456   ;;  %vm192_vm2 = vcmask (!%p138_p2), 1039360   ;;  %vm235_vm3 = vcmask (!%p138_p2), 973824  }
   0x7   : > { %1726 = vset.pattern.permute.xlu0 (!%p138_p2), %v1764_v16  ;;  %1727 = vset.pattern.permute.xlu1 (!%p138_p2), %v1764_v16  ;;  %s1765_s20 = smov (!%p138_p2), 118   ;;  %vm270_vm4 = vcmask (!%p138_p2), 965632   ;;  %vm771_vm5 = vcmask (!%p138_p2), 588800  }
   0x8   : > { %1665 = vmatprep.mubr.msk.bf16.mxu1 (!%p138_p2), %vm1766_vm0, %v1761_v0 }
   0xd   : > { %s2112_s13 = smov (!%p161_p3, %s1539_s13), 1 }
   0xe   : > { %s1626_s14 = sshll.u32 %s2112_s13, 6  ;;  %s1711_s27 = smul.u32 24, %s2112_s13 }
   0xf   : > { %s1801_s17 = scalar_lea.vmem %s2107_s0, %s1626_s14 }
  0x10   : > { %v1805_v1 = vld [vmem:[%s1801_s17 + $0x20] sm:$0xff]  ;;  %v1815_v3 = vld [vmem:[%s1801_s17 + $0x28] sm:$0xff]  ;;  %v1821_v5 = vld [vmem:[%s1801_s17 + $0x10] sm:$0xff]  ;;  %s170_s30 = scalar_lea.vmem %s2110_s3, %s1711_s27 }
  0x11   : > { %v1808_v2 = vld [vmem:[%s1801_s17] sm:$0xff]  ;;  %211 = vrot.lane.b32.xlu1 %v1805_v1, %s1762_s18  ;;  %v1818_v4 = vld [vmem:[%s1801_s17 + $0x8] sm:$0xff]  ;;  %v1824_v6 = vld [vmem:[%s1801_s17 + $0x30] sm:$0xff] }
  0x12   : > { %184 = vrot.lane.b32.xlu0 %v1808_v2, %s1762_s18  ;;  %v173_v7 = vld [vmem:[%s1801_s17 + $0x8] sm:$0xf]  ;;  %v177_v8 = vld [vmem:[%s1801_s17 + $0x18] sm:$0xf]  ;;  %v1549_v9 = vcombine.high %v1808_v2, %v1821_v5  ;;  %v1548_v10 = vcombine.low %v1808_v2, %v1821_v5 }
  0x13   : > { %v200_v11 = vld [vmem:[%s1801_s17 + $0x28] sm:$0xf]  ;;  %175 = vst [vmem:[#allocation2 + $0x8] sm:$0xf] %v173_v7  ;;  %179 = vst [vmem:[#allocation2 + $0x14] sm:$0xf] %v177_v8 }
  0x14   : > { %202 = vst [vmem:[#allocation2 + $0x2c] sm:$0xf] %v200_v11  ;;  %v204_v12 = vld [vmem:[%s1801_s17 + $0x38] sm:$0xf]  ;;  %785 = vmatprep.subr.bf16.mxu0 %v1549_v9  ;;  %v406_v19 = vld [vmem:[%s1801_s17 + $0x28] sm:$0xf] }
  0x15   : > { %213 = vrot.lane.b32.xlu1 %v1815_v3, %s1762_s18  ;;  %206 = vst [vmem:[#allocation2 + $0x38] sm:$0xf] %v204_v12  ;;  %786 = vmatpush1.bf16.msra.mxu0 %v1548_v10  ;;  %v243_v13 = vld [vmem:[%s1801_s17 + $0x18] sm:$0xff]  ;;  %409 = vst [vmem:[#allocation2 + $0xe0] sm:$0xf] %v406_v19 }
  0x16   : > { %186 = vrot.lane.b32.xlu0 %v1818_v4, %s1762_s18  ;;  %v278_v15 = vld [vmem:[%s1801_s17 + $0x18] sm:$0xf] }
  0x17   : > { %281 = vst [vmem:[#allocation2 + $0x74] sm:$0xf] %v278_v15  ;;  %v317_v17 = vld [vmem:[%s1801_s17 + $0x38] sm:$0xf] }
  0x18   : > { %319 = vst [vmem:[#allocation2 + $0x98] sm:$0xf] %v317_v17  ;;  %v338_v18 = vld [vmem:[%s1801_s17 + $0x38] sm:$0xff] }
  0x19   : > { %230 = vrot.lane.b32.xlu1 %v1818_v4, %s1763_s19  ;;  %v411_v20 = vld [vmem:[%s1801_s17 + $0x38] sm:$0xf] }
  0x1a   : > { %228 = vrot.lane.b32.xlu0 %v1808_v2, %s1763_s19  ;;  %v1728_v14 = vld [vmem:[#allocation2 + $0x8] ss:$12 sps:$4 sm:$0xff]   ;;  %413 = vst [vmem:[#allocation2 + $0xec] sm:$0xf] %v411_v20  ;;  %v534_v21 = vld [vmem:[%s1801_s17 + $0x38] sm:$0xf] }
  0x1b   : > { %1656 = vmatpush3.bf16.msra.mxu1 %v1728_v14  ;;  %537 = vst [vmem:[#allocation2 + $0x14c] sm:$0xf] %v534_v21 }
  0x1c   : > { %1657 = vmatprep.subr.bf16.mxu1 %v1761_v0 }
  0x1d   : > { %248 = vrot.lane.b32.xlu1 %v243_v13, %s1763_s19 }
  0x1e   : > { %246 = vrot.lane.b32.xlu0 %v1821_v5, %s1763_s19 }
  0x21   : > { %265 = vrot.lane.b32.xlu1 %v1818_v4, %s1765_s20 }
  0x22   : > { %263 = vrot.lane.b32.xlu0 %v1808_v2, %s1765_s20 }
  0x25   : > { %288 = vrot.lane.b32.xlu1 %v1818_v4, %s1762_s18 }
  0x26   : > { %286 = vrot.lane.b32.xlu0 %v1808_v2, %s1762_s18 }
  0x29   : > { %305 = vrot.lane.b32.xlu1 %v243_v13, %s1762_s18 }
  0x2a   : > { %303 = vrot.lane.b32.xlu0 %v1821_v5, %s1762_s18 }
  0x2d   : > { %326 = vrot.lane.b32.xlu1 %v1815_v3, %s1762_s18 }
  0x2e   : > { %324 = vrot.lane.b32.xlu0 %v1805_v1, %s1762_s18 }
  0x31   : > { %343 = vrot.lane.b32.xlu1 %v338_v18, %s1762_s18 }
  0x32   : > { %341 = vrot.lane.b32.xlu0 %v1824_v6, %s1762_s18 }
  0x35   : > { %360 = vrot.lane.b32.xlu1 %v243_v13, %s1763_s19 }
  0x36   : > { %358 = vrot.lane.b32.xlu0 %v1821_v5, %s1763_s19 }
  0x39   : > { %377 = vrot.lane.b32.xlu1 %v1818_v4, %s1765_s20 }
  0x3a   : > { %375 = vrot.lane.b32.xlu0 %v1808_v2, %s1765_s20 }
  0x3d   : > { %394 = vrot.lane.b32.xlu1 %v243_v13, %s1765_s20 }
  0x3e   : > { %392 = vrot.lane.b32.xlu0 %v1821_v5, %s1765_s20 }
  0x41   : > { %420 = vrot.lane.b32.xlu1 %v1815_v3, %s1762_s18 }
  0x42   : > { %418 = vrot.lane.b32.xlu0 %v1805_v1, %s1762_s18 }
  0x45   : > { %437 = vrot.lane.b32.xlu1 %v1818_v4, %s1763_s19 }
  0x46   : > { %435 = vrot.lane.b32.xlu0 %v1808_v2, %s1763_s19 }
  0x49   : > { %454 = vrot.lane.b32.xlu1 %v243_v13, %s1763_s19 }
  0x4a   : > { %452 = vrot.lane.b32.xlu0 %v1821_v5, %s1763_s19 }
  0x4d   : > { %471 = vrot.lane.b32.xlu1 %v1818_v4, %s1765_s20 }
  0x4e   : > { %469 = vrot.lane.b32.xlu0 %v1808_v2, %s1765_s20 }
  0x51   : > { %488 = vrot.lane.b32.xlu1 %v1815_v3, %s1763_s19 }
  0x52   : > { %486 = vrot.lane.b32.xlu0 %v1805_v1, %s1763_s19 }
  0x55   : > { %505 = vrot.lane.b32.xlu1 %v338_v18, %s1763_s19 }
  0x56   : > { %503 = vrot.lane.b32.xlu0 %v1824_v6, %s1763_s19 }
  0x59   : > { %522 = vrot.lane.b32.xlu1 %v1815_v3, %s1765_s20 }
  0x5a   : > { %520 = vrot.lane.b32.xlu0 %v1805_v1, %s1765_s20 }
  0x5d   : > { %544 = vrot.lane.b32.xlu1 %v1815_v3, %s1762_s18 }
  0x5e   : > { %542 = vrot.lane.b32.xlu0 %v1805_v1, %s1762_s18 }
  0x61   : > { %561 = vrot.lane.b32.xlu1 %v338_v18, %s1762_s18 }
  0x62   : > { %559 = vrot.lane.b32.xlu0 %v1824_v6, %s1762_s18 }
  0x65   : > { %578 = vrot.lane.b32.xlu1 %v243_v13, %s1763_s19 }
  0x66   : > { %576 = vrot.lane.b32.xlu0 %v1821_v5, %s1763_s19 }
  0x69   : > { %595 = vrot.lane.b32.xlu1 %v1818_v4, %s1765_s20 }
  0x6a   : > { %593 = vrot.lane.b32.xlu0 %v1808_v2, %s1765_s20 }
  0x6d   : > { %612 = vrot.lane.b32.xlu1 %v243_v13, %s1765_s20 }
  0x6e   : > { %610 = vrot.lane.b32.xlu0 %v1821_v5, %s1765_s20 }
  0x71   : > { %629 = vrot.lane.b32.xlu1 %v338_v18, %s1763_s19 }
  0x72   : > { %627 = vrot.lane.b32.xlu0 %v1824_v6, %s1763_s19 }
  0x75   : > { %646 = vrot.lane.b32.xlu1 %v1815_v3, %s1765_s20 }
  0x76   : > { %644 = vrot.lane.b32.xlu0 %v1805_v1, %s1765_s20 }
  0x79   : > { %663 = vrot.lane.b32.xlu1 %v338_v18, %s1765_s20  ;;  %v1973_v18 = vld [vmem:[%s2108_s1] sm:$0xff]  }
  0x7a   : > { %661 = vrot.lane.b32.xlu0 %v1824_v6, %s1765_s20 }
  0x7d   : > { %1445 = vperm.xlu1 %1727, %v1437_v23  }
  0x7e   : > { %1440 = vperm.xlu0 %1726, %v1436_v22  }
  0x83   : > { %v212_v24 = vpop.permute.xlu1 %211 }
  0x84   : > { %v185_v25 = vpop.permute.xlu0 %184  ;;  %v215_v29 = vrot.slane %v212_v24, 4 }
  0x85   : > { %v188_v26 = vrot.slane %v185_v25, 4 }
  0x87   : > { %v214_v27 = vpop.permute.xlu1 %213 }
  0x88   : > { %v187_v28 = vpop.permute.xlu0 %186  ;;  %v216_v30 = vrot.slane %v214_v27, 4 }
  0x89   : > { %v189_v31 = vrot.slane %v187_v28, 4 }
  0x8a   : > { %v217_v32 = vsel %vm190_vm1, %v215_v29, %v216_v30  ;;  %v219_v33 = vsel %vm192_vm2, %v214_v27, %v216_v30 }
  0x8b   : > { %v191_v34 = vsel %vm190_vm1, %v188_v26, %v189_v31  ;;  %v194_v35 = vsel %vm192_vm2, %v187_v28, %v189_v31  ;;  %v218_v36 = vsel %vm192_vm2, %v212_v24, %v217_v32  ;;  %223 = vst [vmem:[#allocation2 + $0x44] sm:$0xf] %v219_v33  ;;  %v231_v38 = vpop.permute.xlu1 %230 }
  0x8c   : > { %v193_v37 = vsel %vm192_vm2, %v185_v25, %v191_v34  ;;  %198 = vst [vmem:[#allocation2 + $0x20] sm:$0xf] %v194_v35  ;;  %v229_v39 = vpop.permute.xlu0 %228  ;;  %v233_v40 = vrot.slane %v231_v38, 4  ;;  %v1555_v46 = vcombine.high %v1824_v6, %v218_v36  ;;  %v1554_v52 = vcombine.low %v1824_v6, %v218_v36 }
  0x8d   : > { %v232_v41 = vrot.slane %v229_v39, 4  ;;  %v1552_v42 = vcombine.high %v193_v37, %v1805_v1  ;;  %v1551_v43 = vcombine.low %v193_v37, %v1805_v1 }
  0x8e   : > { %v237_v44 = vsel %vm235_vm3, %v231_v38, %v233_v40 }
  0x8f   : > { %v234_v45 = vsel %vm190_vm1, %v232_v41, %v233_v40  ;;  %787 = vmatprep.subr.bf16.mxu0 %v1552_v42  ;;  %241 = vst [vmem:[#allocation2 + $0x50] sm:$0xf] %v237_v44  ;;  %v249_v48 = vpop.permute.xlu1 %248 }
  0x90   : > { %v236_v47 = vsel %vm235_vm3, %v229_v39, %v234_v45  ;;  %v247_v49 = vpop.permute.xlu0 %246  ;;  %788 = vmatpush1.bf16.msra.mxu0 %v1551_v43  ;;  %v251_v50 = vrot.slane %v249_v48, 4 }
  0x91   : > { %v250_v51 = vrot.slane %v247_v49, 4  ;;  %789 = vmatprep.subr.bf16.mxu0 %v1555_v46 }
  0x92   : > { %v254_v53 = vsel %vm235_vm3, %v249_v48, %v251_v50  ;;  %v1732_v3 = vld [vmem:[#allocation2 + $0x38] ss:$12 sps:$4 sm:$0xff]  }
  0x93   : > { %v252_v54 = vsel %vm190_vm1, %v250_v51, %v251_v50  ;;  %v1731_v55 = vld [vmem:[#allocation2 + $0x20] ss:$12 sps:$4 sm:$0xff]   ;;  %258 = vst [vmem:[#allocation2 + $0x5c] sm:$0xf] %v254_v53  ;;  %v266_v57 = vpop.permute.xlu1 %265 }
  0x94   : > { %v253_v56 = vsel %vm235_vm3, %v247_v49, %v252_v54  ;;  %v264_v58 = vpop.permute.xlu0 %263  ;;  %790 = vmatpush1.bf16.msra.mxu0 %v1554_v52  ;;  %v268_v59 = vrot.slane %v266_v57, 4  ;;  %1658 = vmatpush3.bf16.msra.mxu1 %v1731_v55 }
  0x95   : > { %v267_v60 = vrot.slane %v264_v58, 4  ;;  %v1558_v61 = vcombine.high %v236_v47, %v253_v56  ;;  %v1557_v62 = vcombine.low %v236_v47, %v253_v56  ;;  %1659 = vmatprep.subr.bf16.mxu1 %v1761_v0 }
  0x96   : > { %v272_v63 = vsel %vm270_vm4, %v266_v57, %v268_v59 }
  0x97   : > { %v269_v2 = vsel %vm190_vm1, %v267_v60, %v268_v59  ;;  %791 = vmatprep.subr.bf16.mxu0 %v1558_v61  ;;  %276 = vst [vmem:[#allocation2 + $0x68] sm:$0xf] %v272_v63  ;;  %v289_v7 = vpop.permute.xlu1 %288 }
  0x98   : > { %v271_v4 = vsel %vm270_vm4, %v264_v58, %v269_v2  ;;  %v287_v8 = vpop.permute.xlu0 %286  ;;  %792 = vmatpush1.bf16.msra.mxu0 %v1557_v62  ;;  %v291_v9 = vrot.slane %v289_v7, 4  ;;  %1660 = vmatpush3.bf16.msra.mxu1 %v1732_v3 }
  0x99   : > { %v290_v10 = vrot.slane %v287_v8, 4  ;;  %v1561_v11 = vcombine.high %v271_v4, %v271_v4  ;;  %v1560_v12 = vcombine.low %v271_v4, %v271_v4  ;;  %1661 = vmatprep.subr.bf16.mxu1 %v1761_v0 }
  0x9a   : > { %v294_v13 = vsel %vm192_vm2, %v289_v7, %v291_v9  ;;  %v1733_v15 = vld [vmem:[#allocation2 + $0x50] ss:$12 sps:$4 sm:$0xff]  }
  0x9b   : > { %v292_v14 = vsel %vm190_vm1, %v290_v10, %v291_v9  ;;  %1563 = vmatprep.subr.msk.bf16.mxu0 %vm190_vm1, %v1561_v11  ;;  %v777_v17 = vsel %vm190_vm1, %v1560_v12, 0  ;;  %298 = vst [vmem:[#allocation2 + $0x80] sm:$0xf] %v294_v13  ;;  %v306_v20 = vpop.permute.xlu1 %305 }
  0x9c   : > { %v293_v19 = vsel %vm192_vm2, %v287_v8, %v292_v14  ;;  %v304_v21 = vpop.permute.xlu0 %303  ;;  %794 = vmatpush1.bf16.msra.mxu0 %v777_v17  ;;  %v308_v22 = vrot.slane %v306_v20, 4  ;;  %1662 = vmatpush3.bf16.msra.mxu1 %v1733_v15  ;;  %v1585_v17 = vcombine.high %v1805_v1, %v1824_v6 }
  0x9d   : > { %v307_v23 = vrot.slane %v304_v21, 4  ;;  %v1566_v24 = vcombine.low %v1821_v5, %v293_v19  ;;  %v1567_v25 = vcombine.high %v1821_v5, %v293_v19  ;;  %1663 = vmatprep.subr.bf16.mxu1 %v1761_v0 }
  0x9e   : > { %v311_v26 = vsel %vm192_vm2, %v306_v20, %v308_v22  ;;  %v1734_v28 = vld [vmem:[#allocation2 + $0x68] ss:$0 sps:$4 sm:$0xff]  }
  0x9f   : > { %v309_v27 = vsel %vm190_vm1, %v307_v23, %v308_v22  ;;  %968 = vmatprep.subr.bf16.mxu0 %v1567_v25  ;;  %1564 = vmatmul.mubr.msk.bf16.vlgmr.msra.gmra.mrb[0].mxu0 %vm771_vm5, %v1973_v18  ;;  %315 = vst [vmem:[#allocation2 + $0x8c] sm:$0xf] %v311_v26  ;;  %v327_v30 = vpop.permute.xlu1 %326  ;;  %v783_v33 = vsel %vm190_vm1, %v1734_v28, 0 }
  0xa0   : > { %v310_v29 = vsel %vm192_vm2, %v304_v21, %v309_v27  ;;  %v325_v31 = vpop.permute.xlu0 %324  ;;  %969 = vmatpush1.bf16.msra.mxu0 %v1566_v24  ;;  %1000 = vmatprep.mubr.bf16.mxu0 %v1764_v16  ;;  %v329_v5 = vrot.slane %v327_v30, 4 }
  0xa1   : > { %v328_v32 = vrot.slane %v325_v31, 4  ;;  %v1569_v34 = vcombine.low %v310_v29, %v1824_v6  ;;  %1664 = vmatpush3.bf16.msra.mxu1 %v783_v33  ;;  %v1570_v35 = vcombine.high %v310_v29, %v1824_v6 }
  0xa2   : > { %v332_v36 = vsel %vm192_vm2, %v327_v30, %v329_v5  ;;  %1669 = vmatprep.subr.bf16.mxu1 %v1761_v0  ;;  %v1736_v38 = vld [vmem:[#allocation2 + $0x74] ss:$12 sps:$4 sm:$0xff]   ;;  %v1584_v30 = vcombine.low %v1805_v1, %v1824_v6 }
  0xa3   : > { %v330_v37 = vsel %vm190_vm1, %v328_v32, %v329_v5  ;;  %336 = vst [vmem:[#allocation2 + $0xa4] sm:$0xf] %v332_v36  ;;  %v344_v40 = vpop.permute.xlu1 %343  ;;  %970 = vmatprep.subr.bf16.mxu0 %v1570_v35 }
  0xa4   : > { %v331_v39 = vsel %vm192_vm2, %v325_v31, %v330_v37  ;;  %v342_v41 = vpop.permute.xlu0 %341  ;;  %v346_v42 = vrot.slane %v344_v40, 4  ;;  %1666 = vmatmul.mubr.msk.bf16.vlgmr.msra.gmra.mrb[0].mxu1 %vm771_vm5, %v1973_v18  ;;  %971 = vmatpush1.bf16.msra.mxu0 %v1569_v34 }
  0xa5   : > { %v345_v43 = vrot.slane %v342_v41, 4  ;;  %1670 = vmatpush3.bf16.msra.mxu1 %v1736_v38  ;;  %1679 = vmatprep.mubr.msk.bf16.mxu1 %vm1766_vm0, %v1761_v0 }
  0xa6   : > { %v349_v44 = vsel %vm192_vm2, %v344_v40, %v346_v42  ;;  %1671 = vmatprep.subr.bf16.mxu1 %v1761_v0  ;;  %v1737_v46 = vld [vmem:[#allocation2 + $0x8c] ss:$12 sps:$4 sm:$0xff]  }
  0xa7   : > { %v347_v45 = vsel %vm190_vm1, %v345_v43, %v346_v42  ;;  %353 = vst [vmem:[#allocation2 + $0xb0] sm:$0xf] %v349_v44  ;;  %v361_v48 = vpop.permute.xlu1 %360 }
  0xa8   : > { %v348_v47 = vsel %vm192_vm2, %v342_v41, %v347_v45  ;;  %v359_v49 = vpop.permute.xlu0 %358  ;;  %v363_v50 = vrot.slane %v361_v48, 4  ;;  %v1743_v41 = vld [vmem:[#allocation2 + $0xe0] ss:$12 sps:$4 sm:$0xff]  }
  0xa9   : > { %v362_v51 = vrot.slane %v359_v49, 4  ;;  %v1572_v52 = vcombine.low %v331_v39, %v348_v47  ;;  %v1573_v53 = vcombine.high %v331_v39, %v348_v47  ;;  %1672 = vmatpush3.bf16.msra.mxu1 %v1737_v46 }
  0xaa   : > { %v366_v54 = vsel %vm235_vm3, %v361_v48, %v363_v50  ;;  %1673 = vmatprep.subr.bf16.mxu1 %v1761_v0 }
  0xab   : > { %v364_v55 = vsel %vm190_vm1, %v362_v51, %v363_v50  ;;  %972 = vmatprep.subr.bf16.mxu0 %v1573_v53  ;;  %370 = vst [vmem:[#allocation2 + $0xbc] sm:$0xf] %v366_v54  ;;  %v378_v57 = vpop.permute.xlu1 %377 }
  0xac   : > { %v365_v56 = vsel %vm235_vm3, %v359_v49, %v364_v55  ;;  %v376_v58 = vpop.permute.xlu0 %375  ;;  %973 = vmatpush1.bf16.msra.mxu0 %v1572_v52  ;;  %v380_v59 = vrot.slane %v378_v57, 4 }
  0xad   : > { %v379_v60 = vrot.slane %v376_v58, 4 }
  0xae   : > { %v383_v61 = vsel %vm270_vm4, %v378_v57, %v380_v59  ;;  %v1738_v63 = vld [vmem:[#allocation2 + $0xa4] ss:$12 sps:$4 sm:$0xff]  }
  0xaf   : > { %v381_v62 = vsel %vm190_vm1, %v379_v60, %v380_v59  ;;  %387 = vst [vmem:[#allocation2 + $0xc8] sm:$0xf] %v383_v61  ;;  %v395_v3 = vpop.permute.xlu1 %394  ;;  %1674 = vmatpush3.bf16.msra.mxu1 %v1738_v63 }
  0xb0   : > { %v382_v2 = vsel %vm270_vm4, %v376_v58, %v381_v62  ;;  %v393_v4 = vpop.permute.xlu0 %392  ;;  %v397_v7 = vrot.slane %v395_v3, 4  ;;  %1675 = vmatprep.subr.bf16.mxu1 %v1761_v0 }
  0xb1   : > { %v396_v8 = vrot.slane %v393_v4, 4  ;;  %v1575_v9 = vcombine.low %v365_v56, %v382_v2  ;;  %v1576_v10 = vcombine.high %v365_v56, %v382_v2 }
  0xb2   : > { %v400_v11 = vsel %vm270_vm4, %v395_v3, %v397_v7 }
  0xb3   : > { %v398_v12 = vsel %vm190_vm1, %v396_v8, %v397_v7  ;;  %974 = vmatprep.subr.bf16.mxu0 %v1576_v10  ;;  %404 = vst [vmem:[#allocation2 + $0xd4] sm:$0xf] %v400_v11  ;;  %v421_v14 = vpop.permute.xlu1 %420 }
  0xb4   : > { %v399_v13 = vsel %vm270_vm4, %v393_v4, %v398_v12  ;;  %v419_v15 = vpop.permute.xlu0 %418  ;;  %975 = vmatpush1.bf16.msra.mxu0 %v1575_v9  ;;  %v423_v19 = vrot.slane %v421_v14, 4 }
  0xb5   : > { %v422_v20 = vrot.slane %v419_v15, 4  ;;  %v1579_v21 = vcombine.high %v399_v13, %v399_v13  ;;  %v1578_v22 = vcombine.low %v399_v13, %v399_v13 }
  0xb6   : > { %v426_v23 = vsel %vm192_vm2, %v421_v14, %v423_v19  ;;  %v1739_v25 = vld [vmem:[#allocation2 + $0xbc] ss:$12 sps:$4 sm:$0xff]  }
  0xb7   : > { %v424_v24 = vsel %vm190_vm1, %v422_v20, %v423_v19  ;;  %1581 = vmatprep.subr.msk.bf16.mxu0 %vm190_vm1, %v1579_v21  ;;  %v960_v26 = vsel %vm190_vm1, %v1578_v22, 0  ;;  %430 = vst [vmem:[#allocation2 + $0xf8] sm:$0xf] %v426_v23  ;;  %v438_v28 = vpop.permute.xlu1 %437  ;;  %1676 = vmatpush3.bf16.msra.mxu1 %v1739_v25 }
  0xb8   : > { %v425_v27 = vsel %vm192_vm2, %v419_v15, %v424_v24  ;;  %v436_v29 = vpop.permute.xlu0 %435  ;;  %977 = vmatpush1.bf16.msra.mxu0 %v960_v26  ;;  %v440_v31 = vrot.slane %v438_v28, 4  ;;  %1677 = vmatprep.subr.bf16.mxu1 %v1761_v0 }
  0xb9   : > { %v439_v5 = vrot.slane %v436_v29, 4  ;;  %1157 = vmatprep.subr.bf16.mxu0 %v1585_v17 }
  0xba   : > { %v443_v32 = vsel %vm235_vm3, %v438_v28, %v440_v31  ;;  %v1740_v34 = vld [vmem:[#allocation2 + $0xd4] ss:$0 sps:$4 sm:$0xff]  }
  0xbb   : > { %v441_v33 = vsel %vm190_vm1, %v439_v5, %v440_v31  ;;  %1582 = vmatmul.mubr.msk.bf16.vlgmr.msra.gmra.mrb[4].mxu0 %vm771_vm5, %v1973_v18  ;;  %447 = vst [vmem:[#allocation2 + $0x104] sm:$0xf] %v443_v32  ;;  %v455_v36 = vpop.permute.xlu1 %454  ;;  %v966_v39 = vsel %vm190_vm1, %v1740_v34, 0 }
  0xbc   : > { %v442_v35 = vsel %vm235_vm3, %v436_v29, %v441_v33  ;;  %v453_v37 = vpop.permute.xlu0 %452  ;;  %1158 = vmatpush1.bf16.msra.mxu0 %v1584_v30  ;;  %1189 = vmatprep.mubr.bf16.mxu0 %v1764_v16  ;;  %v457_v1 = vrot.slane %v455_v36, 4 }
  0xbd   : > { %v456_v38 = vrot.slane %v453_v37, 4  ;;  %v1587_v40 = vcombine.low %v425_v27, %v442_v35  ;;  %1678 = vmatpush3.bf16.msra.mxu1 %v966_v39  ;;  %v1588_v42 = vcombine.high %v425_v27, %v442_v35 }
  0xbe   : > { %v460_v43 = vsel %vm235_vm3, %v455_v36, %v457_v1  ;;  %1683 = vmatprep.subr.bf16.mxu1 %v1761_v0 }
  0xbf   : > { %v458_v44 = vsel %vm190_vm1, %v456_v38, %v457_v1  ;;  %464 = vst [vmem:[#allocation2 + $0x110] sm:$0xf] %v460_v43  ;;  %v472_v46 = vpop.permute.xlu1 %471  ;;  %1159 = vmatprep.subr.bf16.mxu0 %v1588_v42 }
  0xc0   : > { %v459_v45 = vsel %vm235_vm3, %v453_v37, %v458_v44  ;;  %v470_v47 = vpop.permute.xlu0 %469  ;;  %v474_v48 = vrot.slane %v472_v46, 4  ;;  %1680 = vmatmul.mubr.msk.bf16.vlgmr.msra.gmra.mrb[4].mxu1 %vm771_vm5, %v1973_v18  ;;  %1160 = vmatpush1.bf16.msra.mxu0 %v1587_v40 }
  0xc1   : > { %v473_v49 = vrot.slane %v470_v47, 4  ;;  %1684 = vmatpush3.bf16.msra.mxu1 %v1743_v41  ;;  %1693 = vmatprep.mubr.msk.bf16.mxu1 %vm1766_vm0, %v1761_v0 }
  0xc2   : > { %v477_v50 = vsel %vm270_vm4, %v472_v46, %v474_v48  ;;  %1685 = vmatprep.subr.bf16.mxu1 %v1761_v0  ;;  %v1744_v52 = vld [vmem:[#allocation2 + $0xf8] ss:$12 sps:$4 sm:$0xff]  }
  0xc3   : > { %v475_v51 = vsel %vm190_vm1, %v473_v49, %v474_v48  ;;  %481 = vst [vmem:[#allocation2 + $0x11c] sm:$0xf] %v477_v50  ;;  %v489_v54 = vpop.permute.xlu1 %488 }
  0xc4   : > { %v476_v53 = vsel %vm270_vm4, %v470_v47, %v475_v51  ;;  %v487_v55 = vpop.permute.xlu0 %486  ;;  %v491_v56 = vrot.slane %v489_v54, 4 }
  0xc5   : > { %v490_v57 = vrot.slane %v487_v55, 4  ;;  %v1590_v58 = vcombine.low %v459_v45, %v476_v53  ;;  %v1591_v59 = vcombine.high %v459_v45, %v476_v53  ;;  %1686 = vmatpush3.bf16.msra.mxu1 %v1744_v52 }
  0xc6   : > { %v494_v60 = vsel %vm235_vm3, %v489_v54, %v491_v56  ;;  %1687 = vmatprep.subr.bf16.mxu1 %v1761_v0 }
  0xc7   : > { %v492_v61 = vsel %vm190_vm1, %v490_v57, %v491_v56  ;;  %1161 = vmatprep.subr.bf16.mxu0 %v1591_v59  ;;  %498 = vst [vmem:[#allocation2 + $0x128] sm:$0xf] %v494_v60  ;;  %v506_v63 = vpop.permute.xlu1 %505 }
  0xc8   : > { %v493_v62 = vsel %vm235_vm3, %v487_v55, %v492_v61  ;;  %v504_v2 = vpop.permute.xlu0 %503  ;;  %1162 = vmatpush1.bf16.msra.mxu0 %v1590_v58  ;;  %v508_v3 = vrot.slane %v506_v63, 4 }
  0xc9   : > { %v507_v4 = vrot.slane %v504_v2, 4 }
  0xca   : > { %v511_v7 = vsel %vm235_vm3, %v506_v63, %v508_v3  ;;  %v1745_v9 = vld [vmem:[#allocation2 + $0x110] ss:$12 sps:$4 sm:$0xff]  }
  0xcb   : > { %v509_v8 = vsel %vm190_vm1, %v507_v4, %v508_v3  ;;  %515 = vst [vmem:[#allocation2 + $0x134] sm:$0xf] %v511_v7  ;;  %v523_v11 = vpop.permute.xlu1 %522  ;;  %1688 = vmatpush3.bf16.msra.mxu1 %v1745_v9 }
  0xcc   : > { %v510_v10 = vsel %vm235_vm3, %v504_v2, %v509_v8  ;;  %v521_v12 = vpop.permute.xlu0 %520  ;;  %v525_v13 = vrot.slane %v523_v11, 4  ;;  %1689 = vmatprep.subr.bf16.mxu1 %v1761_v0 }
  0xcd   : > { %v524_v14 = vrot.slane %v521_v12, 4  ;;  %v1593_v15 = vcombine.low %v493_v62, %v510_v10  ;;  %v1594_v17 = vcombine.high %v493_v62, %v510_v10 }
  0xce   : > { %v528_v19 = vsel %vm270_vm4, %v523_v11, %v525_v13 }
  0xcf   : > { %v526_v20 = vsel %vm190_vm1, %v524_v14, %v525_v13  ;;  %1163 = vmatprep.subr.bf16.mxu0 %v1594_v17  ;;  %532 = vst [vmem:[#allocation2 + $0x140] sm:$0xf] %v528_v19  ;;  %v545_v22 = vpop.permute.xlu1 %544 }
  0xd0   : > { %v527_v21 = vsel %vm270_vm4, %v521_v12, %v526_v20  ;;  %v543_v23 = vpop.permute.xlu0 %542  ;;  %1164 = vmatpush1.bf16.msra.mxu0 %v1593_v15  ;;  %v547_v24 = vrot.slane %v545_v22, 4 }
  0xd1   : > { %v546_v25 = vrot.slane %v543_v23, 4  ;;  %v1597_v26 = vcombine.high %v527_v21, %v527_v21  ;;  %v1596_v27 = vcombine.low %v527_v21, %v527_v21 }
  0xd2   : > { %v550_v28 = vsel %vm192_vm2, %v545_v22, %v547_v24  ;;  %v1746_v30 = vld [vmem:[#allocation2 + $0x128] ss:$12 sps:$4 sm:$0xff]  }
  0xd3   : > { %v548_v29 = vsel %vm190_vm1, %v546_v25, %v547_v24  ;;  %1599 = vmatprep.subr.msk.bf16.mxu0 %vm190_vm1, %v1597_v26  ;;  %v1149_v31 = vsel %vm190_vm1, %v1596_v27, 0  ;;  %554 = vst [vmem:[#allocation2 + $0x158] sm:$0xf] %v550_v28  ;;  %v562_v32 = vpop.permute.xlu1 %561  ;;  %1690 = vmatpush3.bf16.msra.mxu1 %v1746_v30 }
  0xd4   : > { %v549_v5 = vsel %vm192_vm2, %v543_v23, %v548_v29  ;;  %v560_v33 = vpop.permute.xlu0 %559  ;;  %1166 = vmatpush1.bf16.msra.mxu0 %v1149_v31  ;;  %v564_v34 = vrot.slane %v562_v32, 4  ;;  %1691 = vmatprep.subr.bf16.mxu1 %v1761_v0 }
  0xd5   : > { %v563_v35 = vrot.slane %v560_v33, 4  ;;  %v1602_v36 = vcombine.low %v1824_v6, %v549_v5  ;;  %v1603_v37 = vcombine.high %v1824_v6, %v549_v5 }
  0xd6   : > { %v567_v1 = vsel %vm192_vm2, %v562_v32, %v564_v34  ;;  %v1747_v39 = vld [vmem:[#allocation2 + $0x140] ss:$0 sps:$4 sm:$0xff]  }
  0xd7   : > { %v565_v38 = vsel %vm190_vm1, %v563_v35, %v564_v34  ;;  %1600 = vmatmul.mubr.msk.bf16.vlgmr.msra.gmra.mrb[8].mxu0 %vm771_vm5, %v1973_v18  ;;  %1346 = vmatprep.subr.bf16.mxu0 %v1603_v37  ;;  %571 = vst [vmem:[#allocation2 + $0x164] sm:$0xf] %v567_v1  ;;  %v579_v41 = vpop.permute.xlu1 %578  ;;  %v1155_v44 = vsel %vm190_vm1, %v1747_v39, 0 }
  0xd8   : > { %v566_v40 = vsel %vm192_vm2, %v560_v33, %v565_v38  ;;  %v577_v42 = vpop.permute.xlu0 %576  ;;  %1347 = vmatpush1.bf16.msra.mxu0 %v1602_v36  ;;  %1378 = vmatprep.mubr.bf16.mxu0 %v1764_v16  ;;  %v581_v6 = vrot.slane %v579_v41, 4 }
  0xd9   : > { %v580_v43 = vrot.slane %v577_v42, 4  ;;  %1692 = vmatpush3.bf16.msra.mxu1 %v1155_v44 }
  0xda   : > { %v584_v45 = vsel %vm235_vm3, %v579_v41, %v581_v6  ;;  %1697 = vmatprep.subr.bf16.mxu1 %v1761_v0  ;;  %v1748_v47 = vld [vmem:[#allocation2 + $0x14c] ss:$12 sps:$4 sm:$0xff]  }
  0xdb   : > { %v582_v46 = vsel %vm190_vm1, %v580_v43, %v581_v6  ;;  %588 = vst [vmem:[#allocation2 + $0x170] sm:$0xf] %v584_v45  ;;  %v596_v49 = vpop.permute.xlu1 %595 }
  0xdc   : > { %v583_v48 = vsel %vm235_vm3, %v577_v42, %v582_v46  ;;  %v594_v50 = vpop.permute.xlu0 %593  ;;  %v598_v51 = vrot.slane %v596_v49, 4  ;;  %1694 = vmatmul.mubr.msk.bf16.vlgmr.msra.gmra.mrb[8].mxu1 %vm771_vm5, %v1973_v18 }
  0xdd   : > { %v597_v52 = vrot.slane %v594_v50, 4  ;;  %v1605_v16 = vcombine.low %v566_v40, %v583_v48  ;;  %v1606_v53 = vcombine.high %v566_v40, %v583_v48  ;;  %1698 = vmatpush3.bf16.msra.mxu1 %v1748_v47  ;;  %1707 = vmatprep.mubr.msk.bf16.mxu1 %vm1766_vm0, %v1761_v0 }
  0xde   : > { %v601_v54 = vsel %vm270_vm4, %v596_v49, %v598_v51  ;;  %1699 = vmatprep.subr.bf16.mxu1 %v1761_v0 }
  0xdf   : > { %v599_v55 = vsel %vm190_vm1, %v597_v52, %v598_v51  ;;  %1348 = vmatprep.subr.bf16.mxu0 %v1606_v53  ;;  %605 = vst [vmem:[#allocation2 + $0x17c] sm:$0xf] %v601_v54  ;;  %v613_v57 = vpop.permute.xlu1 %612 }
  0xe0   : > { %v600_v56 = vsel %vm270_vm4, %v594_v50, %v599_v55  ;;  %v611_v58 = vpop.permute.xlu0 %610  ;;  %1349 = vmatpush1.bf16.msra.mxu0 %v1605_v16  ;;  %v615_v59 = vrot.slane %v613_v57, 4 }
  0xe1   : > { %v614_v60 = vrot.slane %v611_v58, 4 }
  0xe2   : > { %v618_v61 = vsel %vm270_vm4, %v613_v57, %v615_v59  ;;  %v1749_v63 = vld [vmem:[#allocation2 + $0x164] ss:$12 sps:$4 sm:$0xff]  }
  0xe3   : > { %v616_v62 = vsel %vm190_vm1, %v614_v60, %v615_v59  ;;  %622 = vst [vmem:[#allocation2 + $0x188] sm:$0xf] %v618_v61  ;;  %v630_v3 = vpop.permute.xlu1 %629  ;;  %1700 = vmatpush3.bf16.msra.mxu1 %v1749_v63 }
  0xe4   : > { %v617_v2 = vsel %vm270_vm4, %v611_v58, %v616_v62  ;;  %v628_v4 = vpop.permute.xlu0 %627  ;;  %v632_v7 = vrot.slane %v630_v3, 4  ;;  %1701 = vmatprep.subr.bf16.mxu1 %v1761_v0 }
  0xe5   : > { %v631_v8 = vrot.slane %v628_v4, 4  ;;  %v1608_v9 = vcombine.low %v600_v56, %v617_v2  ;;  %v1609_v10 = vcombine.high %v600_v56, %v617_v2 }
  0xe6   : > { %v635_v11 = vsel %vm235_vm3, %v630_v3, %v632_v7 }
  0xe7   : > { %v633_v12 = vsel %vm190_vm1, %v631_v8, %v632_v7  ;;  %1350 = vmatprep.subr.bf16.mxu0 %v1609_v10  ;;  %639 = vst [vmem:[#allocation2 + $0x194] sm:$0xf] %v635_v11  ;;  %v647_v14 = vpop.permute.xlu1 %646 }
  0xe8   : > { %v634_v13 = vsel %vm235_vm3, %v628_v4, %v633_v12  ;;  %v645_v15 = vpop.permute.xlu0 %644  ;;  %1351 = vmatpush1.bf16.msra.mxu0 %v1608_v9  ;;  %v649_v17 = vrot.slane %v647_v14, 4 }
  0xe9   : > { %v648_v19 = vrot.slane %v645_v15, 4 }
  0xea   : > { %v652_v20 = vsel %vm270_vm4, %v647_v14, %v649_v17  ;;  %v1750_v22 = vld [vmem:[#allocation2 + $0x17c] ss:$12 sps:$4 sm:$0xff]  }
  0xeb   : > { %v650_v21 = vsel %vm190_vm1, %v648_v19, %v649_v17  ;;  %656 = vst [vmem:[#allocation2 + $0x1a0] sm:$0xf] %v652_v20  ;;  %v664_v24 = vpop.permute.xlu1 %663  ;;  %1702 = vmatpush3.bf16.msra.mxu1 %v1750_v22 }
  0xec   : > { %v651_v23 = vsel %vm270_vm4, %v645_v15, %v650_v21  ;;  %v662_v25 = vpop.permute.xlu0 %661  ;;  %v666_v26 = vrot.slane %v664_v24, 4  ;;  %1703 = vmatprep.subr.bf16.mxu1 %v1761_v0 }
  0xed   : > { %v665_v27 = vrot.slane %v662_v25, 4  ;;  %v1611_v28 = vcombine.low %v634_v13, %v651_v23  ;;  %v1612_v29 = vcombine.high %v634_v13, %v651_v23 }
  0xee   : > { %v669_v30 = vsel %vm270_vm4, %v664_v24, %v666_v26 }
  0xef   : > { %v667_v31 = vsel %vm190_vm1, %v665_v27, %v666_v26  ;;  %1352 = vmatprep.subr.bf16.mxu0 %v1612_v29  ;;  %673 = vst [vmem:[#allocation2 + $0x1ac] sm:$0xf] %v669_v30 }
  0xf0   : > { %v668_v5 = vsel %vm270_vm4, %v662_v25, %v667_v31  ;;  %1353 = vmatpush1.bf16.msra.mxu0 %v1611_v28 }
  0xf1   : > { %v1615_v32 = vcombine.high %v668_v5, %v668_v5  ;;  %v1614_v33 = vcombine.low %v668_v5, %v668_v5 }
  0xf2   : > { %v1751_v34 = vld [vmem:[#allocation2 + $0x194] ss:$12 sps:$4 sm:$0xff]  }
  0xf3   : > { %1617 = vmatprep.subr.msk.bf16.mxu0 %vm190_vm1, %v1615_v32  ;;  %v1338_v35 = vsel %vm190_vm1, %v1614_v33, 0  ;;  %1704 = vmatpush3.bf16.msra.mxu1 %v1751_v34 }
  0xf4   : > { %1355 = vmatpush1.bf16.msra.mxu0 %v1338_v35  ;;  %1705 = vmatprep.subr.bf16.mxu1 %v1761_v0 }
  0xf6   : > { %v1752_v36 = vld [vmem:[#allocation2 + $0x1ac] ss:$0 sps:$4 sm:$0xff]  }
  0xf7   : > { %1618 = vmatmul.mubr.msk.bf16.vlgmr.msra.gmra.mrb[12].mxu0 %vm771_vm5, %v1973_v18  ;;  %v1344_v37 = vsel %vm190_vm1, %v1752_v36, 0 }
  0xf8   : > { %1706 = vmatpush3.bf16.msra.mxu1 %v1344_v37 }
  0xfb   : > { %1708 = vmatmul.mubr.msk.bf16.vlgmr.msra.gmra.mrb[12].mxu1 %vm771_vm5, %v1973_v18 }
  0xfc   : > { %v1446_v15 = vpop.permute.xlu1 %1445 }
  0xfd   : > { %v1441_v10 = vpop.permute.xlu0 %1440 }
 0x172   : > { %v819_v1 = vpop.f32.mrb[0].mxu0 }
 0x173   : > { %v821_v38 = vpop.f32.mrb[1].mxu0 }
 0x174   : > { %v823_v39 = vpop.f32.mrb[2].mxu0 }
 0x175   : > { %v825_v40 = vpop.f32.mrb[3].mxu0 }
 0x177   : > { %v862_v41 = vpop.f32.mrb[0].mxu1 }
 0x178   : > { %v1667_v42 = vpop.f32.mrb[1].mxu1 }
 0x179   : > { %v865_v6 = vpop.f32.mrb[2].mxu1 }
 0x17a   : > { %v1668_v43 = vpop.f32.mrb[3].mxu1 }
 0x18e   : > { %v1002_v44 = vpop.f32.mrb[4].mxu0 }
 0x18f   : > { %v1052_v0 = vmax.f32 %v819_v1, %v1002_v44  ;;  %v1004_v45 = vpop.f32.mrb[5].mxu0 }
 0x190   : > { %v1053_v46 = vmax.f32 %v821_v38, %v1004_v45  ;;  %v1006_v47 = vpop.f32.mrb[6].mxu0 }
 0x191   : > { %v1055_v48 = vmax.f32 %v823_v39, %v1006_v47  ;;  %v1008_v49 = vpop.f32.mrb[7].mxu0 }
 0x192   : > { %v1056_v50 = vmax.f32 %v825_v40, %v1008_v49 }
 0x193   : > { %v1045_v51 = vpop.f32.mrb[4].mxu1 }
 0x194   : > { %v1054_v52 = vmax.f32 %v862_v41, %v1045_v51  ;;  %v1681_v16 = vpop.f32.mrb[5].mxu1 }
 0x195   : > { %v1048_v18 = vpop.f32.mrb[6].mxu1 }
 0x196   : > { %v1057_v53 = vmax.f32 %v865_v6, %v1048_v18  ;;  %v1682_v54 = vpop.f32.mrb[7].mxu1 }
 0x1aa   : > { %v1191_v55 = vpop.f32.mrb[8].mxu0 }
 0x1ab   : > { %v1241_v56 = vmax.f32 %v1052_v0, %v1191_v55  ;;  %v1193_v57 = vpop.f32.mrb[9].mxu0 }
 0x1ac   : > { %v1242_v58 = vmax.f32 %v1053_v46, %v1193_v57  ;;  %v1195_v59 = vpop.f32.mrb[10].mxu0 }
 0x1ad   : > { %v1244_v60 = vmax.f32 %v1055_v48, %v1195_v59  ;;  %v1197_v61 = vpop.f32.mrb[11].mxu0 }
 0x1ae   : > { %v1245_v62 = vmax.f32 %v1056_v50, %v1197_v61 }
 0x1af   : > { %v1234_v63 = vpop.f32.mrb[8].mxu1 }
 0x1b0   : > { %v1243_v2 = vmax.f32 %v1054_v52, %v1234_v63  ;;  %v1695_v3 = vpop.f32.mrb[9].mxu1 }
 0x1b1   : > { %v1237_v4 = vpop.f32.mrb[10].mxu1 }
 0x1b2   : > { %v1246_v7 = vmax.f32 %v1057_v53, %v1237_v4  ;;  %v1696_v8 = vpop.f32.mrb[11].mxu1 }
 0x1ca   : > { %v1380_v9 = vpop.f32.mrb[12].mxu0 }
 0x1cb   : > { %v1430_v11 = vmax.f32 %v1241_v56, %v1380_v9  ;;  %v1382_v12 = vpop.f32.mrb[13].mxu0 }
 0x1cc   : > { %v1431_v13 = vmax.f32 %v1242_v58, %v1382_v12  ;;  %v1384_v14 = vpop.f32.mrb[14].mxu0 }
 0x1cd   : > { %v1448_v17 = vadd.f32 %v1441_v10, %v1430_v11  ;;  %v1433_v19 = vmax.f32 %v1244_v60, %v1384_v14  ;;  %v1386_v20 = vpop.f32.mrb[15].mxu0 }
 0x1ce   : > { %v1449_v21 = vadd.f32 %v1441_v10, %v1431_v13  ;;  %v1434_v22 = vmax.f32 %v1245_v62, %v1386_v20  ;;  %v1423_v25 = vpop.f32.mrb[12].mxu1 }
 0x1cf   : > { %v1454_v23 = vmax.f32 %v1448_v17, 0.0  ;;  %v1451_v24 = vadd.f32 %v1446_v15, %v1433_v19  ;;  %v1432_v28 = vmax.f32 %v1243_v2, %v1423_v25  ;;  %v1709_v29 = vpop.f32.mrb[13].mxu1 }
 0x1d0   : > { %v1455_v26 = vmax.f32 %v1449_v21, 0.0  ;;  %v1452_v27 = vadd.f32 %v1446_v15, %v1434_v22  ;;  %v1426_v5 = vpop.f32.mrb[14].mxu1 }
 0x1d1   : > { %v1457_v30 = vmax.f32 %v1451_v24, 0.0  ;;  %v1450_v33 = vadd.f32 %v1441_v10, %v1432_v28  ;;  %v1435_v34 = vmax.f32 %v1246_v7, %v1426_v5  ;;  %v1710_v35 = vpop.f32.mrb[15].mxu1 }
 0x1d2   : > { %v1627_v31 = vpack.c.bf16 %v1455_v26, %v1454_v23  ;;  %v1458_v32 = vmax.f32 %v1452_v27, 0.0 }
 0x1d3   : > { %v1456_v37 = vmax.f32 %v1450_v33, 0.0  ;;  %v1453_v1 = vadd.f32 %v1446_v15, %v1435_v34 }
 0x1d4   : > { %1480 = vst [vmem:[%s170_s30] sm:$0xff] %v1627_v31  ;;  %v1629_v36 = vpack.c.bf16 %v1458_v32, %v1457_v30 }
 0x1d5   : > { %v1628_v38 = vpack.c.bf16 %v1456_v37, %v1456_v37  ;;  %v1459_v39 = vmax.f32 %v1453_v1, 0.0 }
 0x1d6   : > { %1482 = vst [vmem:[%s170_s30 + $0xc] sm:$0xff] %v1629_v36 }
 0x1d7   : > { %1481 = vst [vmem:[%s170_s30 + $0x8] sm:$0xf] %v1628_v38  ;;  %v1630_v40 = vpack.c.bf16 %v1459_v39, %v1459_v39 }
 0x1d9   : > { %1483 = vst [vmem:[%s170_s30 + $0x14] sm:$0xf] %v1630_v40 }
 0x1da PF: > { %s13_s12 = sadd.s32 1, %s1759_s12  }
 0x1db   : > { %p10_p4 = scmp.ge.s32.totalorder %s13_s12, 4  }
 0x1dd   :  { %12 = sbr.rel (!%p10_p4) target bundleno = 1 (0x1), region = 65 }

// kernel: cnn_forward.6
= control target key start
LH: loop header
LB: loop body
LE: loop exit
PB: predicated region body
PF: predicated region fallthrough
CT: control target
= control target key end

     0   :  { %s1278_s12 = smov 0   ;;  %s1493_s0 = inlined_call_operand.vmem [shape: bf16[2,64,256], index: 0, kind: input, shape index: {}]   ;;  %s1494_s1 = inlined_call_operand.vmem [shape: bf16[32,144], index: 1, kind: input, shape index: {}]   ;;  %s1495_s2 = inlined_call_operand.vmem [shape: f32[32,1], index: 2, kind: input, shape index: {}]   ;;  %s1496_s3 = inlined_call_operand.vmem [shape: bf16[2,32,128], index: 3, kind: output, shape index: {}]  }
   0x1 LB: > { %s1098_s13 = sadd.s32 4294967295, %s1252_s12   ;;  %p1102_p0 = scmp.ge.s32.totalorder %s1252_s12, 1  ;;  %s1252_s12 = sphi %s1278_s12, %s13_s12  }
   0x2   : > { %p137_p1 = scmp.lt.s32.totalorder %s1252_s12, 3 }
   0x4   : > { %p138_p2 = pnand %p1102_p0, %p137_p1 }
   0x5   : > { %p161_p3 = scmp.lt.s32.totalorder (!%p138_p2), %s1098_s13, 1  ;;  %v1254_v0 = vmov (!%p138_p2), 0   ;;  %s1255_s18 = smov (!%p138_p2), 127   ;;  %v1331_v12 = vld [vmem:[%s1494_s1 + $0x4] ss:$8 sps:$4 sm:$0xff] (!%p138_p2)   ;;  %vm749_vm0 = vcmask (!%p138_p2), 130048  }
   0x6   : > { %141 = sbr.rel (%p138_p2) target bundleno = 471 (0x1d7), region = 32  ;;  %756 = vmatprep.subr.bf16.mxu0 (!%p138_p2), %v1254_v0  ;;  %814 = vmatprep.subr.bf16.mxu1 (!%p138_p2), %v1254_v0  ;;  %s1256_s19 = smov (!%p138_p2), 123   ;;  %v991_v13 = vld [vmem:[%s1495_s2] sm:$0xff] (!%p138_p2)  ;;  %v992_v14 = vld [vmem:[%s1495_s2 + $0x8] sm:$0xff] (!%p138_p2)  ;;  %v994_v15 = vld [vmem:[%s1495_s2 + $0x18] sm:$0xff] (!%p138_p2)  ;;  %vm204_vm1 = vcmask (!%p138_p2), 1039360  }
   0x7   : > { %1217 = vset.pattern.permute.xlu0 (!%p138_p2), %v1254_v0  ;;  %1218 = vset.pattern.permute.xlu1 (!%p138_p2), %v1254_v0  ;;  %s1257_s22 = smov (!%p138_p2), 122   ;;  %v993_v16 = vld [vmem:[%s1495_s2 + $0x10] sm:$0xff] (!%p138_p2)  ;;  %vm257_vm2 = vcmask (!%p138_p2), 1006592   ;;  %vm292_vm3 = vcmask (!%p138_p2), 998400   ;;  %v1417_v53 = vld [vmem:[%s1494_s1] ss:$8 sps:$4 sm:$0xff] (!%p138_p2)  }
   0x8   : > { %1174 = vmatprep.mubr.msk.bf16.mxu0 (!%p138_p2), %vm749_vm0, %v1331_v12  ;;  %1176 = vmatprep.mubr.msk.bf16.mxu1 (!%p138_p2), %vm749_vm0, %v1331_v12  ;;  %v1424_v57 = vld [vmem:[%s1494_s1 + $0x14] ss:$8 sps:$4 sm:$0xff] (!%p138_p2)   ;;  %v1438_v63 = vld [vmem:[%s1494_s1 + $0x10] ss:$8 sps:$4 sm:$0xff] (!%p138_p2)  }
   0xd   : > { %s1498_s13 = smov (!%p161_p3, %s1098_s13), 1 }
   0xe   : > { %s1188_s14 = sshll.u32 %s1498_s13, 6  ;;  %s1189_s10 = sshll.u32 %s1498_s13, 4 }
   0xf   : > { %s1296_s17 = scalar_lea.vmem %s1493_s0, %s1188_s14  ;;  %s170_s15 = scalar_lea.vmem %s1496_s3, %s1189_s10 }
  0x10   : > { %v1219_v1 = vld [vmem:[%s1296_s17] ss:$8 sps:$4 sm:$0xff]   ;;  %v1221_v2 = vld [vmem:[%s1296_s17 + $0x4] ss:$8 sps:$4 sm:$0xff]   ;;  %v1222_v3 = vld [vmem:[%s1296_s17 + $0x10] ss:$8 sps:$4 sm:$0xff]  }
  0x11   : > { %316 = vrot.lane.b32.xlu0 %v1219_v1, %s1255_s18  ;;  %200 = vrot.lane.b32.xlu1 %v1219_v1, %s1255_s18  ;;  %v1224_v4 = vld [vmem:[%s1296_s17 + $0x14] ss:$8 sps:$4 sm:$0xff]   ;;  %v1231_v5 = vld [vmem:[%s1296_s17] ss:$8 sps:$4 sm:$0xff]  }
  0x12   : > { %v1232_v6 = vld [vmem:[%s1296_s17 + $0x10] ss:$8 sps:$4 sm:$0xff]   ;;  %v1225_v7 = vld [vmem:[%s1296_s17 + $0x20] ss:$8 sps:$4 sm:$0xff]   ;;  %757 = vmatpush1.bf16.msra.mxu0 %v1231_v5  ;;  %v1227_v9 = vld [vmem:[%s1296_s17 + $0x24] ss:$8 sps:$4 sm:$0xff]  }
  0x13   : > { %v1233_v8 = vld [vmem:[%s1296_s17 + $0x10] ss:$8 sps:$4 sm:$0xff]   ;;  %758 = vmatprep.subr.bf16.mxu0 %v1254_v0  ;;  %v1230_v11 = vld [vmem:[%s1296_s17 + $0x34] ss:$8 sps:$4 sm:$0xff]   ;;  %v1234_v23 = vld [vmem:[%s1296_s17 + $0x20] ss:$8 sps:$4 sm:$0xff]  }
  0x14   : > { %815 = vmatpush1.bf16.msra.mxu1 %v1233_v8  ;;  %v1228_v10 = vld [vmem:[%s1296_s17 + $0x30] ss:$8 sps:$4 sm:$0xff]   ;;  %v1240_v54 = vld [vmem:[%s1296_s17 + $0x20] ss:$8 sps:$4 sm:$0xff]  }
  0x15   : > { %318 = vrot.lane.b32.xlu0 %v1221_v2, %s1255_s18  ;;  %202 = vrot.lane.b32.xlu1 %v1221_v2, %s1255_s18  ;;  %v1235_v27 = vld [vmem:[%s1296_s17 + $0x30] ss:$8 sps:$4 sm:$0xff]  }
  0x16   : > { %759 = vmatpush1.bf16.msra.mxu0 %v1232_v6  ;;  %816 = vmatprep.subr.bf16.mxu1 %v1254_v0  ;;  %v1236_v28 = vld [vmem:[%s1296_s17 + $0x30] ss:$8 sps:$4 sm:$0xff]  }
  0x17   : > { %760 = vmatprep.subr.bf16.mxu0 %v1254_v0  ;;  %v1241_v59 = vld [vmem:[%s1296_s17 + $0x30] ss:$8 sps:$4 sm:$0xff]  }
  0x18   : > { %v1242_v60 = vld [vmem:[%s1296_s17 + $0x30] ss:$8 sps:$4 sm:$0xff]  }
  0x19   : > { %333 = vrot.lane.b32.xlu0 %v1222_v3, %s1255_s18  ;;  %335 = vrot.lane.b32.xlu1 %v1224_v4, %s1255_s18 }
  0x1d   : > { %359 = vrot.lane.b32.xlu0 %v1225_v7, %s1255_s18  ;;  %361 = vrot.lane.b32.xlu1 %v1227_v9, %s1255_s18 }
  0x21   : > { %236 = vrot.lane.b32.xlu0 %v1225_v7, %s1255_s18  ;;  %238 = vrot.lane.b32.xlu1 %v1227_v9, %s1255_s18 }
  0x25   : > { %376 = vrot.lane.b32.xlu0 %v1228_v10, %s1255_s18  ;;  %378 = vrot.lane.b32.xlu1 %v1230_v11, %s1255_s18 }
  0x29   : > { %253 = vrot.lane.b32.xlu0 %v1219_v1, %s1256_s19  ;;  %255 = vrot.lane.b32.xlu1 %v1221_v2, %s1256_s19 }
  0x2d   : > { %393 = vrot.lane.b32.xlu0 %v1222_v3, %s1256_s19  ;;  %395 = vrot.lane.b32.xlu1 %v1224_v4, %s1256_s19 }
  0x31   : > { %271 = vrot.lane.b32.xlu0 %v1222_v3, %s1256_s19  ;;  %273 = vrot.lane.b32.xlu1 %v1224_v4, %s1256_s19 }
  0x35   : > { %410 = vrot.lane.b32.xlu0 %v1219_v1, %s1257_s22  ;;  %412 = vrot.lane.b32.xlu1 %v1221_v2, %s1257_s22 }
  0x39   : > { %288 = vrot.lane.b32.xlu0 %v1219_v1, %s1257_s22  ;;  %290 = vrot.lane.b32.xlu1 %v1221_v2, %s1257_s22 }
  0x3d   : > { %427 = vrot.lane.b32.xlu0 %v1222_v3, %s1257_s22  ;;  %429 = vrot.lane.b32.xlu1 %v1224_v4, %s1257_s22 }
  0x41   : > { %592 = vrot.lane.b32.xlu0 %v1225_v7, %s1255_s18  ;;  %594 = vrot.lane.b32.xlu1 %v1227_v9, %s1255_s18 }
  0x45   : > { %463 = vrot.lane.b32.xlu0 %v1225_v7, %s1255_s18  ;;  %465 = vrot.lane.b32.xlu1 %v1227_v9, %s1255_s18 }
  0x49   : > { %609 = vrot.lane.b32.xlu0 %v1228_v10, %s1255_s18  ;;  %611 = vrot.lane.b32.xlu1 %v1230_v11, %s1255_s18 }
  0x4d   : > { %480 = vrot.lane.b32.xlu0 %v1219_v1, %s1256_s19  ;;  %482 = vrot.lane.b32.xlu1 %v1221_v2, %s1256_s19 }
  0x51   : > { %626 = vrot.lane.b32.xlu0 %v1222_v3, %s1256_s19  ;;  %628 = vrot.lane.b32.xlu1 %v1224_v4, %s1256_s19 }
  0x55   : > { %497 = vrot.lane.b32.xlu0 %v1222_v3, %s1256_s19  ;;  %499 = vrot.lane.b32.xlu1 %v1224_v4, %s1256_s19 }
  0x59   : > { %643 = vrot.lane.b32.xlu0 %v1219_v1, %s1257_s22  ;;  %645 = vrot.lane.b32.xlu1 %v1221_v2, %s1257_s22 }
  0x5d   : > { %514 = vrot.lane.b32.xlu0 %v1219_v1, %s1257_s22  ;;  %516 = vrot.lane.b32.xlu1 %v1221_v2, %s1257_s22 }
  0x61   : > { %660 = vrot.lane.b32.xlu0 %v1222_v3, %s1257_s22  ;;  %662 = vrot.lane.b32.xlu1 %v1224_v4, %s1257_s22 }
  0x65   : > { %531 = vrot.lane.b32.xlu0 %v1225_v7, %s1256_s19  ;;  %533 = vrot.lane.b32.xlu1 %v1227_v9, %s1256_s19 }
  0x69   : > { %677 = vrot.lane.b32.xlu0 %v1228_v10, %s1256_s19  ;;  %679 = vrot.lane.b32.xlu1 %v1230_v11, %s1256_s19 }
  0x6d   : > { %548 = vrot.lane.b32.xlu0 %v1228_v10, %s1256_s19  ;;  %550 = vrot.lane.b32.xlu1 %v1230_v11, %s1256_s19 }
  0x71   : > { %694 = vrot.lane.b32.xlu0 %v1225_v7, %s1257_s22  ;;  %696 = vrot.lane.b32.xlu1 %v1227_v9, %s1257_s22 }
  0x75   : > { %565 = vrot.lane.b32.xlu0 %v1225_v7, %s1257_s22  ;;  %567 = vrot.lane.b32.xlu1 %v1227_v9, %s1257_s22 }
  0x79   : > { %711 = vrot.lane.b32.xlu0 %v1228_v10, %s1257_s22  ;;  %713 = vrot.lane.b32.xlu1 %v1230_v11, %s1257_s22 }
  0x7d   : > { %997 = vperm.xlu0 %1217, %v991_v13   ;;  %1002 = vperm.xlu1 %1218, %v992_v14  }
  0x81   : > { %1012 = vperm.xlu0 %1217, %v994_v15   ;;  %1007 = vperm.xlu1 %1218, %v993_v16  }
  0x83   : > { %v317_v17 = vpop.permute.xlu0 %316  ;;  %v201_v18 = vpop.permute.xlu1 %200 }
  0x87   : > { %v319_v19 = vpop.permute.xlu0 %318  ;;  %v203_v20 = vpop.permute.xlu1 %202 }
  0x88   : > { %v205_v21 = vsel %vm204_vm1, %v201_v18, %v203_v20  ;;  %v320_v22 = vsel %vm204_vm1, %v317_v17, %v319_v19 }
  0x89   : > { %761 = vmatpush1.bf16.msra.mxu0 %v205_v21  ;;  %817 = vmatpush1.bf16.msra.mxu1 %v320_v22 }
  0x8a   : > { %762 = vmatprep.subr.bf16.mxu0 %v1254_v0  ;;  %818 = vmatprep.subr.bf16.mxu1 %v1254_v0 }
  0x8b   : > { %v334_v24 = vpop.permute.xlu0 %333  ;;  %v336_v25 = vpop.permute.xlu1 %335 }
  0x8c   : > { %v337_v26 = vsel %vm204_vm1, %v334_v24, %v336_v25 }
  0x8d   : > { %763 = vmatpush1.bf16.msra.mxu0 %v1234_v23  ;;  %819 = vmatpush1.bf16.msra.mxu1 %v337_v26 }
  0x8e   : > { %764 = vmatprep.subr.bf16.mxu0 %v1254_v0  ;;  %820 = vmatprep.subr.bf16.mxu1 %v1254_v0 }
  0x8f   : > { %v360_v29 = vpop.permute.xlu0 %359  ;;  %v362_v30 = vpop.permute.xlu1 %361 }
  0x90   : > { %v363_v34 = vsel %vm204_vm1, %v360_v29, %v362_v30 }
  0x91   : > { %765 = vmatpush1.bf16.msra.mxu0 %v1235_v27  ;;  %821 = vmatpush1.bf16.msra.mxu1 %v1236_v28 }
  0x92   : > { %766 = vmatprep.subr.bf16.mxu0 %v1254_v0  ;;  %822 = vmatprep.subr.bf16.mxu1 %v1254_v0 }
  0x93   : > { %v237_v31 = vpop.permute.xlu0 %236  ;;  %v239_v32 = vpop.permute.xlu1 %238 }
  0x94   : > { %v240_v33 = vsel %vm204_vm1, %v237_v31, %v239_v32 }
  0x95   : > { %767 = vmatpush1.bf16.msra.mxu0 %v240_v33  ;;  %823 = vmatpush1.bf16.msra.mxu1 %v363_v34 }
  0x96   : > { %824 = vmatprep.subr.bf16.mxu1 %v1254_v0  ;;  %768 = vmatprep.subr.bf16.mxu0 %v1254_v0 }
  0x97   : > { %v377_v35 = vpop.permute.xlu0 %376  ;;  %v379_v36 = vpop.permute.xlu1 %378 }
  0x98   : > { %v380_v37 = vsel %vm204_vm1, %v377_v35, %v379_v36 }
  0x99   : > { %825 = vmatpush1.bf16.msra.mxu1 %v380_v37 }
  0x9a   : > { %826 = vmatprep.subr.bf16.mxu1 %v1254_v0 }
  0x9b   : > { %v254_v38 = vpop.permute.xlu0 %253  ;;  %v256_v39 = vpop.permute.xlu1 %255 }
  0x9c   : > { %v258_v40 = vsel %vm257_vm2, %v254_v38, %v256_v39 }
  0x9d   : > { %769 = vmatpush1.bf16.msra.mxu0 %v258_v40 }
  0x9e   : > { %770 = vmatprep.subr.bf16.mxu0 %v1254_v0 }
  0x9f   : > { %v394_v41 = vpop.permute.xlu0 %393  ;;  %v396_v42 = vpop.permute.xlu1 %395 }
  0xa0   : > { %v397_v43 = vsel %vm257_vm2, %v394_v41, %v396_v42 }
  0xa1   : > { %827 = vmatpush1.bf16.msra.mxu1 %v397_v43 }
  0xa2   : > { %828 = vmatprep.subr.bf16.mxu1 %v1254_v0 }
  0xa3   : > { %v272_v44 = vpop.permute.xlu0 %271  ;;  %v274_v45 = vpop.permute.xlu1 %273 }
  0xa4   : > { %v275_v46 = vsel %vm257_vm2, %v272_v44, %v274_v45 }
  0xa5   : > { %771 = vmatpush1.bf16.msra.mxu0 %v275_v46 }
  0xa6   : > { %772 = vmatprep.subr.bf16.mxu0 %v1254_v0 }
  0xa7   : > { %v411_v47 = vpop.permute.xlu0 %410  ;;  %v413_v48 = vpop.permute.xlu1 %412 }
  0xa8   : > { %v414_v49 = vsel %vm292_vm3, %v411_v47, %v413_v48 }
  0xa9   : > { %829 = vmatpush1.bf16.msra.mxu1 %v414_v49 }
  0xaa   : > { %830 = vmatprep.subr.bf16.mxu1 %v1254_v0 }
  0xab   : > { %v289_v50 = vpop.permute.xlu0 %288  ;;  %v291_v51 = vpop.permute.xlu1 %290 }
  0xac   : > { %v293_v52 = vsel %vm292_vm3, %v289_v50, %v291_v51 }
  0xad   : > { %773 = vmatpush1.bf16.msra.mxu0 %v293_v52 }
  0xae   : > { %876 = vmatprep.subr.bf16.mxu0 %v1254_v0 }
  0xaf   : > { %v428_v55 = vpop.permute.xlu0 %427  ;;  %v430_v56 = vpop.permute.xlu1 %429 }
  0xb0   : > { %789 = vmatmul.mubr.bf16.vlgmr.msra.gmra.mrb[0].mxu0 %v1417_v53  ;;  %v431_v58 = vsel %vm292_vm3, %v428_v55, %v430_v56 }
  0xb1   : > { %831 = vmatpush1.bf16.msra.mxu1 %v431_v58  ;;  %877 = vmatpush1.bf16.msra.mxu0 %v1240_v54 }
  0xb2   : > { %878 = vmatprep.subr.bf16.mxu0 %v1254_v0  ;;  %938 = vmatprep.subr.bf16.mxu1 %v1254_v0 }
  0xb3   : > { %v593_v61 = vpop.permute.xlu0 %592  ;;  %v595_v62 = vpop.permute.xlu1 %594  ;;  %1175 = vmatprep.mubr.msk.bf16.mxu0 %vm749_vm0, %v1424_v57 }
  0xb4   : > { %847 = vmatmul.mubr.bf16.vlgmr.msra.gmra.mrb[0].mxu1 %v1417_v53  ;;  %v596_v3 = vsel %vm204_vm1, %v593_v61, %v595_v62 }
  0xb5   : > { %879 = vmatpush1.bf16.msra.mxu0 %v1241_v59  ;;  %939 = vmatpush1.bf16.msra.mxu1 %v1242_v60 }
  0xb6   : > { %880 = vmatprep.subr.bf16.mxu0 %v1254_v0  ;;  %940 = vmatprep.subr.bf16.mxu1 %v1254_v0 }
  0xb7   : > { %v464_v1 = vpop.permute.xlu0 %463  ;;  %v466_v2 = vpop.permute.xlu1 %465  ;;  %1177 = vmatprep.mubr.msk.bf16.mxu1 %vm749_vm0, %v1424_v57 }
  0xb8   : > { %v467_v4 = vsel %vm204_vm1, %v464_v1, %v466_v2  ;;  %797 = vmatmul.mubr.bf16.gmra.mrb[4].mxu0 %v1438_v63 }
  0xb9   : > { %881 = vmatpush1.bf16.msra.mxu0 %v467_v4  ;;  %941 = vmatpush1.bf16.msra.mxu1 %v596_v3 }
  0xba   : > { %942 = vmatprep.subr.bf16.mxu1 %v1254_v0  ;;  %882 = vmatprep.subr.bf16.mxu0 %v1254_v0 }
  0xbb   : > { %v610_v5 = vpop.permute.xlu0 %609  ;;  %v612_v6 = vpop.permute.xlu1 %611  ;;  %1178 = vmatprep.mubr.msk.bf16.mxu0 %vm749_vm0, %v1331_v12 }
  0xbc   : > { %v613_v7 = vsel %vm204_vm1, %v610_v5, %v612_v6  ;;  %855 = vmatmul.mubr.bf16.gmra.mrb[4].mxu1 %v1438_v63 }
  0xbd   : > { %943 = vmatpush1.bf16.msra.mxu1 %v613_v7  ;;  %1180 = vmatprep.mubr.msk.bf16.mxu1 %vm749_vm0, %v1331_v12 }
  0xbe   : > { %944 = vmatprep.subr.bf16.mxu1 %v1254_v0 }
  0xbf   : > { %v481_v8 = vpop.permute.xlu0 %480  ;;  %v483_v9 = vpop.permute.xlu1 %482 }
  0xc0   : > { %v484_v10 = vsel %vm257_vm2, %v481_v8, %v483_v9 }
  0xc1   : > { %883 = vmatpush1.bf16.msra.mxu0 %v484_v10 }
  0xc2   : > { %884 = vmatprep.subr.bf16.mxu0 %v1254_v0 }
  0xc3   : > { %v627_v11 = vpop.permute.xlu0 %626  ;;  %v629_v13 = vpop.permute.xlu1 %628 }
  0xc4   : > { %v630_v14 = vsel %vm257_vm2, %v627_v11, %v629_v13 }
  0xc5   : > { %945 = vmatpush1.bf16.msra.mxu1 %v630_v14 }
  0xc6   : > { %946 = vmatprep.subr.bf16.mxu1 %v1254_v0 }
  0xc7   : > { %v498_v15 = vpop.permute.xlu0 %497  ;;  %v500_v16 = vpop.permute.xlu1 %499 }
  0xc8   : > { %v501_v12 = vsel %vm257_vm2, %v498_v15, %v500_v16 }
  0xc9   : > { %885 = vmatpush1.bf16.msra.mxu0 %v501_v12 }
  0xca   : > { %886 = vmatprep.subr.bf16.mxu0 %v1254_v0 }
  0xcb   : > { %v644_v17 = vpop.permute.xlu0 %643  ;;  %v646_v18 = vpop.permute.xlu1 %645 }
  0xcc   : > { %v647_v19 = vsel %vm292_vm3, %v644_v17, %v646_v18 }
  0xcd   : > { %947 = vmatpush1.bf16.msra.mxu1 %v647_v19 }
  0xce   : > { %948 = vmatprep.subr.bf16.mxu1 %v1254_v0 }
  0xcf   : > { %v515_v20 = vpop.permute.xlu0 %514  ;;  %v517_v21 = vpop.permute.xlu1 %516 }
  0xd0   : > { %v518_v22 = vsel %vm292_vm3, %v515_v20, %v517_v21 }
  0xd1   : > { %887 = vmatpush1.bf16.msra.mxu0 %v518_v22 }
  0xd2   : > { %888 = vmatprep.subr.bf16.mxu0 %v1254_v0 }
  0xd3   : > { %v661_v23 = vpop.permute.xlu0 %660  ;;  %v663_v24 = vpop.permute.xlu1 %662 }
  0xd4   : > { %v664_v25 = vsel %vm292_vm3, %v661_v23, %v663_v24 }
  0xd5   : > { %949 = vmatpush1.bf16.msra.mxu1 %v664_v25 }
  0xd6   : > { %950 = vmatprep.subr.bf16.mxu1 %v1254_v0 }
  0xd7   : > { %v532_v26 = vpop.permute.xlu0 %531  ;;  %v534_v27 = vpop.permute.xlu1 %533 }
  0xd8   : > { %v535_v28 = vsel %vm257_vm2, %v532_v26, %v534_v27 }
  0xd9   : > { %889 = vmatpush1.bf16.msra.mxu0 %v535_v28 }
  0xda   : > { %890 = vmatprep.subr.bf16.mxu0 %v1254_v0 }
  0xdb   : > { %v678_v29 = vpop.permute.xlu0 %677  ;;  %v680_v30 = vpop.permute.xlu1 %679 }
  0xdc   : > { %v681_v31 = vsel %vm257_vm2, %v678_v29, %v680_v30 }
  0xdd   : > { %951 = vmatpush1.bf16.msra.mxu1 %v681_v31 }
  0xde   : > { %952 = vmatprep.subr.bf16.mxu1 %v1254_v0 }
  0xdf   : > { %v549_v32 = vpop.permute.xlu0 %548  ;;  %v551_v33 = vpop.permute.xlu1 %550 }
  0xe0   : > { %v552_v34 = vsel %vm257_vm2, %v549_v32, %v551_v33 }
  0xe1   : > { %891 = vmatpush1.bf16.msra.mxu0 %v552_v34 }
  0xe2   : > { %892 = vmatprep.subr.bf16.mxu0 %v1254_v0 }
  0xe3   : > { %v695_v35 = vpop.permute.xlu0 %694  ;;  %v697_v36 = vpop.permute.xlu1 %696 }
  0xe4   : > { %v698_v37 = vsel %vm292_vm3, %v695_v35, %v697_v36 }
  0xe5   : > { %953 = vmatpush1.bf16.msra.mxu1 %v698_v37 }
  0xe6   : > { %954 = vmatprep.subr.bf16.mxu1 %v1254_v0 }
  0xe7   : > { %v566_v38 = vpop.permute.xlu0 %565  ;;  %v568_v39 = vpop.permute.xlu1 %567 }
  0xe8   : > { %v569_v40 = vsel %vm292_vm3, %v566_v38, %v568_v39 }
  0xe9   : > { %893 = vmatpush1.bf16.msra.mxu0 %v569_v40 }
  0xeb   : > { %v712_v41 = vpop.permute.xlu0 %711  ;;  %v714_v42 = vpop.permute.xlu1 %713 }
  0xec   : > { %v715_v43 = vsel %vm292_vm3, %v712_v41, %v714_v42  ;;  %909 = vmatmul.mubr.bf16.vlgmr.msra.gmra.mrb[8].mxu0 %v1417_v53 }
  0xed   : > { %955 = vmatpush1.bf16.msra.mxu1 %v715_v43  ;;  %1179 = vmatprep.mubr.msk.bf16.mxu0 %vm749_vm0, %v1424_v57 }
  0xf0   : > { %971 = vmatmul.mubr.bf16.vlgmr.msra.gmra.mrb[8].mxu1 %v1417_v53 }
  0xf1   : > { %1181 = vmatprep.mubr.msk.bf16.mxu1 %vm749_vm0, %v1424_v57 }
  0xf4   : > { %917 = vmatmul.mubr.bf16.gmra.mrb[12].mxu0 %v1438_v63 }
  0xf8   : > { %979 = vmatmul.mubr.bf16.gmra.mrb[12].mxu1 %v1438_v63 }
  0xfc   : > { %v998_v7 = vpop.permute.xlu0 %997  ;;  %v1003_v11 = vpop.permute.xlu1 %1002 }
 0x100   : > { %v1008_v28 = vpop.permute.xlu1 %1007  ;;  %v1013_v33 = vpop.permute.xlu0 %1012 }
 0x183   : > { %v790_v0 = vpop.f32.mrb[0].mxu0 }
 0x184   : > { %v792_v44 = vpop.f32.mrb[1].mxu0 }
 0x185   : > { %v793_v45 = vpop.f32.mrb[2].mxu0 }
 0x186   : > { %v795_v46 = vpop.f32.mrb[3].mxu0 }
 0x187   : > { %v848_v47 = vpop.f32.mrb[0].mxu1 }
 0x188   : > { %v863_v48 = vmax.f32 %v790_v0, %v848_v47  ;;  %v850_v49 = vpop.f32.mrb[1].mxu1 }
 0x189   : > { %v851_v50 = vpop.f32.mrb[2].mxu1 }
 0x18a   : > { %v864_v51 = vmax.f32 %v793_v45, %v851_v50  ;;  %v853_v52 = vpop.f32.mrb[3].mxu1 }
 0x18b   : > { %v798_v54 = vpop.f32.mrb[4].mxu0 }
 0x18c   : > { %v800_v55 = vpop.f32.mrb[5].mxu0 }
 0x18d   : > { %v801_v53 = vpop.f32.mrb[6].mxu0 }
 0x18e   : > { %v803_v56 = vpop.f32.mrb[7].mxu0 }
 0x18f   : > { %v856_v58 = vpop.f32.mrb[4].mxu1 }
 0x190   : > { %v865_v57 = vmax.f32 %v798_v54, %v856_v58  ;;  %v858_v59 = vpop.f32.mrb[5].mxu1 }
 0x191   : > { %v859_v60 = vpop.f32.mrb[6].mxu1 }
 0x192   : > { %v866_v61 = vmax.f32 %v801_v53, %v859_v60  ;;  %v861_v62 = vpop.f32.mrb[7].mxu1 }
 0x1bf   : > { %v910_v63 = vpop.f32.mrb[8].mxu0 }
 0x1c0   : > { %v925_v1 = vmax.f32 %v863_v48, %v910_v63  ;;  %v912_v2 = vpop.f32.mrb[9].mxu0 }
 0x1c1   : > { %v913_v3 = vpop.f32.mrb[10].mxu0 }
 0x1c2   : > { %v926_v4 = vmax.f32 %v864_v51, %v913_v3  ;;  %v915_v5 = vpop.f32.mrb[11].mxu0 }
 0x1c3   : > { %v972_v6 = vpop.f32.mrb[8].mxu1 }
 0x1c4   : > { %v987_v8 = vmax.f32 %v925_v1, %v972_v6  ;;  %v974_v9 = vpop.f32.mrb[9].mxu1 }
 0x1c5   : > { %v975_v10 = vpop.f32.mrb[10].mxu1 }
 0x1c6   : > { %v1015_v13 = vadd.f32 %v998_v7, %v987_v8  ;;  %v988_v14 = vmax.f32 %v926_v4, %v975_v10  ;;  %v977_v15 = vpop.f32.mrb[11].mxu1 }
 0x1c7   : > { %v918_v16 = vpop.f32.mrb[12].mxu0 }
 0x1c8   : > { %v1016_v12 = vadd.f32 %v1003_v11, %v988_v14  ;;  %v927_v17 = vmax.f32 %v865_v57, %v918_v16  ;;  %v920_v18 = vpop.f32.mrb[13].mxu0  ;;  %v1019_v20 = vmax.f32 %v1015_v13, 0.0 }
 0x1c9   : > { %v921_v19 = vpop.f32.mrb[14].mxu0 }
 0x1ca   : > { %v1020_v21 = vmax.f32 %v1016_v12, 0.0  ;;  %v928_v22 = vmax.f32 %v866_v61, %v921_v19  ;;  %v923_v23 = vpop.f32.mrb[15].mxu0 }
 0x1cb   : > { %v980_v24 = vpop.f32.mrb[12].mxu1 }
 0x1cc   : > { %v1197_v25 = vpack.c.bf16 %v1020_v21, %v1019_v20  ;;  %v989_v26 = vmax.f32 %v927_v17, %v980_v24  ;;  %v982_v27 = vpop.f32.mrb[13].mxu1 }
 0x1cd   : > { %v983_v29 = vpop.f32.mrb[14].mxu1 }
 0x1ce   : > { %1198 = vst [vmem:[%s170_s15] sm:$0xff] %v1197_v25   ;;  %v1017_v30 = vadd.f32 %v1008_v28, %v989_v26  ;;  %v990_v31 = vmax.f32 %v928_v22, %v983_v29  ;;  %v985_v32 = vpop.f32.mrb[15].mxu1 }
 0x1d0   : > { %v1018_v34 = vadd.f32 %v1013_v33, %v990_v31  ;;  %v1021_v35 = vmax.f32 %v1017_v30, 0.0 }
 0x1d2   : > { %v1022_v36 = vmax.f32 %v1018_v34, 0.0 }
 0x1d4   : > { %v1202_v37 = vpack.c.bf16 %v1022_v36, %v1021_v35 }
 0x1d6   : > { %1204 = vst [vmem:[%s170_s15 + $0x8] sm:$0xff] %v1202_v37  }
 0x1d7 PF: > { %s13_s12 = sadd.s32 1, %s1252_s12  }
 0x1d8   : > { %p10_p4 = scmp.ge.s32.totalorder %s13_s12, 4  }
 0x1da   :  { %12 = sbr.rel (!%p10_p4) target bundleno = 1 (0x1), region = 65 }

// kernel: cnn_forward.7
= control target key start
LH: loop header
LB: loop body
LE: loop exit
PB: predicated region body
PF: predicated region fallthrough
CT: control target
= control target key end

     0   :  { %v474_v2 = vmov 0.0   ;;  %vm475_vm0 = vmmov 0   ;;  %s595_s0 = inlined_call_operand.vmem [shape: bf16[8,288], index: 0, kind: input, shape index: {}]   ;;  %s596_s1 = inlined_call_operand.vmem [shape: bf16[288,32], index: 1, kind: input, shape index: {}]   ;;  %s597_s2 = inlined_call_operand.vmem [shape: f32[1,32], index: 2, kind: input, shape index: {}]   ;;  %s598_s3 = inlined_call_operand.vmem [shape: bf16[32,10], index: 3, kind: input, shape index: {}]   ;;  %s599_s4 = inlined_call_operand.vmem [shape: f32[1,10], index: 4, kind: input, shape index: {}]   ;;  %s600_s5 = inlined_call_operand.hbm [shape: f32[8,10], index: 5, kind: output, shape index: {}]  }
   0x1   :  { %v427_v0 = vld [vmem:[%s596_s1 + $0x40] sm:$0xff]   ;;  %408 = vmatprep.subr.bf16.mxu1 %v474_v2  ;;  %v429_v3 = vld [vmem:[%s596_s1 + $0x48] sm:$0xff]   ;;  %412 = vmatprep.mubr.msk.bf16.mxu1 %vm475_vm0, %v474_v2  ;;  %v431_v5 = vld [vmem:[%s596_s1 + $0x50] sm:$0xff]  }
   0x2   :  { %v428_v1 = vld [vmem:[%s596_s1] sm:$0xff]   ;;  %380 = vmatprep.subr.bf16.mxu0 %v427_v0  ;;  %v430_v4 = vld [vmem:[%s596_s1 + $0x8] sm:$0xff]   ;;  %v432_v6 = vld [vmem:[%s596_s1 + $0x10] sm:$0xff]  }
   0x3   :  { %381 = vmatpush3.bf16.msra.mxu0 %v428_v1  ;;  %v433_v7 = vld [vmem:[%s596_s1 + $0x58] sm:$0xff]   ;;  %v435_v9 = vld [vmem:[%s596_s1 + $0x60] sm:$0xff]   ;;  %v437_v12 = vld [vmem:[%s596_s1 + $0x68] sm:$0xff]  }
   0x4   :  { %382 = vmatprep.subr.bf16.mxu0 %v429_v3  ;;  %v434_v8 = vld [vmem:[%s596_s1 + $0x18] sm:$0xff]   ;;  %v441_v10 = vld [vmem:[%s596_s1 + $0x80] sm:$0xff]   ;;  %v438_v13 = vld [vmem:[%s596_s1 + $0x28] sm:$0xff]  }
   0x5   :  { %v436_v11 = vld [vmem:[%s596_s1 + $0x20] sm:$0xff]   ;;  %409 = vmatpush3.bf16.msra.mxu1 %v441_v10  ;;  %v439_v15 = vld [vmem:[%s596_s1 + $0x70] sm:$0xff]   ;;  %v446_v17 = vld [vmem:[%s596_s1 + $0x88] sm:$0xff]  }
   0x6   :  { %410 = vmatprep.subr.bf16.mxu1 %v474_v2  ;;  %v22_v14 = vld [vmem:[%s595_s0] sm:$0xff]  ;;  %v447_v18 = vld [vmem:[%s595_s0 + $0x8] ss:$0 sps:$4 sm:$0xff]  }
   0x7   :  { %383 = vmatpush3.bf16.msra.mxu0 %v430_v4  ;;  %v355_v16 = vcombine.high %v22_v14, %v22_v14 }
   0x8   :  { %384 = vmatprep.subr.bf16.mxu0 %v431_v5 }
   0x9   :  { %221 = vmatprep.mubr.bf16.mxu0 %v355_v16 }
   0xb   :  { %385 = vmatpush3.bf16.msra.mxu0 %v432_v6 }
   0xc   :  { %386 = vmatprep.subr.bf16.mxu0 %v433_v7 }
   0xf   :  { %387 = vmatpush3.bf16.msra.mxu0 %v434_v8 }
  0x10   :  { %388 = vmatprep.subr.bf16.mxu0 %v435_v9 }
  0x13   :  { %389 = vmatpush3.bf16.msra.mxu0 %v436_v11 }
  0x14   :  { %390 = vmatprep.subr.bf16.mxu0 %v437_v12 }
  0x15   :  { %10 = vsyncpa [#allocation3], 0  ;;  %411 = vmatpush3.bf16.msra.mxu1 %v446_v17  ;;  %vm185_vm1 = vcmask 261120   ;;  %v440_v19 = vld [vmem:[%s596_s1 + $0x30] sm:$0xff]   ;;  %v442_v20 = vld [vmem:[%s596_s1 + $0x78] sm:$0xff]   ;;  %v354_v22 = vcombine.low %v22_v14, %v22_v14  ;;  %s476_s13 = smov [#allocation2]  }
  0x16   :  { %416 = vmatprep.subr.bf16.mxu1 %v474_v2  ;;  %v443_v21 = vld [vmem:[%s596_s1 + $0x38] sm:$0xff]   ;;  %v448_v23 = vld [vmem:[%s598_s3] sm:$0xff]   ;;  %v449_v24 = vld [vmem:[%s598_s3 + $0x8] sm:$0xff]   ;;  %s345_s14 = sshll.u32 %s476_s13, 4  ;;  %vm337_vm2 = vcmask 80896   ;;  %s346_s14 = int_to_ptr.vmem [resolvable:$true] %s345_s14 }
  0x17   :  { %391 = vmatpush3.bf16.msra.mxu0 %v438_v13  ;;  %v353_v31 = vld [vmem:[%s597_s2] ss:$0 sm:$0xff]  ;;  %s450_s2 = scalar_lea.vmem %s346_s14, 128  ;;  %p455_p1 = scmp.lt.s32.totalorder %s346_s14, %s346_s14 }
  0x18   :  { %392 = vmatprep.subr.bf16.mxu0 %v439_v15  ;;  %413 = vmatmul.mubr.msk.bf16.vlgmr.msra.gmra.mrb[0].mxu1 %vm185_vm1, %v447_v18  ;;  %v376_v39 = vld [vmem:[%s599_s4] ss:$0 sm:$0xff]  ;;  %p451_p0 = scmp.ne.s32.totalorder %s346_s14, %s450_s2  ;;  %p456_p2 = scmp.lt.s32.totalorder %s450_s2, %s450_s2 }
  0x19   :  { %420 = vmatprep.mubr.msk.bf16.mxu1 %vm475_vm0, %v474_v2  ;;  %417 = vmatpush3.bf16.msra.mxu1 %v448_v23 }
  0x1a   :  { %418 = vmatprep.subr.bf16.mxu1 %v474_v2  ;;  %p457_p3 = por %p456_p2, %p455_p1 }
  0x1b   :  { %393 = vmatpush3.bf16.msra.mxu0 %v440_v19 }
  0x1c   :  { %394 = vmatprep.subr.bf16.mxu0 %v442_v20  ;;  %p458_p4 = pnand %p457_p3, %p451_p0 }
  0x1d   :  { %419 = vmatpush3.bf16.msra.mxu1 %v449_v24 }
  0x1f   :  { %395 = vmatpush3.bf16.msra.mxu0 %v443_v21 }
  0x22   :  { %222 = vmatmul.mubr.bf16.vlgmr.msra.gmra.mrb[0].mxu0 %v354_v22 }
  0xeb   :  { %v263_v25 = vpop.f32.mrb[0].mxu1 }
  0xec   :  { %v414_v26 = vpop.f32.mrb[1].mxu1 }
  0xed   :  { %v266_v27 = vpop.f32.mrb[2].mxu1 }
  0xee   :  { %v415_v28 = vpop.f32.mrb[3].mxu1 }
  0xf5   :  { %v396_v29 = vpop.f32.mrb[0].mxu0 }
  0xf6   :  { %v397_v30 = vpop.f32.mrb[1].mxu0 }
  0xf7   :  { %v398_v32 = vadd.f32 %v397_v30, %v396_v29  ;;  %v399_v33 = vpop.f32.mrb[2].mxu0 }
  0xf8   :  { %v400_v34 = vpop.f32.mrb[3].mxu0 }
  0xf9   :  { %v224_v35 = vadd.f32 %v398_v32, %v353_v31 }
  0xfb   :  { %v264_v36 = vadd.f32 %v263_v25, %v224_v35 }
  0xfd   :  { %v269_v37 = vmax.f32 %v264_v36, 0.0 }
  0xff   :  { %v270_v38 = vpack.c.bf16 %v269_v37, %v269_v37 }
 0x101   :  { %421 = vmatmul.mubr.msk.bf16.vlgmr.msra.gmra.mrb[4].mxu1 %vm185_vm1, %v270_v38 }
 0x1d4   :  { %v331_v40 = vpop.f32.mrb[4].mxu1 }
 0x1d5   :  { %v332_v41 = vadd.f32 %v376_v39, %v331_v40  ;;  %v422_v42 = vpop.f32.mrb[5].mxu1 }
 0x1d6   :  { %v334_v43 = vpop.f32.mrb[6].mxu1 }
 0x1d7   :  { %v423_v44 = vpop.f32.mrb[7].mxu1  ;;  %338 = vst.msk [vmem:[#allocation2] sm:$0xff] %vm337_vm2, %v332_v41 }
 0x1d8   :  { %461 = shalt.err (!%p458_p4)
}
 0x1d9   :  { %s462_s4 = scalar_lea.hbm %s600_s5, 128 }
 0x1da   :  { %p463_p5 = scmp.ne.s32.totalorder %s600_s5, %s462_s4  ;;  %p466_p6 = scmp.lt.u32.totalorder %s462_s4, %s600_s5 }
 0x1dc   :  { %p468_p7 = pnand %p466_p6, %p463_p5 }
 0x1de   :  { %471 = shalt.err (!%p468_p7)
}
 0x1df   :  { %348 = dma.vmem_to_hbm [thread:$0]  %s346_s14, 128, %s600_s5, [#allocation3]  }
 0x1e0   :  { %472 = dma.done.wait [#allocation3], 128  }
 0x1e1   :  { %473 = vsyncadd [#allocation3], 4294967168 }
 0x1e2   :  { %352 = vsyncpa [#allocation3], 1 }

</bundles_post_ra>
